<compile_context>
chip_gen: v7x
topology: tpu7x:2x2x1
jax: 0.10.0
libtpu: 0.0.40
codegen_flags: <defaults>
</compile_context>

<pallas_src>
import functools
import math

import jax
import jax.numpy as jnp
from jax import lax
from jax.experimental import pallas as pl
from jax.experimental.pallas import tpu as pltpu

BN_EPS = 1e-5            # nn.BatchNorm2d default eps
LEAKY_SLOPE = 0.1        # nn.LeakyReLU(negative_slope=0.1)
LANE = 128


def _vmem_limit_bytes():
    try:
        cap = pltpu.get_tpu_info().vmem_capacity_bytes
    except Exception:
        cap = 64 * 1024 * 1024
    return int(max(32 * 1024 * 1024, min(cap * 3 // 4, 100 * 1024 * 1024)))


VMEM_LIMIT = _vmem_limit_bytes()


# ---------------------------------------------------------------------------
# small helpers
# ---------------------------------------------------------------------------

def _round_up(v, m):
    return ((v + m - 1) // m) * m


def _tile_dim(dim, target):
    """(tile, padded_dim): full dim as one block if small, else tile+pad."""
    if dim <= target:
        return dim, dim
    return target, _round_up(dim, target)


def _largest_divisor_leq(n_val, limit):
    limit = max(1, min(limit, n_val))
    for d in range(limit, 0, -1):
        if n_val % d == 0:
            return d
    return 1


# ---------------------------------------------------------------------------
# Pallas kernels
# ---------------------------------------------------------------------------

def _conv_bnstats_kernel(x_ref, w_ref, y_ref, s_ref, acc_ref, *,
                         offsets, cin, wp, wvalid):
    """Implicit-im2col conv (bf16 in, f32 acc) + per-image BN partial stats.

    x_ref : (1, Hp*Wp, cin)  bf16 -- whole padded image for batch element b.
    w_ref : (k*k*cin, tn)    bf16 -- fully resident weight slab (index (0, j)).
    y_ref : (1, Hout*Wp, tn) bf16 -- padded-width conv output tile.
    s_ref : (1, 2, tn)       f32  -- row0 = sum, row1 = sum of squares (valid
                                     columns only).
    acc_ref: (Hout*Wp, tn)   f32 VMEM scratch accumulator.
    """
    m = acc_ref.shape[0]
    for t, off in enumerate(offsets):
        lhs = x_ref[0, pl.ds(off, m), :]                   # shifted input rows
        rhs = w_ref[pl.ds(t * cin, cin), :]                # this tap's weights
        prod = jnp.dot(lhs, rhs, preferred_element_type=jnp.float32)
        if t == 0:
            acc_ref[...] = prod
        else:
            acc_ref[...] += prod

    acc = acc_ref[...]
    y_ref[0] = acc.astype(y_ref.dtype)

    if wvalid < wp:
        # mask the right-halo "junk" output columns out of the statistics
        col = lax.broadcasted_iota(jnp.int32, (m, 1), 0) % wp
        acc = jnp.where(col < wvalid, acc, 0.0)
    s_ref[0, 0:1, :] = jnp.sum(acc, axis=0, keepdims=True)
    s_ref[0, 1:2, :] = jnp.sum(acc * acc, axis=0, keepdims=True)


def _bn_leaky_kernel(y_ref, sc_ref, sh_ref, o_ref, *, wvalid):
    """Fused BN (precomputed scale/shift) + LeakyReLU + halo-column removal."""
    z = y_ref[0, :, :wvalid, :].astype(jnp.float32) * sc_ref[...] + sh_ref[...]
    o_ref[0] = jnp.where(z >= 0, z, LEAKY_SLOPE * z).astype(o_ref.dtype)


def _maxpool_kernel(x_ref, o_ref, *, k, c, wout, rh):
    """Non-overlapping k x k max pool.

    x_ref : (1, k*rh*wout, k*c) -- W-taps folded into lanes (c is a multiple
                                   of 128, so every lane slice is aligned).
    o_ref : (1, rh*wout, c)
    """
    def _one_out_row(j, dynamic):
        m = None
        for dh in range(k):
            start = (k * j + dh) * wout
            if dynamic and wout % 8 == 0:
                start = pl.multiple_of(start, 8)
            blk = x_ref[0, pl.ds(start, wout), :]          # (wout, k*c)
            for dw in range(k):
                v = blk[:, dw * c:(dw + 1) * c]            # lane-aligned slice
                m = v if m is None else jnp.maximum(m, v)
        ostart = j * wout
        if dynamic and wout % 8 == 0:
            ostart = pl.multiple_of(ostart, 8)
        o_ref[0, pl.ds(ostart, wout), :] = m

    if rh <= 8:
        for j in range(rh):
            _one_out_row(j, dynamic=False)
    else:
        def body(j, carry):
            _one_out_row(j, dynamic=True)
            return carry
        lax.fori_loop(0, rh, body, 0)


def _linear_kernel(x_ref, w_ref, b_ref, o_ref):
    """Tiled matmul; accumulates directly into the resident f32 output block."""
    @pl.when(pl.program_id(2) == 0)
    def _():
        o_ref[...] = jnp.broadcast_to(b_ref[...], o_ref.shape)
    o_ref[...] += jnp.dot(x_ref[...], w_ref[...],
                          preferred_element_type=jnp.float32)


# ---------------------------------------------------------------------------
# layer wrappers
# ---------------------------------------------------------------------------

def _im2col_nhwc(x, k, s):
    """Fallback for stride != 1: explicit patches (N, Hout, Wout, k*k*C)."""
    # TODO(synk): implicit/halo-DMA im2col for strided convs to avoid the k^2
    # HBM expansion (only the first real-YOLO layer uses stride > 1).
    n, h, w, c = x.shape
    p = k // 2
    if p:
        x = jnp.pad(x, ((0, 0), (p, p), (p, p), (0, 0)))
    hout = (h + 2 * p - k) // s + 1
    wout = (w + 2 * p - k) // s + 1
    cols = [x[:, kh:kh + s * hout:s, kw:kw + s * wout:s, :]
            for kh in range(k) for kw in range(k)]
    return jnp.concatenate(cols, axis=-1), (hout, wout)


def cbl_forward(x, layer):
    ksz, stride = layer["k"], layer["s"]
    n, h, w, _ = x.shape
    cp, tn = layer["cp"], layer["tn"]
    w_arr = layer["w"]

    if stride == 1:
        p = ksz // 2
        hout = h + 2 * p - ksz + 1
        wout = w + 2 * p - ksz + 1
        if ksz > 1:
            # one extra zero row at the bottom keeps every tap's flat slice
            # in-bounds (it only ever feeds the masked-out halo columns).
            x = jnp.pad(x, ((0, 0), (p, p + 1), (p, p), (0, 0)))
        hp, wp = x.shape[1], x.shape[2]
        cin_eff = x.shape[3]
        offsets = tuple(kh * wp + kw for kh in range(ksz) for kw in range(ksz))
    else:
        x, (hout, wout) = _im2col_nhwc(x, ksz, stride)
        hp, wp = hout, wout
        cin_eff = x.shape[3]
        offsets = (0,)

    x_flat = x.reshape(n, hp * wp, cin_eff).astype(jnp.bfloat16)
    m_rows = hout * wp
    kdim = w_arr.shape[0]
    assert kdim == len(offsets) * cin_eff

    # ---- pass 1: implicit-im2col conv + per-image BN partial stats ----------
    conv_kern = functools.partial(_conv_bnstats_kernel, offsets=offsets,
                                  cin=cin_eff, wp=wp, wvalid=wout)
    y, stats = pl.pallas_call(
        conv_kern,
        grid=(cp // tn, n),     # (Cout tiles, batch): weight resident over batch
        in_specs=[pl.BlockSpec((1, hp * wp, cin_eff), lambda j, b: (b, 0, 0)),
                  pl.BlockSpec((kdim, tn), lambda j, b: (0, j))],
        out_specs=[pl.BlockSpec((1, m_rows, tn), lambda j, b: (b, 0, j)),
                   pl.BlockSpec((1, 2, tn), lambda j, b: (b, 0, j))],
        out_shape=[jax.ShapeDtypeStruct((n, m_rows, cp), jnp.bfloat16),
                   jax.ShapeDtypeStruct((n, 2, cp), jnp.float32)],
        scratch_shapes=[pltpu.VMEM((m_rows, tn), jnp.float32)],
        compiler_params=pltpu.CompilerParams(
            dimension_semantics=("parallel", "parallel"),
            vmem_limit_bytes=VMEM_LIMIT),
    )(x_flat, w_arr)

    # ---- BN batch statistics -> fused scale/shift (tiny XLA math) -----------
    count = float(n * hout * wout)
    sums = jnp.sum(stats, axis=0)                     # (2, cp)
    mean = sums[0] / count
    var = jnp.maximum(sums[1] / count - mean * mean, 0.0)   # clamp cancellation
    scale = layer["gamma"][0] * lax.rsqrt(var + BN_EPS)
    shift = layer["beta"][0] - mean * scale
    scale = scale[None, :]
    shift = shift[None, :]

    # ---- pass 2: BN apply + LeakyReLU + halo-column removal, bf16 out -------
    y4 = y.reshape(n, hout, wp, cp)
    rh = _largest_divisor_leq(hout, max(1, (4 * 1024 * 1024) // (wp * tn * 2)))
    bn_kern = functools.partial(_bn_leaky_kernel, wvalid=wout)
    act = pl.pallas_call(
        bn_kern,
        grid=(n, hout // rh, cp // tn),
        in_specs=[pl.BlockSpec((1, rh, wp, tn), lambda b, i, j: (b, i, 0, j)),
                  pl.BlockSpec((1, tn), lambda b, i, j: (0, j)),
                  pl.BlockSpec((1, tn), lambda b, i, j: (0, j))],
        out_specs=pl.BlockSpec((1, rh, wout, tn), lambda b, i, j: (b, i, 0, j)),
        out_shape=jax.ShapeDtypeStruct((n, hout, wout, cp), jnp.bfloat16),
        compiler_params=pltpu.CompilerParams(
            dimension_semantics=("parallel", "parallel", "parallel"),
            vmem_limit_bytes=VMEM_LIMIT),
    )(y4, scale, shift)
    return act          # channel-padded (cp) bf16 NHWC, fed directly downstream


def _pick_pool_rh(hout, wout, k, c, itemsize):
    """Largest divisor of hout whose input tile fits ~8 MiB and keeps the
    (8,128)-style layout constraints satisfied."""
    budget = 8 * 1024 * 1024
    valid = []
    for d in range(1, hout + 1):
        if hout % d:
            continue
        if d == hout or ((k * d * wout) % 8 == 0 and (d * wout) % 8 == 0):
            valid.append(d)
    in_budget = [d for d in valid if k * d * wout * k * c * itemsize <= budget]
    return max(in_budget) if in_budget else min(valid)


def maxpool_forward(x, k, s):
    assert k == s, "only non-overlapping pooling supported"  # TODO(synk): s != k
    n, h, w, c = x.shape
    assert h % k == 0 and w % k == 0, "odd spatial maxpool not supported"  # TODO(synk)
    hout, wout = h // k, w // k
    xr = x.reshape(n, h * wout, k * c)          # free reshape: W-taps -> lanes
    rh = _pick_pool_rh(hout, wout, k, c, x.dtype.itemsize)
    kern = functools.partial(_maxpool_kernel, k=k, c=c, wout=wout, rh=rh)
    out = pl.pallas_call(
        kern,
        grid=(n, hout // rh),
        in_specs=[pl.BlockSpec((1, k * rh * wout, k * c), lambda b, i: (b, i, 0))],
        out_specs=pl.BlockSpec((1, rh * wout, c), lambda b, i: (b, i, 0)),
        out_shape=jax.ShapeDtypeStruct((n, hout * wout, c), x.dtype),
        compiler_params=pltpu.CompilerParams(
            dimension_semantics=("parallel", "parallel"),
            vmem_limit_bytes=VMEM_LIMIT),
    )(xr)
    return out.reshape(n, hout, wout, c)


def _pick_out_tile(outp):
    for t in (512, 256, 128):
        if outp % t == 0:
            return t
    return outp


def linear_forward(x, layer):
    out_f, outp = layer["out_f"], layer["outp"]
    m, k_dim = x.shape
    w_arr = layer["w"]
    assert k_dim == w_arr.shape[0]

    tn = _pick_out_tile(outp)
    tm, mp = _tile_dim(m, 256)
    tk, kp = _tile_dim(k_dim, 2048)

    xb = x.astype(jnp.bfloat16)
    if (mp, kp) != (m, k_dim):
        xb = jnp.pad(xb, ((0, mp - m), (0, kp - k_dim)))
    if kp != k_dim:
        w_arr = jnp.pad(w_arr, ((0, kp - k_dim), (0, 0)))

    out = pl.pallas_call(
        _linear_kernel,
        grid=(mp // tm, outp // tn, kp // tk),
        in_specs=[pl.BlockSpec((tm, tk), lambda i, j, kk: (i, kk)),
                  pl.BlockSpec((tk, tn), lambda i, j, kk: (kk, j)),
                  pl.BlockSpec((1, tn), lambda i, j, kk: (0, j))],
        out_specs=pl.BlockSpec((tm, tn), lambda i, j, kk: (i, j)),
        out_shape=jax.ShapeDtypeStruct((mp, outp), jnp.float32),
        compiler_params=pltpu.CompilerParams(
            dimension_semantics=("parallel", "parallel", "arbitrary"),
            vmem_limit_bytes=VMEM_LIMIT),
    )(xb, w_arr, layer["b"])
    return out[:m, :out_f]


# ---------------------------------------------------------------------------
# Parameter init (mirrors yolo_v1.__init__ custom init, deterministic)
# ---------------------------------------------------------------------------

def init_cbl_params(key, in_c, out_c, k, s, cin_p):
    scale = math.sqrt(2.0 / (k * k * in_c))
    w_pt = scale * jax.random.normal(key, (out_c, in_c, k, k), dtype=jnp.float32)
    cp = LANE if out_c <= LANE else _round_up(out_c, 2 * LANE)
    tn = LANE if cp == LANE else 2 * LANE
    # (Cout,Cin,KH,KW) -> (KH,KW,Cin,Cout); pad Cin -> cin_p, Cout -> cp
    wt = jnp.transpose(w_pt, (2, 3, 1, 0))
    wt = jnp.pad(wt, ((0, 0), (0, 0), (0, cin_p - in_c), (0, cp - out_c)))
    w = wt.reshape(k * k * cin_p, cp).astype(jnp.bfloat16)
    gamma = jnp.ones((1, cp), jnp.float32)          # BN affine defaults
    beta = jnp.zeros((1, cp), jnp.float32)
    return dict(type="CBL", w=w, gamma=gamma, beta=beta, k=k, s=s,
                in_c=in_c, out_c=out_c, cin_p=cin_p, cp=cp, tn=tn)


def init_linear_params(key, in_f, out_f, prev_c=None, prev_cp=None):
    scale = math.sqrt(2.0 / in_f)
    w_pt = scale * jax.random.uniform(key, (out_f, in_f), dtype=jnp.float32,
                                      minval=-1.0, maxval=1.0)
    outp = _round_up(out_f, LANE)
    if prev_c is not None and prev_cp is not None and in_f % prev_c == 0:
        # Activation reaching this layer is channel-padded NHWC flattened as
        # (H*W, cp); permute/zero-pad the torch (C,H,W)-ordered weight rows so
        # no activation transpose or channel slice is needed before the matmul.
        hw = in_f // prev_c
        wt = w_pt.reshape(out_f, prev_c, hw)        # (out, C, HW)
        wt = jnp.transpose(wt, (2, 1, 0))           # (HW, C, out)
        wt = jnp.pad(wt, ((0, 0), (0, prev_cp - prev_c), (0, 0)))
        w = wt.reshape(hw * prev_cp, out_f)
    else:
        w = jnp.transpose(w_pt)
    w = jnp.pad(w, ((0, 0), (0, outp - out_f))).astype(jnp.bfloat16)
    b = jnp.zeros((1, outp), jnp.float32)           # bias init to 0.0
    return dict(type="linear", w=w, b=b, out_f=out_f, outp=outp)


def build_yolo_v1(key, net_cfg, in_channels):
    layers = []
    cur_c, cur_cp = in_channels, in_channels
    flat_c, flat_cp = None, None
    for item in net_cfg:
        kind = item[0]
        if kind == "CBL":
            for cfg in item[1:]:
                key, sub = jax.random.split(key)
                lay = init_cbl_params(sub, cfg[0], cfg[1], cfg[2], cfg[3], cur_cp)
                layers.append(lay)
                cur_c, cur_cp = cfg[1], lay["cp"]
        elif kind == "maxpool":
            layers.append(dict(type="maxpool", k=item[-1][0], s=item[-1][1]))
        elif kind == "one2three":
            in_c, out_c, rep = item[-1][0], item[-1][1], item[-1][-1]
            for _ in range(rep):
                key, k1, k2 = jax.random.split(key, 3)
                l1 = init_cbl_params(k1, in_c, out_c, 1, 1, cur_cp)
                layers.append(l1)
                cur_c, cur_cp = out_c, l1["cp"]
                l2 = init_cbl_params(k2, out_c, in_c, 3, 1, cur_cp)
                layers.append(l2)
                cur_c, cur_cp = in_c, l2["cp"]
        elif kind == "Flatten":
            layers.append(dict(type="flatten"))
            flat_c, flat_cp = cur_c, cur_cp
        elif kind == "dropout":
            # TODO(synk): train-mode dropout is stochastic; eval-mode identity used.
            layers.append(dict(type="dropout", p=item[-1][0]))
        elif kind == "linear":
            key, sub = jax.random.split(key)
            layers.append(init_linear_params(sub, item[-1][0], item[-1][1],
                                             flat_c, flat_cp))
            flat_c, flat_cp = None, None
        elif kind == "local":
            # TODO(synk): LocallyConnected2d class is not provided in the reference; not supported.
            raise NotImplementedError("LocallyConnected2d not available")
    return layers


def yolo_v1_forward(layers, x_nchw):
    x = jnp.transpose(x_nchw, (0, 2, 3, 1)).astype(jnp.bfloat16)  # NCHW -> NHWC
    for layer in layers:
        t = layer["type"]
        if t == "CBL":
            x = cbl_forward(x, layer)
        elif t == "maxpool":
            x = maxpool_forward(x, layer["k"], layer["s"])
        elif t == "flatten":
            # free reshape; the Linear weight rows were permuted/padded at init
            # to match the (H, W, cp) activation layout.
            x = x.reshape(x.shape[0], -1)
        elif t == "dropout":
            pass
        elif t == "linear":
            x = linear_forward(x, layer)
    return x


# ---------------------------------------------------------------------------

if __name__ == "__main__":
    # small net_cfg consistent with yolo_v1's config grammar
    net_cfg = [
        ("CBL", (4, 8, 3, 1)),        # Conv 4->8 3x3 s1 + BN + LeakyReLU
        ("maxpool", (2, 2)),          # 16x16 -> 8x8
        ("one2three", (8, 4, 1)),     # CBL 8->4 1x1, CBL 4->8 3x3
        ("maxpool", (2, 2)),          # 8x8 -> 4x4
        ("Flatten",),
        ("linear", (8 * 4 * 4, 32)),  # 128 -> 32
    ]

    key = jax.random.PRNGKey(0)
    key, pkey, xkey = jax.random.split(key, 3)
    layers = build_yolo_v1(pkey, net_cfg, in_channels=4)

    x = jax.random.normal(xkey, (2, 4, 16, 16), dtype=jnp.float32)  # NCHW, like torch

    fwd = jax.jit(lambda inp: yolo_v1_forward(layers, inp))
    out = jax.block_until_ready(fwd(x))

    assert out.shape == (2, 32) and out.dtype == jnp.float32
    assert bool(jnp.all(jnp.isfinite(out)))
    print("KERNEL_OK")
</pallas_src>

<mosaic_0001>
module attributes {stable_mosaic.version = 11 : i64} {
  func.func @_conv_bnstats_kernel(%arg0: i32, %arg1: i32, %arg2: memref<1x342x4xbf16, #tpu.memory_space<vmem>>, %arg3: memref<36x128xbf16, #tpu.memory_space<vmem>>, %arg4: memref<1x288x128xbf16, #tpu.memory_space<vmem>>, %arg5: memref<1x2x128xf32, #tpu.memory_space<vmem>>, %arg6: memref<288x128xf32, #tpu.memory_space<vmem>>) attributes {dimension_semantics = [#tpu.dimension_semantics<parallel>, #tpu.dimension_semantics<parallel>], iteration_bounds = array<i64: 1, 2>, scalar_prefetch = 0 : i64, scratch_operands = 1 : i64, tpu.core_type = #tpu.core_type<tc>, window_params = [{transform_indices = @transform_0, window_bounds = array<i64: 1, 342, 4>}, {transform_indices = @transform_1, window_bounds = array<i64: 36, 128>}, {transform_indices = @transform_2, window_bounds = array<i64: 1, 288, 128>}, {transform_indices = @transform_3, window_bounds = array<i64: 1, 2, 128>}]} {
    %c0 = arith.constant 0 : index
    %c0_0 = arith.constant 0 : index
    %c0_1 = arith.constant 0 : index
    %0 = vector.load %arg2[%c0, %c0_0, %c0_1] : memref<1x342x4xbf16, #tpu.memory_space<vmem>>, vector<1x288x4xbf16>
    %1 = vector.shape_cast %0 : vector<1x288x4xbf16> to vector<288x4xbf16>
    %c0_2 = arith.constant 0 : index
    %c0_3 = arith.constant 0 : index
    %2 = vector.load %arg3[%c0_2, %c0_3] : memref<36x128xbf16, #tpu.memory_space<vmem>>, vector<4x128xbf16>
    %cst = arith.constant dense<0.000000e+00> : vector<288x128xf32>
    %3 = tpu.matmul %1, %2, %cst {dimension_numbers = #tpu.dot_dimension_numbers<[1], [0], [0], [1], [0, 0, 1, 1], [], []>} : vector<288x4xbf16>, vector<4x128xbf16>, vector<288x128xf32> -> vector<288x128xf32>
    %c0_4 = arith.constant 0 : index
    %c0_5 = arith.constant 0 : index
    %4 = vector.load %arg6[%c0_4, %c0_5] : memref<288x128xf32, #tpu.memory_space<vmem>>, vector<288x128xf32>
    tpu.vector_store %arg6[%c0_4, %c0_5], %3 {strides = array<i32>} : memref<288x128xf32, #tpu.memory_space<vmem>>, vector<288x128xf32>,
    %c0_6 = arith.constant 0 : index
    %c1 = arith.constant 1 : index
    %c0_7 = arith.constant 0 : index
    %5 = vector.load %arg2[%c0_6, %c1, %c0_7] : memref<1x342x4xbf16, #tpu.memory_space<vmem>>, vector<1x288x4xbf16>
    %6 = vector.shape_cast %5 : vector<1x288x4xbf16> to vector<288x4xbf16>
    %c4 = arith.constant 4 : index
    %c0_8 = arith.constant 0 : index
    %7 = vector.load %arg3[%c4, %c0_8] : memref<36x128xbf16, #tpu.memory_space<vmem>>, vector<4x128xbf16>
    %cst_9 = arith.constant dense<0.000000e+00> : vector<288x128xf32>
    %8 = tpu.matmul %6, %7, %cst_9 {dimension_numbers = #tpu.dot_dimension_numbers<[1], [0], [0], [1], [0, 0, 1, 1], [], []>} : vector<288x4xbf16>, vector<4x128xbf16>, vector<288x128xf32> -> vector<288x128xf32>
    %c0_10 = arith.constant 0 : index
    %c0_11 = arith.constant 0 : index
    %9 = vector.load %arg6[%c0_10, %c0_11] : memref<288x128xf32, #tpu.memory_space<vmem>>, vector<288x128xf32>
    %10 = arith.addf %9, %8 : vector<288x128xf32>
    %c0_12 = arith.constant 0 : index
    %c0_13 = arith.constant 0 : index
    %11 = vector.load %arg6[%c0_12, %c0_13] : memref<288x128xf32, #tpu.memory_space<vmem>>, vector<288x128xf32>
    tpu.vector_store %arg6[%c0_12, %c0_13], %10 {strides = array<i32>} : memref<288x128xf32, #tpu.memory_space<vmem>>, vector<288x128xf32>,
    %c0_14 = arith.constant 0 : index
    %c2 = arith.constant 2 : index
    %c0_15 = arith.constant 0 : index
    %12 = vector.load %arg2[%c0_14, %c2, %c0_15] : memref<1x342x4xbf16, #tpu.memory_space<vmem>>, vector<1x288x4xbf16>
    %13 = vector.shape_cast %12 : vector<1x288x4xbf16> to vector<288x4xbf16>
    %c8 = arith.constant 8 : index
    %c0_16 = arith.constant 0 : index
    %14 = vector.load %arg3[%c8, %c0_16] : memref<36x128xbf16, #tpu.memory_space<vmem>>, vector<4x128xbf16>
    %cst_17 = arith.constant dense<0.000000e+00> : vector<288x128xf32>
    %15 = tpu.matmul %13, %14, %cst_17 {dimension_numbers = #tpu.dot_dimension_numbers<[1], [0], [0], [1], [0, 0, 1, 1], [], []>} : vector<288x4xbf16>, vector<4x128xbf16>, vector<288x128xf32> -> vector<288x128xf32>
    %c0_18 = arith.constant 0 : index
    %c0_19 = arith.constant 0 : index
    %16 = vector.load %arg6[%c0_18, %c0_19] : memref<288x128xf32, #tpu.memory_space<vmem>>, vector<288x128xf32>
    %17 = arith.addf %16, %15 : vector<288x128xf32>
    %c0_20 = arith.constant 0 : index
    %c0_21 = arith.constant 0 : index
    %18 = vector.load %arg6[%c0_20, %c0_21] : memref<288x128xf32, #tpu.memory_space<vmem>>, vector<288x128xf32>
    tpu.vector_store %arg6[%c0_20, %c0_21], %17 {strides = array<i32>} : memref<288x128xf32, #tpu.memory_space<vmem>>, vector<288x128xf32>,
    %c0_22 = arith.constant 0 : index
    %c18 = arith.constant 18 : index
    %c0_23 = arith.constant 0 : index
    %19 = vector.load %arg2[%c0_22, %c18, %c0_23] : memref<1x342x4xbf16, #tpu.memory_space<vmem>>, vector<1x288x4xbf16>
    %20 = vector.shape_cast %19 : vector<1x288x4xbf16> to vector<288x4xbf16>
    %c12 = arith.constant 12 : index
    %c0_24 = arith.constant 0 : index
    %21 = vector.load %arg3[%c12, %c0_24] : memref<36x128xbf16, #tpu.memory_space<vmem>>, vector<4x128xbf16>
    %cst_25 = arith.constant dense<0.000000e+00> : vector<288x128xf32>
    %22 = tpu.matmul %20, %21, %cst_25 {dimension_numbers = #tpu.dot_dimension_numbers<[1], [0], [0], [1], [0, 0, 1, 1], [], []>} : vector<288x4xbf16>, vector<4x128xbf16>, vector<288x128xf32> -> vector<288x128xf32>
    %c0_26 = arith.constant 0 : index
    %c0_27 = arith.constant 0 : index
    %23 = vector.load %arg6[%c0_26, %c0_27] : memref<288x128xf32, #tpu.memory_space<vmem>>, vector<288x128xf32>
    %24 = arith.addf %23, %22 : vector<288x128xf32>
    %c0_28 = arith.constant 0 : index
    %c0_29 = arith.constant 0 : index
    %25 = vector.load %arg6[%c0_28, %c0_29] : memref<288x128xf32, #tpu.memory_space<vmem>>, vector<288x128xf32>
    tpu.vector_store %arg6[%c0_28, %c0_29], %24 {strides = array<i32>} : memref<288x128xf32, #tpu.memory_space<vmem>>, vector<288x128xf32>,
    %c0_30 = arith.constant 0 : index
    %c19 = arith.constant 19 : index
    %c0_31 = arith.constant 0 : index
    %26 = vector.load %arg2[%c0_30, %c19, %c0_31] : memref<1x342x4xbf16, #tpu.memory_space<vmem>>, vector<1x288x4xbf16>
    %27 = vector.shape_cast %26 : vector<1x288x4xbf16> to vector<288x4xbf16>
    %c16 = arith.constant 16 : index
    %c0_32 = arith.constant 0 : index
    %28 = vector.load %arg3[%c16, %c0_32] : memref<36x128xbf16, #tpu.memory_space<vmem>>, vector<4x128xbf16>
    %cst_33 = arith.constant dense<0.000000e+00> : vector<288x128xf32>
    %29 = tpu.matmul %27, %28, %cst_33 {dimension_numbers = #tpu.dot_dimension_numbers<[1], [0], [0], [1], [0, 0, 1, 1], [], []>} : vector<288x4xbf16>, vector<4x128xbf16>, vector<288x128xf32> -> vector<288x128xf32>
    %c0_34 = arith.constant 0 : index
    %c0_35 = arith.constant 0 : index
    %30 = vector.load %arg6[%c0_34, %c0_35] : memref<288x128xf32, #tpu.memory_space<vmem>>, vector<288x128xf32>
    %31 = arith.addf %30, %29 : vector<288x128xf32>
    %c0_36 = arith.constant 0 : index
    %c0_37 = arith.constant 0 : index
    %32 = vector.load %arg6[%c0_36, %c0_37] : memref<288x128xf32, #tpu.memory_space<vmem>>, vector<288x128xf32>
    tpu.vector_store %arg6[%c0_36, %c0_37], %31 {strides = array<i32>} : memref<288x128xf32, #tpu.memory_space<vmem>>, vector<288x128xf32>,
    %c0_38 = arith.constant 0 : index
    %c20 = arith.constant 20 : index
    %c0_39 = arith.constant 0 : index
    %33 = vector.load %arg2[%c0_38, %c20, %c0_39] : memref<1x342x4xbf16, #tpu.memory_space<vmem>>, vector<1x288x4xbf16>
    %34 = vector.shape_cast %33 : vector<1x288x4xbf16> to vector<288x4xbf16>
    %c20_40 = arith.constant 20 : index
    %c0_41 = arith.constant 0 : index
    %35 = vector.load %arg3[%c20_40, %c0_41] : memref<36x128xbf16, #tpu.memory_space<vmem>>, vector<4x128xbf16>
    %cst_42 = arith.constant dense<0.000000e+00> : vector<288x128xf32>
    %36 = tpu.matmul %34, %35, %cst_42 {dimension_numbers = #tpu.dot_dimension_numbers<[1], [0], [0], [1], [0, 0, 1, 1], [], []>} : vector<288x4xbf16>, vector<4x128xbf16>, vector<288x128xf32> -> vector<288x128xf32>
    %c0_43 = arith.constant 0 : index
    %c0_44 = arith.constant 0 : index
    %37 = vector.load %arg6[%c0_43, %c0_44] : memref<288x128xf32, #tpu.memory_space<vmem>>, vector<288x128xf32>
    %38 = arith.addf %37, %36 : vector<288x128xf32>
    %c0_45 = arith.constant 0 : index
    %c0_46 = arith.constant 0 : index
    %39 = vector.load %arg6[%c0_45, %c0_46] : memref<288x128xf32, #tpu.memory_space<vmem>>, vector<288x128xf32>
    tpu.vector_store %arg6[%c0_45, %c0_46], %38 {strides = array<i32>} : memref<288x128xf32, #tpu.memory_space<vmem>>, vector<288x128xf32>,
    %c0_47 = arith.constant 0 : index
    %c36 = arith.constant 36 : index
    %c0_48 = arith.constant 0 : index
    %40 = vector.load %arg2[%c0_47, %c36, %c0_48] : memref<1x342x4xbf16, #tpu.memory_space<vmem>>, vector<1x288x4xbf16>
    %41 = vector.shape_cast %40 : vector<1x288x4xbf16> to vector<288x4xbf16>
    %c24 = arith.constant 24 : index
    %c0_49 = arith.constant 0 : index
    %42 = vector.load %arg3[%c24, %c0_49] : memref<36x128xbf16, #tpu.memory_space<vmem>>, vector<4x128xbf16>
    %cst_50 = arith.constant dense<0.000000e+00> : vector<288x128xf32>
    %43 = tpu.matmul %41, %42, %cst_50 {dimension_numbers = #tpu.dot_dimension_numbers<[1], [0], [0], [1], [0, 0, 1, 1], [], []>} : vector<288x4xbf16>, vector<4x128xbf16>, vector<288x128xf32> -> vector<288x128xf32>
    %c0_51 = arith.constant 0 : index
    %c0_52 = arith.constant 0 : index
    %44 = vector.load %arg6[%c0_51, %c0_52] : memref<288x128xf32, #tpu.memory_space<vmem>>, vector<288x128xf32>
    %45 = arith.addf %44, %43 : vector<288x128xf32>
    %c0_53 = arith.constant 0 : index
    %c0_54 = arith.constant 0 : index
    %46 = vector.load %arg6[%c0_53, %c0_54] : memref<288x128xf32, #tpu.memory_space<vmem>>, vector<288x128xf32>
    tpu.vector_store %arg6[%c0_53, %c0_54], %45 {strides = array<i32>} : memref<288x128xf32, #tpu.memory_space<vmem>>, vector<288x128xf32>,
    %c0_55 = arith.constant 0 : index
    %c37 = arith.constant 37 : index
    %c0_56 = arith.constant 0 : index
    %47 = vector.load %arg2[%c0_55, %c37, %c0_56] : memref<1x342x4xbf16, #tpu.memory_space<vmem>>, vector<1x288x4xbf16>
    %48 = vector.shape_cast %47 : vector<1x288x4xbf16> to vector<288x4xbf16>
    %c28 = arith.constant 28 : index
    %c0_57 = arith.constant 0 : index
    %49 = vector.load %arg3[%c28, %c0_57] : memref<36x128xbf16, #tpu.memory_space<vmem>>, vector<4x128xbf16>
    %cst_58 = arith.constant dense<0.000000e+00> : vector<288x128xf32>
    %50 = tpu.matmul %48, %49, %cst_58 {dimension_numbers = #tpu.dot_dimension_numbers<[1], [0], [0], [1], [0, 0, 1, 1], [], []>} : vector<288x4xbf16>, vector<4x128xbf16>, vector<288x128xf32> -> vector<288x128xf32>
    %c0_59 = arith.constant 0 : index
    %c0_60 = arith.constant 0 : index
    %51 = vector.load %arg6[%c0_59, %c0_60] : memref<288x128xf32, #tpu.memory_space<vmem>>, vector<288x128xf32>
    %52 = arith.addf %51, %50 : vector<288x128xf32>
    %c0_61 = arith.constant 0 : index
    %c0_62 = arith.constant 0 : index
    %53 = vector.load %arg6[%c0_61, %c0_62] : memref<288x128xf32, #tpu.memory_space<vmem>>, vector<288x128xf32>
    tpu.vector_store %arg6[%c0_61, %c0_62], %52 {strides = array<i32>} : memref<288x128xf32, #tpu.memory_space<vmem>>, vector<288x128xf32>,
    %c0_63 = arith.constant 0 : index
    %c38 = arith.constant 38 : index
    %c0_64 = arith.constant 0 : index
    %54 = vector.load %arg2[%c0_63, %c38, %c0_64] : memref<1x342x4xbf16, #tpu.memory_space<vmem>>, vector<1x288x4xbf16>
    %55 = vector.shape_cast %54 : vector<1x288x4xbf16> to vector<288x4xbf16>
    %c32 = arith.constant 32 : index
    %c0_65 = arith.constant 0 : index
    %56 = vector.load %arg3[%c32, %c0_65] : memref<36x128xbf16, #tpu.memory_space<vmem>>, vector<4x128xbf16>
    %cst_66 = arith.constant dense<0.000000e+00> : vector<288x128xf32>
    %57 = tpu.matmul %55, %56, %cst_66 {dimension_numbers = #tpu.dot_dimension_numbers<[1], [0], [0], [1], [0, 0, 1, 1], [], []>} : vector<288x4xbf16>, vector<4x128xbf16>, vector<288x128xf32> -> vector<288x128xf32>
    %c0_67 = arith.constant 0 : index
    %c0_68 = arith.constant 0 : index
    %58 = vector.load %arg6[%c0_67, %c0_68] : memref<288x128xf32, #tpu.memory_space<vmem>>, vector<288x128xf32>
    %59 = arith.addf %58, %57 : vector<288x128xf32>
    %c0_69 = arith.constant 0 : index
    %c0_70 = arith.constant 0 : index
    %60 = vector.load %arg6[%c0_69, %c0_70] : memref<288x128xf32, #tpu.memory_space<vmem>>, vector<288x128xf32>
    tpu.vector_store %arg6[%c0_69, %c0_70], %59 {strides = array<i32>} : memref<288x128xf32, #tpu.memory_space<vmem>>, vector<288x128xf32>,
    %c0_71 = arith.constant 0 : index
    %c0_72 = arith.constant 0 : index
    %61 = vector.load %arg6[%c0_71, %c0_72] : memref<288x128xf32, #tpu.memory_space<vmem>>, vector<288x128xf32>
    %62 = arith.truncf %61 : vector<288x128xf32> to vector<288x128xbf16>
    %c0_73 = arith.constant 0 : index
    %c0_74 = arith.constant 0 : index
    %c0_75 = arith.constant 0 : index
    %63 = vector.load %arg4[%c0_73, %c0_74, %c0_75] : memref<1x288x128xbf16, #tpu.memory_space<vmem>>, vector<1x288x128xbf16>
    %64 = vector.shape_cast %63 : vector<1x288x128xbf16> to vector<288x128xbf16>
    %65 = vector.shape_cast %62 : vector<288x128xbf16> to vector<1x288x128xbf16>
    tpu.vector_store %arg4[%c0_73, %c0_74, %c0_75], %65 {strides = array<i32>} : memref<1x288x128xbf16, #tpu.memory_space<vmem>>, vector<1x288x128xbf16>,
    %66 = tpu.iota {dimensions = array<i32: 0>} : vector<288x1xi32>
    %c18_i32 = arith.constant 18 : i32
    %c0_i32 = arith.constant 0 : i32
    %67 = arith.cmpi eq, %c18_i32, %c0_i32 : i32
    %c1_i32 = arith.constant 1 : i32
    %68 = arith.select %67, %c1_i32, %c18_i32 : i32
    %69 = vector.broadcast %68 : i32 to vector<288x1xi32>
    %70 = arith.remsi %66, %69 : vector<288x1xi32>
    %c0_i32_76 = arith.constant 0 : i32
    %71 = vector.broadcast %c0_i32_76 : i32 to vector<288x1xi32>
    %72 = arith.cmpi ne, %70, %71 : vector<288x1xi32>
    %c0_i32_77 = arith.constant 0 : i32
    %73 = vector.broadcast %c0_i32_77 : i32 to vector<288x1xi32>
    %74 = arith.cmpi slt, %70, %73 : vector<288x1xi32>
    %c0_i32_78 = arith.constant 0 : i32
    %75 = arith.cmpi slt, %68, %c0_i32_78 : i32
    %76 = vector.broadcast %75 : i1 to vector<288x1xi1>
    %77 = vector.broadcast %76 : vector<288x1xi1> to vector<288x1xi1>
    %78 = arith.xori %74, %77 : vector<288x1xi1>
    %79 = arith.andi %78, %72 : vector<288x1xi1>
    %80 = vector.broadcast %68 : i32 to vector<288x1xi32>
    %81 = arith.addi %70, %80 : vector<288x1xi32>
    %82 = arith.select %79, %81, %70 : vector<288x1xi1>, vector<288x1xi32>
    %c16_i32 = arith.constant 16 : i32
    %83 = vector.broadcast %c16_i32 : i32 to vector<288x1xi32>
    %84 = arith.cmpi slt, %82, %83 : vector<288x1xi32>
    %cst_79 = arith.constant 0.000000e+00 : f32
    %85 = vector.shape_cast %84 : vector<288x1xi1> to vector<288x1xi1>
    %86 = vector.broadcast %85 : vector<288x1xi1> to vector<288x128xi1>
    %87 = vector.broadcast %cst_79 : f32 to vector<288x128xf32>
    %88 = arith.select %86, %61, %87 : vector<288x128xi1>, vector<288x128xf32>
    %cst_80 = arith.constant dense<0.000000e+00> : vector<128xf32>
    %89 = vector.multi_reduction <add>, %88, %cst_80 [0] : vector<288x128xf32> to vector<128xf32>
    %90 = vector.shape_cast %89 : vector<128xf32> to vector<1x128xf32>
    %c0_81 = arith.constant 0 : index
    %c0_82 = arith.constant 0 : index
    %c0_83 = arith.constant 0 : index
    %91 = vector.load %arg5[%c0_81, %c0_82, %c0_83] : memref<1x2x128xf32, #tpu.memory_space<vmem>>, vector<1x1x128xf32>
    %92 = vector.shape_cast %91 : vector<1x1x128xf32> to vector<1x128xf32>
    %93 = vector.shape_cast %90 : vector<1x128xf32> to vector<1x1x128xf32>
    tpu.vector_store %arg5[%c0_81, %c0_82, %c0_83], %93 {strides = array<i32>} : memref<1x2x128xf32, #tpu.memory_space<vmem>>, vector<1x1x128xf32>,
    %94 = arith.mulf %88, %88 : vector<288x128xf32>
    %cst_84 = arith.constant dense<0.000000e+00> : vector<128xf32>
    %95 = vector.multi_reduction <add>, %94, %cst_84 [0] : vector<288x128xf32> to vector<128xf32>
    %96 = vector.shape_cast %95 : vector<128xf32> to vector<1x128xf32>
    %c0_85 = arith.constant 0 : index
    %c1_86 = arith.constant 1 : index
    %c0_87 = arith.constant 0 : index
    %97 = vector.load %arg5[%c0_85, %c1_86, %c0_87] : memref<1x2x128xf32, #tpu.memory_space<vmem>>, vector<1x1x128xf32>
    %98 = vector.shape_cast %97 : vector<1x1x128xf32> to vector<1x128xf32>
    %99 = vector.shape_cast %96 : vector<1x128xf32> to vector<1x1x128xf32>
    tpu.vector_store %arg5[%c0_85, %c1_86, %c0_87], %99 {strides = array<i32>} : memref<1x2x128xf32, #tpu.memory_space<vmem>>, vector<1x1x128xf32>,
    return
  }
  func.func @transform_0(%arg0: i32, %arg1: i32) -> (i32, i32, i32) {
    %c0_i32 = arith.constant 0 : i32
    %c0_i32_0 = arith.constant 0 : i32
    %c0_i32_1 = arith.constant 0 : i32
    return %arg1, %c0_i32, %c0_i32_0 : i32, i32, i32
  }
  func.func @transform_1(%arg0: i32, %arg1: i32) -> (i32, i32) {
    %c0_i32 = arith.constant 0 : i32
    %c0_i32_0 = arith.constant 0 : i32
    return %c0_i32, %arg0 : i32, i32
  }
  func.func @transform_2(%arg0: i32, %arg1: i32) -> (i32, i32, i32) {
    %c0_i32 = arith.constant 0 : i32
    %c0_i32_0 = arith.constant 0 : i32
    return %arg1, %c0_i32, %arg0 : i32, i32, i32
  }
  func.func @transform_3(%arg0: i32, %arg1: i32) -> (i32, i32, i32) {
    %c0_i32 = arith.constant 0 : i32
    %c0_i32_0 = arith.constant 0 : i32
    return %arg1, %c0_i32, %arg0 : i32, i32, i32
  }
}

module attributes {stable_mosaic.version = 11 : i64} {
  func.func @_bn_leaky_kernel(%arg0: i32, %arg1: i32, %arg2: i32, %arg3: memref<1x16x18x128xbf16, #tpu.memory_space<vmem>>, %arg4: memref<1x128xf32, #tpu.memory_space<vmem>>, %arg5: memref<1x128xf32, #tpu.memory_space<vmem>>, %arg6: memref<1x16x16x128xbf16, #tpu.memory_space<vmem>>) attributes {dimension_semantics = [#tpu.dimension_semantics<parallel>, #tpu.dimension_semantics<parallel>, #tpu.dimension_semantics<parallel>], iteration_bounds = array<i64: 2, 1, 1>, scalar_prefetch = 0 : i64, scratch_operands = 0 : i64, tpu.core_type = #tpu.core_type<tc>, window_params = [{transform_indices = @transform_0, window_bounds = array<i64: 1, 16, 18, 128>}, {transform_indices = @transform_1, window_bounds = array<i64: 1, 128>}, {transform_indices = @transform_2, window_bounds = array<i64: 1, 128>}, {transform_indices = @transform_3, window_bounds = array<i64: 1, 16, 16, 128>}]} {
    %c0 = arith.constant 0 : index
    %c0_0 = arith.constant 0 : index
    %c0_1 = arith.constant 0 : index
    %c0_2 = arith.constant 0 : index
    %0 = vector.load %arg3[%c0, %c0_0, %c0_1, %c0_2] : memref<1x16x18x128xbf16, #tpu.memory_space<vmem>>, vector<1x16x16x128xbf16>
    %1 = vector.shape_cast %0 : vector<1x16x16x128xbf16> to vector<16x16x128xbf16>
    %2 = arith.extf %1 : vector<16x16x128xbf16> to vector<16x16x128xf32>
    %c0_3 = arith.constant 0 : index
    %c0_4 = arith.constant 0 : index
    %3 = vector.load %arg4[%c0_3, %c0_4] : memref<1x128xf32, #tpu.memory_space<vmem>>, vector<1x128xf32>
    %4 = vector.shape_cast %3 : vector<1x128xf32> to vector<1x1x128xf32>
    %5 = vector.broadcast %4 : vector<1x1x128xf32> to vector<16x16x128xf32>
    %6 = arith.mulf %2, %5 : vector<16x16x128xf32>
    %c0_5 = arith.constant 0 : index
    %c0_6 = arith.constant 0 : index
    %7 = vector.load %arg5[%c0_5, %c0_6] : memref<1x128xf32, #tpu.memory_space<vmem>>, vector<1x128xf32>
    %8 = vector.shape_cast %7 : vector<1x128xf32> to vector<1x1x128xf32>
    %9 = vector.broadcast %8 : vector<1x1x128xf32> to vector<16x16x128xf32>
    %10 = arith.addf %6, %9 : vector<16x16x128xf32>
    %cst = arith.constant 0.000000e+00 : f32
    %11 = vector.broadcast %cst : f32 to vector<16x16x128xf32>
    %12 = arith.cmpf oge, %10, %11 : vector<16x16x128xf32>
    %cst_7 = arith.constant 1.000000e-01 : f32
    %13 = vector.broadcast %cst_7 : f32 to vector<16x16x128xf32>
    %14 = arith.mulf %13, %10 : vector<16x16x128xf32>
    %15 = arith.select %12, %10, %14 : vector<16x16x128xi1>, vector<16x16x128xf32>
    %16 = arith.truncf %15 : vector<16x16x128xf32> to vector<16x16x128xbf16>
    %c0_8 = arith.constant 0 : index
    %c0_9 = arith.constant 0 : index
    %c0_10 = arith.constant 0 : index
    %c0_11 = arith.constant 0 : index
    %17 = vector.load %arg6[%c0_8, %c0_9, %c0_10, %c0_11] : memref<1x16x16x128xbf16, #tpu.memory_space<vmem>>, vector<1x16x16x128xbf16>
    %18 = vector.shape_cast %17 : vector<1x16x16x128xbf16> to vector<16x16x128xbf16>
    %19 = vector.shape_cast %16 : vector<16x16x128xbf16> to vector<1x16x16x128xbf16>
    tpu.vector_store %arg6[%c0_8, %c0_9, %c0_10, %c0_11], %19 {strides = array<i32>} : memref<1x16x16x128xbf16, #tpu.memory_space<vmem>>, vector<1x16x16x128xbf16>,
    return
  }
  func.func @transform_0(%arg0: i32, %arg1: i32, %arg2: i32) -> (i32, i32, i32, i32) {
    %c0_i32 = arith.constant 0 : i32
    %c0_i32_0 = arith.constant 0 : i32
    return %arg0, %arg1, %c0_i32, %arg2 : i32, i32, i32, i32
  }
  func.func @transform_1(%arg0: i32, %arg1: i32, %arg2: i32) -> (i32, i32) {
    %c0_i32 = arith.constant 0 : i32
    %c0_i32_0 = arith.constant 0 : i32
    return %c0_i32, %arg2 : i32, i32
  }
  func.func @transform_2(%arg0: i32, %arg1: i32, %arg2: i32) -> (i32, i32) {
    %c0_i32 = arith.constant 0 : i32
    %c0_i32_0 = arith.constant 0 : i32
    return %c0_i32, %arg2 : i32, i32
  }
  func.func @transform_3(%arg0: i32, %arg1: i32, %arg2: i32) -> (i32, i32, i32, i32) {
    %c0_i32 = arith.constant 0 : i32
    %c0_i32_0 = arith.constant 0 : i32
    return %arg0, %arg1, %c0_i32, %arg2 : i32, i32, i32, i32
  }
}

module attributes {stable_mosaic.version = 11 : i64} {
  func.func @_maxpool_kernel(%arg0: i32, %arg1: i32, %arg2: memref<1x128x256xbf16, #tpu.memory_space<vmem>>, %arg3: memref<1x64x128xbf16, #tpu.memory_space<vmem>>) attributes {dimension_semantics = [#tpu.dimension_semantics<parallel>, #tpu.dimension_semantics<parallel>], iteration_bounds = array<i64: 2, 1>, scalar_prefetch = 0 : i64, scratch_operands = 0 : i64, tpu.core_type = #tpu.core_type<tc>, window_params = [{transform_indices = @transform_0, window_bounds = array<i64: 1, 128, 256>}, {transform_indices = @transform_1, window_bounds = array<i64: 1, 64, 128>}]} {
    %c0 = arith.constant 0 : index
    %c0_0 = arith.constant 0 : index
    %c0_1 = arith.constant 0 : index
    %0 = vector.load %arg2[%c0, %c0_0, %c0_1] : memref<1x128x256xbf16, #tpu.memory_space<vmem>>, vector<1x8x256xbf16>
    %1 = vector.shape_cast %0 : vector<1x8x256xbf16> to vector<8x256xbf16>
    %2 = vector.extract_strided_slice %1 {offsets = [0, 0], sizes = [8, 128], strides = [1, 1]} : vector<8x256xbf16> to vector<8x128xbf16>
    %3 = vector.extract_strided_slice %1 {offsets = [0, 128], sizes = [8, 128], strides = [1, 1]} : vector<8x256xbf16> to vector<8x128xbf16>
    %4 = arith.maximumf %2, %3 : vector<8x128xbf16>
    %c0_2 = arith.constant 0 : index
    %c8 = arith.constant 8 : index
    %c0_3 = arith.constant 0 : index
    %5 = vector.load %arg2[%c0_2, %c8, %c0_3] : memref<1x128x256xbf16, #tpu.memory_space<vmem>>, vector<1x8x256xbf16>
    %6 = vector.shape_cast %5 : vector<1x8x256xbf16> to vector<8x256xbf16>
    %7 = vector.extract_strided_slice %6 {offsets = [0, 0], sizes = [8, 128], strides = [1, 1]} : vector<8x256xbf16> to vector<8x128xbf16>
    %8 = arith.maximumf %4, %7 : vector<8x128xbf16>
    %9 = vector.extract_strided_slice %6 {offsets = [0, 128], sizes = [8, 128], strides = [1, 1]} : vector<8x256xbf16> to vector<8x128xbf16>
    %10 = arith.maximumf %8, %9 : vector<8x128xbf16>
    %c0_4 = arith.constant 0 : index
    %c0_5 = arith.constant 0 : index
    %c0_6 = arith.constant 0 : index
    %11 = vector.load %arg3[%c0_4, %c0_5, %c0_6] : memref<1x64x128xbf16, #tpu.memory_space<vmem>>, vector<1x8x128xbf16>
    %12 = vector.shape_cast %11 : vector<1x8x128xbf16> to vector<8x128xbf16>
    %13 = vector.shape_cast %10 : vector<8x128xbf16> to vector<1x8x128xbf16>
    tpu.vector_store %arg3[%c0_4, %c0_5, %c0_6], %13 {strides = array<i32>} : memref<1x64x128xbf16, #tpu.memory_space<vmem>>, vector<1x8x128xbf16>,
    %c0_7 = arith.constant 0 : index
    %c16 = arith.constant 16 : index
    %c0_8 = arith.constant 0 : index
    %14 = vector.load %arg2[%c0_7, %c16, %c0_8] : memref<1x128x256xbf16, #tpu.memory_space<vmem>>, vector<1x8x256xbf16>
    %15 = vector.shape_cast %14 : vector<1x8x256xbf16> to vector<8x256xbf16>
    %16 = vector.extract_strided_slice %15 {offsets = [0, 0], sizes = [8, 128], strides = [1, 1]} : vector<8x256xbf16> to vector<8x128xbf16>
    %17 = vector.extract_strided_slice %15 {offsets = [0, 128], sizes = [8, 128], strides = [1, 1]} : vector<8x256xbf16> to vector<8x128xbf16>
    %18 = arith.maximumf %16, %17 : vector<8x128xbf16>
    %c0_9 = arith.constant 0 : index
    %c24 = arith.constant 24 : index
    %c0_10 = arith.constant 0 : index
    %19 = vector.load %arg2[%c0_9, %c24, %c0_10] : memref<1x128x256xbf16, #tpu.memory_space<vmem>>, vector<1x8x256xbf16>
    %20 = vector.shape_cast %19 : vector<1x8x256xbf16> to vector<8x256xbf16>
    %21 = vector.extract_strided_slice %20 {offsets = [0, 0], sizes = [8, 128], strides = [1, 1]} : vector<8x256xbf16> to vector<8x128xbf16>
    %22 = arith.maximumf %18, %21 : vector<8x128xbf16>
    %23 = vector.extract_strided_slice %20 {offsets = [0, 128], sizes = [8, 128], strides = [1, 1]} : vector<8x256xbf16> to vector<8x128xbf16>
    %24 = arith.maximumf %22, %23 : vector<8x128xbf16>
    %c0_11 = arith.constant 0 : index
    %c8_12 = arith.constant 8 : index
    %c0_13 = arith.constant 0 : index
    %25 = vector.load %arg3[%c0_11, %c8_12, %c0_13] : memref<1x64x128xbf16, #tpu.memory_space<vmem>>, vector<1x8x128xbf16>
    %26 = vector.shape_cast %25 : vector<1x8x128xbf16> to vector<8x128xbf16>
    %27 = vector.shape_cast %24 : vector<8x128xbf16> to vector<1x8x128xbf16>
    tpu.vector_store %arg3[%c0_11, %c8_12, %c0_13], %27 {strides = array<i32>} : memref<1x64x128xbf16, #tpu.memory_space<vmem>>, vector<1x8x128xbf16>,
    %c0_14 = arith.constant 0 : index
    %c32 = arith.constant 32 : index
    %c0_15 = arith.constant 0 : index
    %28 = vector.load %arg2[%c0_14, %c32, %c0_15] : memref<1x128x256xbf16, #tpu.memory_space<vmem>>, vector<1x8x256xbf16>
    %29 = vector.shape_cast %28 : vector<1x8x256xbf16> to vector<8x256xbf16>
    %30 = vector.extract_strided_slice %29 {offsets = [0, 0], sizes = [8, 128], strides = [1, 1]} : vector<8x256xbf16> to vector<8x128xbf16>
    %31 = vector.extract_strided_slice %29 {offsets = [0, 128], sizes = [8, 128], strides = [1, 1]} : vector<8x256xbf16> to vector<8x128xbf16>
    %32 = arith.maximumf %30, %31 : vector<8x128xbf16>
    %c0_16 = arith.constant 0 : index
    %c40 = arith.constant 40 : index
    %c0_17 = arith.constant 0 : index
    %33 = vector.load %arg2[%c0_16, %c40, %c0_17] : memref<1x128x256xbf16, #tpu.memory_space<vmem>>, vector<1x8x256xbf16>
    %34 = vector.shape_cast %33 : vector<1x8x256xbf16> to vector<8x256xbf16>
    %35 = vector.extract_strided_slice %34 {offsets = [0, 0], sizes = [8, 128], strides = [1, 1]} : vector<8x256xbf16> to vector<8x128xbf16>
    %36 = arith.maximumf %32, %35 : vector<8x128xbf16>
    %37 = vector.extract_strided_slice %34 {offsets = [0, 128], sizes = [8, 128], strides = [1, 1]} : vector<8x256xbf16> to vector<8x128xbf16>
    %38 = arith.maximumf %36, %37 : vector<8x128xbf16>
    %c0_18 = arith.constant 0 : index
    %c16_19 = arith.constant 16 : index
    %c0_20 = arith.constant 0 : index
    %39 = vector.load %arg3[%c0_18, %c16_19, %c0_20] : memref<1x64x128xbf16, #tpu.memory_space<vmem>>, vector<1x8x128xbf16>
    %40 = vector.shape_cast %39 : vector<1x8x128xbf16> to vector<8x128xbf16>
    %41 = vector.shape_cast %38 : vector<8x128xbf16> to vector<1x8x128xbf16>
    tpu.vector_store %arg3[%c0_18, %c16_19, %c0_20], %41 {strides = array<i32>} : memref<1x64x128xbf16, #tpu.memory_space<vmem>>, vector<1x8x128xbf16>,
    %c0_21 = arith.constant 0 : index
    %c48 = arith.constant 48 : index
    %c0_22 = arith.constant 0 : index
    %42 = vector.load %arg2[%c0_21, %c48, %c0_22] : memref<1x128x256xbf16, #tpu.memory_space<vmem>>, vector<1x8x256xbf16>
    %43 = vector.shape_cast %42 : vector<1x8x256xbf16> to vector<8x256xbf16>
    %44 = vector.extract_strided_slice %43 {offsets = [0, 0], sizes = [8, 128], strides = [1, 1]} : vector<8x256xbf16> to vector<8x128xbf16>
    %45 = vector.extract_strided_slice %43 {offsets = [0, 128], sizes = [8, 128], strides = [1, 1]} : vector<8x256xbf16> to vector<8x128xbf16>
    %46 = arith.maximumf %44, %45 : vector<8x128xbf16>
    %c0_23 = arith.constant 0 : index
    %c56 = arith.constant 56 : index
    %c0_24 = arith.constant 0 : index
    %47 = vector.load %arg2[%c0_23, %c56, %c0_24] : memref<1x128x256xbf16, #tpu.memory_space<vmem>>, vector<1x8x256xbf16>
    %48 = vector.shape_cast %47 : vector<1x8x256xbf16> to vector<8x256xbf16>
    %49 = vector.extract_strided_slice %48 {offsets = [0, 0], sizes = [8, 128], strides = [1, 1]} : vector<8x256xbf16> to vector<8x128xbf16>
    %50 = arith.maximumf %46, %49 : vector<8x128xbf16>
    %51 = vector.extract_strided_slice %48 {offsets = [0, 128], sizes = [8, 128], strides = [1, 1]} : vector<8x256xbf16> to vector<8x128xbf16>
    %52 = arith.maximumf %50, %51 : vector<8x128xbf16>
    %c0_25 = arith.constant 0 : index
    %c24_26 = arith.constant 24 : index
    %c0_27 = arith.constant 0 : index
    %53 = vector.load %arg3[%c0_25, %c24_26, %c0_27] : memref<1x64x128xbf16, #tpu.memory_space<vmem>>, vector<1x8x128xbf16>
    %54 = vector.shape_cast %53 : vector<1x8x128xbf16> to vector<8x128xbf16>
    %55 = vector.shape_cast %52 : vector<8x128xbf16> to vector<1x8x128xbf16>
    tpu.vector_store %arg3[%c0_25, %c24_26, %c0_27], %55 {strides = array<i32>} : memref<1x64x128xbf16, #tpu.memory_space<vmem>>, vector<1x8x128xbf16>,
    %c0_28 = arith.constant 0 : index
    %c64 = arith.constant 64 : index
    %c0_29 = arith.constant 0 : index
    %56 = vector.load %arg2[%c0_28, %c64, %c0_29] : memref<1x128x256xbf16, #tpu.memory_space<vmem>>, vector<1x8x256xbf16>
    %57 = vector.shape_cast %56 : vector<1x8x256xbf16> to vector<8x256xbf16>
    %58 = vector.extract_strided_slice %57 {offsets = [0, 0], sizes = [8, 128], strides = [1, 1]} : vector<8x256xbf16> to vector<8x128xbf16>
    %59 = vector.extract_strided_slice %57 {offsets = [0, 128], sizes = [8, 128], strides = [1, 1]} : vector<8x256xbf16> to vector<8x128xbf16>
    %60 = arith.maximumf %58, %59 : vector<8x128xbf16>
    %c0_30 = arith.constant 0 : index
    %c72 = arith.constant 72 : index
    %c0_31 = arith.constant 0 : index
    %61 = vector.load %arg2[%c0_30, %c72, %c0_31] : memref<1x128x256xbf16, #tpu.memory_space<vmem>>, vector<1x8x256xbf16>
    %62 = vector.shape_cast %61 : vector<1x8x256xbf16> to vector<8x256xbf16>
    %63 = vector.extract_strided_slice %62 {offsets = [0, 0], sizes = [8, 128], strides = [1, 1]} : vector<8x256xbf16> to vector<8x128xbf16>
    %64 = arith.maximumf %60, %63 : vector<8x128xbf16>
    %65 = vector.extract_strided_slice %62 {offsets = [0, 128], sizes = [8, 128], strides = [1, 1]} : vector<8x256xbf16> to vector<8x128xbf16>
    %66 = arith.maximumf %64, %65 : vector<8x128xbf16>
    %c0_32 = arith.constant 0 : index
    %c32_33 = arith.constant 32 : index
    %c0_34 = arith.constant 0 : index
    %67 = vector.load %arg3[%c0_32, %c32_33, %c0_34] : memref<1x64x128xbf16, #tpu.memory_space<vmem>>, vector<1x8x128xbf16>
    %68 = vector.shape_cast %67 : vector<1x8x128xbf16> to vector<8x128xbf16>
    %69 = vector.shape_cast %66 : vector<8x128xbf16> to vector<1x8x128xbf16>
    tpu.vector_store %arg3[%c0_32, %c32_33, %c0_34], %69 {strides = array<i32>} : memref<1x64x128xbf16, #tpu.memory_space<vmem>>, vector<1x8x128xbf16>,
    %c0_35 = arith.constant 0 : index
    %c80 = arith.constant 80 : index
    %c0_36 = arith.constant 0 : index
    %70 = vector.load %arg2[%c0_35, %c80, %c0_36] : memref<1x128x256xbf16, #tpu.memory_space<vmem>>, vector<1x8x256xbf16>
    %71 = vector.shape_cast %70 : vector<1x8x256xbf16> to vector<8x256xbf16>
    %72 = vector.extract_strided_slice %71 {offsets = [0, 0], sizes = [8, 128], strides = [1, 1]} : vector<8x256xbf16> to vector<8x128xbf16>
    %73 = vector.extract_strided_slice %71 {offsets = [0, 128], sizes = [8, 128], strides = [1, 1]} : vector<8x256xbf16> to vector<8x128xbf16>
    %74 = arith.maximumf %72, %73 : vector<8x128xbf16>
    %c0_37 = arith.constant 0 : index
    %c88 = arith.constant 88 : index
    %c0_38 = arith.constant 0 : index
    %75 = vector.load %arg2[%c0_37, %c88, %c0_38] : memref<1x128x256xbf16, #tpu.memory_space<vmem>>, vector<1x8x256xbf16>
    %76 = vector.shape_cast %75 : vector<1x8x256xbf16> to vector<8x256xbf16>
    %77 = vector.extract_strided_slice %76 {offsets = [0, 0], sizes = [8, 128], strides = [1, 1]} : vector<8x256xbf16> to vector<8x128xbf16>
    %78 = arith.maximumf %74, %77 : vector<8x128xbf16>
    %79 = vector.extract_strided_slice %76 {offsets = [0, 128], sizes = [8, 128], strides = [1, 1]} : vector<8x256xbf16> to vector<8x128xbf16>
    %80 = arith.maximumf %78, %79 : vector<8x128xbf16>
    %c0_39 = arith.constant 0 : index
    %c40_40 = arith.constant 40 : index
    %c0_41 = arith.constant 0 : index
    %81 = vector.load %arg3[%c0_39, %c40_40, %c0_41] : memref<1x64x128xbf16, #tpu.memory_space<vmem>>, vector<1x8x128xbf16>
    %82 = vector.shape_cast %81 : vector<1x8x128xbf16> to vector<8x128xbf16>
    %83 = vector.shape_cast %80 : vector<8x128xbf16> to vector<1x8x128xbf16>
    tpu.vector_store %arg3[%c0_39, %c40_40, %c0_41], %83 {strides = array<i32>} : memref<1x64x128xbf16, #tpu.memory_space<vmem>>, vector<1x8x128xbf16>,
    %c0_42 = arith.constant 0 : index
    %c96 = arith.constant 96 : index
    %c0_43 = arith.constant 0 : index
    %84 = vector.load %arg2[%c0_42, %c96, %c0_43] : memref<1x128x256xbf16, #tpu.memory_space<vmem>>, vector<1x8x256xbf16>
    %85 = vector.shape_cast %84 : vector<1x8x256xbf16> to vector<8x256xbf16>
    %86 = vector.extract_strided_slice %85 {offsets = [0, 0], sizes = [8, 128], strides = [1, 1]} : vector<8x256xbf16> to vector<8x128xbf16>
    %87 = vector.extract_strided_slice %85 {offsets = [0, 128], sizes = [8, 128], strides = [1, 1]} : vector<8x256xbf16> to vector<8x128xbf16>
    %88 = arith.maximumf %86, %87 : vector<8x128xbf16>
    %c0_44 = arith.constant 0 : index
    %c104 = arith.constant 104 : index
    %c0_45 = arith.constant 0 : index
    %89 = vector.load %arg2[%c0_44, %c104, %c0_45] : memref<1x128x256xbf16, #tpu.memory_space<vmem>>, vector<1x8x256xbf16>
    %90 = vector.shape_cast %89 : vector<1x8x256xbf16> to vector<8x256xbf16>
    %91 = vector.extract_strided_slice %90 {offsets = [0, 0], sizes = [8, 128], strides = [1, 1]} : vector<8x256xbf16> to vector<8x128xbf16>
    %92 = arith.maximumf %88, %91 : vector<8x128xbf16>
    %93 = vector.extract_strided_slice %90 {offsets = [0, 128], sizes = [8, 128], strides = [1, 1]} : vector<8x256xbf16> to vector<8x128xbf16>
    %94 = arith.maximumf %92, %93 : vector<8x128xbf16>
    %c0_46 = arith.constant 0 : index
    %c48_47 = arith.constant 48 : index
    %c0_48 = arith.constant 0 : index
    %95 = vector.load %arg3[%c0_46, %c48_47, %c0_48] : memref<1x64x128xbf16, #tpu.memory_space<vmem>>, vector<1x8x128xbf16>
    %96 = vector.shape_cast %95 : vector<1x8x128xbf16> to vector<8x128xbf16>
    %97 = vector.shape_cast %94 : vector<8x128xbf16> to vector<1x8x128xbf16>
    tpu.vector_store %arg3[%c0_46, %c48_47, %c0_48], %97 {strides = array<i32>} : memref<1x64x128xbf16, #tpu.memory_space<vmem>>, vector<1x8x128xbf16>,
    %c0_49 = arith.constant 0 : index
    %c112 = arith.constant 112 : index
    %c0_50 = arith.constant 0 : index
    %98 = vector.load %arg2[%c0_49, %c112, %c0_50] : memref<1x128x256xbf16, #tpu.memory_space<vmem>>, vector<1x8x256xbf16>
    %99 = vector.shape_cast %98 : vector<1x8x256xbf16> to vector<8x256xbf16>
    %100 = vector.extract_strided_slice %99 {offsets = [0, 0], sizes = [8, 128], strides = [1, 1]} : vector<8x256xbf16> to vector<8x128xbf16>
    %101 = vector.extract_strided_slice %99 {offsets = [0, 128], sizes = [8, 128], strides = [1, 1]} : vector<8x256xbf16> to vector<8x128xbf16>
    %102 = arith.maximumf %100, %101 : vector<8x128xbf16>
    %c0_51 = arith.constant 0 : index
    %c120 = arith.constant 120 : index
    %c0_52 = arith.constant 0 : index
    %103 = vector.load %arg2[%c0_51, %c120, %c0_52] : memref<1x128x256xbf16, #tpu.memory_space<vmem>>, vector<1x8x256xbf16>
    %104 = vector.shape_cast %103 : vector<1x8x256xbf16> to vector<8x256xbf16>
    %105 = vector.extract_strided_slice %104 {offsets = [0, 0], sizes = [8, 128], strides = [1, 1]} : vector<8x256xbf16> to vector<8x128xbf16>
    %106 = arith.maximumf %102, %105 : vector<8x128xbf16>
    %107 = vector.extract_strided_slice %104 {offsets = [0, 128], sizes = [8, 128], strides = [1, 1]} : vector<8x256xbf16> to vector<8x128xbf16>
    %108 = arith.maximumf %106, %107 : vector<8x128xbf16>
    %c0_53 = arith.constant 0 : index
    %c56_54 = arith.constant 56 : index
    %c0_55 = arith.constant 0 : index
    %109 = vector.load %arg3[%c0_53, %c56_54, %c0_55] : memref<1x64x128xbf16, #tpu.memory_space<vmem>>, vector<1x8x128xbf16>
    %110 = vector.shape_cast %109 : vector<1x8x128xbf16> to vector<8x128xbf16>
    %111 = vector.shape_cast %108 : vector<8x128xbf16> to vector<1x8x128xbf16>
    tpu.vector_store %arg3[%c0_53, %c56_54, %c0_55], %111 {strides = array<i32>} : memref<1x64x128xbf16, #tpu.memory_space<vmem>>, vector<1x8x128xbf16>,
    return
  }
  func.func @transform_0(%arg0: i32, %arg1: i32) -> (i32, i32, i32) {
    %c0_i32 = arith.constant 0 : i32
    %c0_i32_0 = arith.constant 0 : i32
    return %arg0, %arg1, %c0_i32 : i32, i32, i32
  }
  func.func @transform_1(%arg0: i32, %arg1: i32) -> (i32, i32, i32) {
    %c0_i32 = arith.constant 0 : i32
    %c0_i32_0 = arith.constant 0 : i32
    return %arg0, %arg1, %c0_i32 : i32, i32, i32
  }
}

module attributes {stable_mosaic.version = 11 : i64} {
  func.func @_conv_bnstats_kernel(%arg0: i32, %arg1: i32, %arg2: memref<1x64x128xbf16, #tpu.memory_space<vmem>>, %arg3: memref<128x128xbf16, #tpu.memory_space<vmem>>, %arg4: memref<1x64x128xbf16, #tpu.memory_space<vmem>>, %arg5: memref<1x2x128xf32, #tpu.memory_space<vmem>>, %arg6: memref<64x128xf32, #tpu.memory_space<vmem>>) attributes {dimension_semantics = [#tpu.dimension_semantics<parallel>, #tpu.dimension_semantics<parallel>], iteration_bounds = array<i64: 1, 2>, scalar_prefetch = 0 : i64, scratch_operands = 1 : i64, tpu.core_type = #tpu.core_type<tc>, window_params = [{transform_indices = @transform_0, window_bounds = array<i64: 1, 64, 128>}, {transform_indices = @transform_1, window_bounds = array<i64: 128, 128>}, {transform_indices = @transform_2, window_bounds = array<i64: 1, 64, 128>}, {transform_indices = @transform_3, window_bounds = array<i64: 1, 2, 128>}]} {
    %c0 = arith.constant 0 : index
    %c0_0 = arith.constant 0 : index
    %c0_1 = arith.constant 0 : index
    %0 = vector.load %arg2[%c0, %c0_0, %c0_1] : memref<1x64x128xbf16, #tpu.memory_space<vmem>>, vector<1x64x128xbf16>
    %1 = vector.shape_cast %0 : vector<1x64x128xbf16> to vector<64x128xbf16>
    %c0_2 = arith.constant 0 : index
    %c0_3 = arith.constant 0 : index
    %2 = vector.load %arg3[%c0_2, %c0_3] : memref<128x128xbf16, #tpu.memory_space<vmem>>, vector<128x128xbf16>
    %cst = arith.constant dense<0.000000e+00> : vector<64x128xf32>
    %3 = tpu.matmul %1, %2, %cst {dimension_numbers = #tpu.dot_dimension_numbers<[1], [0], [0], [1], [0, 0, 1, 1], [], []>} : vector<64x128xbf16>, vector<128x128xbf16>, vector<64x128xf32> -> vector<64x128xf32>
    %c0_4 = arith.constant 0 : index
    %c0_5 = arith.constant 0 : index
    %4 = vector.load %arg6[%c0_4, %c0_5] : memref<64x128xf32, #tpu.memory_space<vmem>>, vector<64x128xf32>
    tpu.vector_store %arg6[%c0_4, %c0_5], %3 {strides = array<i32>} : memref<64x128xf32, #tpu.memory_space<vmem>>, vector<64x128xf32>,
    %c0_6 = arith.constant 0 : index
    %c0_7 = arith.constant 0 : index
    %5 = vector.load %arg6[%c0_6, %c0_7] : memref<64x128xf32, #tpu.memory_space<vmem>>, vector<64x128xf32>
    %6 = arith.truncf %5 : vector<64x128xf32> to vector<64x128xbf16>
    %c0_8 = arith.constant 0 : index
    %c0_9 = arith.constant 0 : index
    %c0_10 = arith.constant 0 : index
    %7 = vector.load %arg4[%c0_8, %c0_9, %c0_10] : memref<1x64x128xbf16, #tpu.memory_space<vmem>>, vector<1x64x128xbf16>
    %8 = vector.shape_cast %7 : vector<1x64x128xbf16> to vector<64x128xbf16>
    %9 = vector.shape_cast %6 : vector<64x128xbf16> to vector<1x64x128xbf16>
    tpu.vector_store %arg4[%c0_8, %c0_9, %c0_10], %9 {strides = array<i32>} : memref<1x64x128xbf16, #tpu.memory_space<vmem>>, vector<1x64x128xbf16>,
    %cst_11 = arith.constant dense<0.000000e+00> : vector<128xf32>
    %10 = vector.multi_reduction <add>, %5, %cst_11 [0] : vector<64x128xf32> to vector<128xf32>
    %11 = vector.shape_cast %10 : vector<128xf32> to vector<1x128xf32>
    %c0_12 = arith.constant 0 : index
    %c0_13 = arith.constant 0 : index
    %c0_14 = arith.constant 0 : index
    %12 = vector.load %arg5[%c0_12, %c0_13, %c0_14] : memref<1x2x128xf32, #tpu.memory_space<vmem>>, vector<1x1x128xf32>
    %13 = vector.shape_cast %12 : vector<1x1x128xf32> to vector<1x128xf32>
    %14 = vector.shape_cast %11 : vector<1x128xf32> to vector<1x1x128xf32>
    tpu.vector_store %arg5[%c0_12, %c0_13, %c0_14], %14 {strides = array<i32>} : memref<1x2x128xf32, #tpu.memory_space<vmem>>, vector<1x1x128xf32>,
    %15 = arith.mulf %5, %5 : vector<64x128xf32>
    %cst_15 = arith.constant dense<0.000000e+00> : vector<128xf32>
    %16 = vector.multi_reduction <add>, %15, %cst_15 [0] : vector<64x128xf32> to vector<128xf32>
    %17 = vector.shape_cast %16 : vector<128xf32> to vector<1x128xf32>
    %c0_16 = arith.constant 0 : index
    %c1 = arith.constant 1 : index
    %c0_17 = arith.constant 0 : index
    %18 = vector.load %arg5[%c0_16, %c1, %c0_17] : memref<1x2x128xf32, #tpu.memory_space<vmem>>, vector<1x1x128xf32>
    %19 = vector.shape_cast %18 : vector<1x1x128xf32> to vector<1x128xf32>
    %20 = vector.shape_cast %17 : vector<1x128xf32> to vector<1x1x128xf32>
    tpu.vector_store %arg5[%c0_16, %c1, %c0_17], %20 {strides = array<i32>} : memref<1x2x128xf32, #tpu.memory_space<vmem>>, vector<1x1x128xf32>,
    return
  }
  func.func @transform_0(%arg0: i32, %arg1: i32) -> (i32, i32, i32) {
    %c0_i32 = arith.constant 0 : i32
    %c0_i32_0 = arith.constant 0 : i32
    %c0_i32_1 = arith.constant 0 : i32
    return %arg1, %c0_i32, %c0_i32_0 : i32, i32, i32
  }
  func.func @transform_1(%arg0: i32, %arg1: i32) -> (i32, i32) {
    %c0_i32 = arith.constant 0 : i32
    %c0_i32_0 = arith.constant 0 : i32
    return %c0_i32, %arg0 : i32, i32
  }
  func.func @transform_2(%arg0: i32, %arg1: i32) -> (i32, i32, i32) {
    %c0_i32 = arith.constant 0 : i32
    %c0_i32_0 = arith.constant 0 : i32
    return %arg1, %c0_i32, %arg0 : i32, i32, i32
  }
  func.func @transform_3(%arg0: i32, %arg1: i32) -> (i32, i32, i32) {
    %c0_i32 = arith.constant 0 : i32
    %c0_i32_0 = arith.constant 0 : i32
    return %arg1, %c0_i32, %arg0 : i32, i32, i32
  }
}

module attributes {stable_mosaic.version = 11 : i64} {
  func.func @_bn_leaky_kernel(%arg0: i32, %arg1: i32, %arg2: i32, %arg3: memref<1x8x8x128xbf16, #tpu.memory_space<vmem>>, %arg4: memref<1x128xf32, #tpu.memory_space<vmem>>, %arg5: memref<1x128xf32, #tpu.memory_space<vmem>>, %arg6: memref<1x8x8x128xbf16, #tpu.memory_space<vmem>>) attributes {dimension_semantics = [#tpu.dimension_semantics<parallel>, #tpu.dimension_semantics<parallel>, #tpu.dimension_semantics<parallel>], iteration_bounds = array<i64: 2, 1, 1>, scalar_prefetch = 0 : i64, scratch_operands = 0 : i64, tpu.core_type = #tpu.core_type<tc>, window_params = [{transform_indices = @transform_0, window_bounds = array<i64: 1, 8, 8, 128>}, {transform_indices = @transform_1, window_bounds = array<i64: 1, 128>}, {transform_indices = @transform_2, window_bounds = array<i64: 1, 128>}, {transform_indices = @transform_3, window_bounds = array<i64: 1, 8, 8, 128>}]} {
    %c0 = arith.constant 0 : index
    %c0_0 = arith.constant 0 : index
    %c0_1 = arith.constant 0 : index
    %c0_2 = arith.constant 0 : index
    %0 = vector.load %arg3[%c0, %c0_0, %c0_1, %c0_2] : memref<1x8x8x128xbf16, #tpu.memory_space<vmem>>, vector<1x8x8x128xbf16>
    %1 = vector.shape_cast %0 : vector<1x8x8x128xbf16> to vector<8x8x128xbf16>
    %2 = arith.extf %1 : vector<8x8x128xbf16> to vector<8x8x128xf32>
    %c0_3 = arith.constant 0 : index
    %c0_4 = arith.constant 0 : index
    %3 = vector.load %arg4[%c0_3, %c0_4] : memref<1x128xf32, #tpu.memory_space<vmem>>, vector<1x128xf32>
    %4 = vector.shape_cast %3 : vector<1x128xf32> to vector<1x1x128xf32>
    %5 = vector.broadcast %4 : vector<1x1x128xf32> to vector<8x8x128xf32>
    %6 = arith.mulf %2, %5 : vector<8x8x128xf32>
    %c0_5 = arith.constant 0 : index
    %c0_6 = arith.constant 0 : index
    %7 = vector.load %arg5[%c0_5, %c0_6] : memref<1x128xf32, #tpu.memory_space<vmem>>, vector<1x128xf32>
    %8 = vector.shape_cast %7 : vector<1x128xf32> to vector<1x1x128xf32>
    %9 = vector.broadcast %8 : vector<1x1x128xf32> to vector<8x8x128xf32>
    %10 = arith.addf %6, %9 : vector<8x8x128xf32>
    %cst = arith.constant 0.000000e+00 : f32
    %11 = vector.broadcast %cst : f32 to vector<8x8x128xf32>
    %12 = arith.cmpf oge, %10, %11 : vector<8x8x128xf32>
    %cst_7 = arith.constant 1.000000e-01 : f32
    %13 = vector.broadcast %cst_7 : f32 to vector<8x8x128xf32>
    %14 = arith.mulf %13, %10 : vector<8x8x128xf32>
    %15 = arith.select %12, %10, %14 : vector<8x8x128xi1>, vector<8x8x128xf32>
    %16 = arith.truncf %15 : vector<8x8x128xf32> to vector<8x8x128xbf16>
    %c0_8 = arith.constant 0 : index
    %c0_9 = arith.constant 0 : index
    %c0_10 = arith.constant 0 : index
    %c0_11 = arith.constant 0 : index
    %17 = vector.load %arg6[%c0_8, %c0_9, %c0_10, %c0_11] : memref<1x8x8x128xbf16, #tpu.memory_space<vmem>>, vector<1x8x8x128xbf16>
    %18 = vector.shape_cast %17 : vector<1x8x8x128xbf16> to vector<8x8x128xbf16>
    %19 = vector.shape_cast %16 : vector<8x8x128xbf16> to vector<1x8x8x128xbf16>
    tpu.vector_store %arg6[%c0_8, %c0_9, %c0_10, %c0_11], %19 {strides = array<i32>} : memref<1x8x8x128xbf16, #tpu.memory_space<vmem>>, vector<1x8x8x128xbf16>,
    return
  }
  func.func @transform_0(%arg0: i32, %arg1: i32, %arg2: i32) -> (i32, i32, i32, i32) {
    %c0_i32 = arith.constant 0 : i32
    %c0_i32_0 = arith.constant 0 : i32
    return %arg0, %arg1, %c0_i32, %arg2 : i32, i32, i32, i32
  }
  func.func @transform_1(%arg0: i32, %arg1: i32, %arg2: i32) -> (i32, i32) {
    %c0_i32 = arith.constant 0 : i32
    %c0_i32_0 = arith.constant 0 : i32
    return %c0_i32, %arg2 : i32, i32
  }
  func.func @transform_2(%arg0: i32, %arg1: i32, %arg2: i32) -> (i32, i32) {
    %c0_i32 = arith.constant 0 : i32
    %c0_i32_0 = arith.constant 0 : i32
    return %c0_i32, %arg2 : i32, i32
  }
  func.func @transform_3(%arg0: i32, %arg1: i32, %arg2: i32) -> (i32, i32, i32, i32) {
    %c0_i32 = arith.constant 0 : i32
    %c0_i32_0 = arith.constant 0 : i32
    return %arg0, %arg1, %c0_i32, %arg2 : i32, i32, i32, i32
  }
}

module attributes {stable_mosaic.version = 11 : i64} {
  func.func @_conv_bnstats_kernel(%arg0: i32, %arg1: i32, %arg2: memref<1x110x128xbf16, #tpu.memory_space<vmem>>, %arg3: memref<1152x128xbf16, #tpu.memory_space<vmem>>, %arg4: memref<1x80x128xbf16, #tpu.memory_space<vmem>>, %arg5: memref<1x2x128xf32, #tpu.memory_space<vmem>>, %arg6: memref<80x128xf32, #tpu.memory_space<vmem>>) attributes {dimension_semantics = [#tpu.dimension_semantics<parallel>, #tpu.dimension_semantics<parallel>], iteration_bounds = array<i64: 1, 2>, scalar_prefetch = 0 : i64, scratch_operands = 1 : i64, tpu.core_type = #tpu.core_type<tc>, window_params = [{transform_indices = @transform_0, window_bounds = array<i64: 1, 110, 128>}, {transform_indices = @transform_1, window_bounds = array<i64: 1152, 128>}, {transform_indices = @transform_2, window_bounds = array<i64: 1, 80, 128>}, {transform_indices = @transform_3, window_bounds = array<i64: 1, 2, 128>}]} {
    %c0 = arith.constant 0 : index
    %c0_0 = arith.constant 0 : index
    %c0_1 = arith.constant 0 : index
    %0 = vector.load %arg2[%c0, %c0_0, %c0_1] : memref<1x110x128xbf16, #tpu.memory_space<vmem>>, vector<1x80x128xbf16>
    %1 = vector.shape_cast %0 : vector<1x80x128xbf16> to vector<80x128xbf16>
    %c0_2 = arith.constant 0 : index
    %c0_3 = arith.constant 0 : index
    %2 = vector.load %arg3[%c0_2, %c0_3] : memref<1152x128xbf16, #tpu.memory_space<vmem>>, vector<128x128xbf16>
    %cst = arith.constant dense<0.000000e+00> : vector<80x128xf32>
    %3 = tpu.matmul %1, %2, %cst {dimension_numbers = #tpu.dot_dimension_numbers<[1], [0], [0], [1], [0, 0, 1, 1], [], []>} : vector<80x128xbf16>, vector<128x128xbf16>, vector<80x128xf32> -> vector<80x128xf32>
    %c0_4 = arith.constant 0 : index
    %c0_5 = arith.constant 0 : index
    %4 = vector.load %arg6[%c0_4, %c0_5] : memref<80x128xf32, #tpu.memory_space<vmem>>, vector<80x128xf32>
    tpu.vector_store %arg6[%c0_4, %c0_5], %3 {strides = array<i32>} : memref<80x128xf32, #tpu.memory_space<vmem>>, vector<80x128xf32>,
    %c0_6 = arith.constant 0 : index
    %c1 = arith.constant 1 : index
    %c0_7 = arith.constant 0 : index
    %5 = vector.load %arg2[%c0_6, %c1, %c0_7] : memref<1x110x128xbf16, #tpu.memory_space<vmem>>, vector<1x80x128xbf16>
    %6 = vector.shape_cast %5 : vector<1x80x128xbf16> to vector<80x128xbf16>
    %c128 = arith.constant 128 : index
    %c0_8 = arith.constant 0 : index
    %7 = vector.load %arg3[%c128, %c0_8] : memref<1152x128xbf16, #tpu.memory_space<vmem>>, vector<128x128xbf16>
    %cst_9 = arith.constant dense<0.000000e+00> : vector<80x128xf32>
    %8 = tpu.matmul %6, %7, %cst_9 {dimension_numbers = #tpu.dot_dimension_numbers<[1], [0], [0], [1], [0, 0, 1, 1], [], []>} : vector<80x128xbf16>, vector<128x128xbf16>, vector<80x128xf32> -> vector<80x128xf32>
    %c0_10 = arith.constant 0 : index
    %c0_11 = arith.constant 0 : index
    %9 = vector.load %arg6[%c0_10, %c0_11] : memref<80x128xf32, #tpu.memory_space<vmem>>, vector<80x128xf32>
    %10 = arith.addf %9, %8 : vector<80x128xf32>
    %c0_12 = arith.constant 0 : index
    %c0_13 = arith.constant 0 : index
    %11 = vector.load %arg6[%c0_12, %c0_13] : memref<80x128xf32, #tpu.memory_space<vmem>>, vector<80x128xf32>
    tpu.vector_store %arg6[%c0_12, %c0_13], %10 {strides = array<i32>} : memref<80x128xf32, #tpu.memory_space<vmem>>, vector<80x128xf32>,
    %c0_14 = arith.constant 0 : index
    %c2 = arith.constant 2 : index
    %c0_15 = arith.constant 0 : index
    %12 = vector.load %arg2[%c0_14, %c2, %c0_15] : memref<1x110x128xbf16, #tpu.memory_space<vmem>>, vector<1x80x128xbf16>
    %13 = vector.shape_cast %12 : vector<1x80x128xbf16> to vector<80x128xbf16>
    %c256 = arith.constant 256 : index
    %c0_16 = arith.constant 0 : index
    %14 = vector.load %arg3[%c256, %c0_16] : memref<1152x128xbf16, #tpu.memory_space<vmem>>, vector<128x128xbf16>
    %cst_17 = arith.constant dense<0.000000e+00> : vector<80x128xf32>
    %15 = tpu.matmul %13, %14, %cst_17 {dimension_numbers = #tpu.dot_dimension_numbers<[1], [0], [0], [1], [0, 0, 1, 1], [], []>} : vector<80x128xbf16>, vector<128x128xbf16>, vector<80x128xf32> -> vector<80x128xf32>
    %c0_18 = arith.constant 0 : index
    %c0_19 = arith.constant 0 : index
    %16 = vector.load %arg6[%c0_18, %c0_19] : memref<80x128xf32, #tpu.memory_space<vmem>>, vector<80x128xf32>
    %17 = arith.addf %16, %15 : vector<80x128xf32>
    %c0_20 = arith.constant 0 : index
    %c0_21 = arith.constant 0 : index
    %18 = vector.load %arg6[%c0_20, %c0_21] : memref<80x128xf32, #tpu.memory_space<vmem>>, vector<80x128xf32>
    tpu.vector_store %arg6[%c0_20, %c0_21], %17 {strides = array<i32>} : memref<80x128xf32, #tpu.memory_space<vmem>>, vector<80x128xf32>,
    %c0_22 = arith.constant 0 : index
    %c10 = arith.constant 10 : index
    %c0_23 = arith.constant 0 : index
    %19 = vector.load %arg2[%c0_22, %c10, %c0_23] : memref<1x110x128xbf16, #tpu.memory_space<vmem>>, vector<1x80x128xbf16>
    %20 = vector.shape_cast %19 : vector<1x80x128xbf16> to vector<80x128xbf16>
    %c384 = arith.constant 384 : index
    %c0_24 = arith.constant 0 : index
    %21 = vector.load %arg3[%c384, %c0_24] : memref<1152x128xbf16, #tpu.memory_space<vmem>>, vector<128x128xbf16>
    %cst_25 = arith.constant dense<0.000000e+00> : vector<80x128xf32>
    %22 = tpu.matmul %20, %21, %cst_25 {dimension_numbers = #tpu.dot_dimension_numbers<[1], [0], [0], [1], [0, 0, 1, 1], [], []>} : vector<80x128xbf16>, vector<128x128xbf16>, vector<80x128xf32> -> vector<80x128xf32>
    %c0_26 = arith.constant 0 : index
    %c0_27 = arith.constant 0 : index
    %23 = vector.load %arg6[%c0_26, %c0_27] : memref<80x128xf32, #tpu.memory_space<vmem>>, vector<80x128xf32>
    %24 = arith.addf %23, %22 : vector<80x128xf32>
    %c0_28 = arith.constant 0 : index
    %c0_29 = arith.constant 0 : index
    %25 = vector.load %arg6[%c0_28, %c0_29] : memref<80x128xf32, #tpu.memory_space<vmem>>, vector<80x128xf32>
    tpu.vector_store %arg6[%c0_28, %c0_29], %24 {strides = array<i32>} : memref<80x128xf32, #tpu.memory_space<vmem>>, vector<80x128xf32>,
    %c0_30 = arith.constant 0 : index
    %c11 = arith.constant 11 : index
    %c0_31 = arith.constant 0 : index
    %26 = vector.load %arg2[%c0_30, %c11, %c0_31] : memref<1x110x128xbf16, #tpu.memory_space<vmem>>, vector<1x80x128xbf16>
    %27 = vector.shape_cast %26 : vector<1x80x128xbf16> to vector<80x128xbf16>
    %c512 = arith.constant 512 : index
    %c0_32 = arith.constant 0 : index
    %28 = vector.load %arg3[%c512, %c0_32] : memref<1152x128xbf16, #tpu.memory_space<vmem>>, vector<128x128xbf16>
    %cst_33 = arith.constant dense<0.000000e+00> : vector<80x128xf32>
    %29 = tpu.matmul %27, %28, %cst_33 {dimension_numbers = #tpu.dot_dimension_numbers<[1], [0], [0], [1], [0, 0, 1, 1], [], []>} : vector<80x128xbf16>, vector<128x128xbf16>, vector<80x128xf32> -> vector<80x128xf32>
    %c0_34 = arith.constant 0 : index
    %c0_35 = arith.constant 0 : index
    %30 = vector.load %arg6[%c0_34, %c0_35] : memref<80x128xf32, #tpu.memory_space<vmem>>, vector<80x128xf32>
    %31 = arith.addf %30, %29 : vector<80x128xf32>
    %c0_36 = arith.constant 0 : index
    %c0_37 = arith.constant 0 : index
    %32 = vector.load %arg6[%c0_36, %c0_37] : memref<80x128xf32, #tpu.memory_space<vmem>>, vector<80x128xf32>
    tpu.vector_store %arg6[%c0_36, %c0_37], %31 {strides = array<i32>} : memref<80x128xf32, #tpu.memory_space<vmem>>, vector<80x128xf32>,
    %c0_38 = arith.constant 0 : index
    %c12 = arith.constant 12 : index
    %c0_39 = arith.constant 0 : index
    %33 = vector.load %arg2[%c0_38, %c12, %c0_39] : memref<1x110x128xbf16, #tpu.memory_space<vmem>>, vector<1x80x128xbf16>
    %34 = vector.shape_cast %33 : vector<1x80x128xbf16> to vector<80x128xbf16>
    %c640 = arith.constant 640 : index
    %c0_40 = arith.constant 0 : index
    %35 = vector.load %arg3[%c640, %c0_40] : memref<1152x128xbf16, #tpu.memory_space<vmem>>, vector<128x128xbf16>
    %cst_41 = arith.constant dense<0.000000e+00> : vector<80x128xf32>
    %36 = tpu.matmul %34, %35, %cst_41 {dimension_numbers = #tpu.dot_dimension_numbers<[1], [0], [0], [1], [0, 0, 1, 1], [], []>} : vector<80x128xbf16>, vector<128x128xbf16>, vector<80x128xf32> -> vector<80x128xf32>
    %c0_42 = arith.constant 0 : index
    %c0_43 = arith.constant 0 : index
    %37 = vector.load %arg6[%c0_42, %c0_43] : memref<80x128xf32, #tpu.memory_space<vmem>>, vector<80x128xf32>
    %38 = arith.addf %37, %36 : vector<80x128xf32>
    %c0_44 = arith.constant 0 : index
    %c0_45 = arith.constant 0 : index
    %39 = vector.load %arg6[%c0_44, %c0_45] : memref<80x128xf32, #tpu.memory_space<vmem>>, vector<80x128xf32>
    tpu.vector_store %arg6[%c0_44, %c0_45], %38 {strides = array<i32>} : memref<80x128xf32, #tpu.memory_space<vmem>>, vector<80x128xf32>,
    %c0_46 = arith.constant 0 : index
    %c20 = arith.constant 20 : index
    %c0_47 = arith.constant 0 : index
    %40 = vector.load %arg2[%c0_46, %c20, %c0_47] : memref<1x110x128xbf16, #tpu.memory_space<vmem>>, vector<1x80x128xbf16>
    %41 = vector.shape_cast %40 : vector<1x80x128xbf16> to vector<80x128xbf16>
    %c768 = arith.constant 768 : index
    %c0_48 = arith.constant 0 : index
    %42 = vector.load %arg3[%c768, %c0_48] : memref<1152x128xbf16, #tpu.memory_space<vmem>>, vector<128x128xbf16>
    %cst_49 = arith.constant dense<0.000000e+00> : vector<80x128xf32>
    %43 = tpu.matmul %41, %42, %cst_49 {dimension_numbers = #tpu.dot_dimension_numbers<[1], [0], [0], [1], [0, 0, 1, 1], [], []>} : vector<80x128xbf16>, vector<128x128xbf16>, vector<80x128xf32> -> vector<80x128xf32>
    %c0_50 = arith.constant 0 : index
    %c0_51 = arith.constant 0 : index
    %44 = vector.load %arg6[%c0_50, %c0_51] : memref<80x128xf32, #tpu.memory_space<vmem>>, vector<80x128xf32>
    %45 = arith.addf %44, %43 : vector<80x128xf32>
    %c0_52 = arith.constant 0 : index
    %c0_53 = arith.constant 0 : index
    %46 = vector.load %arg6[%c0_52, %c0_53] : memref<80x128xf32, #tpu.memory_space<vmem>>, vector<80x128xf32>
    tpu.vector_store %arg6[%c0_52, %c0_53], %45 {strides = array<i32>} : memref<80x128xf32, #tpu.memory_space<vmem>>, vector<80x128xf32>,
    %c0_54 = arith.constant 0 : index
    %c21 = arith.constant 21 : index
    %c0_55 = arith.constant 0 : index
    %47 = vector.load %arg2[%c0_54, %c21, %c0_55] : memref<1x110x128xbf16, #tpu.memory_space<vmem>>, vector<1x80x128xbf16>
    %48 = vector.shape_cast %47 : vector<1x80x128xbf16> to vector<80x128xbf16>
    %c896 = arith.constant 896 : index
    %c0_56 = arith.constant 0 : index
    %49 = vector.load %arg3[%c896, %c0_56] : memref<1152x128xbf16, #tpu.memory_space<vmem>>, vector<128x128xbf16>
    %cst_57 = arith.constant dense<0.000000e+00> : vector<80x128xf32>
    %50 = tpu.matmul %48, %49, %cst_57 {dimension_numbers = #tpu.dot_dimension_numbers<[1], [0], [0], [1], [0, 0, 1, 1], [], []>} : vector<80x128xbf16>, vector<128x128xbf16>, vector<80x128xf32> -> vector<80x128xf32>
    %c0_58 = arith.constant 0 : index
    %c0_59 = arith.constant 0 : index
    %51 = vector.load %arg6[%c0_58, %c0_59] : memref<80x128xf32, #tpu.memory_space<vmem>>, vector<80x128xf32>
    %52 = arith.addf %51, %50 : vector<80x128xf32>
    %c0_60 = arith.constant 0 : index
    %c0_61 = arith.constant 0 : index
    %53 = vector.load %arg6[%c0_60, %c0_61] : memref<80x128xf32, #tpu.memory_space<vmem>>, vector<80x128xf32>
    tpu.vector_store %arg6[%c0_60, %c0_61], %52 {strides = array<i32>} : memref<80x128xf32, #tpu.memory_space<vmem>>, vector<80x128xf32>,
    %c0_62 = arith.constant 0 : index
    %c22 = arith.constant 22 : index
    %c0_63 = arith.constant 0 : index
    %54 = vector.load %arg2[%c0_62, %c22, %c0_63] : memref<1x110x128xbf16, #tpu.memory_space<vmem>>, vector<1x80x128xbf16>
    %55 = vector.shape_cast %54 : vector<1x80x128xbf16> to vector<80x128xbf16>
    %c1024 = arith.constant 1024 : index
    %c0_64 = arith.constant 0 : index
    %56 = vector.load %arg3[%c1024, %c0_64] : memref<1152x128xbf16, #tpu.memory_space<vmem>>, vector<128x128xbf16>
    %cst_65 = arith.constant dense<0.000000e+00> : vector<80x128xf32>
    %57 = tpu.matmul %55, %56, %cst_65 {dimension_numbers = #tpu.dot_dimension_numbers<[1], [0], [0], [1], [0, 0, 1, 1], [], []>} : vector<80x128xbf16>, vector<128x128xbf16>, vector<80x128xf32> -> vector<80x128xf32>
    %c0_66 = arith.constant 0 : index
    %c0_67 = arith.constant 0 : index
    %58 = vector.load %arg6[%c0_66, %c0_67] : memref<80x128xf32, #tpu.memory_space<vmem>>, vector<80x128xf32>
    %59 = arith.addf %58, %57 : vector<80x128xf32>
    %c0_68 = arith.constant 0 : index
    %c0_69 = arith.constant 0 : index
    %60 = vector.load %arg6[%c0_68, %c0_69] : memref<80x128xf32, #tpu.memory_space<vmem>>, vector<80x128xf32>
    tpu.vector_store %arg6[%c0_68, %c0_69], %59 {strides = array<i32>} : memref<80x128xf32, #tpu.memory_space<vmem>>, vector<80x128xf32>,
    %c0_70 = arith.constant 0 : index
    %c0_71 = arith.constant 0 : index
    %61 = vector.load %arg6[%c0_70, %c0_71] : memref<80x128xf32, #tpu.memory_space<vmem>>, vector<80x128xf32>
    %62 = arith.truncf %61 : vector<80x128xf32> to vector<80x128xbf16>
    %c0_72 = arith.constant 0 : index
    %c0_73 = arith.constant 0 : index
    %c0_74 = arith.constant 0 : index
    %63 = vector.load %arg4[%c0_72, %c0_73, %c0_74] : memref<1x80x128xbf16, #tpu.memory_space<vmem>>, vector<1x80x128xbf16>
    %64 = vector.shape_cast %63 : vector<1x80x128xbf16> to vector<80x128xbf16>
    %65 = vector.shape_cast %62 : vector<80x128xbf16> to vector<1x80x128xbf16>
    tpu.vector_store %arg4[%c0_72, %c0_73, %c0_74], %65 {strides = array<i32>} : memref<1x80x128xbf16, #tpu.memory_space<vmem>>, vector<1x80x128xbf16>,
    %66 = tpu.iota {dimensions = array<i32: 0>} : vector<80x1xi32>
    %c10_i32 = arith.constant 10 : i32
    %c0_i32 = arith.constant 0 : i32
    %67 = arith.cmpi eq, %c10_i32, %c0_i32 : i32
    %c1_i32 = arith.constant 1 : i32
    %68 = arith.select %67, %c1_i32, %c10_i32 : i32
    %69 = vector.broadcast %68 : i32 to vector<80x1xi32>
    %70 = arith.remsi %66, %69 : vector<80x1xi32>
    %c0_i32_75 = arith.constant 0 : i32
    %71 = vector.broadcast %c0_i32_75 : i32 to vector<80x1xi32>
    %72 = arith.cmpi ne, %70, %71 : vector<80x1xi32>
    %c0_i32_76 = arith.constant 0 : i32
    %73 = vector.broadcast %c0_i32_76 : i32 to vector<80x1xi32>
    %74 = arith.cmpi slt, %70, %73 : vector<80x1xi32>
    %c0_i32_77 = arith.constant 0 : i32
    %75 = arith.cmpi slt, %68, %c0_i32_77 : i32
    %76 = vector.broadcast %75 : i1 to vector<80x1xi1>
    %77 = vector.broadcast %76 : vector<80x1xi1> to vector<80x1xi1>
    %78 = arith.xori %74, %77 : vector<80x1xi1>
    %79 = arith.andi %78, %72 : vector<80x1xi1>
    %80 = vector.broadcast %68 : i32 to vector<80x1xi32>
    %81 = arith.addi %70, %80 : vector<80x1xi32>
    %82 = arith.select %79, %81, %70 : vector<80x1xi1>, vector<80x1xi32>
    %c8_i32 = arith.constant 8 : i32
    %83 = vector.broadcast %c8_i32 : i32 to vector<80x1xi32>
    %84 = arith.cmpi slt, %82, %83 : vector<80x1xi32>
    %cst_78 = arith.constant 0.000000e+00 : f32
    %85 = vector.shape_cast %84 : vector<80x1xi1> to vector<80x1xi1>
    %86 = vector.broadcast %85 : vector<80x1xi1> to vector<80x128xi1>
    %87 = vector.broadcast %cst_78 : f32 to vector<80x128xf32>
    %88 = arith.select %86, %61, %87 : vector<80x128xi1>, vector<80x128xf32>
    %cst_79 = arith.constant dense<0.000000e+00> : vector<128xf32>
    %89 = vector.multi_reduction <add>, %88, %cst_79 [0] : vector<80x128xf32> to vector<128xf32>
    %90 = vector.shape_cast %89 : vector<128xf32> to vector<1x128xf32>
    %c0_80 = arith.constant 0 : index
    %c0_81 = arith.constant 0 : index
    %c0_82 = arith.constant 0 : index
    %91 = vector.load %arg5[%c0_80, %c0_81, %c0_82] : memref<1x2x128xf32, #tpu.memory_space<vmem>>, vector<1x1x128xf32>
    %92 = vector.shape_cast %91 : vector<1x1x128xf32> to vector<1x128xf32>
    %93 = vector.shape_cast %90 : vector<1x128xf32> to vector<1x1x128xf32>
    tpu.vector_store %arg5[%c0_80, %c0_81, %c0_82], %93 {strides = array<i32>} : memref<1x2x128xf32, #tpu.memory_space<vmem>>, vector<1x1x128xf32>,
    %94 = arith.mulf %88, %88 : vector<80x128xf32>
    %cst_83 = arith.constant dense<0.000000e+00> : vector<128xf32>
    %95 = vector.multi_reduction <add>, %94, %cst_83 [0] : vector<80x128xf32> to vector<128xf32>
    %96 = vector.shape_cast %95 : vector<128xf32> to vector<1x128xf32>
    %c0_84 = arith.constant 0 : index
    %c1_85 = arith.constant 1 : index
    %c0_86 = arith.constant 0 : index
    %97 = vector.load %arg5[%c0_84, %c1_85, %c0_86] : memref<1x2x128xf32, #tpu.memory_space<vmem>>, vector<1x1x128xf32>
    %98 = vector.shape_cast %97 : vector<1x1x128xf32> to vector<1x128xf32>
    %99 = vector.shape_cast %96 : vector<1x128xf32> to vector<1x1x128xf32>
    tpu.vector_store %arg5[%c0_84, %c1_85, %c0_86], %99 {strides = array<i32>} : memref<1x2x128xf32, #tpu.memory_space<vmem>>, vector<1x1x128xf32>,
    return
  }
  func.func @transform_0(%arg0: i32, %arg1: i32) -> (i32, i32, i32) {
    %c0_i32 = arith.constant 0 : i32
    %c0_i32_0 = arith.constant 0 : i32
    %c0_i32_1 = arith.constant 0 : i32
    return %arg1, %c0_i32, %c0_i32_0 : i32, i32, i32
  }
  func.func @transform_1(%arg0: i32, %arg1: i32) -> (i32, i32) {
    %c0_i32 = arith.constant 0 : i32
    %c0_i32_0 = arith.constant 0 : i32
    return %c0_i32, %arg0 : i32, i32
  }
  func.func @transform_2(%arg0: i32, %arg1: i32) -> (i32, i32, i32) {
    %c0_i32 = arith.constant 0 : i32
    %c0_i32_0 = arith.constant 0 : i32
    return %arg1, %c0_i32, %arg0 : i32, i32, i32
  }
  func.func @transform_3(%arg0: i32, %arg1: i32) -> (i32, i32, i32) {
    %c0_i32 = arith.constant 0 : i32
    %c0_i32_0 = arith.constant 0 : i32
    return %arg1, %c0_i32, %arg0 : i32, i32, i32
  }
}

module attributes {stable_mosaic.version = 11 : i64} {
  func.func @_maxpool_kernel(%arg0: i32, %arg1: i32, %arg2: memref<1x32x256xbf16, #tpu.memory_space<vmem>>, %arg3: memref<1x16x128xbf16, #tpu.memory_space<vmem>>) attributes {dimension_semantics = [#tpu.dimension_semantics<parallel>, #tpu.dimension_semantics<parallel>], iteration_bounds = array<i64: 2, 1>, scalar_prefetch = 0 : i64, scratch_operands = 0 : i64, tpu.core_type = #tpu.core_type<tc>, window_params = [{transform_indices = @transform_0, window_bounds = array<i64: 1, 32, 256>}, {transform_indices = @transform_1, window_bounds = array<i64: 1, 16, 128>}]} {
    %c0 = arith.constant 0 : index
    %c0_0 = arith.constant 0 : index
    %c0_1 = arith.constant 0 : index
    %0 = vector.load %arg2[%c0, %c0_0, %c0_1] : memref<1x32x256xbf16, #tpu.memory_space<vmem>>, vector<1x4x256xbf16>
    %1 = vector.shape_cast %0 : vector<1x4x256xbf16> to vector<4x256xbf16>
    %2 = vector.extract_strided_slice %1 {offsets = [0, 0], sizes = [4, 128], strides = [1, 1]} : vector<4x256xbf16> to vector<4x128xbf16>
    %3 = vector.extract_strided_slice %1 {offsets = [0, 128], sizes = [4, 128], strides = [1, 1]} : vector<4x256xbf16> to vector<4x128xbf16>
    %4 = arith.maximumf %2, %3 : vector<4x128xbf16>
    %c0_2 = arith.constant 0 : index
    %c4 = arith.constant 4 : index
    %c0_3 = arith.constant 0 : index
    %5 = vector.load %arg2[%c0_2, %c4, %c0_3] : memref<1x32x256xbf16, #tpu.memory_space<vmem>>, vector<1x4x256xbf16>
    %6 = vector.shape_cast %5 : vector<1x4x256xbf16> to vector<4x256xbf16>
    %7 = vector.extract_strided_slice %6 {offsets = [0, 0], sizes = [4, 128], strides = [1, 1]} : vector<4x256xbf16> to vector<4x128xbf16>
    %8 = arith.maximumf %4, %7 : vector<4x128xbf16>
    %9 = vector.extract_strided_slice %6 {offsets = [0, 128], sizes = [4, 128], strides = [1, 1]} : vector<4x256xbf16> to vector<4x128xbf16>
    %10 = arith.maximumf %8, %9 : vector<4x128xbf16>
    %c0_4 = arith.constant 0 : index
    %c0_5 = arith.constant 0 : index
    %c0_6 = arith.constant 0 : index
    %11 = vector.load %arg3[%c0_4, %c0_5, %c0_6] : memref<1x16x128xbf16, #tpu.memory_space<vmem>>, vector<1x4x128xbf16>
    %12 = vector.shape_cast %11 : vector<1x4x128xbf16> to vector<4x128xbf16>
    %13 = vector.shape_cast %10 : vector<4x128xbf16> to vector<1x4x128xbf16>
    tpu.vector_store %arg3[%c0_4, %c0_5, %c0_6], %13 {strides = array<i32>} : memref<1x16x128xbf16, #tpu.memory_space<vmem>>, vector<1x4x128xbf16>,
    %c0_7 = arith.constant 0 : index
    %c8 = arith.constant 8 : index
    %c0_8 = arith.constant 0 : index
    %14 = vector.load %arg2[%c0_7, %c8, %c0_8] : memref<1x32x256xbf16, #tpu.memory_space<vmem>>, vector<1x4x256xbf16>
    %15 = vector.shape_cast %14 : vector<1x4x256xbf16> to vector<4x256xbf16>
    %16 = vector.extract_strided_slice %15 {offsets = [0, 0], sizes = [4, 128], strides = [1, 1]} : vector<4x256xbf16> to vector<4x128xbf16>
    %17 = vector.extract_strided_slice %15 {offsets = [0, 128], sizes = [4, 128], strides = [1, 1]} : vector<4x256xbf16> to vector<4x128xbf16>
    %18 = arith.maximumf %16, %17 : vector<4x128xbf16>
    %c0_9 = arith.constant 0 : index
    %c12 = arith.constant 12 : index
    %c0_10 = arith.constant 0 : index
    %19 = vector.load %arg2[%c0_9, %c12, %c0_10] : memref<1x32x256xbf16, #tpu.memory_space<vmem>>, vector<1x4x256xbf16>
    %20 = vector.shape_cast %19 : vector<1x4x256xbf16> to vector<4x256xbf16>
    %21 = vector.extract_strided_slice %20 {offsets = [0, 0], sizes = [4, 128], strides = [1, 1]} : vector<4x256xbf16> to vector<4x128xbf16>
    %22 = arith.maximumf %18, %21 : vector<4x128xbf16>
    %23 = vector.extract_strided_slice %20 {offsets = [0, 128], sizes = [4, 128], strides = [1, 1]} : vector<4x256xbf16> to vector<4x128xbf16>
    %24 = arith.maximumf %22, %23 : vector<4x128xbf16>
    %c0_11 = arith.constant 0 : index
    %c4_12 = arith.constant 4 : index
    %c0_13 = arith.constant 0 : index
    %25 = vector.load %arg3[%c0_11, %c4_12, %c0_13] : memref<1x16x128xbf16, #tpu.memory_space<vmem>>, vector<1x4x128xbf16>
    %26 = vector.shape_cast %25 : vector<1x4x128xbf16> to vector<4x128xbf16>
    %27 = vector.shape_cast %24 : vector<4x128xbf16> to vector<1x4x128xbf16>
    tpu.vector_store %arg3[%c0_11, %c4_12, %c0_13], %27 {strides = array<i32>} : memref<1x16x128xbf16, #tpu.memory_space<vmem>>, vector<1x4x128xbf16>,
    %c0_14 = arith.constant 0 : index
    %c16 = arith.constant 16 : index
    %c0_15 = arith.constant 0 : index
    %28 = vector.load %arg2[%c0_14, %c16, %c0_15] : memref<1x32x256xbf16, #tpu.memory_space<vmem>>, vector<1x4x256xbf16>
    %29 = vector.shape_cast %28 : vector<1x4x256xbf16> to vector<4x256xbf16>
    %30 = vector.extract_strided_slice %29 {offsets = [0, 0], sizes = [4, 128], strides = [1, 1]} : vector<4x256xbf16> to vector<4x128xbf16>
    %31 = vector.extract_strided_slice %29 {offsets = [0, 128], sizes = [4, 128], strides = [1, 1]} : vector<4x256xbf16> to vector<4x128xbf16>
    %32 = arith.maximumf %30, %31 : vector<4x128xbf16>
    %c0_16 = arith.constant 0 : index
    %c20 = arith.constant 20 : index
    %c0_17 = arith.constant 0 : index
    %33 = vector.load %arg2[%c0_16, %c20, %c0_17] : memref<1x32x256xbf16, #tpu.memory_space<vmem>>, vector<1x4x256xbf16>
    %34 = vector.shape_cast %33 : vector<1x4x256xbf16> to vector<4x256xbf16>
    %35 = vector.extract_strided_slice %34 {offsets = [0, 0], sizes = [4, 128], strides = [1, 1]} : vector<4x256xbf16> to vector<4x128xbf16>
    %36 = arith.maximumf %32, %35 : vector<4x128xbf16>
    %37 = vector.extract_strided_slice %34 {offsets = [0, 128], sizes = [4, 128], strides = [1, 1]} : vector<4x256xbf16> to vector<4x128xbf16>
    %38 = arith.maximumf %36, %37 : vector<4x128xbf16>
    %c0_18 = arith.constant 0 : index
    %c8_19 = arith.constant 8 : index
    %c0_20 = arith.constant 0 : index
    %39 = vector.load %arg3[%c0_18, %c8_19, %c0_20] : memref<1x16x128xbf16, #tpu.memory_space<vmem>>, vector<1x4x128xbf16>
    %40 = vector.shape_cast %39 : vector<1x4x128xbf16> to vector<4x128xbf16>
    %41 = vector.shape_cast %38 : vector<4x128xbf16> to vector<1x4x128xbf16>
    tpu.vector_store %arg3[%c0_18, %c8_19, %c0_20], %41 {strides = array<i32>} : memref<1x16x128xbf16, #tpu.memory_space<vmem>>, vector<1x4x128xbf16>,
    %c0_21 = arith.constant 0 : index
    %c24 = arith.constant 24 : index
    %c0_22 = arith.constant 0 : index
    %42 = vector.load %arg2[%c0_21, %c24, %c0_22] : memref<1x32x256xbf16, #tpu.memory_space<vmem>>, vector<1x4x256xbf16>
    %43 = vector.shape_cast %42 : vector<1x4x256xbf16> to vector<4x256xbf16>
    %44 = vector.extract_strided_slice %43 {offsets = [0, 0], sizes = [4, 128], strides = [1, 1]} : vector<4x256xbf16> to vector<4x128xbf16>
    %45 = vector.extract_strided_slice %43 {offsets = [0, 128], sizes = [4, 128], strides = [1, 1]} : vector<4x256xbf16> to vector<4x128xbf16>
    %46 = arith.maximumf %44, %45 : vector<4x128xbf16>
    %c0_23 = arith.constant 0 : index
    %c28 = arith.constant 28 : index
    %c0_24 = arith.constant 0 : index
    %47 = vector.load %arg2[%c0_23, %c28, %c0_24] : memref<1x32x256xbf16, #tpu.memory_space<vmem>>, vector<1x4x256xbf16>
    %48 = vector.shape_cast %47 : vector<1x4x256xbf16> to vector<4x256xbf16>
    %49 = vector.extract_strided_slice %48 {offsets = [0, 0], sizes = [4, 128], strides = [1, 1]} : vector<4x256xbf16> to vector<4x128xbf16>
    %50 = arith.maximumf %46, %49 : vector<4x128xbf16>
    %51 = vector.extract_strided_slice %48 {offsets = [0, 128], sizes = [4, 128], strides = [1, 1]} : vector<4x256xbf16> to vector<4x128xbf16>
    %52 = arith.maximumf %50, %51 : vector<4x128xbf16>
    %c0_25 = arith.constant 0 : index
    %c12_26 = arith.constant 12 : index
    %c0_27 = arith.constant 0 : index
    %53 = vector.load %arg3[%c0_25, %c12_26, %c0_27] : memref<1x16x128xbf16, #tpu.memory_space<vmem>>, vector<1x4x128xbf16>
    %54 = vector.shape_cast %53 : vector<1x4x128xbf16> to vector<4x128xbf16>
    %55 = vector.shape_cast %52 : vector<4x128xbf16> to vector<1x4x128xbf16>
    tpu.vector_store %arg3[%c0_25, %c12_26, %c0_27], %55 {strides = array<i32>} : memref<1x16x128xbf16, #tpu.memory_space<vmem>>, vector<1x4x128xbf16>,
    return
  }
  func.func @transform_0(%arg0: i32, %arg1: i32) -> (i32, i32, i32) {
    %c0_i32 = arith.constant 0 : i32
    %c0_i32_0 = arith.constant 0 : i32
    return %arg0, %arg1, %c0_i32 : i32, i32, i32
  }
  func.func @transform_1(%arg0: i32, %arg1: i32) -> (i32, i32, i32) {
    %c0_i32 = arith.constant 0 : i32
    %c0_i32_0 = arith.constant 0 : i32
    return %arg0, %arg1, %c0_i32 : i32, i32, i32
  }
}

module attributes {stable_mosaic.version = 11 : i64} {
  func.func @_bn_leaky_kernel(%arg0: i32, %arg1: i32, %arg2: i32, %arg3: memref<1x8x10x128xbf16, #tpu.memory_space<vmem>>, %arg4: memref<1x128xf32, #tpu.memory_space<vmem>>, %arg5: memref<1x128xf32, #tpu.memory_space<vmem>>, %arg6: memref<1x8x8x128xbf16, #tpu.memory_space<vmem>>) attributes {dimension_semantics = [#tpu.dimension_semantics<parallel>, #tpu.dimension_semantics<parallel>, #tpu.dimension_semantics<parallel>], iteration_bounds = array<i64: 2, 1, 1>, scalar_prefetch = 0 : i64, scratch_operands = 0 : i64, tpu.core_type = #tpu.core_type<tc>, window_params = [{transform_indices = @transform_0, window_bounds = array<i64: 1, 8, 10, 128>}, {transform_indices = @transform_1, window_bounds = array<i64: 1, 128>}, {transform_indices = @transform_2, window_bounds = array<i64: 1, 128>}, {transform_indices = @transform_3, window_bounds = array<i64: 1, 8, 8, 128>}]} {
    %c0 = arith.constant 0 : index
    %c0_0 = arith.constant 0 : index
    %c0_1 = arith.constant 0 : index
    %c0_2 = arith.constant 0 : index
    %0 = vector.load %arg3[%c0, %c0_0, %c0_1, %c0_2] : memref<1x8x10x128xbf16, #tpu.memory_space<vmem>>, vector<1x8x8x128xbf16>
    %1 = vector.shape_cast %0 : vector<1x8x8x128xbf16> to vector<8x8x128xbf16>
    %2 = arith.extf %1 : vector<8x8x128xbf16> to vector<8x8x128xf32>
    %c0_3 = arith.constant 0 : index
    %c0_4 = arith.constant 0 : index
    %3 = vector.load %arg4[%c0_3, %c0_4] : memref<1x128xf32, #tpu.memory_space<vmem>>, vector<1x128xf32>
    %4 = vector.shape_cast %3 : vector<1x128xf32> to vector<1x1x128xf32>
    %5 = vector.broadcast %4 : vector<1x1x128xf32> to vector<8x8x128xf32>
    %6 = arith.mulf %2, %5 : vector<8x8x128xf32>
    %c0_5 = arith.constant 0 : index
    %c0_6 = arith.constant 0 : index
    %7 = vector.load %arg5[%c0_5, %c0_6] : memref<1x128xf32, #tpu.memory_space<vmem>>, vector<1x128xf32>
    %8 = vector.shape_cast %7 : vector<1x128xf32> to vector<1x1x128xf32>
    %9 = vector.broadcast %8 : vector<1x1x128xf32> to vector<8x8x128xf32>
    %10 = arith.addf %6, %9 : vector<8x8x128xf32>
    %cst = arith.constant 0.000000e+00 : f32
    %11 = vector.broadcast %cst : f32 to vector<8x8x128xf32>
    %12 = arith.cmpf oge, %10, %11 : vector<8x8x128xf32>
    %cst_7 = arith.constant 1.000000e-01 : f32
    %13 = vector.broadcast %cst_7 : f32 to vector<8x8x128xf32>
    %14 = arith.mulf %13, %10 : vector<8x8x128xf32>
    %15 = arith.select %12, %10, %14 : vector<8x8x128xi1>, vector<8x8x128xf32>
    %16 = arith.truncf %15 : vector<8x8x128xf32> to vector<8x8x128xbf16>
    %c0_8 = arith.constant 0 : index
    %c0_9 = arith.constant 0 : index
    %c0_10 = arith.constant 0 : index
    %c0_11 = arith.constant 0 : index
    %17 = vector.load %arg6[%c0_8, %c0_9, %c0_10, %c0_11] : memref<1x8x8x128xbf16, #tpu.memory_space<vmem>>, vector<1x8x8x128xbf16>
    %18 = vector.shape_cast %17 : vector<1x8x8x128xbf16> to vector<8x8x128xbf16>
    %19 = vector.shape_cast %16 : vector<8x8x128xbf16> to vector<1x8x8x128xbf16>
    tpu.vector_store %arg6[%c0_8, %c0_9, %c0_10, %c0_11], %19 {strides = array<i32>} : memref<1x8x8x128xbf16, #tpu.memory_space<vmem>>, vector<1x8x8x128xbf16>,
    return
  }
  func.func @transform_0(%arg0: i32, %arg1: i32, %arg2: i32) -> (i32, i32, i32, i32) {
    %c0_i32 = arith.constant 0 : i32
    %c0_i32_0 = arith.constant 0 : i32
    return %arg0, %arg1, %c0_i32, %arg2 : i32, i32, i32, i32
  }
  func.func @transform_1(%arg0: i32, %arg1: i32, %arg2: i32) -> (i32, i32) {
    %c0_i32 = arith.constant 0 : i32
    %c0_i32_0 = arith.constant 0 : i32
    return %c0_i32, %arg2 : i32, i32
  }
  func.func @transform_2(%arg0: i32, %arg1: i32, %arg2: i32) -> (i32, i32) {
    %c0_i32 = arith.constant 0 : i32
    %c0_i32_0 = arith.constant 0 : i32
    return %c0_i32, %arg2 : i32, i32
  }
  func.func @transform_3(%arg0: i32, %arg1: i32, %arg2: i32) -> (i32, i32, i32, i32) {
    %c0_i32 = arith.constant 0 : i32
    %c0_i32_0 = arith.constant 0 : i32
    return %arg0, %arg1, %c0_i32, %arg2 : i32, i32, i32, i32
  }
}

module attributes {stable_mosaic.version = 11 : i64} {
  func.func @_linear_kernel(%arg0: i32, %arg1: i32, %arg2: i32, %arg3: memref<2x2048xbf16, #tpu.memory_space<vmem>>, %arg4: memref<2048x128xbf16, #tpu.memory_space<vmem>>, %arg5: memref<1x128xf32, #tpu.memory_space<vmem>>, %arg6: memref<2x128xf32, #tpu.memory_space<vmem>>) attributes {dimension_semantics = [#tpu.dimension_semantics<parallel>, #tpu.dimension_semantics<parallel>, #tpu.dimension_semantics<arbitrary>], iteration_bounds = array<i64: 1, 1, 1>, scalar_prefetch = 0 : i64, scratch_operands = 0 : i64, tpu.core_type = #tpu.core_type<tc>, window_params = [{transform_indices = @transform_0, window_bounds = array<i64: 2, 2048>}, {transform_indices = @transform_1, window_bounds = array<i64: 2048, 128>}, {transform_indices = @transform_2, window_bounds = array<i64: 1, 128>}, {transform_indices = @transform_3, window_bounds = array<i64: 2, 128>}]} {
    %c0_i32 = arith.constant 0 : i32
    %0 = arith.cmpi eq, %arg2, %c0_i32 : i32
    %1 = arith.extui %0 : i1 to i32
    %c0_i32_0 = arith.constant 0 : i32
    %2 = arith.cmpi ne, %1, %c0_i32_0 : i32
    scf.if %2 {
      %c0_8 = arith.constant 0 : index
      %c0_9 = arith.constant 0 : index
      %9 = vector.load %arg5[%c0_8, %c0_9] : memref<1x128xf32, #tpu.memory_space<vmem>>, vector<1x128xf32>
      %10 = vector.shape_cast %9 : vector<1x128xf32> to vector<1x128xf32>
      %11 = vector.broadcast %10 : vector<1x128xf32> to vector<2x128xf32>
      %c0_10 = arith.constant 0 : index
      %c0_11 = arith.constant 0 : index
      %12 = vector.load %arg6[%c0_10, %c0_11] : memref<2x128xf32, #tpu.memory_space<vmem>>, vector<2x128xf32>
      tpu.vector_store %arg6[%c0_10, %c0_11], %11 {strides = array<i32>} : memref<2x128xf32, #tpu.memory_space<vmem>>, vector<2x128xf32>,
    } else {
    }
    %c0 = arith.constant 0 : index
    %c0_1 = arith.constant 0 : index
    %3 = vector.load %arg6[%c0, %c0_1] : memref<2x128xf32, #tpu.memory_space<vmem>>, vector<2x128xf32>
    %c0_2 = arith.constant 0 : index
    %c0_3 = arith.constant 0 : index
    %4 = vector.load %arg3[%c0_2, %c0_3] : memref<2x2048xbf16, #tpu.memory_space<vmem>>, vector<2x2048xbf16>
    %c0_4 = arith.constant 0 : index
    %c0_5 = arith.constant 0 : index
    %5 = vector.load %arg4[%c0_4, %c0_5] : memref<2048x128xbf16, #tpu.memory_space<vmem>>, vector<2048x128xbf16>
    %cst = arith.constant dense<0.000000e+00> : vector<2x128xf32>
    %6 = tpu.matmul %4, %5, %cst {dimension_numbers = #tpu.dot_dimension_numbers<[1], [0], [0], [1], [0, 0, 1, 1], [], []>} : vector<2x2048xbf16>, vector<2048x128xbf16>, vector<2x128xf32> -> vector<2x128xf32>
    %7 = arith.addf %3, %6 : vector<2x128xf32>
    %c0_6 = arith.constant 0 : index
    %c0_7 = arith.constant 0 : index
    %8 = vector.load %arg6[%c0_6, %c0_7] : memref<2x128xf32, #tpu.memory_space<vmem>>, vector<2x128xf32>
    tpu.vector_store %arg6[%c0_6, %c0_7], %7 {strides = array<i32>} : memref<2x128xf32, #tpu.memory_space<vmem>>, vector<2x128xf32>,
    return
  }
  func.func @transform_0(%arg0: i32, %arg1: i32, %arg2: i32) -> (i32, i32) {
    %c0_i32 = arith.constant 0 : i32
    return %arg0, %arg2 : i32, i32
  }
  func.func @transform_1(%arg0: i32, %arg1: i32, %arg2: i32) -> (i32, i32) {
    %c0_i32 = arith.constant 0 : i32
    return %arg2, %arg1 : i32, i32
  }
  func.func @transform_2(%arg0: i32, %arg1: i32, %arg2: i32) -> (i32, i32) {
    %c0_i32 = arith.constant 0 : i32
    %c0_i32_0 = arith.constant 0 : i32
    return %c0_i32, %arg1 : i32, i32
  }
  func.func @transform_3(%arg0: i32, %arg1: i32, %arg2: i32) -> (i32, i32) {
    %c0_i32 = arith.constant 0 : i32
    return %arg0, %arg1 : i32, i32
  }
}

</mosaic_0001>

<bundles_post_ra>
// kernel: _lambda_.10
= control target key start
LH: loop header
LB: loop body
LE: loop exit
PB: predicated region body
PF: predicated region fallthrough
CT: control target
= control target key end

     0   :  { %s1085_s12 = smov 0   ;;  %s1087_s13 = smov 0   ;;  %s1233_s0 = inlined_call_operand.vmem [shape: bf16[2,16,18,128], index: 0, kind: input, shape index: {}]   ;;  %s1234_s1 = inlined_call_operand.vmem [shape: f32[1,128], index: 1, kind: input, shape index: {}]   ;;  %s1235_s2 = inlined_call_operand.vmem [shape: f32[1,128], index: 2, kind: input, shape index: {}]   ;;  %s1236_s3 = inlined_call_operand.vmem [shape: bf16[2,16,16,128], index: 3, kind: output, shape index: {}]  }
   0x1   :  { %s1089_s14 = smov 0  }
   0x2 LB: > { %s32_s15 = sadd.s32 1, %s1059_s13  ;;  %p809_p0 = scmp.ge.s32.totalorder %s1063_s14, 1  ;;  %s1063_s14 = sphi %s1089_s14, %s13_s14   ;;  %s1059_s13 = sphi %s1087_s13, %s1238_s13   ;;  %s1055_s12 = sphi %s1085_s12, %s1237_s12  }
   0x3   : > { %p34_p1 = scmp.ge.s32.totalorder %s32_s15, 2  ;;  %p189_p2 = scmp.lt.s32.totalorder %s1063_s14, 3 }
   0x5   : > { %s1240_s15 = smov (%p34_p1, %s32_s15), 0  ;;  %p190_p3 = pnand %p809_p0, %p189_p2 }
   0x6   : > { %p236_p4 = scmp.lt.s32.totalorder (!%p190_p3), %s1055_s12, 1  ;;  %v1114_v0 = vld [vmem:[%s1234_s1] ss:$0 sm:$0xff] (!%p190_p3) }
   0x7   : > { %193 = sbr.rel (%p190_p3) target bundleno = 78 (0x4e), region = 32  ;;  %v1123_v9 = vld [vmem:[%s1235_s2] ss:$0 sm:$0xff] (!%p190_p3) }
   0xe   : > { %s1242_s12 = smov (!%p236_p4, %s1055_s12), 1 }
   0xf   : > { %s1016_s16 = smul.u32 192, %s1242_s12  ;;  %s849_s24 = sshll.u32 %s1242_s12, 7 }
  0x10   : > { %s1145_s27 = scalar_lea.vmem %s1236_s3, %s849_s24 }
  0x11   : > { %s1109_s19 = scalar_lea.vmem %s1233_s0, %s1016_s16 }
  0x12   : > { %v883_v1 = vld [vmem:[%s1109_s19] sm:$0xff]   ;;  %v271_v2 = vld [vmem:[%s1109_s19 + $0xc] sm:$0xff]   ;;  %v994_v3 = vld [vmem:[%s1109_s19 + $0x18] sm:$0xff]  }
  0x13   : > { %v884_v4 = vunpack.c.l.bf16 %v883_v1  ;;  %v885_v5 = vunpack.c.h.bf16 %v883_v1  ;;  %v303_v6 = vunpack.c.l.bf16 %v271_v2  ;;  %v304_v7 = vunpack.c.h.bf16 %v271_v2  ;;  %v275_v8 = vld [vmem:[%s1109_s19 + $0x24] sm:$0xff]   ;;  %v995_v36 = vld [vmem:[%s1109_s19 + $0x30] sm:$0xff]   ;;  %v279_v41 = vld [vmem:[%s1109_s19 + $0x3c] sm:$0xff]  }
  0x14   : > { %v888_v10 = vunpack.c.l.bf16 %v994_v3  ;;  %v889_v11 = vunpack.c.h.bf16 %v994_v3  ;;  %v307_v12 = vunpack.c.l.bf16 %v275_v8  ;;  %v308_v13 = vunpack.c.h.bf16 %v275_v8  ;;  %v996_v52 = vld [vmem:[%s1109_s19 + $0x48] sm:$0xff]   ;;  %v283_v53 = vld [vmem:[%s1109_s19 + $0x54] sm:$0xff]  }
  0x15   : > { %v340_v14 = vmul.f32 %v884_v4, %v1114_v0  ;;  %v341_v15 = vmul.f32 %v885_v5, %v1114_v0  ;;  %v342_v16 = vmul.f32 %v1114_v0, %v303_v6  ;;  %v343_v17 = vmul.f32 %v1114_v0, %v304_v7 }
  0x16   : > { %v344_v18 = vmul.f32 %v888_v10, %v1114_v0  ;;  %v345_v19 = vmul.f32 %v889_v11, %v1114_v0  ;;  %v346_v20 = vmul.f32 %v1114_v0, %v307_v12  ;;  %v347_v21 = vmul.f32 %v1114_v0, %v308_v13 }
  0x17   : > { %v379_v22 = vadd.f32 %v1123_v9, %v340_v14  ;;  %v380_v23 = vadd.f32 %v1123_v9, %v341_v15  ;;  %v381_v24 = vadd.f32 %v1123_v9, %v342_v16  ;;  %v382_v25 = vadd.f32 %v1123_v9, %v343_v17 }
  0x18   : > { %v383_v26 = vadd.f32 %v1123_v9, %v344_v18  ;;  %v384_v27 = vadd.f32 %v1123_v9, %v345_v19  ;;  %v385_v28 = vadd.f32 %v1123_v9, %v346_v20  ;;  %v386_v29 = vadd.f32 %v1123_v9, %v347_v21  ;;  %v997_v20 = vld [vmem:[%s1109_s19 + $0x60] sm:$0xff]  }
  0x19   : > { %vm411_vm0 = vcmp.ge.f32.partialorder %v379_v22, 0.0  ;;  %vm412_vm1 = vcmp.ge.f32.partialorder %v380_v23, 0.0  ;;  %v443_v30 = vmul.f32 0.1, %v379_v22  ;;  %v444_v31 = vmul.f32 0.1, %v380_v23 }
  0x1a   : > { %vm413_vm2 = vcmp.ge.f32.partialorder %v381_v24, 0.0  ;;  %vm414_vm3 = vcmp.ge.f32.partialorder %v382_v25, 0.0  ;;  %v445_v32 = vmul.f32 0.1, %v381_v24  ;;  %v446_v33 = vmul.f32 0.1, %v382_v25 }
  0x1b   : > { %v475_v34 = vsel %vm411_vm0, %v379_v22, %v443_v30  ;;  %v476_v35 = vsel %vm412_vm1, %v380_v23, %v444_v31  ;;  %vm415_vm4 = vcmp.ge.f32.partialorder %v383_v26, 0.0  ;;  %vm416_vm5 = vcmp.ge.f32.partialorder %v384_v27, 0.0 }
  0x1c   : > { %v917_v37 = vpack.c.bf16 %v476_v35, %v475_v34  ;;  %v477_v38 = vsel %vm413_vm2, %v381_v24, %v445_v32  ;;  %v478_v39 = vsel %vm414_vm3, %v382_v25, %v446_v33  ;;  %v447_v40 = vmul.f32 0.1, %v383_v26  ;;  %v287_v24 = vld [vmem:[%s1109_s19 + $0x6c] sm:$0xff]  }
  0x1d   : > { %v922_v42 = vpack.c.bf16 %v478_v39, %v477_v38  ;;  %v448_v43 = vmul.f32 0.1, %v384_v27  ;;  %vm417_vm6 = vcmp.ge.f32.partialorder %v385_v28, 0.0  ;;  %vm418_vm7 = vcmp.ge.f32.partialorder %v386_v29, 0.0 }
  0x1e   : > { %918 = vst [vmem:[%s1145_s27] sm:$0xff] %v917_v37   ;;  %v479_v44 = vsel %vm415_vm4, %v383_v26, %v447_v40  ;;  %v449_v45 = vmul.f32 0.1, %v385_v28  ;;  %v450_v46 = vmul.f32 0.1, %v386_v29  ;;  %v892_v47 = vunpack.c.l.bf16 %v995_v36 }
  0x1f   : > { %1001 = vst [vmem:[%s1145_s27 + $0x8] sm:$0xff] %v922_v42   ;;  %v480_v48 = vsel %vm416_vm5, %v384_v27, %v448_v43  ;;  %v893_v49 = vunpack.c.h.bf16 %v995_v36  ;;  %v311_v50 = vunpack.c.l.bf16 %v279_v41  ;;  %v312_v51 = vunpack.c.h.bf16 %v279_v41  ;;  %v998_v36 = vld [vmem:[%s1109_s19 + $0x78] sm:$0xff]  }
  0x20   : > { %v927_v54 = vpack.c.bf16 %v480_v48, %v479_v44  ;;  %v481_v55 = vsel %vm417_vm6, %v385_v28, %v449_v45  ;;  %v482_v56 = vsel %vm418_vm7, %v386_v29, %v450_v46  ;;  %v348_v57 = vmul.f32 %v892_v47, %v1114_v0 }
  0x21   : > { %v932_v58 = vpack.c.bf16 %v482_v56, %v481_v55  ;;  %v349_v59 = vmul.f32 %v893_v49, %v1114_v0  ;;  %v350_v60 = vmul.f32 %v1114_v0, %v311_v50  ;;  %v351_v61 = vmul.f32 %v1114_v0, %v312_v51  ;;  %v291_v55 = vld [vmem:[%s1109_s19 + $0x84] sm:$0xff]  }
  0x22   : > { %1002 = vst [vmem:[%s1145_s27 + $0x10] sm:$0xff] %v927_v54   ;;  %v387_v62 = vadd.f32 %v1123_v9, %v348_v57  ;;  %v896_v63 = vunpack.c.l.bf16 %v996_v52  ;;  %v897_v1 = vunpack.c.h.bf16 %v996_v52  ;;  %v315_v2 = vunpack.c.l.bf16 %v283_v53 }
  0x23   : > { %1003 = vst [vmem:[%s1145_s27 + $0x18] sm:$0xff] %v932_v58   ;;  %v388_v3 = vadd.f32 %v1123_v9, %v349_v59  ;;  %v389_v4 = vadd.f32 %v1123_v9, %v350_v60  ;;  %v390_v5 = vadd.f32 %v1123_v9, %v351_v61  ;;  %v316_v6 = vunpack.c.h.bf16 %v283_v53 }
  0x24   : > { %vm419_vm8 = vcmp.ge.f32.partialorder %v387_v62, 0.0  ;;  %v451_v7 = vmul.f32 0.1, %v387_v62  ;;  %v352_v8 = vmul.f32 %v896_v63, %v1114_v0  ;;  %v353_v10 = vmul.f32 %v897_v1, %v1114_v0  ;;  %v999_v1 = vld [vmem:[%s1109_s19 + $0x90] sm:$0xff]  }
  0x25   : > { %vm420_vm9 = vcmp.ge.f32.partialorder %v388_v3, 0.0  ;;  %v452_v11 = vmul.f32 0.1, %v388_v3  ;;  %vm421_vm10 = vcmp.ge.f32.partialorder %v389_v4, 0.0  ;;  %vm422_vm11 = vcmp.ge.f32.partialorder %v390_v5, 0.0 }
  0x26   : > { %v483_v12 = vsel %vm419_vm8, %v387_v62, %v451_v7  ;;  %v453_v13 = vmul.f32 0.1, %v389_v4  ;;  %v454_v14 = vmul.f32 0.1, %v390_v5  ;;  %v391_v15 = vadd.f32 %v1123_v9, %v352_v8 }
  0x27   : > { %v484_v16 = vsel %vm420_vm9, %v388_v3, %v452_v11  ;;  %v392_v17 = vadd.f32 %v1123_v9, %v353_v10  ;;  %v354_v18 = vmul.f32 %v1114_v0, %v315_v2  ;;  %v355_v19 = vmul.f32 %v1114_v0, %v316_v6  ;;  %v295_v6 = vld [vmem:[%s1109_s19 + $0x9c] sm:$0xff]  }
  0x28   : > { %v937_v21 = vpack.c.bf16 %v484_v16, %v483_v12  ;;  %v485_v22 = vsel %vm421_vm10, %v389_v4, %v453_v13  ;;  %v486_v23 = vsel %vm422_vm11, %v390_v5, %v454_v14  ;;  %vm423_vm12 = vcmp.ge.f32.partialorder %v391_v15, 0.0 }
  0x29   : > { %v942_v25 = vpack.c.bf16 %v486_v23, %v485_v22  ;;  %vm424_vm13 = vcmp.ge.f32.partialorder %v392_v17, 0.0  ;;  %v455_v26 = vmul.f32 0.1, %v391_v15  ;;  %v456_v27 = vmul.f32 0.1, %v392_v17  ;;  %v1000_v22 = vld [vmem:[%s1109_s19 + $0xa8] sm:$0xff]  }
  0x2a   : > { %1004 = vst [vmem:[%s1145_s27 + $0x20] sm:$0xff] %v937_v21   ;;  %v393_v28 = vadd.f32 %v1123_v9, %v354_v18  ;;  %v394_v29 = vadd.f32 %v1123_v9, %v355_v19  ;;  %v900_v30 = vunpack.c.l.bf16 %v997_v20  ;;  %v901_v31 = vunpack.c.h.bf16 %v997_v20 }
  0x2b   : > { %1005 = vst [vmem:[%s1145_s27 + $0x28] sm:$0xff] %v942_v25   ;;  %v487_v32 = vsel %vm423_vm12, %v391_v15, %v455_v26  ;;  %v488_v33 = vsel %vm424_vm13, %v392_v17, %v456_v27  ;;  %v319_v34 = vunpack.c.l.bf16 %v287_v24  ;;  %v320_v35 = vunpack.c.h.bf16 %v287_v24 }
  0x2c   : > { %v947_v37 = vpack.c.bf16 %v488_v33, %v487_v32  ;;  %vm425_vm14 = vcmp.ge.f32.partialorder %v393_v28, 0.0  ;;  %vm426_vm15 = vcmp.ge.f32.partialorder %v394_v29, 0.0  ;;  %v457_v38 = vmul.f32 0.1, %v393_v28 }
  0x2d   : > { %v458_v39 = vmul.f32 0.1, %v394_v29  ;;  %v356_v40 = vmul.f32 %v900_v30, %v1114_v0  ;;  %v357_v41 = vmul.f32 %v901_v31, %v1114_v0  ;;  %v358_v42 = vmul.f32 %v1114_v0, %v319_v34 }
  0x2e   : > { %1006 = vst [vmem:[%s1145_s27 + $0x30] sm:$0xff] %v947_v37   ;;  %v489_v43 = vsel %vm425_vm14, %v393_v28, %v457_v38  ;;  %v359_v44 = vmul.f32 %v1114_v0, %v320_v35  ;;  %v904_v45 = vunpack.c.l.bf16 %v998_v36  ;;  %v905_v46 = vunpack.c.h.bf16 %v998_v36 }
  0x2f   : > { %v490_v47 = vsel %vm426_vm15, %v394_v29, %v458_v39  ;;  %v395_v48 = vadd.f32 %v1123_v9, %v356_v40  ;;  %v396_v49 = vadd.f32 %v1123_v9, %v357_v41  ;;  %v397_v50 = vadd.f32 %v1123_v9, %v358_v42  ;;  %v299_v41 = vld [vmem:[%s1109_s19 + $0xb4] sm:$0xff]  }
  0x30   : > { %v952_v51 = vpack.c.bf16 %v490_v47, %v489_v43  ;;  %v398_v52 = vadd.f32 %v1123_v9, %v359_v44  ;;  %v360_v53 = vmul.f32 %v904_v45, %v1114_v0  ;;  %v361_v54 = vmul.f32 %v905_v46, %v1114_v0 }
  0x31   : > { %vm427_vm0 = vcmp.ge.f32.partialorder %v395_v48, 0.0  ;;  %vm428_vm1 = vcmp.ge.f32.partialorder %v396_v49, 0.0  ;;  %v459_v56 = vmul.f32 0.1, %v395_v48  ;;  %v460_v57 = vmul.f32 0.1, %v396_v49 }
  0x32   : > { %1007 = vst [vmem:[%s1145_s27 + $0x38] sm:$0xff] %v952_v51   ;;  %vm429_vm2 = vcmp.ge.f32.partialorder %v397_v50, 0.0  ;;  %vm430_vm3 = vcmp.ge.f32.partialorder %v398_v52, 0.0  ;;  %v461_v58 = vmul.f32 0.1, %v397_v50  ;;  %v399_v62 = vadd.f32 %v1123_v9, %v360_v53 }
  0x33   : > { %v462_v59 = vmul.f32 0.1, %v398_v52  ;;  %v491_v60 = vsel %vm427_vm0, %v395_v48, %v459_v56  ;;  %v492_v61 = vsel %vm428_vm1, %v396_v49, %v460_v57  ;;  %v400_v63 = vadd.f32 %v1123_v9, %v361_v54 }
  0x34   : > { %v957_v2 = vpack.c.bf16 %v492_v61, %v491_v60  ;;  %v493_v3 = vsel %vm429_vm2, %v397_v50, %v461_v58  ;;  %v323_v5 = vunpack.c.l.bf16 %v291_v55  ;;  %vm431_vm4 = vcmp.ge.f32.partialorder %v399_v62, 0.0 }
  0x35   : > { %v494_v4 = vsel %vm430_vm3, %v398_v52, %v462_v59  ;;  %vm432_vm5 = vcmp.ge.f32.partialorder %v400_v63, 0.0  ;;  %v463_v8 = vmul.f32 0.1, %v399_v62  ;;  %v464_v10 = vmul.f32 0.1, %v400_v63 }
  0x36   : > { %v962_v7 = vpack.c.bf16 %v494_v4, %v493_v3  ;;  %1008 = vst [vmem:[%s1145_s27 + $0x40] sm:$0xff] %v957_v2   ;;  %v324_v11 = vunpack.c.h.bf16 %v291_v55  ;;  %v362_v12 = vmul.f32 %v1114_v0, %v323_v5  ;;  %v908_v13 = vunpack.c.l.bf16 %v999_v1 }
  0x37   : > { %v495_v14 = vsel %vm431_vm4, %v399_v62, %v463_v8  ;;  %v909_v15 = vunpack.c.h.bf16 %v999_v1  ;;  %v327_v16 = vunpack.c.l.bf16 %v295_v6  ;;  %v328_v17 = vunpack.c.h.bf16 %v295_v6 }
  0x38   : > { %1009 = vst [vmem:[%s1145_s27 + $0x48] sm:$0xff] %v962_v7   ;;  %v496_v18 = vsel %vm432_vm5, %v400_v63, %v464_v10  ;;  %v363_v19 = vmul.f32 %v1114_v0, %v324_v11  ;;  %v401_v20 = vadd.f32 %v1123_v9, %v362_v12  ;;  %v364_v21 = vmul.f32 %v908_v13, %v1114_v0 }
  0x39   : > { %v967_v23 = vpack.c.bf16 %v496_v18, %v495_v14  ;;  %v365_v24 = vmul.f32 %v909_v15, %v1114_v0  ;;  %v366_v25 = vmul.f32 %v1114_v0, %v327_v16  ;;  %v367_v26 = vmul.f32 %v1114_v0, %v328_v17 }
  0x3a   : > { %v402_v27 = vadd.f32 %v1123_v9, %v363_v19  ;;  %vm433_vm6 = vcmp.ge.f32.partialorder %v401_v20, 0.0  ;;  %v465_v28 = vmul.f32 0.1, %v401_v20  ;;  %v403_v29 = vadd.f32 %v1123_v9, %v364_v21 }
  0x3b   : > { %1010 = vst [vmem:[%s1145_s27 + $0x50] sm:$0xff] %v967_v23   ;;  %v404_v30 = vadd.f32 %v1123_v9, %v365_v24  ;;  %v405_v31 = vadd.f32 %v1123_v9, %v366_v25  ;;  %v406_v32 = vadd.f32 %v1123_v9, %v367_v26  ;;  %v912_v33 = vunpack.c.l.bf16 %v1000_v22 }
  0x3c   : > { %vm434_vm7 = vcmp.ge.f32.partialorder %v402_v27, 0.0  ;;  %v466_v34 = vmul.f32 0.1, %v402_v27  ;;  %v497_v35 = vsel %vm433_vm6, %v401_v20, %v465_v28  ;;  %vm435_vm8 = vcmp.ge.f32.partialorder %v403_v29, 0.0 }
  0x3d   : > { %vm436_vm9 = vcmp.ge.f32.partialorder %v404_v30, 0.0  ;;  %v467_v36 = vmul.f32 0.1, %v403_v29  ;;  %v468_v37 = vmul.f32 0.1, %v404_v30  ;;  %vm437_vm10 = vcmp.ge.f32.partialorder %v405_v31, 0.0 }
  0x3e   : > { %v498_v38 = vsel %vm434_vm7, %v402_v27, %v466_v34  ;;  %vm438_vm11 = vcmp.ge.f32.partialorder %v406_v32, 0.0  ;;  %v469_v39 = vmul.f32 0.1, %v405_v31  ;;  %v470_v40 = vmul.f32 0.1, %v406_v32 }
  0x3f   : > { %v972_v42 = vpack.c.bf16 %v498_v38, %v497_v35  ;;  %v499_v43 = vsel %vm435_vm8, %v403_v29, %v467_v36  ;;  %v500_v44 = vsel %vm436_vm9, %v404_v30, %v468_v37  ;;  %v913_v45 = vunpack.c.h.bf16 %v1000_v22 }
  0x40   : > { %v977_v46 = vpack.c.bf16 %v500_v44, %v499_v43  ;;  %v501_v47 = vsel %vm437_vm10, %v405_v31, %v469_v39  ;;  %v502_v48 = vsel %vm438_vm11, %v406_v32, %v470_v40  ;;  %v368_v49 = vmul.f32 %v912_v33, %v1114_v0 }
  0x41   : > { %1011 = vst [vmem:[%s1145_s27 + $0x58] sm:$0xff] %v972_v42   ;;  %v982_v50 = vpack.c.bf16 %v502_v48, %v501_v47  ;;  %v369_v51 = vmul.f32 %v913_v45, %v1114_v0  ;;  %v331_v52 = vunpack.c.l.bf16 %v299_v41  ;;  %v332_v53 = vunpack.c.h.bf16 %v299_v41 }
  0x42   : > { %1012 = vst [vmem:[%s1145_s27 + $0x60] sm:$0xff] %v977_v46   ;;  %v407_v54 = vadd.f32 %v1123_v9, %v368_v49 }
  0x43   : > { %1013 = vst [vmem:[%s1145_s27 + $0x68] sm:$0xff] %v982_v50   ;;  %v408_v55 = vadd.f32 %v1123_v9, %v369_v51  ;;  %v370_v56 = vmul.f32 %v1114_v0, %v331_v52  ;;  %v371_v57 = vmul.f32 %v1114_v0, %v332_v53 }
  0x44   : > { %vm439_vm12 = vcmp.ge.f32.partialorder %v407_v54, 0.0  ;;  %v471_v58 = vmul.f32 0.1, %v407_v54 }
  0x45   : > { %vm440_vm13 = vcmp.ge.f32.partialorder %v408_v55, 0.0  ;;  %v472_v59 = vmul.f32 0.1, %v408_v55  ;;  %v409_v60 = vadd.f32 %v1123_v9, %v370_v56  ;;  %v410_v61 = vadd.f32 %v1123_v9, %v371_v57 }
  0x46   : > { %v503_v62 = vsel %vm439_vm12, %v407_v54, %v471_v58 }
  0x47   : > { %v504_v63 = vsel %vm440_vm13, %v408_v55, %v472_v59  ;;  %vm441_vm14 = vcmp.ge.f32.partialorder %v409_v60, 0.0  ;;  %vm442_vm15 = vcmp.ge.f32.partialorder %v410_v61, 0.0  ;;  %v473_v1 = vmul.f32 0.1, %v409_v60 }
  0x48   : > { %v987_v2 = vpack.c.bf16 %v504_v63, %v503_v62  ;;  %v474_v3 = vmul.f32 0.1, %v410_v61 }
  0x49   : > { %v505_v4 = vsel %vm441_vm14, %v409_v60, %v473_v1 }
  0x4a   : > { %1014 = vst [vmem:[%s1145_s27 + $0x70] sm:$0xff] %v987_v2   ;;  %v506_v5 = vsel %vm442_vm15, %v410_v61, %v474_v3 }
  0x4b   : > { %v992_v0 = vpack.c.bf16 %v506_v5, %v505_v4 }
  0x4d   : > { %1015 = vst [vmem:[%s1145_s27 + $0x78] sm:$0xff] %v992_v0  }
  0x4e PF: > { %s13_s14 = sadd.s32 1, %s1063_s14   ;;  %s1237_s12 = smov %s1059_s13 }
  0x4f   : > { %p10_p5 = scmp.ge.s32.totalorder %s13_s14, 4   ;;  %s1238_s13 = smov %s1240_s15 }
  0x51   :  { %12 = sbr.rel (!%p10_p5) target bundleno = 2 (0x2), region = 68 }

// kernel: _lambda_.11
= control target key start
LH: loop header
LB: loop body
LE: loop exit
PB: predicated region body
PF: predicated region fallthrough
CT: control target
= control target key end

     0   :  { %s416_s6 = smov 0   ;;  %s418_s7 = smov 0   ;;  %s481_s0 = inlined_call_operand.vmem [shape: bf16[2,128,256], index: 0, kind: input, shape index: {}]   ;;  %s482_s1 = inlined_call_operand.vmem [shape: bf16[2,64,128], index: 1, kind: output, shape index: {}]  }
   0x1   :  { %s420_s8 = smov 0  }
   0x2 LB: > { %s23_s9 = sadd.s32 1, %s400_s7  ;;  %p349_p0 = scmp.ge.s32.totalorder %s404_s8, 1  ;;  %s404_s8 = sphi %s420_s8, %s11_s8   ;;  %s400_s7 = sphi %s418_s7, %s484_s7   ;;  %s396_s6 = sphi %s416_s6, %s483_s6  }
   0x3   : > { %p25_p1 = scmp.ge.s32.totalorder %s23_s9, 2  ;;  %p109_p2 = scmp.lt.s32.totalorder %s404_s8, 3 }
   0x5   : > { %s486_s9 = smov (%p25_p1, %s23_s9), 0  ;;  %p110_p3 = pnand %p349_p0, %p109_p2 }
   0x6   : > { %p139_p4 = scmp.lt.s32.totalorder (!%p110_p3), %s396_s6, 1 }
   0x7   : > { %113 = sbr.rel (%p110_p3) target bundleno = 35 (0x23), region = 24 }
   0xe   : > { %s488_s6 = smov (!%p139_p4, %s396_s6), 1 }
   0xf   : > { %s356_s10 = sshll.u32 %s488_s6, 7  ;;  %s357_s14 = sshll.u32 %s488_s6, 5 }
  0x10   : > { %s440_s13 = scalar_lea.vmem %s481_s0, %s356_s10  ;;  %s460_s17 = scalar_lea.vmem %s482_s1, %s357_s14 }
  0x11   : > { %v159_v0 = vld [vmem:[%s440_s13] sm:$0xff]  ;;  %v164_v1 = vld [vmem:[%s440_s13 + $0x8] sm:$0xff]  ;;  %v171_v2 = vld [vmem:[%s440_s13 + $0x10] sm:$0xff] }
  0x12   : > { %v161_v3 = vrot.slane %v159_v0, 4  ;;  %v167_v4 = vrot.slane %v164_v1, 4  ;;  %v173_v5 = vrot.slane %v171_v2, 4  ;;  %v176_v6 = vld [vmem:[%s440_s13 + $0x18] sm:$0xff]  ;;  %v183_v7 = vld [vmem:[%s440_s13 + $0x20] sm:$0xff]  ;;  %v188_v8 = vld [vmem:[%s440_s13 + $0x28] sm:$0xff] }
  0x13   : > { %v179_v9 = vrot.slane %v176_v6, 4  ;;  %v185_v10 = vrot.slane %v183_v7, 4  ;;  %v191_v11 = vrot.slane %v188_v8, 4  ;;  %v195_v12 = vld [vmem:[%s440_s13 + $0x30] sm:$0xff]  ;;  %v200_v13 = vld [vmem:[%s440_s13 + $0x38] sm:$0xff]  ;;  %v207_v14 = vld [vmem:[%s440_s13 + $0x40] sm:$0xff] }
  0x14   : > { %v163_v15 = vmax.bf16 %v161_v3, %v159_v0  ;;  %v175_v16 = vmax.bf16 %v173_v5, %v171_v2  ;;  %v197_v17 = vrot.slane %v195_v12, 4  ;;  %v203_v18 = vrot.slane %v200_v13, 4  ;;  %v212_v19 = vld [vmem:[%s440_s13 + $0x48] sm:$0xff]  ;;  %v219_v20 = vld [vmem:[%s440_s13 + $0x50] sm:$0xff]  ;;  %v224_v21 = vld [vmem:[%s440_s13 + $0x58] sm:$0xff] }
  0x15   : > { %v187_v22 = vmax.bf16 %v185_v10, %v183_v7  ;;  %v209_v23 = vrot.slane %v207_v14, 4  ;;  %v215_v24 = vrot.slane %v212_v19, 4  ;;  %v221_v25 = vrot.slane %v219_v20, 4  ;;  %v231_v26 = vld [vmem:[%s440_s13 + $0x60] sm:$0xff]  ;;  %v236_v27 = vld [vmem:[%s440_s13 + $0x68] sm:$0xff]  ;;  %v243_v36 = vld [vmem:[%s440_s13 + $0x70] sm:$0xff] }
  0x16   : > { %v165_v28 = vmax.bf16 %v164_v1, %v163_v15  ;;  %v177_v29 = vmax.bf16 %v176_v6, %v175_v16  ;;  %v199_v30 = vmax.bf16 %v197_v17, %v195_v12  ;;  %v227_v31 = vrot.slane %v224_v21, 4  ;;  %v248_v45 = vld [vmem:[%s440_s13 + $0x78] sm:$0xff] }
  0x17   : > { %v189_v32 = vmax.bf16 %v188_v8, %v187_v22  ;;  %v211_v33 = vmax.bf16 %v209_v23, %v207_v14  ;;  %v223_v34 = vmax.bf16 %v221_v25, %v219_v20  ;;  %v233_v35 = vrot.slane %v231_v26, 4 }
  0x18   : > { %v169_v37 = vmax.bf16 %v167_v4, %v165_v28  ;;  %v181_v38 = vmax.bf16 %v179_v9, %v177_v29  ;;  %v201_v39 = vmax.bf16 %v200_v13, %v199_v30  ;;  %v239_v40 = vrot.slane %v236_v27, 4 }
  0x19   : > { %v193_v41 = vmax.bf16 %v191_v11, %v189_v32  ;;  %v213_v42 = vmax.bf16 %v212_v19, %v211_v33  ;;  %v225_v43 = vmax.bf16 %v224_v21, %v223_v34  ;;  %v235_v44 = vmax.bf16 %v233_v35, %v231_v26 }
  0x1a   : > { %170 = vst [vmem:[%s460_s17] sm:$0xf] %v169_v37  ;;  %182 = vst [vmem:[%s460_s17 + $0x4] sm:$0xf] %v181_v38  ;;  %v205_v46 = vmax.bf16 %v203_v18, %v201_v39  ;;  %v245_v47 = vrot.slane %v243_v36, 4  ;;  %v251_v52 = vrot.slane %v248_v45, 4 }
  0x1b   : > { %194 = vst [vmem:[%s460_s17 + $0x8] sm:$0xf] %v193_v41  ;;  %v217_v48 = vmax.bf16 %v215_v24, %v213_v42  ;;  %v229_v49 = vmax.bf16 %v227_v31, %v225_v43  ;;  %v237_v50 = vmax.bf16 %v236_v27, %v235_v44 }
  0x1c   : > { %206 = vst [vmem:[%s460_s17 + $0xc] sm:$0xf] %v205_v46  ;;  %v247_v51 = vmax.bf16 %v245_v47, %v243_v36 }
  0x1d   : > { %218 = vst [vmem:[%s460_s17 + $0x10] sm:$0xf] %v217_v48  ;;  %230 = vst [vmem:[%s460_s17 + $0x14] sm:$0xf] %v229_v49  ;;  %v241_v53 = vmax.bf16 %v239_v40, %v237_v50 }
  0x1e   : > { %v249_v54 = vmax.bf16 %v248_v45, %v247_v51 }
  0x1f   : > { %242 = vst [vmem:[%s460_s17 + $0x18] sm:$0xf] %v241_v53 }
  0x20   : > { %v253_v55 = vmax.bf16 %v251_v52, %v249_v54 }
  0x22   : > { %254 = vst [vmem:[%s460_s17 + $0x1c] sm:$0xf] %v253_v55 }
  0x23 PF: > { %s11_s8 = sadd.s32 1, %s404_s8   ;;  %s483_s6 = smov %s400_s7 }
  0x24   : > { %p8_p5 = scmp.ge.s32.totalorder %s11_s8, 4   ;;  %s484_s7 = smov %s486_s9 }
  0x26   :  { %10 = sbr.rel (!%p8_p5) target bundleno = 2 (0x2), region = 54 }

// kernel: _lambda_.12
= control target key start
LH: loop header
LB: loop body
LE: loop exit
PB: predicated region body
PF: predicated region fallthrough
CT: control target
= control target key end

     0   :  { %s813_s12 = smov 0   ;;  %s815_s13 = smov 0   ;;  %s887_s0 = inlined_call_operand.vmem [shape: bf16[2,64,128], index: 0, kind: input, shape index: {}]   ;;  %s888_s1 = inlined_call_operand.vmem [shape: bf16[128,128], index: 1, kind: input, shape index: {}]   ;;  %s889_s2 = inlined_call_operand.vmem [shape: bf16[2,64,128], index: 2, kind: output, shape index: {0}]   ;;  %s890_s3 = inlined_call_operand.vmem [shape: f32[2,2,128], index: 3, kind: output, shape index: {1}]  }
   0x1   :  { %s817_s14 = smov 0  }
   0x2 LB: > { %s23_s15 = sadd.s32 1, %s787_s13  ;;  %p620_p0 = scmp.ge.s32.totalorder %s791_s14, 1  ;;  %s791_s14 = sphi %s817_s14, %s14_s14   ;;  %s787_s13 = sphi %s815_s13, %s892_s13   ;;  %s783_s12 = sphi %s813_s12, %s891_s12  }
   0x3   : > { %p24_p1 = scmp.ge.s32.totalorder %s23_s15, 2  ;;  %p165_p2 = scmp.lt.s32.totalorder %s791_s14, 3 }
   0x5   : > { %s894_s15 = smov (%p24_p1, %s23_s15), 0  ;;  %p166_p3 = pnand %p620_p0, %p165_p2 }
   0x6   : > { %v757_v0 = vld [vmem:[%s888_s1] sm:$0xff] (!%p166_p3)   ;;  %p203_p4 = scmp.lt.s32.totalorder (!%p166_p3), %s783_s12, 1  ;;  %v758_v1 = vld [vmem:[%s888_s1 + $0x8] sm:$0xff] (!%p166_p3)   ;;  %v759_v2 = vld [vmem:[%s888_s1 + $0x10] sm:$0xff] (!%p166_p3)  }
   0x7   : > { %169 = sbr.rel (%p166_p3) target bundleno = 283 (0x11b), region = 28  ;;  %693 = vmatprep.subr.bf16.mxu0 (!%p166_p3), %v757_v0  ;;  %717 = vmatprep.subr.bf16.mxu1 (!%p166_p3), %v757_v0  ;;  %v760_v3 = vld [vmem:[%s888_s1 + $0x18] sm:$0xff] (!%p166_p3)   ;;  %v761_v6 = vld [vmem:[%s888_s1 + $0x20] sm:$0xff] (!%p166_p3)   ;;  %v762_v7 = vld [vmem:[%s888_s1 + $0x28] sm:$0xff] (!%p166_p3)  }
   0x8   : > { %694 = vmatpush3.bf16.msra.mxu0 (!%p166_p3), %v757_v0  ;;  %725 = vmatpush3.bf16.msra.mxu1 (!%p166_p3), %v757_v0  ;;  %v763_v8 = vld [vmem:[%s888_s1 + $0x30] sm:$0xff] (!%p166_p3)   ;;  %v764_v9 = vld [vmem:[%s888_s1 + $0x38] sm:$0xff] (!%p166_p3)  }
   0x9   : > { %695 = vmatprep.subr.bf16.mxu0 (!%p166_p3), %v758_v1  ;;  %718 = vmatprep.subr.bf16.mxu1 (!%p166_p3), %v758_v1 }
   0xc   : > { %696 = vmatpush3.bf16.msra.mxu0 (!%p166_p3), %v758_v1  ;;  %726 = vmatpush3.bf16.msra.mxu1 (!%p166_p3), %v758_v1 }
   0xd   : > { %697 = vmatprep.subr.bf16.mxu0 (!%p166_p3), %v759_v2  ;;  %719 = vmatprep.subr.bf16.mxu1 (!%p166_p3), %v759_v2 }
   0xe   : > { %s896_s12 = smov (!%p203_p4, %s783_s12), 1 }
   0xf   : > { %s648_s22 = sshll.u32 %s896_s12, 5  ;;  %s625_s16 = sshll.u32 %s896_s12, 1 }
  0x10   : > { %s848_s25 = scalar_lea.vmem %s887_s0, %s648_s22  ;;  %698 = vmatpush3.bf16.msra.mxu0 %v759_v2  ;;  %727 = vmatpush3.bf16.msra.mxu1 %v759_v2  ;;  %s219_s11 = scalar_lea.vmem %s889_s2, %s648_s22 }
  0x11   : > { %v765_v4 = vld [vmem:[%s848_s25] sm:$0xff]   ;;  %v767_v5 = vld [vmem:[%s848_s25 + $0x10] sm:$0xff]   ;;  %699 = vmatprep.subr.bf16.mxu0 %v760_v3  ;;  %720 = vmatprep.subr.bf16.mxu1 %v760_v3  ;;  %v766_v10 = vld [vmem:[%s848_s25 + $0x8] sm:$0xff]   ;;  %s226_s19 = scalar_lea.vmem %s890_s3, %s625_s16 }
  0x12   : > { %709 = vmatprep.mubr.bf16.mxu0 %v765_v4  ;;  %713 = vmatprep.mubr.bf16.mxu1 %v767_v5  ;;  %v768_v11 = vld [vmem:[%s848_s25 + $0x18] sm:$0xff]  }
  0x14   : > { %700 = vmatpush3.bf16.msra.mxu0 %v760_v3  ;;  %728 = vmatpush3.bf16.msra.mxu1 %v760_v3 }
  0x15   : > { %701 = vmatprep.subr.bf16.mxu0 %v761_v6  ;;  %721 = vmatprep.subr.bf16.mxu1 %v761_v6 }
  0x18   : > { %702 = vmatpush3.bf16.msra.mxu0 %v761_v6  ;;  %729 = vmatpush3.bf16.msra.mxu1 %v761_v6 }
  0x19   : > { %703 = vmatprep.subr.bf16.mxu0 %v762_v7  ;;  %722 = vmatprep.subr.bf16.mxu1 %v762_v7 }
  0x1c   : > { %704 = vmatpush3.bf16.msra.mxu0 %v762_v7  ;;  %730 = vmatpush3.bf16.msra.mxu1 %v762_v7 }
  0x1d   : > { %705 = vmatprep.subr.bf16.mxu0 %v763_v8  ;;  %723 = vmatprep.subr.bf16.mxu1 %v763_v8 }
  0x20   : > { %706 = vmatpush3.bf16.msra.mxu0 %v763_v8  ;;  %731 = vmatpush3.bf16.msra.mxu1 %v763_v8 }
  0x21   : > { %707 = vmatprep.subr.bf16.mxu0 %v764_v9  ;;  %724 = vmatprep.subr.bf16.mxu1 %v764_v9 }
  0x24   : > { %708 = vmatpush3.bf16.msra.mxu0 %v764_v9  ;;  %732 = vmatpush3.bf16.msra.mxu1 %v764_v9 }
  0x27   : > { %710 = vmatmul.mubr.bf16.vlgmr.msra.gmra.mrb[0].mxu0 %v766_v10  ;;  %714 = vmatmul.mubr.bf16.vlgmr.msra.gmra.mrb[0].mxu1 %v768_v11 }
  0xfa   : > { %v711_v12 = vpop.f32.mrb[0].mxu0  ;;  %v715_v13 = vpop.f32.mrb[0].mxu1 }
  0xfb   : > { %v358_v14 = vpop.f32.mrb[1].mxu0  ;;  %v374_v15 = vpop.f32.mrb[1].mxu1  ;;  %v461_v27 = vmul.f32 %v711_v12, %v711_v12  ;;  %v465_v39 = vmul.f32 %v715_v13, %v715_v13 }
  0xfc   : > { %v712_v16 = vpop.f32.mrb[2].mxu0  ;;  %v716_v17 = vpop.f32.mrb[2].mxu1  ;;  %v459_v18 = vmul.f32 %v358_v14, %v358_v14  ;;  %v463_v33 = vmul.f32 %v374_v15, %v374_v15 }
  0xfd   : > { %v666_v19 = vpack.c.bf16 %v712_v16, %v711_v12  ;;  %v361_v20 = vpop.f32.mrb[3].mxu0  ;;  %v676_v21 = vpack.c.bf16 %v716_v17, %v715_v13  ;;  %v377_v22 = vpop.f32.mrb[3].mxu1  ;;  %v462_v30 = vmul.f32 %v712_v16, %v712_v16  ;;  %v466_v42 = vmul.f32 %v716_v17, %v716_v17 }
  0xfe   : > { %v661_v23 = vpack.c.bf16 %v361_v20, %v358_v14  ;;  %v445_v24 = vadd.f32 %v361_v20, %v358_v14  ;;  %v460_v25 = vmul.f32 %v361_v20, %v361_v20  ;;  %v671_v26 = vpack.c.bf16 %v377_v22, %v374_v15 }
  0xff   : > { %678 = vst [vmem:[%s219_s11 + $0x8] sm:$0xff] %v666_v19   ;;  %680 = vst [vmem:[%s219_s11 + $0x18] sm:$0xff] %v676_v21   ;;  %v464_v38 = vmul.f32 %v377_v22, %v377_v22 }
 0x100   : > { %662 = vst [vmem:[%s219_s11] sm:$0xff] %v661_v23   ;;  %v446_v28 = vadd.f32 %v711_v12, %v445_v24  ;;  %v467_v29 = vadd.f32 %v460_v25, %v459_v18  ;;  %679 = vst [vmem:[%s219_s11 + $0x10] sm:$0xff] %v671_v26  }
 0x102   : > { %v468_v31 = vadd.f32 %v467_v29, %v461_v27  ;;  %v447_v32 = vadd.f32 %v712_v16, %v446_v28 }
 0x104   : > { %v448_v34 = vadd.f32 %v447_v32, %v374_v15  ;;  %v469_v35 = vadd.f32 %v468_v31, %v462_v30 }
 0x106   : > { %v470_v36 = vadd.f32 %v469_v35, %v463_v33  ;;  %v449_v37 = vadd.f32 %v448_v34, %v377_v22 }
 0x108   : > { %v450_v40 = vadd.f32 %v715_v13, %v449_v37  ;;  %v471_v41 = vadd.f32 %v470_v36, %v464_v38 }
 0x10a   : > { %v451_v43 = vadd.f32 %v716_v17, %v450_v40  ;;  %v472_v44 = vadd.f32 %v471_v41, %v465_v39 }
 0x10c   : > { %v452_v45 = vrot.slane %v451_v43, 4  ;;  %v473_v46 = vadd.f32 %v472_v44, %v466_v42 }
 0x10e   : > { %v453_v47 = vadd.f32 %v452_v45, %v451_v43  ;;  %v474_v48 = vrot.slane %v473_v46, 4 }
 0x110   : > { %v454_v49 = vrot.slane %v453_v47, 2  ;;  %v475_v50 = vadd.f32 %v474_v48, %v473_v46 }
 0x112   : > { %v455_v51 = vadd.f32 %v454_v49, %v453_v47  ;;  %v476_v52 = vrot.slane %v475_v50, 2 }
 0x114   : > { %v456_v53 = vrot.slane %v455_v51, 1  ;;  %v477_v54 = vadd.f32 %v476_v52, %v475_v50 }
 0x116   : > { %v457_v55 = vadd.f32 %v456_v53, %v455_v51  ;;  %v478_v56 = vrot.slane %v477_v54, 1 }
 0x118   : > { %458 = vst [vmem:[%s226_s19] sm:$0x1] %v457_v55  ;;  %v479_v57 = vadd.f32 %v478_v56, %v477_v54 }
 0x11a   : > { %480 = vst [vmem:[%s226_s19 + $0x1] sm:$0x1] %v479_v57 }
 0x11b PF: > { %s14_s14 = sadd.s32 1, %s791_s14   ;;  %s891_s12 = smov %s787_s13 }
 0x11c   : > { %p11_p5 = scmp.ge.s32.totalorder %s14_s14, 4   ;;  %s892_s13 = smov %s894_s15 }
 0x11e   :  { %13 = sbr.rel (!%p11_p5) target bundleno = 2 (0x2), region = 73 }

// kernel: _lambda_.13
= control target key start
LH: loop header
LB: loop body
LE: loop exit
PB: predicated region body
PF: predicated region fallthrough
CT: control target
= control target key end

     0   :  { %s604_s12 = smov 0   ;;  %s606_s13 = smov 0   ;;  %s650_s0 = inlined_call_operand.vmem [shape: bf16[2,8,8,128], index: 0, kind: input, shape index: {}]   ;;  %s651_s1 = inlined_call_operand.vmem [shape: f32[1,128], index: 1, kind: input, shape index: {}]   ;;  %s652_s2 = inlined_call_operand.vmem [shape: f32[1,128], index: 2, kind: input, shape index: {}]   ;;  %s653_s3 = inlined_call_operand.vmem [shape: bf16[2,8,8,128], index: 3, kind: output, shape index: {}]  }
   0x1   :  { %s608_s14 = smov 0  }
   0x2 LB: > { %s32_s15 = sadd.s32 1, %s578_s13  ;;  %p483_p0 = scmp.ge.s32.totalorder %s582_s14, 1  ;;  %s582_s14 = sphi %s608_s14, %s13_s14   ;;  %s578_s13 = sphi %s606_s13, %s655_s13   ;;  %s574_s12 = sphi %s604_s12, %s654_s12  }
   0x3   : > { %p34_p1 = scmp.ge.s32.totalorder %s32_s15, 2  ;;  %p188_p2 = scmp.lt.s32.totalorder %s582_s14, 3 }
   0x5   : > { %s657_s15 = smov (%p34_p1, %s32_s15), 0  ;;  %p189_p3 = pnand %p483_p0, %p188_p2 }
   0x6   : > { %p233_p4 = scmp.lt.s32.totalorder (!%p189_p3), %s574_s12, 1  ;;  %v488_v0 = vld [vmem:[%s651_s1] ss:$0 sm:$0xff] (!%p189_p3) }
   0x7   : > { %192 = sbr.rel (%p189_p3) target bundleno = 35 (0x23), region = 32  ;;  %v489_v13 = vld [vmem:[%s652_s2] ss:$0 sm:$0xff] (!%p189_p3) }
   0xe   : > { %s659_s12 = smov (!%p233_p4, %s574_s12), 1 }
   0xf   : > { %s492_s16 = sshll.u32 %s659_s12, 5 }
  0x10   : > { %s243_s19 = scalar_lea.vmem %s650_s0, %s492_s16  ;;  %s262_s26 = scalar_lea.vmem %s653_s3, %s492_s16 }
  0x11   : > { %v495_v1 = vld [vmem:[%s243_s19] sm:$0xff]   ;;  %v530_v2 = vld [vmem:[%s243_s19 + $0x8] sm:$0xff]   ;;  %v531_v3 = vld [vmem:[%s243_s19 + $0x10] sm:$0xff]  }
  0x12   : > { %v496_v4 = vunpack.c.l.bf16 %v495_v1  ;;  %v497_v5 = vunpack.c.h.bf16 %v495_v1  ;;  %v500_v6 = vunpack.c.l.bf16 %v530_v2  ;;  %v501_v7 = vunpack.c.h.bf16 %v530_v2  ;;  %v532_v8 = vld [vmem:[%s243_s19 + $0x18] sm:$0xff]  }
  0x13   : > { %v504_v9 = vunpack.c.l.bf16 %v531_v3  ;;  %v505_v10 = vunpack.c.h.bf16 %v531_v3  ;;  %v508_v11 = vunpack.c.l.bf16 %v532_v8  ;;  %v509_v12 = vunpack.c.h.bf16 %v532_v8 }
  0x14   : > { %v287_v14 = vmul.f32 %v496_v4, %v488_v0  ;;  %v288_v15 = vmul.f32 %v497_v5, %v488_v0  ;;  %v289_v16 = vmul.f32 %v500_v6, %v488_v0  ;;  %v290_v17 = vmul.f32 %v501_v7, %v488_v0 }
  0x15   : > { %v291_v18 = vmul.f32 %v504_v9, %v488_v0  ;;  %v292_v19 = vmul.f32 %v505_v10, %v488_v0  ;;  %v293_v20 = vmul.f32 %v508_v11, %v488_v0  ;;  %v294_v21 = vmul.f32 %v509_v12, %v488_v0 }
  0x16   : > { %v302_v22 = vadd.f32 %v489_v13, %v287_v14  ;;  %v303_v23 = vadd.f32 %v489_v13, %v288_v15  ;;  %v304_v24 = vadd.f32 %v489_v13, %v289_v16  ;;  %v305_v25 = vadd.f32 %v489_v13, %v290_v17 }
  0x17   : > { %v306_v26 = vadd.f32 %v489_v13, %v291_v18  ;;  %v307_v27 = vadd.f32 %v489_v13, %v292_v19  ;;  %v308_v28 = vadd.f32 %v489_v13, %v293_v20  ;;  %v309_v29 = vadd.f32 %v489_v13, %v294_v21 }
  0x18   : > { %vm310_vm0 = vcmp.ge.f32.partialorder %v302_v22, 0.0  ;;  %vm311_vm1 = vcmp.ge.f32.partialorder %v303_v23, 0.0  ;;  %v318_v30 = vmul.f32 0.1, %v302_v22  ;;  %v319_v31 = vmul.f32 0.1, %v303_v23 }
  0x19   : > { %vm312_vm2 = vcmp.ge.f32.partialorder %v304_v24, 0.0  ;;  %vm313_vm3 = vcmp.ge.f32.partialorder %v305_v25, 0.0  ;;  %v320_v32 = vmul.f32 0.1, %v304_v24  ;;  %v321_v33 = vmul.f32 0.1, %v305_v25 }
  0x1a   : > { %v326_v34 = vsel %vm310_vm0, %v302_v22, %v318_v30  ;;  %v327_v35 = vsel %vm311_vm1, %v303_v23, %v319_v31  ;;  %vm314_vm4 = vcmp.ge.f32.partialorder %v306_v26, 0.0  ;;  %vm315_vm5 = vcmp.ge.f32.partialorder %v307_v27, 0.0 }
  0x1b   : > { %v513_v36 = vpack.c.bf16 %v327_v35, %v326_v34  ;;  %v328_v37 = vsel %vm312_vm2, %v304_v24, %v320_v32  ;;  %v329_v38 = vsel %vm313_vm3, %v305_v25, %v321_v33  ;;  %v322_v39 = vmul.f32 0.1, %v306_v26 }
  0x1c   : > { %v518_v40 = vpack.c.bf16 %v329_v38, %v328_v37  ;;  %v323_v41 = vmul.f32 0.1, %v307_v27  ;;  %vm316_vm6 = vcmp.ge.f32.partialorder %v308_v28, 0.0  ;;  %vm317_vm7 = vcmp.ge.f32.partialorder %v309_v29, 0.0 }
  0x1d   : > { %514 = vst [vmem:[%s262_s26] sm:$0xff] %v513_v36   ;;  %v330_v42 = vsel %vm314_vm4, %v306_v26, %v322_v39  ;;  %v324_v43 = vmul.f32 0.1, %v308_v28  ;;  %v325_v44 = vmul.f32 0.1, %v309_v29 }
  0x1e   : > { %533 = vst [vmem:[%s262_s26 + $0x8] sm:$0xff] %v518_v40   ;;  %v331_v45 = vsel %vm315_vm5, %v307_v27, %v323_v41 }
  0x1f   : > { %v523_v46 = vpack.c.bf16 %v331_v45, %v330_v42  ;;  %v332_v47 = vsel %vm316_vm6, %v308_v28, %v324_v43  ;;  %v333_v48 = vsel %vm317_vm7, %v309_v29, %v325_v44 }
  0x20   : > { %v528_v49 = vpack.c.bf16 %v333_v48, %v332_v47 }
  0x21   : > { %534 = vst [vmem:[%s262_s26 + $0x10] sm:$0xff] %v523_v46  }
  0x22   : > { %535 = vst [vmem:[%s262_s26 + $0x18] sm:$0xff] %v528_v49  }
  0x23 PF: > { %s13_s14 = sadd.s32 1, %s582_s14   ;;  %s654_s12 = smov %s578_s13 }
  0x24   : > { %p10_p5 = scmp.ge.s32.totalorder %s13_s14, 4   ;;  %s655_s13 = smov %s657_s15 }
  0x26   :  { %12 = sbr.rel (!%p10_p5) target bundleno = 2 (0x2), region = 68 }

// kernel: _lambda_.16
= control target key start
LH: loop header
LB: loop body
LE: loop exit
PB: predicated region body
PF: predicated region fallthrough
CT: control target
= control target key end

     0   :  { %s386_s6 = smov 0   ;;  %s388_s7 = smov 0   ;;  %s419_s0 = inlined_call_operand.vmem [shape: bf16[2,32,256], index: 0, kind: input, shape index: {}]   ;;  %s420_s1 = inlined_call_operand.vmem [shape: bf16[2,16,128], index: 1, kind: output, shape index: {}]  }
   0x1   :  { %s390_s8 = smov 0  }
   0x2 LB: > { %s23_s9 = sadd.s32 1, %s370_s7  ;;  %p319_p0 = scmp.ge.s32.totalorder %s374_s8, 1  ;;  %s374_s8 = sphi %s390_s8, %s11_s8   ;;  %s370_s7 = sphi %s388_s7, %s422_s7   ;;  %s366_s6 = sphi %s386_s6, %s421_s6  }
   0x3   : > { %p25_p1 = scmp.ge.s32.totalorder %s23_s9, 2  ;;  %p109_p2 = scmp.lt.s32.totalorder %s374_s8, 3 }
   0x5   : > { %s424_s9 = smov (%p25_p1, %s23_s9), 0  ;;  %p110_p3 = pnand %p319_p0, %p109_p2 }
   0x6   : > { %p139_p4 = scmp.lt.s32.totalorder (!%p110_p3), %s366_s6, 1 }
   0x7   : > { %113 = sbr.rel (%p110_p3) target bundleno = 33 (0x21), region = 24 }
   0xe   : > { %s426_s6 = smov (!%p139_p4, %s366_s6), 1 }
   0xf   : > { %s326_s10 = sshll.u32 %s426_s6, 5  ;;  %s327_s14 = sshll.u32 %s426_s6, 3 }
  0x10   : > { %s147_s13 = scalar_lea.vmem %s419_s0, %s326_s10  ;;  %s157_s17 = scalar_lea.vmem %s420_s1, %s327_s14 }
  0x11   : > { %v159_v0 = vld [vmem:[%s147_s13] sm:$0x33]  ;;  %v164_v1 = vld [vmem:[%s147_s13] sm:$0xcc]  ;;  %v174_v2 = vld [vmem:[%s147_s13 + $0x8] sm:$0x33] }
  0x12   : > { %v161_v3 = vrot.slane %v159_v0, 4  ;;  %v166_v4 = vrot.slane %v164_v1, 6  ;;  %v176_v5 = vrot.slane %v174_v2, 4  ;;  %v179_v6 = vld [vmem:[%s147_s13 + $0x8] sm:$0xcc] }
  0x13   : > { %v181_v7 = vrot.slane %v179_v6, 6  ;;  %v192_v8 = vld [vmem:[%s147_s13 + $0x10] sm:$0x33]  ;;  %v197_v9 = vld [vmem:[%s147_s13 + $0x10] sm:$0xcc] }
  0x14   : > { %v163_v10 = vmax.bf16 %v161_v3, %v159_v0  ;;  %v167_v11 = vrot.slane %v166_v4, 4  ;;  %v178_v12 = vmax.bf16 %v176_v5, %v174_v2  ;;  %v194_v13 = vrot.slane %v192_v8, 4  ;;  %v207_v14 = vld [vmem:[%s147_s13 + $0x18] sm:$0x33]  ;;  %v212_v15 = vld [vmem:[%s147_s13 + $0x18] sm:$0xcc] }
  0x15   : > { %v182_v16 = vrot.slane %v181_v7, 4  ;;  %v199_v17 = vrot.slane %v197_v9, 6  ;;  %v209_v18 = vrot.slane %v207_v14, 4  ;;  %v214_v19 = vrot.slane %v212_v15, 6 }
  0x16   : > { %v169_v20 = vmax.bf16 %v167_v11, %v163_v10  ;;  %v170_v21 = vrot.slane %v167_v11, 4  ;;  %v196_v22 = vmax.bf16 %v194_v13, %v192_v8 }
  0x17   : > { %v184_v23 = vmax.bf16 %v182_v16, %v178_v12  ;;  %v185_v24 = vrot.slane %v182_v16, 4  ;;  %v200_v25 = vrot.slane %v199_v17, 4  ;;  %v211_v26 = vmax.bf16 %v209_v18, %v207_v14 }
  0x18   : > { %v172_v27 = vmax.bf16 %v170_v21, %v169_v20  ;;  %v215_v28 = vrot.slane %v214_v19, 4 }
  0x19   : > { %v187_v29 = vmax.bf16 %v185_v24, %v184_v23  ;;  %v202_v30 = vmax.bf16 %v200_v25, %v196_v22  ;;  %v203_v31 = vrot.slane %v200_v25, 4 }
  0x1a   : > { %173 = vst [vmem:[%s157_s17] sm:$0x3] %v172_v27  ;;  %v217_v32 = vmax.bf16 %v215_v28, %v211_v26  ;;  %v218_v33 = vrot.slane %v215_v28, 4 }
  0x1b   : > { %v189_v34 = vrot.slane %v187_v29, 6  ;;  %v205_v35 = vmax.bf16 %v203_v31, %v202_v30 }
  0x1c   : > { %v220_v36 = vmax.bf16 %v218_v33, %v217_v32 }
  0x1d   : > { %191 = vst [vmem:[%s157_s17] sm:$0xc] %v189_v34  ;;  %206 = vst [vmem:[%s157_s17 + $0x4] sm:$0x3] %v205_v35 }
  0x1e   : > { %v222_v37 = vrot.slane %v220_v36, 6 }
  0x20   : > { %224 = vst [vmem:[%s157_s17 + $0x4] sm:$0xc] %v222_v37 }
  0x21 PF: > { %s11_s8 = sadd.s32 1, %s374_s8   ;;  %s421_s6 = smov %s370_s7 }
  0x22   : > { %p8_p5 = scmp.ge.s32.totalorder %s11_s8, 4   ;;  %s422_s7 = smov %s424_s9 }
  0x24   :  { %10 = sbr.rel (!%p8_p5) target bundleno = 2 (0x2), region = 54 }

// kernel: _lambda_.15
= control target key start
LH: loop header
LB: loop body
LE: loop exit
PB: predicated region body
PF: predicated region fallthrough
CT: control target
= control target key end

     0   :  { %s591_s12 = smov 0   ;;  %s593_s13 = smov 0   ;;  %s634_s0 = inlined_call_operand.vmem [shape: bf16[2,8,10,128], index: 0, kind: input, shape index: {}]   ;;  %s635_s1 = inlined_call_operand.vmem [shape: f32[1,128], index: 1, kind: input, shape index: {}]   ;;  %s636_s2 = inlined_call_operand.vmem [shape: f32[1,128], index: 2, kind: input, shape index: {}]   ;;  %s637_s3 = inlined_call_operand.vmem [shape: bf16[2,8,8,128], index: 3, kind: output, shape index: {}]  }
   0x1   :  { %s595_s14 = smov 0  }
   0x2 LB: > { %s32_s15 = sadd.s32 1, %s565_s13  ;;  %p489_p0 = scmp.ge.s32.totalorder %s569_s14, 1  ;;  %s569_s14 = sphi %s595_s14, %s13_s14   ;;  %s565_s13 = sphi %s593_s13, %s639_s13   ;;  %s561_s12 = sphi %s591_s12, %s638_s12  }
   0x3   : > { %p34_p1 = scmp.ge.s32.totalorder %s32_s15, 2  ;;  %p189_p2 = scmp.lt.s32.totalorder %s569_s14, 3 }
   0x5   : > { %s641_s15 = smov (%p34_p1, %s32_s15), 0  ;;  %p190_p3 = pnand %p489_p0, %p189_p2 }
   0x6   : > { %p235_p4 = scmp.lt.s32.totalorder (!%p190_p3), %s561_s12, 1  ;;  %v494_v0 = vld [vmem:[%s635_s1] ss:$0 sm:$0xff] (!%p190_p3) }
   0x7   : > { %193 = sbr.rel (%p190_p3) target bundleno = 35 (0x23), region = 32  ;;  %v495_v9 = vld [vmem:[%s636_s2] ss:$0 sm:$0xff] (!%p190_p3) }
   0xe   : > { %s643_s12 = smov (!%p235_p4, %s561_s12), 1 }
   0xf   : > { %s498_s16 = sshll.u32 %s643_s12, 6  ;;  %s499_s24 = sshll.u32 %s643_s12, 5 }
  0x10   : > { %s246_s19 = scalar_lea.vmem %s634_s0, %s498_s16  ;;  %s265_s27 = scalar_lea.vmem %s637_s3, %s499_s24 }
  0x11   : > { %v267_v1 = vld [vmem:[%s246_s19] ss:$8 sps:$4 sm:$0xff]   ;;  %v269_v2 = vld [vmem:[%s246_s19 + $0x10] ss:$8 sps:$4 sm:$0xff]  }
  0x12   : > { %v271_v3 = vld [vmem:[%s246_s19 + $0x20] ss:$8 sps:$4 sm:$0xff]   ;;  %v275_v4 = vunpack.c.l.bf16 %v267_v1  ;;  %v276_v5 = vunpack.c.h.bf16 %v267_v1  ;;  %v277_v6 = vunpack.c.l.bf16 %v269_v2  ;;  %v278_v7 = vunpack.c.h.bf16 %v269_v2  ;;  %v273_v8 = vld [vmem:[%s246_s19 + $0x30] ss:$8 sps:$4 sm:$0xff]  }
  0x13   : > { %v279_v10 = vunpack.c.l.bf16 %v271_v3  ;;  %v280_v11 = vunpack.c.h.bf16 %v271_v3  ;;  %v281_v12 = vunpack.c.l.bf16 %v273_v8  ;;  %v282_v13 = vunpack.c.h.bf16 %v273_v8 }
  0x14   : > { %v290_v14 = vmul.f32 %v494_v0, %v275_v4  ;;  %v291_v15 = vmul.f32 %v494_v0, %v276_v5  ;;  %v292_v16 = vmul.f32 %v494_v0, %v277_v6  ;;  %v293_v17 = vmul.f32 %v494_v0, %v278_v7 }
  0x15   : > { %v294_v18 = vmul.f32 %v494_v0, %v279_v10  ;;  %v295_v19 = vmul.f32 %v494_v0, %v280_v11  ;;  %v296_v20 = vmul.f32 %v494_v0, %v281_v12  ;;  %v297_v21 = vmul.f32 %v494_v0, %v282_v13 }
  0x16   : > { %v305_v22 = vadd.f32 %v495_v9, %v290_v14  ;;  %v306_v23 = vadd.f32 %v495_v9, %v291_v15  ;;  %v307_v24 = vadd.f32 %v495_v9, %v292_v16  ;;  %v308_v25 = vadd.f32 %v495_v9, %v293_v17 }
  0x17   : > { %v309_v26 = vadd.f32 %v495_v9, %v294_v18  ;;  %v310_v27 = vadd.f32 %v495_v9, %v295_v19  ;;  %v311_v28 = vadd.f32 %v495_v9, %v296_v20  ;;  %v312_v29 = vadd.f32 %v495_v9, %v297_v21 }
  0x18   : > { %vm313_vm0 = vcmp.ge.f32.partialorder %v305_v22, 0.0  ;;  %vm314_vm1 = vcmp.ge.f32.partialorder %v306_v23, 0.0  ;;  %v321_v30 = vmul.f32 0.1, %v305_v22  ;;  %v322_v31 = vmul.f32 0.1, %v306_v23 }
  0x19   : > { %vm315_vm2 = vcmp.ge.f32.partialorder %v307_v24, 0.0  ;;  %vm316_vm3 = vcmp.ge.f32.partialorder %v308_v25, 0.0  ;;  %v323_v32 = vmul.f32 0.1, %v307_v24  ;;  %v324_v33 = vmul.f32 0.1, %v308_v25 }
  0x1a   : > { %v329_v34 = vsel %vm313_vm0, %v305_v22, %v321_v30  ;;  %v330_v35 = vsel %vm314_vm1, %v306_v23, %v322_v31  ;;  %vm317_vm4 = vcmp.ge.f32.partialorder %v309_v26, 0.0  ;;  %vm318_vm5 = vcmp.ge.f32.partialorder %v310_v27, 0.0 }
  0x1b   : > { %v503_v36 = vpack.c.bf16 %v330_v35, %v329_v34  ;;  %v331_v37 = vsel %vm315_vm2, %v307_v24, %v323_v32  ;;  %v332_v38 = vsel %vm316_vm3, %v308_v25, %v324_v33  ;;  %v325_v39 = vmul.f32 0.1, %v309_v26 }
  0x1c   : > { %v508_v40 = vpack.c.bf16 %v332_v38, %v331_v37  ;;  %v326_v41 = vmul.f32 0.1, %v310_v27  ;;  %vm319_vm6 = vcmp.ge.f32.partialorder %v311_v28, 0.0  ;;  %vm320_vm7 = vcmp.ge.f32.partialorder %v312_v29, 0.0 }
  0x1d   : > { %504 = vst [vmem:[%s265_s27] sm:$0xff] %v503_v36   ;;  %v333_v42 = vsel %vm317_vm4, %v309_v26, %v325_v39  ;;  %v327_v43 = vmul.f32 0.1, %v311_v28  ;;  %v328_v44 = vmul.f32 0.1, %v312_v29 }
  0x1e   : > { %520 = vst [vmem:[%s265_s27 + $0x8] sm:$0xff] %v508_v40   ;;  %v334_v45 = vsel %vm318_vm5, %v310_v27, %v326_v41 }
  0x1f   : > { %v513_v46 = vpack.c.bf16 %v334_v45, %v333_v42  ;;  %v335_v47 = vsel %vm319_vm6, %v311_v28, %v327_v43  ;;  %v336_v48 = vsel %vm320_vm7, %v312_v29, %v328_v44 }
  0x20   : > { %v518_v49 = vpack.c.bf16 %v336_v48, %v335_v47 }
  0x21   : > { %521 = vst [vmem:[%s265_s27 + $0x10] sm:$0xff] %v513_v46  }
  0x22   : > { %522 = vst [vmem:[%s265_s27 + $0x18] sm:$0xff] %v518_v49  }
  0x23 PF: > { %s13_s14 = sadd.s32 1, %s569_s14   ;;  %s638_s12 = smov %s565_s13 }
  0x24   : > { %p10_p5 = scmp.ge.s32.totalorder %s13_s14, 4   ;;  %s639_s13 = smov %s641_s15 }
  0x26   :  { %12 = sbr.rel (!%p10_p5) target bundleno = 2 (0x2), region = 68 }

// kernel: _lambda_.9
= control target key start
LH: loop header
LB: loop body
LE: loop exit
PB: predicated region body
PF: predicated region fallthrough
CT: control target
= control target key end

     0   :  { %s7989_s12 = smov 0   ;;  %s7991_s13 = smov 0   ;;  %s10029_s0 = inlined_call_operand.vmem [shape: bf16[2,342,4], index: 0, kind: input, shape index: {}]   ;;  %s10030_s1 = inlined_call_operand.vmem [shape: bf16[36,128], index: 1, kind: input, shape index: {}]   ;;  %s10031_s2 = inlined_call_operand.vmem [shape: bf16[2,288,128], index: 2, kind: output, shape index: {0}]   ;;  %s10032_s3 = inlined_call_operand.vmem [shape: f32[2,2,128], index: 3, kind: output, shape index: {1}]  }
   0x1   :  { %s7993_s14 = smov 0  }
   0x2 LB: > { %s23_s15 = sadd.s32 1, %s7963_s13  ;;  %p6338_p0 = scmp.ge.s32.totalorder %s7967_s14, 1  ;;  %s7967_s14 = sphi %s7993_s14, %s14_s14   ;;  %s7963_s13 = sphi %s7991_s13, %s10407_s13   ;;  %s7959_s12 = sphi %s7989_s12, %s10406_s12  }
   0x3   : > { %p24_p1 = scmp.ge.s32.totalorder %s23_s15, 2  ;;  %p165_p2 = scmp.lt.s32.totalorder %s7967_s14, 3 }
   0x5   : > { %s10409_s15 = smov (%p24_p1, %s23_s15), 0  ;;  %p166_p3 = pnand %p6338_p0, %p165_p2 }
   0x7   : > { %169 = sbr.rel (%p166_p3) target bundleno = 608 (0x260), region = 28 }
   0xe   : > { %v264_v0 = vld [vmem:[%s10030_s1] sm:$0x3]  ;;  %vm410_vm0 = vcmask 1041408   ;;  %p203_p4 = scmp.lt.s32.totalorder %s7959_s12, 1  ;;  %v2315_v2 = vld [vmem:[%s10030_s1 + $0x8] sm:$0x3] }
   0xf   : > { %7662 = vmatprep.subr.msk.bf16.mxu1 %vm410_vm0, %v264_v0  ;;  %v412_v1 = vsel %vm410_vm0, %v264_v0, 0  ;;  %7666 = vmatprep.subr.msk.bf16.mxu0 %vm410_vm0, %v2315_v2  ;;  %v8019_v3 = vsel %vm410_vm0, %v2315_v2, 0  ;;  %v7774_v4 = vld [vmem:[%s10030_s1 + $0x8] ss:$0 sps:$4 sm:$0xcc]   ;;  %vm355_vm1 = vcmask 31744  }
  0x10   : > { %7031 = vmatpush3.bf16.msra.mxu1 %v412_v1  ;;  %s10411_s12 = smov (!%p203_p4, %s7959_s12), 1  ;;  %7183 = vmatpush3.bf16.msra.mxu0 %v8019_v3  ;;  %v7778_v5 = vld [vmem:[%s10030_s1] ss:$0 sps:$4 sm:$0xcc]   ;;  %v3094_v6 = vrot.slane %v7774_v4, 2  ;;  %vm3053_vm3 = vcmask 1045504  }
  0x11   : > { %s7672_s24 = smul.u32 172, %s10411_s12  ;;  %v910_v7 = vrot.slane %v7778_v5, 2  ;;  %vm2409_vm2 = vsmask.f32 6400  ;;  %v8040_v9 = vld [vmem:[%s10030_s1 + $0x4] sm:$0x3] }
  0x12   : > { %7668 = vmatprep.subr.msk.bf16.mxu0 %vm410_vm0, %v3094_v6  ;;  %v3150_v20 = vsel %vm410_vm0, %v3094_v6, 0  ;;  %v8065_v42 = vld [vmem:[%s10030_s1 + $0xc] sm:$0x3]  ;;  %vm758_vm4 = vsmask.f32 7424  ;;  %vm1384_vm5 = vcmask 1046528  }
  0x13   : > { %s8032_s27 = scalar_lea.vmem %s10029_s0, %s7672_s24  ;;  %7663 = vmatprep.subr.msk.bf16.mxu1 %vm410_vm0, %v910_v7  ;;  %v966_v11 = vsel %vm410_vm0, %v910_v7, 0  ;;  %vm4078_vm6 = vsmask.f32 5376  ;;  %vm4726_vm7 = vcmask 1044480   ;;  %s7673_s17 = smul.u32 144, %s10411_s12 }
  0x14   : > { %v7770_v8 = vld [vmem:[%s8032_s27] sm:$0xff]   ;;  %v7771_v10 = vld [vmem:[%s8032_s27 + $0x8] sm:$0xff]   ;;  %v7773_v13 = vld [vmem:[%s8032_s27 + $0x10] sm:$0xff]   ;;  %s6341_s21 = sshll.u32 %s10411_s12, 1 }
  0x15   : > { %7032 = vmatprep.mubr.msk.bf16.mxu1 %vm355_vm1, %v7770_v8  ;;  %v7772_v12 = vld [vmem:[%s8032_s27 + $0x8] sm:$0xfe]   ;;  %v7775_v14 = vld [vmem:[%s8032_s27 + $0x10] sm:$0xff]   ;;  %v2419_v17 = vshrl.u32 %v7773_v13, 16  ;;  %v2422_v18 = vshll.u32 %v7773_v13, 16  ;;  %v7776_v19 = vld [vmem:[%s8032_s27 + $0x18] sm:$0xff]   ;;  %s9424_s20 = scalar_lea.vmem %s10031_s2, %s7673_s17  ;;  %s226_s24 = scalar_lea.vmem %s10032_s3, %s6341_s21 }
  0x16   : > { %7033 = vmatmul.mubr.msk.bf16.vlgmr.msra.gmra.mrb[0].mxu1 %vm355_vm1, %v7771_v10  ;;  %v2411_v15 = vshrl.u32 %v7772_v12, 16  ;;  %v2414_v16 = vshll.u32 %v7772_v12, 16  ;;  %v2428_v25 = vshrl.u32 %v7776_v19, 16  ;;  %v2431_v26 = vshll.u32 %v7776_v19, 16  ;;  %v7777_v27 = vld [vmem:[%s8032_s27 + $0x18] sm:$0xff]   ;;  %v7779_v28 = vld [vmem:[%s8032_s27 + $0x20] sm:$0xff]  }
  0x17   : > { %7069 = vmatpush3.bf16.msra.mxu1 %v966_v11  ;;  %7036 = vmatprep.mubr.msk.bf16.mxu1 %vm355_vm1, %v7775_v14  ;;  %v2421_v23 = vrot.slane %v2419_v17, 1  ;;  %v2424_v24 = vrot.slane %v2422_v18, 2  ;;  %v2437_v33 = vshrl.u32 %v7779_v28, 16  ;;  %v2440_v34 = vshll.u32 %v7779_v28, 16  ;;  %v7780_v35 = vld [vmem:[%s8032_s27 + $0x20] sm:$0xff]   ;;  %v7781_v36 = vld [vmem:[%s8032_s27 + $0x28] sm:$0xff]  }
  0x18   : > { %7664 = vmatprep.subr.msk.bf16.mxu1 %vm410_vm0, %v8040_v9  ;;  %v2413_v21 = vrot.slane %v2411_v15, 1  ;;  %v2416_v22 = vrot.slane %v2414_v16, 2  ;;  %v2430_v31 = vrot.slane %v2428_v25, 1  ;;  %v2433_v32 = vrot.slane %v2431_v26, 2  ;;  %v7782_v44 = vld [vmem:[%s8032_s27 + $0x28] sm:$0xff]   ;;  %v7783_v45 = vld [vmem:[%s8032_s27 + $0x30] sm:$0xff]  }
  0x19   : > { %v2425_v30 = vor.u32 %v2424_v24, %v2421_v23  ;;  %v2439_v39 = vrot.slane %v2437_v33, 1  ;;  %v2442_v40 = vrot.slane %v2440_v34, 2  ;;  %v2446_v41 = vshrl.u32 %v7781_v36, 16  ;;  %v7784_v49 = vld [vmem:[%s8032_s27 + $0x30] sm:$0xff]   ;;  %v7785_v53 = vld [vmem:[%s8032_s27 + $0x38] sm:$0xff]   ;;  %v7787_v60 = vld [vmem:[%s8032_s27 + $0x40] sm:$0xff]  }
  0x1a   : > { %v2417_v29 = vor.u32 %v2416_v22, %v2413_v21  ;;  %v2434_v38 = vor.u32 %v2433_v32, %v2430_v31  ;;  %v2449_v43 = vshll.u32 %v7781_v36, 16  ;;  %v2455_v51 = vshrl.u32 %v7783_v45, 16  ;;  %v7789_v4 = vld [vmem:[%s8032_s27 + $0x48] sm:$0xff]   ;;  %v7786_v6 = vld [vmem:[%s8032_s27 + $0x38] sm:$0xff]   ;;  %v7791_v10 = vld [vmem:[%s8032_s27 + $0x50] sm:$0xff]  }
  0x1b   : > { %v2443_v47 = vor.u32 %v2442_v40, %v2439_v39  ;;  %v2448_v48 = vrot.slane %v2446_v41, 1  ;;  %v2458_v52 = vshll.u32 %v7783_v45, 16  ;;  %v2464_v58 = vshrl.u32 %v7785_v53, 16  ;;  %v7788_v14 = vld [vmem:[%s8032_s27 + $0x40] sm:$0xff]   ;;  %v7790_v25 = vld [vmem:[%s8032_s27 + $0x48] sm:$0xff]   ;;  %v7792_v26 = vld [vmem:[%s8032_s27 + $0x50] sm:$0xff]  }
  0x1c   : > { %v2426_v37 = vsel %vm2409_vm2, %v2417_v29, %v2425_v30  ;;  %v2435_v46 = vsel %vm2409_vm2, %v2425_v30, %v2434_v38  ;;  %v2451_v50 = vrot.slane %v2449_v43, 2  ;;  %v2457_v56 = vrot.slane %v2455_v51, 1  ;;  %v7796_v31 = vld [vmem:[%s8032_s27 + $0x10] sm:$0xff]   ;;  %v7795_v36 = vld [vmem:[%s8032_s27 + $0x8] sm:$0xfc]   ;;  %v7797_v39 = vld [vmem:[%s8032_s27 + $0x60] sm:$0xff]  }
  0x1d   : > { %7184 = vmatprep.mubr.msk.bf16.mxu0 %vm355_vm1, %v2426_v37  ;;  %v2444_v54 = vsel %vm2409_vm2, %v2434_v38, %v2443_v47  ;;  %v2460_v57 = vrot.slane %v2458_v52, 2  ;;  %v2467_v59 = vshll.u32 %v7785_v53, 16  ;;  %v2466_v62 = vrot.slane %v2464_v58, 1  ;;  %v7794_v37 = vld [vmem:[%s8032_s27 + $0x58] sm:$0xff]   ;;  %v7809_v52 = vld [vmem:[%s8032_s27] sm:$0xff]   ;;  %v7802_v53 = vld [vmem:[%s8032_s27 + $0x28] sm:$0xff]  }
  0x1e   : > { %7037 = vmatmul.mubr.msk.bf16.gmra.mrb[4].mxu1 %vm355_vm1, %v7777_v27  ;;  %7185 = vmatmul.mubr.msk.bf16.vlgmr.msra.gmra.mrb[0].mxu0 %vm355_vm1, %v2435_v46  ;;  %v2452_v55 = vor.u32 %v2451_v50, %v2448_v48  ;;  %v2473_v1 = vshrl.u32 %v7787_v60, 16  ;;  %v2476_v2 = vshll.u32 %v7787_v60, 16  ;;  %v2482_v11 = vshrl.u32 %v7789_v4, 16  ;;  %v7800_v46 = vld [vmem:[%s8032_s27 + $0x20] sm:$0xff]   ;;  %v7799_v48 = vld [vmem:[%s8032_s27 + $0x68] sm:$0xff]   ;;  %v7801_v50 = vld [vmem:[%s8032_s27 + $0x70] sm:$0xff]  }
  0x1f   : > { %7040 = vmatprep.mubr.msk.bf16.mxu1 %vm355_vm1, %v7780_v35  ;;  %7221 = vmatpush3.bf16.msra.mxu0 %v3150_v20  ;;  %v2461_v61 = vor.u32 %v2460_v57, %v2457_v56  ;;  %v2469_v0 = vrot.slane %v2467_v59, 2  ;;  %v2485_v12 = vshll.u32 %v7789_v4, 16  ;;  %v2491_v16 = vshrl.u32 %v7791_v10, 16  ;;  %v7793_v20 = vld [vmem:[%s8032_s27 + $0x58] sm:$0xff]   ;;  %v7810_v56 = vld [vmem:[%s8032_s27 + $0x8] sm:$0xff]   ;;  %v7804_v59 = vld [vmem:[%s8032_s27 + $0x30] sm:$0xff]  }
  0x20   : > { %7188 = vmatprep.mubr.msk.bf16.mxu0 %vm355_vm1, %v2444_v54  ;;  %7669 = vmatprep.subr.msk.bf16.mxu0 %vm410_vm0, %v8065_v42  ;;  %v2453_v63 = vsel %vm2409_vm2, %v2443_v47, %v2452_v55  ;;  %v2475_v7 = vrot.slane %v2473_v1, 1  ;;  %v2478_v8 = vrot.slane %v2476_v2, 2  ;;  %v2494_v17 = vshll.u32 %v7791_v10, 16  ;;  %v8119_v47 = vld [vmem:[%s10030_s1 + $0xc] ss:$0 sps:$4 sm:$0xcc]  }
  0x21   : > { %v2462_v5 = vsel %vm2409_vm2, %v2452_v55, %v2461_v61  ;;  %v2470_v13 = vor.u32 %v2469_v0, %v2466_v62  ;;  %v2484_v18 = vrot.slane %v2482_v11, 1  ;;  %v2487_v19 = vrot.slane %v2485_v12, 2  ;;  %v7803_v62 = vld [vmem:[%s8032_s27 + $0x78] sm:$0xff]  }
  0x22   : > { %v2479_v15 = vor.u32 %v2478_v8, %v2475_v7  ;;  %v2493_v23 = vrot.slane %v2491_v16, 1  ;;  %v2496_v24 = vrot.slane %v2494_v17, 2  ;;  %v2500_v28 = vshrl.u32 %v7793_v20, 16  ;;  %v7806_v4 = vld [vmem:[%s8032_s27 + $0x38] sm:$0xff]   ;;  %v7808_v7 = vld [vmem:[%s8032_s27 + $0x40] sm:$0xff]  }
  0x23   : > { %v2471_v21 = vsel %vm2409_vm2, %v2461_v61, %v2470_v13  ;;  %v2488_v27 = vor.u32 %v2487_v19, %v2484_v18  ;;  %v2503_v29 = vshll.u32 %v7793_v20, 16  ;;  %v3054_v40 = vrot.slane %v7795_v36, 2  ;;  %v7814_v10 = vld [vmem:[%s8032_s27 + $0x18] sm:$0xff]  }
  0x24   : > { %v2480_v22 = vsel %vm2409_vm2, %v2470_v13, %v2479_v15  ;;  %v2497_v30 = vor.u32 %v2496_v24, %v2493_v23  ;;  %v2502_v33 = vrot.slane %v2500_v28, 1  ;;  %v3055_v41 = vrot.slane %v7796_v31, 2  ;;  %v7807_v13 = vld [vmem:[%s8032_s27 + $0x88] sm:$0xff]   ;;  %v7816_v23 = vld [vmem:[%s8032_s27 + $0x20] sm:$0xff]  }
  0x25   : > { %v2489_v32 = vsel %vm2409_vm2, %v2479_v15, %v2488_v27  ;;  %v2505_v34 = vrot.slane %v2503_v29, 2  ;;  %v3059_v51 = vrot.slane %v7800_v46, 2  ;;  %v3660_v55 = vsel %vm410_vm0, %v8065_v42, 0  ;;  %v7805_v42 = vld [vmem:[%s8032_s27 + $0x80] sm:$0xff]  }
  0x26   : > { %7041 = vmatmul.mubr.msk.bf16.gmra.mrb[8].mxu1 %vm355_vm1, %v7782_v44  ;;  %7189 = vmatmul.mubr.msk.bf16.gmra.mrb[4].mxu0 %vm355_vm1, %v2453_v63  ;;  %v2498_v35 = vsel %vm2409_vm2, %v2488_v27, %v2497_v30  ;;  %v7798_v44 = vld [vmem:[%s8032_s27 + $0x18] sm:$0xff]   ;;  %v3056_v45 = vsel %vm3053_vm3, %v3054_v40, %v3055_v41  ;;  %v4252_v57 = vrot.slane %v8119_v47, 2  ;;  %v762_v60 = vshll.u32 %v7809_v52, 16 }
  0x27   : > { %7044 = vmatprep.mubr.msk.bf16.mxu1 %vm355_vm1, %v7784_v49  ;;  %7192 = vmatprep.mubr.msk.bf16.mxu0 %vm355_vm1, %v2462_v5  ;;  %v8106_v38 = vor.u32 %v2505_v34, %v2502_v33  ;;  %v3057_v49 = vrot.slane %v7798_v44, 2  ;;  %v3061_v61 = vrot.slane %v7802_v53, 2  ;;  %v767_v63 = vshll.u32 %v7810_v56, 16  ;;  %v7812_v5 = vld [vmem:[%s8032_s27 + $0x10] sm:$0xff]  }
  0x28   : > { %v3063_v0 = vrot.slane %v7804_v59, 2  ;;  %v760_v1 = vshrl.u32 %v7809_v52, 16  ;;  %v764_v2 = vrot.slane %v762_v60, 1  ;;  %v3065_v15 = vrot.slane %v7806_v4, 2  ;;  %v7820_v44 = vld [vmem:[%s8032_s27 + $0x30] sm:$0xff]  }
  0x29   : > { %v2507_v43 = vsel %vm2409_vm2, %v2497_v30, %v8106_v38  ;;  %v3058_v54 = vsel %vm3053_vm3, %v3055_v41, %v3057_v49  ;;  %v3060_v58 = vsel %vm3053_vm3, %v3057_v49, %v3059_v51  ;;  %v769_v8 = vrot.slane %v767_v63, 1  ;;  %v7818_v30 = vld [vmem:[%s8032_s27 + $0x28] sm:$0xff]   ;;  %v7815_v41 = vld [vmem:[%s8032_s27 + $0x58] sm:$0xff]   ;;  %v7824_v63 = vld [vmem:[%s8032_s27 + $0x40] sm:$0xff]  }
  0x2a   : > { %v3064_v11 = vsel %vm3053_vm3, %v3061_v61, %v3063_v0  ;;  %v765_v12 = vor.u32 %v764_v2, %v760_v1  ;;  %v771_v16 = vshrl.u32 %v7810_v56, 16  ;;  %v3067_v17 = vrot.slane %v7808_v7, 2 }
  0x2b   : > { %v779_v19 = vshrl.u32 %v7812_v5, 16  ;;  %v783_v20 = vshll.u32 %v7814_v10, 16  ;;  %v3066_v24 = vsel %vm3053_vm3, %v3063_v0, %v3065_v15  ;;  %v1477_v31 = vsel %vm410_vm0, %v8040_v9, 0  ;;  %v7817_v9 = vld [vmem:[%s8032_s27 + $0x60] sm:$0xff]  }
  0x2c   : > { %v770_v18 = vsel %vm758_vm4, %v765_v12, %v769_v8  ;;  %v3068_v27 = vsel %vm3053_vm3, %v3065_v15, %v3067_v17  ;;  %v791_v33 = vshll.u32 %v7816_v23, 16  ;;  %v787_v36 = vshrl.u32 %v7814_v10, 16  ;;  %v7823_v12 = vld [vmem:[%s8032_s27 + $0x78] sm:$0xff]  }
  0x2d   : > { %v785_v29 = vrot.slane %v783_v20, 1  ;;  %v799_v40 = vshll.u32 %v7818_v30, 16  ;;  %v3073_v52 = vrot.slane %v7815_v41, 2  ;;  %v3075_v53 = vrot.slane %v7817_v9, 2 }
  0x2e   : > { %7045 = vmatmul.mubr.msk.bf16.gmra.mrb[12].mxu1 %vm355_vm1, %v7786_v6  ;;  %7193 = vmatmul.mubr.msk.bf16.gmra.mrb[8].mxu0 %vm355_vm1, %v2471_v21  ;;  %v3062_v6 = vsel %vm3053_vm3, %v3059_v51, %v3061_v61  ;;  %v7811_v21 = vld [vmem:[%s8032_s27 + $0x48] sm:$0xff]   ;;  %v803_v56 = vshrl.u32 %v7818_v30, 16  ;;  %v823_v10 = vshll.u32 %v7824_v63, 16  ;;  %v827_v15 = vshrl.u32 %v7824_v63, 16 }
  0x2f   : > { %7048 = vmatprep.mubr.msk.bf16.mxu1 %vm355_vm1, %v7788_v14  ;;  %7196 = vmatprep.mubr.msk.bf16.mxu0 %vm355_vm1, %v2480_v22  ;;  %v775_v14 = vshll.u32 %v7812_v5, 16  ;;  %v789_v46 = vor.u32 %v787_v36, %v785_v29  ;;  %v801_v51 = vrot.slane %v799_v40, 1  ;;  %v7819_v61 = vld [vmem:[%s8032_s27 + $0x68] sm:$0xff]   ;;  %v3076_v2 = vsel %vm3053_vm3, %v3073_v52, %v3075_v53 }
  0x30   : > { %v3077_v7 = vrot.slane %v7819_v61, 2  ;;  %v7827_v36 = vld [vmem:[%s8032_s27 + $0x88] sm:$0xff]  }
  0x31   : > { %v777_v22 = vrot.slane %v775_v14, 1  ;;  %v805_v1 = vor.u32 %v803_v56, %v801_v51 }
  0x32   : > { %v3078_v20 = vsel %vm3053_vm3, %v3075_v53, %v3077_v7 }
  0x33   : > { %v781_v28 = vor.u32 %v779_v19, %v777_v22  ;;  %v7828_v19 = vld [vmem:[%s8032_s27 + $0x50] sm:$0xff]  }
  0x36   : > { %7049 = vmatmul.mubr.msk.bf16.gmra.mrb[16].mxu1 %vm355_vm1, %v7790_v25  ;;  %7197 = vmatmul.mubr.msk.bf16.gmra.mrb[12].mxu0 %vm355_vm1, %v2489_v32  ;;  %v773_v25 = vor.u32 %v771_v16, %v769_v8  ;;  %v3069_v32 = vrot.slane %v7811_v21, 2 }
  0x37   : > { %7052 = vmatprep.mubr.msk.bf16.mxu1 %vm355_vm1, %v7792_v26  ;;  %7200 = vmatprep.mubr.msk.bf16.mxu0 %vm355_vm1, %v2498_v35  ;;  %v7813_v26 = vld [vmem:[%s8032_s27 + $0x50] sm:$0xff]  }
  0x38   : > { %v778_v34 = vsel %vm758_vm4, %v773_v25, %v777_v22  ;;  %v3071_v35 = vrot.slane %v7813_v26, 2  ;;  %v7830_v25 = vld [vmem:[%s8032_s27 + $0x58] sm:$0xff]   ;;  %v3081_v26 = vrot.slane %v7823_v12, 2 }
  0x3a   : > { %v3072_v49 = vsel %vm3053_vm3, %v3069_v32, %v3071_v35  ;;  %v3074_v0 = vsel %vm3053_vm3, %v3071_v35, %v3073_v52  ;;  %v851_v52 = vshrl.u32 %v7830_v25, 16 }
  0x3e   : > { %7053 = vmatmul.mubr.msk.bf16.gmra.mrb[20].mxu1 %vm355_vm1, %v7794_v37  ;;  %7201 = vmatmul.mubr.msk.bf16.gmra.mrb[16].mxu0 %vm355_vm1, %v2507_v43  ;;  %v786_v37 = vsel %vm758_vm4, %v781_v28, %v785_v29  ;;  %v793_v43 = vrot.slane %v791_v33, 1  ;;  %v839_v28 = vshll.u32 %v7828_v19, 16  ;;  %v8205_v29 = vld [vmem:[%s10030_s1 + $0x4] ss:$0 sps:$4 sm:$0xcc]  }
  0x3f   : > { %7056 = vmatprep.mubr.msk.bf16.mxu1 %vm355_vm1, %v7797_v39  ;;  %7222 = vmatprep.mubr.msk.bf16.mxu0 %vm355_vm1, %v3056_v45  ;;  %v795_v39 = vshrl.u32 %v7816_v23, 16  ;;  %v3070_v45 = vsel %vm3053_vm3, %v3067_v17, %v3069_v32  ;;  %v7825_v17 = vld [vmem:[%s8032_s27 + $0x80] sm:$0xff]   ;;  %v843_v32 = vshrl.u32 %v7828_v19, 16  ;;  %v1935_v35 = vrot.slane %v8205_v29, 2  ;;  %v7944_v29 = vld [vmem:[%s10030_s1 + $0x8] sm:$0x3] }
  0x46   : > { %7057 = vmatmul.mubr.msk.bf16.gmra.mrb[24].mxu1 %vm355_vm1, %v7799_v48  ;;  %7223 = vmatmul.mubr.msk.bf16.vlgmr.msra.gmra.mrb[0].mxu0 %vm355_vm1, %v3058_v54  ;;  %v7822_v48 = vld [vmem:[%s8032_s27 + $0x38] sm:$0xff]   ;;  %v807_v54 = vshll.u32 %v7820_v44, 16 }
  0x47   : > { %7060 = vmatprep.mubr.msk.bf16.mxu1 %vm355_vm1, %v7801_v50  ;;  %7259 = vmatpush3.bf16.msra.mxu0 %v3660_v55  ;;  %v797_v50 = vor.u32 %v795_v39, %v793_v43  ;;  %v794_v55 = vsel %vm758_vm4, %v789_v46, %v793_v43  ;;  %v815_v59 = vshll.u32 %v7822_v48, 16  ;;  %v7832_v39 = vld [vmem:[%s8032_s27 + $0x60] sm:$0xff]   ;;  %v7829_v43 = vld [vmem:[%s8032_s27 + $0x90] sm:$0xff]   ;;  %v7836_v46 = vld [vmem:[%s8032_s27 + $0x68] sm:$0xff]  }
  0x48   : > { %7226 = vmatprep.mubr.msk.bf16.mxu0 %vm355_vm1, %v3060_v58  ;;  %7670 = vmatprep.subr.msk.bf16.mxu0 %vm410_vm0, %v4252_v57  ;;  %v811_v58 = vshrl.u32 %v7820_v44, 16  ;;  %v863_v56 = vshll.u32 %v7836_v46, 16 }
  0x49   : > { %v802_v60 = vsel %vm758_vm4, %v797_v50, %v801_v51  ;;  %v817_v5 = vrot.slane %v815_v59, 1  ;;  %v3087_v51 = vrot.slane %v7829_v43, 2 }
  0x4e   : > { %7061 = vmatmul.mubr.msk.bf16.gmra.mrb[28].mxu1 %vm355_vm1, %v7803_v62  ;;  %7227 = vmatmul.mubr.msk.bf16.gmra.mrb[4].mxu0 %vm355_vm1, %v3062_v6  ;;  %v7821_v62 = vld [vmem:[%s8032_s27 + $0x70] sm:$0xff]   ;;  %v7826_v6 = vld [vmem:[%s8032_s27 + $0x48] sm:$0xff]  }
  0x4f   : > { %7064 = vmatprep.mubr.msk.bf16.mxu1 %vm355_vm1, %v7805_v42  ;;  %7230 = vmatprep.mubr.msk.bf16.mxu0 %vm355_vm1, %v3064_v11  ;;  %v809_v42 = vrot.slane %v807_v54, 1  ;;  %v3079_v8 = vrot.slane %v7821_v62, 2  ;;  %v831_v16 = vshll.u32 %v7826_v6, 16  ;;  %v7831_v54 = vld [vmem:[%s8032_s27 + $0x98] ss:$0 sps:$4 sm:$0x33]  }
  0x51   : > { %v813_v4 = vor.u32 %v811_v58, %v809_v42  ;;  %v810_v11 = vsel %vm758_vm4, %v805_v1, %v809_v42  ;;  %v3080_v22 = vsel %vm3053_vm3, %v3077_v7, %v3079_v8  ;;  %v3082_v40 = vsel %vm3053_vm3, %v3079_v8, %v3081_v26  ;;  %v7834_v58 = vld [vmem:[%s8032_s27 + $0x18] sm:$0xff]   ;;  %v7833_v42 = vld [vmem:[%s8032_s27 + $0x10] sm:$0xfc]  }
  0x52   : > { %v865_v1 = vrot.slane %v863_v56, 1  ;;  %v3569_v7 = vrot.slane %v7834_v58, 2  ;;  %v867_v8 = vshrl.u32 %v7836_v46, 16  ;;  %v7847_v58 = vld [vmem:[%s8032_s27 + $0x48] sm:$0xff]  }
  0x53   : > { %v818_v14 = vsel %vm758_vm4, %v813_v4, %v817_v5  ;;  %v3089_v4 = vrot.slane %v7831_v54, 2  ;;  %v7845_v54 = vld [vmem:[%s8032_s27 + $0x40] sm:$0xff]  }
  0x56   : > { %7065 = vmatmul.mubr.msk.bf16.gmra.mrb[32].mxu1 %vm355_vm1, %v7807_v13  ;;  %7231 = vmatmul.mubr.msk.bf16.gmra.mrb[8].mxu0 %vm355_vm1, %v3066_v24  ;;  %v819_v13 = vshrl.u32 %v7822_v48, 16  ;;  %v833_v24 = vrot.slane %v831_v16, 1  ;;  %v3085_v48 = vrot.slane %v7827_v36, 2  ;;  %v3090_v16 = vsel %vm3053_vm3, %v3087_v51, %v3089_v4  ;;  %v7846_v36 = vld [vmem:[%s8032_s27 + $0x90] ss:$0 sps:$4 sm:$0x11]  }
  0x57   : > { %7070 = vmatprep.mubr.msk.bf16.mxu1 %vm355_vm1, %v770_v18  ;;  %7234 = vmatprep.mubr.msk.bf16.mxu0 %vm355_vm1, %v3068_v27  ;;  %v825_v18 = vrot.slane %v823_v10, 1  ;;  %v3083_v27 = vrot.slane %v7825_v17, 2  ;;  %v3568_v10 = vrot.slane %v7833_v42, 2  ;;  %v7837_v17 = vld [vmem:[%s8032_s27 + $0x20] sm:$0xff]  }
  0x58   : > { %v821_v21 = vor.u32 %v819_v13, %v817_v5  ;;  %v3088_v63 = vsel %vm3053_vm3, %v3085_v48, %v3087_v51 }
  0x59   : > { %v829_v23 = vor.u32 %v827_v15, %v825_v18  ;;  %v3084_v9 = vsel %vm3053_vm3, %v3081_v26, %v3083_v27  ;;  %v3086_v61 = vsel %vm3053_vm3, %v3083_v27, %v3085_v48  ;;  %v7842_v15 = vld [vmem:[%s8032_s27 + $0x80] sm:$0xff]   ;;  %v3570_v19 = vsel %vm3053_vm3, %v3568_v10, %v3569_v7 }
  0x5a   : > { %v826_v30 = vsel %vm758_vm4, %v821_v21, %v825_v18  ;;  %v869_v18 = vor.u32 %v867_v8, %v865_v1 }
  0x5b   : > { %v834_v33 = vsel %vm758_vm4, %v829_v23, %v833_v24  ;;  %v7844_v23 = vld [vmem:[%s8032_s27 + $0x88] sm:$0xff]  }
  0x5c   : > { %v899_v48 = vshrl.u32 %v7844_v23, 16 }
  0x5e   : > { %7071 = vmatmul.mubr.msk.bf16.vlgmr.msra.gmra.mrb[0].mxu1 %vm355_vm1, %v778_v34  ;;  %7235 = vmatmul.mubr.msk.bf16.gmra.mrb[12].mxu0 %vm355_vm1, %v3070_v45  ;;  %v847_v34 = vshll.u32 %v7830_v25, 16  ;;  %v3571_v25 = vrot.slane %v7837_v17, 2  ;;  %v1991_v17 = vsel %vm410_vm0, %v1935_v35, 0 }
  0x5f   : > { %7074 = vmatprep.mubr.msk.bf16.mxu1 %vm355_vm1, %v786_v37  ;;  %7107 = vmatpush3.bf16.msra.mxu1 %v1477_v31  ;;  %v835_v31 = vshrl.u32 %v7826_v6, 16  ;;  %v841_v37 = vrot.slane %v839_v28, 1 }
  0x60   : > { %7238 = vmatprep.mubr.msk.bf16.mxu0 %vm355_vm1, %v3072_v49  ;;  %7665 = vmatprep.subr.msk.bf16.mxu1 %vm410_vm0, %v1935_v35  ;;  %v849_v45 = vrot.slane %v847_v34, 1  ;;  %v855_v49 = vshll.u32 %v7832_v39, 16 }
  0x61   : > { %v837_v41 = vor.u32 %v835_v31, %v833_v24  ;;  %v845_v44 = vor.u32 %v843_v32, %v841_v37  ;;  %v887_v24 = vshll.u32 %v7842_v15, 16  ;;  %v891_v31 = vshrl.u32 %v7842_v15, 16 }
  0x62   : > { %v857_v59 = vrot.slane %v855_v49, 1  ;;  %v853_v62 = vor.u32 %v851_v52, %v849_v45  ;;  %v895_v32 = vshll.u32 %v7844_v23, 16  ;;  %v903_v49 = vshll.u32 %v7846_v36, 16  ;;  %v7848_v52 = vld [vmem:[%s8032_s27] sm:$0xfe]  }
  0x63   : > { %v842_v50 = vsel %vm758_vm4, %v837_v41, %v841_v37  ;;  %v850_v53 = vsel %vm758_vm4, %v845_v44, %v849_v45  ;;  %v889_v34 = vrot.slane %v887_v24, 1  ;;  %v3572_v37 = vsel %vm3053_vm3, %v3569_v7, %v3571_v25  ;;  %v8264_v45 = vld [vmem:[%s10030_s1 + $0x10] sm:$0x3]  ;;  %v7852_v7 = vld [vmem:[%s8032_s27 + $0x58] sm:$0xff]  }
  0x64   : > { %v858_v6 = vsel %vm758_vm4, %v853_v62, %v857_v59  ;;  %v4308_v41 = vsel %vm410_vm0, %v4252_v57, 0  ;;  %v897_v44 = vrot.slane %v895_v32, 1  ;;  %v905_v56 = vrot.slane %v903_v49, 1 }
  0x65   : > { %v3579_v62 = vrot.slane %v7845_v54, 2 }
  0x66   : > { %7075 = vmatmul.mubr.msk.bf16.gmra.mrb[4].mxu1 %vm355_vm1, %v794_v55  ;;  %7239 = vmatmul.mubr.msk.bf16.gmra.mrb[16].mxu0 %vm355_vm1, %v3074_v0  ;;  %v859_v55 = vshrl.u32 %v7832_v39, 16 }
  0x67   : > { %7078 = vmatprep.mubr.msk.bf16.mxu1 %vm355_vm1, %v802_v60  ;;  %7242 = vmatprep.mubr.msk.bf16.mxu0 %vm355_vm1, %v3076_v2  ;;  %v7838_v60 = vld [vmem:[%s8032_s27 + $0x70] sm:$0xff]   ;;  %v7840_v2 = vld [vmem:[%s8032_s27 + $0x78] sm:$0xff]  }
  0x68   : > { %v861_v0 = vor.u32 %v859_v55, %v857_v59  ;;  %v871_v5 = vshll.u32 %v7838_v60, 16  ;;  %v875_v12 = vshrl.u32 %v7838_v60, 16  ;;  %v879_v13 = vshll.u32 %v7840_v2, 16 }
  0x69   : > { %v883_v27 = vshrl.u32 %v7840_v2, 16  ;;  %v901_v55 = vor.u32 %v899_v48, %v897_v44  ;;  %v1385_v60 = vrot.slane %v7848_v52, 1  ;;  %v7853_v2 = vld [vmem:[%s8032_s27 + $0x18] sm:$0xff]   ;;  %v7865_v48 = vld [vmem:[%s8032_s27 + $0x88] sm:$0xff]  }
  0x6a   : > { %v1390_v10 = vrot.slane %v7853_v2, 1  ;;  %v3597_v54 = vrot.slane %v7865_v48, 2 }
  0x6b   : > { %v906_v42 = vsel %vm758_vm4, %v901_v55, %v905_v56  ;;  %v7867_v56 = vld [vmem:[%s8032_s27 + $0x90] sm:$0xff]  }
  0x6e   : > { %7079 = vmatmul.mubr.msk.bf16.gmra.mrb[8].mxu1 %vm355_vm1, %v810_v11  ;;  %7243 = vmatmul.mubr.msk.bf16.gmra.mrb[20].mxu0 %vm355_vm1, %v3078_v20  ;;  %v866_v11 = vsel %vm758_vm4, %v861_v0, %v865_v1  ;;  %v7839_v20 = vld [vmem:[%s8032_s27 + $0x28] sm:$0xff]   ;;  %v3581_v0 = vrot.slane %v7847_v58, 2 }
  0x6f   : > { %7082 = vmatprep.mubr.msk.bf16.mxu1 %vm355_vm1, %v818_v14  ;;  %7246 = vmatprep.mubr.msk.bf16.mxu0 %vm355_vm1, %v3080_v22  ;;  %v873_v14 = vrot.slane %v871_v5, 1  ;;  %v881_v22 = vrot.slane %v879_v13, 1  ;;  %v3573_v28 = vrot.slane %v7839_v20, 2  ;;  %v7850_v5 = vld [vmem:[%s8032_s27 + $0x50] sm:$0xff]   ;;  %v3585_v13 = vrot.slane %v7852_v7, 2 }
  0x70   : > { %v3582_v8 = vsel %vm3053_vm3, %v3579_v62, %v3581_v0 }
  0x71   : > { %v877_v21 = vor.u32 %v875_v12, %v873_v14  ;;  %v874_v26 = vsel %vm758_vm4, %v869_v18, %v873_v14  ;;  %v885_v39 = vor.u32 %v883_v27, %v881_v22  ;;  %v3574_v43 = vsel %vm3053_vm3, %v3571_v25, %v3573_v28  ;;  %v7855_v14 = vld [vmem:[%s8032_s27 + $0x20] sm:$0xff]   ;;  %v7860_v25 = vld [vmem:[%s8032_s27 + $0x30] sm:$0xff]  }
  0x72   : > { %v1392_v20 = vrot.slane %v7855_v14, 1  ;;  %v1396_v32 = vrot.slane %v7860_v25, 1 }
  0x73   : > { %v890_v47 = vsel %vm758_vm4, %v885_v39, %v889_v34 }
  0x74   : > { %v1393_v24 = vsel %vm1384_vm5, %v1390_v10, %v1392_v20 }
  0x76   : > { %7083 = vmatmul.mubr.msk.bf16.gmra.mrb[12].mxu1 %vm355_vm1, %v826_v30  ;;  %7247 = vmatmul.mubr.msk.bf16.gmra.mrb[24].mxu0 %vm355_vm1, %v3082_v40  ;;  %v882_v30 = vsel %vm758_vm4, %v877_v21, %v881_v22  ;;  %v7843_v40 = vld [vmem:[%s8032_s27 + $0x38] sm:$0xff]   ;;  %v7857_v22 = vld [vmem:[%s8032_s27 + $0x68] sm:$0xff]  }
  0x77   : > { %7086 = vmatprep.mubr.msk.bf16.mxu1 %vm355_vm1, %v834_v33  ;;  %7250 = vmatprep.mubr.msk.bf16.mxu0 %vm355_vm1, %v3084_v9  ;;  %v7841_v33 = vld [vmem:[%s8032_s27 + $0x30] sm:$0xff]   ;;  %v893_v9 = vor.u32 %v891_v31, %v889_v34  ;;  %v3577_v57 = vrot.slane %v7843_v40, 2  ;;  %v7861_v34 = vld [vmem:[%s8032_s27 + $0x78] sm:$0xff]   ;;  %v7864_v40 = vld [vmem:[%s8032_s27 + $0x40] sm:$0xff]  }
  0x78   : > { %v3575_v46 = vrot.slane %v7841_v33, 2  ;;  %v7859_v31 = vld [vmem:[%s8032_s27 + $0x70] sm:$0xff]  }
  0x79   : > { %v898_v51 = vsel %vm758_vm4, %v893_v9, %v897_v44  ;;  %v3580_v4 = vsel %vm3053_vm3, %v3577_v57, %v3579_v62  ;;  %v7866_v9 = vld [vmem:[%s8032_s27 + $0x48] sm:$0xff]   ;;  %v7874_v62 = vld [vmem:[%s8032_s27 + $0x18] sm:$0xff]  }
  0x7a   : > { %v3578_v59 = vsel %vm3053_vm3, %v3575_v46, %v3577_v57  ;;  %v1402_v49 = vrot.slane %v7866_v9, 1  ;;  %v4091_v7 = vshll.u32 %v7874_v62, 16 }
  0x7e   : > { %7087 = vmatmul.mubr.msk.bf16.gmra.mrb[16].mxu1 %vm355_vm1, %v842_v50  ;;  %7251 = vmatmul.mubr.msk.bf16.gmra.mrb[28].mxu0 %vm355_vm1, %v3086_v61  ;;  %v7849_v50 = vld [vmem:[%s8032_s27 + $0x8] sm:$0xff]  }
  0x7f   : > { %7090 = vmatprep.mubr.msk.bf16.mxu1 %vm355_vm1, %v850_v53  ;;  %7254 = vmatprep.mubr.msk.bf16.mxu0 %vm355_vm1, %v3088_v63  ;;  %v3576_v53 = vsel %vm3053_vm3, %v3573_v28, %v3575_v46  ;;  %v1386_v61 = vrot.slane %v7849_v50, 1  ;;  %v7851_v63 = vld [vmem:[%s8032_s27 + $0x10] sm:$0xff]   ;;  %v7862_v28 = vld [vmem:[%s8032_s27 + $0x38] sm:$0xff]   ;;  %v7863_v46 = vld [vmem:[%s8032_s27 + $0x80] sm:$0xff]  }
  0x80   : > { %v1398_v36 = vrot.slane %v7862_v28, 1  ;;  %v7868_v50 = vld [vmem:[%s8032_s27 + $0x50] sm:$0xff]  }
  0x81   : > { %v1387_v1 = vsel %vm1384_vm5, %v1385_v60, %v1386_v61  ;;  %v1404_v58 = vrot.slane %v7868_v50, 1 }
  0x86   : > { %7091 = vmatmul.mubr.msk.bf16.gmra.mrb[20].mxu1 %vm355_vm1, %v858_v6  ;;  %7255 = vmatmul.mubr.msk.bf16.gmra.mrb[32].mxu0 %vm355_vm1, %v3090_v16  ;;  %v1388_v6 = vrot.slane %v7851_v63, 1  ;;  %v7858_v16 = vld [vmem:[%s8032_s27 + $0x28] sm:$0xff]   ;;  %v7873_v63 = vld [vmem:[%s8032_s27 + $0x10] sm:$0xfc]  }
  0x87   : > { %7094 = vmatprep.mubr.msk.bf16.mxu1 %vm355_vm1, %v866_v11  ;;  %7260 = vmatprep.mubr.msk.bf16.mxu0 %vm355_vm1, %v3570_v19  ;;  %v3583_v11 = vrot.slane %v7850_v5, 2  ;;  %v7854_v19 = vld [vmem:[%s8032_s27 + $0x60] sm:$0xff]   ;;  %v1394_v23 = vrot.slane %v7858_v16, 1  ;;  %v1405_v5 = vsel %vm1384_vm5, %v1402_v49, %v1404_v58 }
  0x88   : > { %v1389_v12 = vsel %vm1384_vm5, %v1386_v61, %v1388_v6  ;;  %v1391_v15 = vsel %vm1384_vm5, %v1388_v6, %v1390_v10  ;;  %v3587_v35 = vrot.slane %v7854_v19, 2  ;;  %v4088_v6 = vshrl.u32 %v7874_v62, 16 }
  0x89   : > { %v3584_v18 = vsel %vm3053_vm3, %v3581_v0, %v3583_v11  ;;  %v3586_v21 = vsel %vm3053_vm3, %v3583_v11, %v3585_v13  ;;  %v1395_v27 = vsel %vm1384_vm5, %v1392_v20, %v1394_v23  ;;  %v1397_v39 = vsel %vm1384_vm5, %v1394_v23, %v1396_v32 }
  0x8a   : > { %v3599_v0 = vrot.slane %v7867_v56, 2  ;;  %v4080_v10 = vshrl.u32 %v7873_v63, 16  ;;  %v4083_v11 = vshll.u32 %v7873_v63, 16 }
  0x8c   : > { %v3600_v14 = vsel %vm3053_vm3, %v3597_v54, %v3599_v0  ;;  %v4082_v19 = vrot.slane %v4080_v10, 2  ;;  %v4085_v20 = vrot.slane %v4083_v11, 3 }
  0x8e   : > { %7095 = vmatmul.mubr.msk.bf16.gmra.mrb[24].mxu1 %vm355_vm1, %v874_v26  ;;  %7261 = vmatmul.mubr.msk.bf16.vlgmr.msra.gmra.mrb[0].mxu0 %vm355_vm1, %v3572_v37  ;;  %v3589_v26 = vrot.slane %v7857_v22, 2  ;;  %v3591_v37 = vrot.slane %v7859_v31, 2 }
  0x8f   : > { %7098 = vmatprep.mubr.msk.bf16.mxu1 %vm355_vm1, %v882_v30  ;;  %7297 = vmatpush3.bf16.msra.mxu0 %v4308_v41  ;;  %v3588_v30 = vsel %vm3053_vm3, %v3585_v13, %v3587_v35  ;;  %v3593_v41 = vrot.slane %v7861_v34, 2  ;;  %v7876_v13 = vld [vmem:[%s8032_s27 + $0x20] sm:$0xff]  }
  0x90   : > { %7264 = vmatprep.mubr.msk.bf16.mxu0 %vm355_vm1, %v3574_v43  ;;  %7671 = vmatprep.subr.msk.bf16.mxu0 %vm410_vm0, %v8264_v45  ;;  %v3590_v33 = vsel %vm3053_vm3, %v3587_v35, %v3589_v26  ;;  %v1399_v43 = vsel %vm1384_vm5, %v1396_v32, %v1398_v36  ;;  %v3592_v44 = vsel %vm3053_vm3, %v3589_v26, %v3591_v37  ;;  %v7877_v35 = vld [vmem:[%s8032_s27 + $0x70] sm:$0xff]   ;;  %v4100_v25 = vshll.u32 %v7876_v13, 16  ;;  %v7879_v32 = vld [vmem:[%s8032_s27 + $0x78] sm:$0xff]  }
  0x91   : > { %v3594_v57 = vsel %vm3053_vm3, %v3591_v37, %v3593_v41  ;;  %v1412_v34 = vrot.slane %v7877_v35, 1 }
  0x96   : > { %7099 = vmatmul.mubr.msk.bf16.gmra.mrb[28].mxu1 %vm355_vm1, %v890_v47  ;;  %7265 = vmatmul.mubr.msk.bf16.gmra.mrb[4].mxu0 %vm355_vm1, %v3576_v53  ;;  %v1400_v47 = vrot.slane %v7864_v40, 1  ;;  %v7870_v53 = vld [vmem:[%s8032_s27 + $0x58] sm:$0xff]  }
  0x97   : > { %7102 = vmatprep.mubr.msk.bf16.mxu1 %vm355_vm1, %v898_v51  ;;  %7268 = vmatprep.mubr.msk.bf16.mxu0 %vm355_vm1, %v3578_v59  ;;  %v3595_v51 = vrot.slane %v7863_v46, 2  ;;  %v7869_v59 = vld [vmem:[%s8032_s27 + $0x98] sm:$0xff]   ;;  %v1406_v61 = vrot.slane %v7870_v53, 1 }
  0x98   : > { %v1401_v52 = vsel %vm1384_vm5, %v1398_v36, %v1400_v47  ;;  %v1403_v55 = vsel %vm1384_vm5, %v1400_v47, %v1402_v49  ;;  %v3601_v2 = vrot.slane %v7869_v59, 2  ;;  %v7880_v36 = vld [vmem:[%s8032_s27 + $0x30] sm:$0xff]   ;;  %v7882_v40 = vld [vmem:[%s8032_s27 + $0x38] sm:$0xff]  }
  0x99   : > { %v3596_v60 = vsel %vm3053_vm3, %v3593_v41, %v3595_v51  ;;  %v4115_v46 = vshrl.u32 %v7880_v36, 16  ;;  %v4118_v47 = vshll.u32 %v7880_v36, 16  ;;  %v4124_v50 = vshrl.u32 %v7882_v40, 16 }
  0x9b   : > { %v4117_v56 = vrot.slane %v4115_v46, 2  ;;  %v7895_v46 = vld [vmem:[%s8032_s27 + $0x68] sm:$0xff]  }
  0x9e   : > { %7103 = vmatmul.mubr.msk.bf16.gmra.mrb[32].mxu1 %vm355_vm1, %v906_v42  ;;  %7269 = vmatmul.mubr.msk.bf16.gmra.mrb[8].mxu0 %vm355_vm1, %v3580_v4  ;;  %v3598_v42 = vsel %vm3053_vm3, %v3595_v51, %v3597_v54  ;;  %v7875_v4 = vld [vmem:[%s8032_s27 + $0x68] sm:$0xff]   ;;  %v4127_v51 = vshll.u32 %v7882_v40, 16  ;;  %v7893_v40 = vld [vmem:[%s8032_s27 + $0x60] sm:$0xff]  }
  0x9f   : > { %7108 = vmatprep.mubr.msk.bf16.mxu1 %vm355_vm1, %v1387_v1  ;;  %7272 = vmatprep.mubr.msk.bf16.mxu0 %vm355_vm1, %v3582_v8  ;;  %v7872_v1 = vld [vmem:[%s8032_s27 + $0x60] sm:$0xff]   ;;  %v1407_v8 = vsel %vm1384_vm5, %v1404_v58, %v1406_v61  ;;  %v1410_v22 = vrot.slane %v7875_v4, 1  ;;  %v7883_v54 = vld [vmem:[%s8032_s27 + $0x88] sm:$0xff]   ;;  %v4120_v58 = vrot.slane %v4118_v47, 3 }
  0xa0   : > { %v1408_v16 = vrot.slane %v7872_v1, 1  ;;  %v4129_v62 = vrot.slane %v4127_v51, 3  ;;  %v7886_v1 = vld [vmem:[%s8032_s27 + $0x48] sm:$0xff]  }
  0xa1   : > { %v1413_v49 = vsel %vm1384_vm5, %v1410_v22, %v1412_v34  ;;  %v4142_v10 = vshrl.u32 %v7886_v1, 16  ;;  %v4145_v11 = vshll.u32 %v7886_v1, 16  ;;  %v7899_v1 = vld [vmem:[%s8032_s27 + $0x78] sm:$0xff]  }
  0xa6   : > { %7109 = vmatmul.mubr.msk.bf16.vlgmr.msra.gmra.mrb[0].mxu1 %vm355_vm1, %v1389_v12  ;;  %7273 = vmatmul.mubr.msk.bf16.gmra.mrb[12].mxu0 %vm355_vm1, %v3584_v18  ;;  %v7871_v12 = vld [vmem:[%s8032_s27 + $0xa0] ss:$0 sps:$4 sm:$0x33]   ;;  %v7878_v18 = vld [vmem:[%s8032_s27 + $0x28] sm:$0xff]  }
  0xa7   : > { %7112 = vmatprep.mubr.msk.bf16.mxu1 %vm355_vm1, %v1391_v15  ;;  %7145 = vmatpush3.bf16.msra.mxu1 %v1991_v17  ;;  %v3602_v15 = vsel %vm3053_vm3, %v3599_v0, %v3601_v2  ;;  %v4090_v17 = vrot.slane %v4088_v6, 2  ;;  %v3603_v23 = vrot.slane %v7871_v12, 2  ;;  %v4106_v26 = vshrl.u32 %v7878_v18, 16  ;;  %v7887_v12 = vld [vmem:[%s8032_s27 + $0x8] sm:$0xfe]  }
  0xa8   : > { %7667 = vmatprep.subr.msk.bf16.mxu1 %vm410_vm0, %v7944_v29  ;;  %7276 = vmatprep.mubr.msk.bf16.mxu0 %vm355_vm1, %v3586_v21  ;;  %v4093_v21 = vrot.slane %v4091_v7, 3  ;;  %v4097_v29 = vshrl.u32 %v7876_v13, 16  ;;  %v4109_v31 = vshll.u32 %v7878_v18, 16  ;;  %v1418_v0 = vrot.slane %v7883_v54, 1  ;;  %v7888_v13 = vld [vmem:[%s8032_s27 + $0x10] sm:$0xff]  }
  0xa9   : > { %v3604_v37 = vsel %vm3053_vm3, %v3601_v2, %v3603_v23  ;;  %v7885_v7 = vld [vmem:[%s8032_s27 + $0x90] ss:$0 sps:$4 sm:$0x11]   ;;  %v1896_v23 = vrot.slane %v7888_v13, 1  ;;  %v4181_v54 = vshll.u32 %v7895_v46, 16 }
  0xaa   : > { %v4094_v28 = vor.u32 %v4093_v21, %v4090_v17  ;;  %v4111_v9 = vrot.slane %v4109_v31, 3  ;;  %v1420_v18 = vrot.slane %v7885_v7, 1  ;;  %v4147_v21 = vrot.slane %v4145_v11, 3  ;;  %v7900_v11 = vld [vmem:[%s8032_s27 + $0x40] sm:$0xff]  }
  0xae   : > { %7113 = vmatmul.mubr.msk.bf16.gmra.mrb[4].mxu1 %vm355_vm1, %v1393_v24  ;;  %7277 = vmatmul.mubr.msk.bf16.gmra.mrb[16].mxu0 %vm355_vm1, %v3588_v30  ;;  %v1409_v24 = vsel %vm1384_vm5, %v1406_v61, %v1408_v16  ;;  %v1411_v30 = vsel %vm1384_vm5, %v1408_v16, %v1410_v22  ;;  %v4126_v61 = vrot.slane %v4124_v50, 2  ;;  %v1895_v22 = vrot.slane %v7887_v12, 1  ;;  %v7894_v50 = vld [vmem:[%s8032_s27 + $0x28] sm:$0xff]  }
  0xaf   : > { %7116 = vmatprep.mubr.msk.bf16.mxu1 %vm355_vm1, %v1395_v27  ;;  %7280 = vmatprep.mubr.msk.bf16.mxu0 %vm355_vm1, %v3590_v33  ;;  %v4086_v27 = vor.u32 %v4085_v20, %v4082_v19  ;;  %v4099_v33 = vrot.slane %v4097_v29, 2  ;;  %v7889_v19 = vld [vmem:[%s8032_s27 + $0x50] sm:$0xff]   ;;  %v4144_v20 = vrot.slane %v4142_v10, 2  ;;  %v7891_v29 = vld [vmem:[%s8032_s27 + $0x58] sm:$0xff]   ;;  %v4199_v10 = vshll.u32 %v7899_v1, 16 }
  0xb0   : > { %v4130_v4 = vor.u32 %v4129_v62, %v4126_v61  ;;  %v4160_v31 = vshrl.u32 %v7891_v29, 16  ;;  %v7897_v61 = vld [vmem:[%s8032_s27 + $0x70] sm:$0xff]  }
  0xb1   : > { %v4095_v41 = vsel %vm4078_vm6, %v4086_v27, %v4094_v28  ;;  %v7890_v27 = vld [vmem:[%s8032_s27 + $0x18] sm:$0xff]  }
  0xb6   : > { %7117 = vmatmul.mubr.msk.bf16.gmra.mrb[8].mxu1 %vm355_vm1, %v1397_v39  ;;  %7281 = vmatmul.mubr.msk.bf16.gmra.mrb[20].mxu0 %vm355_vm1, %v3592_v44  ;;  %v4102_v39 = vrot.slane %v4100_v25, 3  ;;  %v1414_v44 = vrot.slane %v7879_v32, 1  ;;  %v4151_v25 = vshrl.u32 %v7889_v19, 16  ;;  %v4163_v32 = vshll.u32 %v7891_v29, 16 }
  0xb7   : > { %7120 = vmatprep.mubr.msk.bf16.mxu1 %vm355_vm1, %v1399_v43  ;;  %7284 = vmatprep.mubr.msk.bf16.mxu0 %vm355_vm1, %v3594_v57  ;;  %v4108_v43 = vrot.slane %v4106_v26, 2  ;;  %v7881_v57 = vld [vmem:[%s8032_s27 + $0x80] sm:$0xff]   ;;  %v4154_v26 = vshll.u32 %v7889_v19, 16  ;;  %v4201_v19 = vrot.slane %v4199_v10, 3 }
  0xb8   : > { %v4103_v48 = vor.u32 %v4102_v39, %v4099_v33  ;;  %v1415_v53 = vsel %vm1384_vm5, %v1412_v34, %v1414_v44  ;;  %v7892_v33 = vld [vmem:[%s8032_s27 + $0x20] sm:$0xff]   ;;  %v4153_v36 = vrot.slane %v4151_v25, 2  ;;  %v1898_v39 = vrot.slane %v7890_v27, 1 }
  0xba   : > { %v4104_v59 = vsel %vm4078_vm6, %v4094_v28, %v4103_v48  ;;  %v4148_v28 = vor.u32 %v4147_v21, %v4144_v20  ;;  %v1908_v20 = vrot.slane %v7900_v11, 1  ;;  %v7903_v21 = vld [vmem:[%s8032_s27 + $0x88] sm:$0xff]   ;;  %v7911_v11 = vld [vmem:[%s8032_s27 + $0x10] sm:$0xf8]  }
  0xbb   : > { %v4214_v27 = vshrl.u32 %v7903_v21, 16 }
  0xbe   : > { %7121 = vmatmul.mubr.msk.bf16.gmra.mrb[12].mxu1 %vm355_vm1, %v1401_v52  ;;  %7285 = vmatmul.mubr.msk.bf16.gmra.mrb[24].mxu0 %vm355_vm1, %v3596_v60  ;;  %v4112_v52 = vor.u32 %v4111_v9, %v4108_v43  ;;  %v1416_v60 = vrot.slane %v7881_v57, 1  ;;  %v4162_v43 = vrot.slane %v4160_v31, 2  ;;  %v4165_v9 = vrot.slane %v4163_v32, 3 }
  0xbf   : > { %7124 = vmatprep.mubr.msk.bf16.mxu1 %vm355_vm1, %v1403_v55  ;;  %7288 = vmatprep.mubr.msk.bf16.mxu0 %vm355_vm1, %v3598_v42  ;;  %v4819_v55 = vsel %vm410_vm0, %v8264_v45, 0  ;;  %v7884_v42 = vld [vmem:[%s8032_s27 + $0x40] sm:$0xff]   ;;  %v4121_v45 = vor.u32 %v4120_v58, %v4117_v56  ;;  %v1899_v57 = vsel %vm1384_vm5, %v1896_v23, %v1898_v39 }
  0xc0   : > { %v4113_v63 = vsel %vm4078_vm6, %v4103_v48, %v4112_v52  ;;  %v1417_v2 = vsel %vm1384_vm5, %v1414_v44, %v1416_v60  ;;  %v4136_v6 = vshll.u32 %v7884_v42, 16  ;;  %v1900_v44 = vrot.slane %v7892_v33, 1 }
  0xc1   : > { %v4169_v48 = vshrl.u32 %v7893_v40, 16  ;;  %v4166_v51 = vor.u32 %v4165_v9, %v4162_v43  ;;  %v7907_v43 = vld [vmem:[%s8032_s27 + $0x98] sm:$0xff]  }
  0xc2   : > { %v4138_v17 = vrot.slane %v4136_v6, 3  ;;  %v7898_v6 = vld [vmem:[%s8032_s27 + $0x38] sm:$0xff]  }
  0xc3   : > { %v4171_v58 = vrot.slane %v4169_v48, 2 }
  0xc6   : > { %7125 = vmatmul.mubr.msk.bf16.gmra.mrb[16].mxu1 %vm355_vm1, %v1405_v5  ;;  %7289 = vmatmul.mubr.msk.bf16.gmra.mrb[28].mxu0 %vm355_vm1, %v3600_v14  ;;  %v4133_v5 = vshrl.u32 %v7884_v42, 16  ;;  %v4122_v14 = vsel %vm4078_vm6, %v4112_v52, %v4121_v45  ;;  %v1901_v52 = vsel %vm1384_vm5, %v1898_v39, %v1900_v44  ;;  %v4216_v39 = vrot.slane %v4214_v27, 2  ;;  %v7919_v27 = vld [vmem:[%s8032_s27 + $0x88] sm:$0xff]  }
  0xc7   : > { %7128 = vmatprep.mubr.msk.bf16.mxu1 %vm355_vm1, %v1407_v8  ;;  %7292 = vmatprep.mubr.msk.bf16.mxu0 %vm355_vm1, %v3602_v15  ;;  %v1419_v8 = vsel %vm1384_vm5, %v1416_v60, %v1418_v0  ;;  %v4131_v15 = vsel %vm4078_vm6, %v4121_v45, %v4130_v4  ;;  %v1902_v60 = vrot.slane %v7894_v50, 1  ;;  %v4232_v50 = vshrl.u32 %v7907_v43, 16 }
  0xc8   : > { %v4135_v16 = vrot.slane %v4133_v5, 2  ;;  %v4190_v5 = vshll.u32 %v7897_v61, 16 }
  0xca   : > { %v4139_v35 = vor.u32 %v4138_v17, %v4135_v16  ;;  %v7901_v16 = vld [vmem:[%s8032_s27 + $0x80] sm:$0xff]  }
  0xcb   : > { %v4205_v29 = vshrl.u32 %v7901_v16, 16 }
  0xcc   : > { %v4140_v34 = vsel %vm4078_vm6, %v4130_v4, %v4139_v35  ;;  %v4187_v4 = vshrl.u32 %v7897_v61, 16 }
  0xcd   : > { %v4207_v32 = vrot.slane %v4205_v29, 2 }
  0xce   : > { %7129 = vmatmul.mubr.msk.bf16.gmra.mrb[20].mxu1 %vm355_vm1, %v1409_v24  ;;  %7293 = vmatmul.mubr.msk.bf16.gmra.mrb[32].mxu0 %vm355_vm1, %v3604_v37  ;;  %v1421_v24 = vsel %vm1384_vm5, %v1418_v0, %v1420_v18  ;;  %v4156_v37 = vrot.slane %v4154_v26, 3  ;;  %v4189_v13 = vrot.slane %v4187_v4, 2 }
  0xcf   : > { %7132 = vmatprep.mubr.msk.bf16.mxu1 %vm355_vm1, %v1411_v30  ;;  %7298 = vmatprep.mubr.msk.bf16.mxu0 %vm355_vm1, %v4095_v41  ;;  %v1897_v30 = vsel %vm1384_vm5, %v1895_v22, %v1896_v23  ;;  %v4149_v41 = vsel %vm4078_vm6, %v4139_v35, %v4148_v28  ;;  %v4208_v35 = vshll.u32 %v7901_v16, 16  ;;  %v7915_v16 = vld [vmem:[%s8032_s27 + $0x78] sm:$0xff]  }
  0xd0   : > { %v4157_v47 = vor.u32 %v4156_v37, %v4153_v36  ;;  %v7905_v36 = vld [vmem:[%s8032_s27 + $0x90] sm:$0xff]  }
  0xd1   : > { %v4210_v33 = vrot.slane %v4208_v35, 3  ;;  %v7916_v35 = vld [vmem:[%s8032_s27 + $0x28] sm:$0xff]  }
  0xd2   : > { %v4158_v56 = vsel %vm4078_vm6, %v4148_v28, %v4157_v47  ;;  %v4167_v62 = vsel %vm4078_vm6, %v4157_v47, %v4166_v51  ;;  %v4217_v28 = vshll.u32 %v7903_v21, 16  ;;  %v4226_v47 = vshll.u32 %v7905_v36, 16 }
  0xd3   : > { %v4211_v9 = vor.u32 %v4210_v33, %v4207_v32  ;;  %v7925_v32 = vld [vmem:[%s8032_s27 + $0x60] sm:$0xff]  }
  0xd6   : > { %7133 = vmatmul.mubr.msk.bf16.gmra.mrb[24].mxu1 %vm355_vm1, %v1413_v49  ;;  %7299 = vmatmul.mubr.msk.bf16.vlgmr.msra.gmra.mrb[0].mxu0 %vm355_vm1, %v4104_v59  ;;  %v4172_v49 = vshll.u32 %v7893_v40, 16  ;;  %v4219_v40 = vrot.slane %v4217_v28, 3  ;;  %v4732_v28 = vrot.slane %v7916_v35, 3 }
  0xd7   : > { %7136 = vmatprep.mubr.msk.bf16.mxu1 %vm355_vm1, %v1415_v53  ;;  %7335 = vmatpush3.bf16.msra.mxu0 %v4819_v55  ;;  %v4178_v53 = vshrl.u32 %v7895_v46, 16  ;;  %v7896_v55 = vld [vmem:[%s8032_s27 + $0x30] sm:$0xff]   ;;  %v4223_v46 = vshrl.u32 %v7905_v36, 16  ;;  %v1926_v36 = vrot.slane %v7919_v27, 1 }
  0xd8   : > { %7302 = vmatprep.mubr.msk.bf16.mxu0 %vm355_vm1, %v4113_v63  ;;  %v4174_v59 = vrot.slane %v4172_v49, 3  ;;  %v4183_v63 = vrot.slane %v4181_v54, 3  ;;  %v1904_v0 = vrot.slane %v7896_v55, 1  ;;  %v4220_v48 = vor.u32 %v4219_v40, %v4216_v39  ;;  %v7920_v39 = vld [vmem:[%s8032_s27 + $0x38] sm:$0xff]  }
  0xd9   : > { %v4180_v42 = vrot.slane %v4178_v53, 2  ;;  %v4225_v54 = vrot.slane %v4223_v46, 2  ;;  %v4228_v55 = vrot.slane %v4226_v47, 3  ;;  %v7923_v46 = vld [vmem:[%s8032_s27 + $0x98] ss:$0 sps:$4 sm:$0x11]  }
  0xda   : > { %v4175_v45 = vor.u32 %v4174_v59, %v4171_v58  ;;  %v1905_v7 = vsel %vm1384_vm5, %v1902_v60, %v1904_v0  ;;  %v7909_v58 = vld [vmem:[%s8032_s27 + $0xa0] ss:$0 sps:$4 sm:$0x77]   ;;  %v4221_v59 = vsel %vm4078_vm6, %v4211_v9, %v4220_v48  ;;  %v7927_v47 = vld [vmem:[%s8032_s27 + $0x68] sm:$0xff]  }
  0xdc   : > { %v4176_v12 = vsel %vm4078_vm6, %v4166_v51, %v4175_v45  ;;  %v4235_v51 = vshll.u32 %v7907_v43, 16  ;;  %v2512_v43 = vshll.u32 %v7925_v32, 16 }
  0xde   : > { %7137 = vmatmul.mubr.msk.bf16.gmra.mrb[28].mxu1 %vm355_vm1, %v1417_v2  ;;  %7303 = vmatmul.mubr.msk.bf16.gmra.mrb[4].mxu0 %vm355_vm1, %v4122_v14  ;;  %v1903_v2 = vsel %vm1384_vm5, %v1900_v44, %v1902_v60  ;;  %v4192_v14 = vrot.slane %v4190_v5, 3  ;;  %v4234_v60 = vrot.slane %v4232_v50, 2  ;;  %v4237_v61 = vrot.slane %v4235_v51, 3  ;;  %v7913_v5 = vld [vmem:[%s8032_s27 + $0x70] sm:$0xff]  }
  0xdf   : > { %7140 = vmatprep.mubr.msk.bf16.mxu1 %vm355_vm1, %v1419_v8  ;;  %7306 = vmatprep.mubr.msk.bf16.mxu0 %vm355_vm1, %v4131_v15  ;;  %v4196_v8 = vshrl.u32 %v7899_v1, 16  ;;  %v1906_v15 = vrot.slane %v7898_v6, 1  ;;  %v4244_v1 = vshll.u32 %v7909_v58, 16  ;;  %v2514_v50 = vrot.slane %v2512_v43, 2  ;;  %v7929_v51 = vld [vmem:[%s8032_s27 + $0x70] sm:$0xff]  }
  0xe0   : > { %v4193_v22 = vor.u32 %v4192_v14, %v4189_v13  ;;  %v1920_v13 = vrot.slane %v7913_v5, 1  ;;  %v7939_v43 = vld [vmem:[%s8032_s27 + $0x98] ss:$0 sps:$4 sm:$0x33]  }
  0xe1   : > { %v4198_v18 = vrot.slane %v4196_v8, 2  ;;  %v1907_v23 = vsel %vm1384_vm5, %v1904_v0, %v1906_v15  ;;  %v1909_v26 = vsel %vm1384_vm5, %v1906_v15, %v1908_v20  ;;  %v4241_v0 = vshrl.u32 %v7909_v58, 16 }
  0xe3   : > { %v4202_v25 = vor.u32 %v4201_v19, %v4198_v18 }
  0xe5   : > { %v4203_v37 = vsel %vm4078_vm6, %v4193_v22, %v4202_v25  ;;  %v4212_v53 = vsel %vm4078_vm6, %v4202_v25, %v4211_v9 }
  0xe6   : > { %7141 = vmatmul.mubr.msk.bf16.gmra.mrb[32].mxu1 %vm355_vm1, %v1421_v24  ;;  %7307 = vmatmul.mubr.msk.bf16.gmra.mrb[8].mxu0 %vm355_vm1, %v4140_v34  ;;  %v7902_v24 = vld [vmem:[%s8032_s27 + $0x48] sm:$0xff]  }
  0xe7   : > { %7146 = vmatprep.mubr.msk.bf16.mxu1 %vm355_vm1, %v1897_v30  ;;  %7310 = vmatprep.mubr.msk.bf16.mxu0 %vm355_vm1, %v4149_v41  ;;  %v7904_v30 = vld [vmem:[%s8032_s27 + $0x50] sm:$0xff]   ;;  %v1910_v34 = vrot.slane %v7902_v24, 1 }
  0xe8   : > { %v1912_v41 = vrot.slane %v7904_v30, 1 }
  0xe9   : > { %v1911_v44 = vsel %vm1384_vm5, %v1908_v20, %v1910_v34  ;;  %v7917_v20 = vld [vmem:[%s8032_s27 + $0x80] sm:$0xff]  }
  0xea   : > { %v1913_v49 = vsel %vm1384_vm5, %v1910_v34, %v1912_v41  ;;  %v1924_v24 = vrot.slane %v7917_v20, 1  ;;  %v7918_v34 = vld [vmem:[%s8032_s27 + $0x30] sm:$0xff]  }
  0xeb   : > { %v4734_v9 = vrot.slane %v7918_v34, 3 }
  0xee   : > { %7147 = vmatmul.mubr.msk.bf16.vlgmr.msra.gmra.mrb[0].mxu1 %vm355_vm1, %v1899_v57  ;;  %7311 = vmatmul.mubr.msk.bf16.gmra.mrb[12].mxu0 %vm355_vm1, %v4158_v56  ;;  %v7906_v57 = vld [vmem:[%s8032_s27 + $0x58] sm:$0xff]  }
  0xef   : > { %7150 = vmatprep.mubr.msk.bf16.mxu1 %vm355_vm1, %v1901_v52  ;;  %7373 = vmatpush3.bf16.msra.mxu1 %v8019_v3  ;;  %v4184_v3 = vor.u32 %v4183_v63, %v4180_v42  ;;  %v7908_v52 = vld [vmem:[%s8032_s27 + $0x60] sm:$0xff]   ;;  %v1914_v56 = vrot.slane %v7906_v57, 1  ;;  %v4229_v42 = vor.u32 %v4228_v55, %v4225_v54  ;;  %v4736_v57 = vrot.slane %v7920_v39, 3 }
  0xf0   : > { %7314 = vmatprep.mubr.msk.bf16.mxu0 %vm355_vm1, %v4167_v62  ;;  %v1916_v62 = vrot.slane %v7908_v52, 1  ;;  %v4735_v52 = vsel %vm4726_vm7, %v4732_v28, %v4734_v9  ;;  %v1930_v54 = vrot.slane %v7923_v46, 1  ;;  %v2518_v55 = vshrl.u32 %v7927_v47, 16 }
  0xf1   : > { %v4185_v17 = vsel %vm4078_vm6, %v4175_v45, %v4184_v3  ;;  %v4194_v31 = vsel %vm4078_vm6, %v4184_v3, %v4193_v22  ;;  %v1915_v63 = vsel %vm1384_vm5, %v1912_v41, %v1914_v56  ;;  %v7910_v45 = vld [vmem:[%s8032_s27 + $0x68] sm:$0xff]   ;;  %v4230_v6 = vsel %vm4078_vm6, %v4220_v48, %v4229_v42  ;;  %v7914_v22 = vld [vmem:[%s8032_s27 + $0x20] sm:$0xff]  }
  0xf2   : > { %v1917_v4 = vsel %vm1384_vm5, %v1914_v56, %v1916_v62  ;;  %v4243_v3 = vrot.slane %v4241_v0, 2  ;;  %v1918_v8 = vrot.slane %v7910_v45, 1  ;;  %v4730_v25 = vrot.slane %v7914_v22, 3  ;;  %v7931_v45 = vld [vmem:[%s8032_s27 + $0x78] sm:$0xff]  }
  0xf3   : > { %v2509_v41 = vshrl.u32 %v7925_v32, 16  ;;  %v2521_v56 = vshll.u32 %v7927_v47, 16  ;;  %v4737_v58 = vsel %vm4726_vm7, %v4734_v9, %v4736_v57  ;;  %v2520_v0 = vrot.slane %v2518_v55, 1  ;;  %v7932_v32 = vld [vmem:[%s8032_s27 + $0x68] sm:$0xff]  }
  0xf4   : > { %v1919_v15 = vsel %vm1384_vm5, %v1916_v62, %v1918_v8  ;;  %v1921_v19 = vsel %vm1384_vm5, %v1918_v8, %v1920_v13  ;;  %v2530_v62 = vshll.u32 %v7929_v51, 16  ;;  %v7926_v8 = vld [vmem:[%s8032_s27 + $0x50] sm:$0xff]   ;;  %v4748_v9 = vrot.slane %v7932_v32, 3 }
  0xf6   : > { %7151 = vmatmul.mubr.msk.bf16.gmra.mrb[4].mxu1 %vm355_vm1, %v1903_v2  ;;  %7315 = vmatmul.mubr.msk.bf16.gmra.mrb[16].mxu0 %vm355_vm1, %v4176_v12  ;;  %v4238_v2 = vor.u32 %v4237_v61, %v4234_v60  ;;  %v7912_v12 = vld [vmem:[%s8032_s27 + $0x18] sm:$0xff]   ;;  %v2527_v61 = vshrl.u32 %v7929_v51, 16  ;;  %v2575_v51 = vshll.u32 %v7939_v43, 16 }
  0xf7   : > { %7154 = vmatprep.mubr.msk.bf16.mxu1 %vm355_vm1, %v1905_v7  ;;  %7318 = vmatprep.mubr.msk.bf16.mxu0 %vm355_vm1, %v4185_v17  ;;  %v4246_v7 = vrot.slane %v4244_v1, 3  ;;  %v4727_v17 = vrot.slane %v7911_v11, 3  ;;  %v4728_v18 = vrot.slane %v7912_v12, 3  ;;  %v2523_v1 = vrot.slane %v2521_v56, 2 }
  0xf8   : > { %v4239_v10 = vsel %vm4078_vm6, %v4229_v42, %v4238_v2  ;;  %v2529_v5 = vrot.slane %v2527_v61, 1  ;;  %v2536_v11 = vshrl.u32 %v7931_v45, 16  ;;  %v2539_v12 = vshll.u32 %v7931_v45, 16 }
  0xf9   : > { %v4247_v14 = vor.u32 %v4246_v7, %v4243_v3  ;;  %v4729_v29 = vsel %vm4726_vm7, %v4727_v17, %v4728_v18  ;;  %v4731_v33 = vsel %vm4726_vm7, %v4728_v18, %v4730_v25  ;;  %v7933_v3 = vld [vmem:[%s8032_s27 + $0x80] sm:$0xff]   ;;  %v4742_v17 = vrot.slane %v7926_v8, 3 }
  0xfa   : > { %v2541_v20 = vrot.slane %v2539_v12, 2  ;;  %v7943_v12 = vld [vmem:[%s8032_s27 + $0xa0] ss:$0 sps:$4 sm:$0x77]  }
  0xfb   : > { %v4248_v21 = vsel %vm4078_vm6, %v4238_v2, %v4247_v14  ;;  %v7928_v14 = vld [vmem:[%s8032_s27 + $0x58] sm:$0xff]  }
  0xfc   : > { %v4744_v22 = vrot.slane %v7928_v14, 3  ;;  %v4762_v14 = vrot.slane %v7943_v12, 3 }
  0xfe   : > { %7155 = vmatmul.mubr.msk.bf16.gmra.mrb[8].mxu1 %vm355_vm1, %v1907_v23  ;;  %7319 = vmatmul.mubr.msk.bf16.gmra.mrb[20].mxu0 %vm355_vm1, %v4194_v31  ;;  %v1922_v23 = vrot.slane %v7915_v16, 1  ;;  %v7921_v31 = vld [vmem:[%s8032_s27 + $0x90] sm:$0xff]   ;;  %v2548_v16 = vshll.u32 %v7933_v3, 16 }
  0xff   : > { %7158 = vmatprep.mubr.msk.bf16.mxu1 %vm355_vm1, %v1909_v26  ;;  %7322 = vmatprep.mubr.msk.bf16.mxu0 %vm355_vm1, %v4203_v37  ;;  %v4733_v37 = vsel %vm4726_vm7, %v4730_v25, %v4732_v28  ;;  %v1928_v40 = vrot.slane %v7921_v31, 1  ;;  %v4745_v31 = vsel %vm4726_vm7, %v4742_v17, %v4744_v22 }
 0x100   : > { %v1923_v26 = vsel %vm1384_vm5, %v1920_v13, %v1922_v23  ;;  %v1925_v30 = vsel %vm1384_vm5, %v1922_v23, %v1924_v24  ;;  %v2550_v35 = vrot.slane %v2548_v16, 2 }
 0x101   : > { %v1929_v48 = vsel %vm1384_vm5, %v1926_v36, %v1928_v40 }
 0x106   : > { %7159 = vmatmul.mubr.msk.bf16.gmra.mrb[12].mxu1 %vm355_vm1, %v1911_v44  ;;  %7323 = vmatmul.mubr.msk.bf16.gmra.mrb[24].mxu0 %vm355_vm1, %v4212_v53  ;;  %v1927_v44 = vsel %vm1384_vm5, %v1924_v24, %v1926_v36  ;;  %v7922_v53 = vld [vmem:[%s8032_s27 + $0x40] sm:$0xff]   ;;  %v7937_v24 = vld [vmem:[%s8032_s27 + $0x90] sm:$0xff]  }
 0x107   : > { %7162 = vmatprep.mubr.msk.bf16.mxu1 %vm355_vm1, %v1913_v49  ;;  %7326 = vmatprep.mubr.msk.bf16.mxu0 %vm355_vm1, %v4221_v59  ;;  %v2511_v49 = vrot.slane %v2509_v41, 1  ;;  %v7924_v59 = vld [vmem:[%s8032_s27 + $0x48] sm:$0xff]   ;;  %v4738_v42 = vrot.slane %v7922_v53, 3  ;;  %v2563_v34 = vshrl.u32 %v7937_v24, 16  ;;  %v2566_v36 = vshll.u32 %v7937_v24, 16  ;;  %v7936_v53 = vld [vmem:[%s8032_s27 + $0x78] sm:$0xff]  }
 0x108   : > { %v4740_v2 = vrot.slane %v7924_v59, 3  ;;  %v2577_v59 = vrot.slane %v2575_v51, 2 }
 0x109   : > { %v2515_v60 = vor.u32 %v2514_v50, %v2511_v49  ;;  %v4739_v7 = vsel %vm4726_vm7, %v4736_v57, %v4738_v42  ;;  %v2565_v46 = vrot.slane %v2563_v34, 1  ;;  %v2568_v47 = vrot.slane %v2566_v36, 2 }
 0x10a   : > { %v4741_v13 = vsel %vm4726_vm7, %v4738_v42, %v4740_v2  ;;  %v4743_v25 = vsel %vm4726_vm7, %v4740_v2, %v4742_v17  ;;  %v2572_v50 = vshrl.u32 %v7939_v43, 16  ;;  %v7938_v42 = vld [vmem:[%s8032_s27 + $0x80] sm:$0xff]  }
 0x10b   : > { %v4754_v45 = vrot.slane %v7938_v42, 3 }
 0x10e   : > { %7163 = vmatmul.mubr.msk.bf16.gmra.mrb[16].mxu1 %vm355_vm1, %v1915_v63  ;;  %7327 = vmatmul.mubr.msk.bf16.gmra.mrb[28].mxu0 %vm355_vm1, %v4230_v6  ;;  %v1931_v63 = vsel %vm1384_vm5, %v1928_v40, %v1930_v54  ;;  %v2532_v6 = vrot.slane %v2530_v62, 2  ;;  %v2569_v54 = vor.u32 %v2568_v47, %v2565_v46 }
 0x10f   : > { %7166 = vmatprep.mubr.msk.bf16.mxu1 %vm355_vm1, %v1917_v4  ;;  %7330 = vmatprep.mubr.msk.bf16.mxu0 %vm355_vm1, %v4239_v10  ;;  %v2516_v4 = vsel %vm2409_vm2, %v8106_v38, %v2515_v60  ;;  %v2524_v10 = vor.u32 %v2523_v1, %v2520_v0  ;;  %v2545_v38 = vshrl.u32 %v7933_v3, 16  ;;  %v7940_v1 = vld [vmem:[%s8032_s27 + $0x88] sm:$0xff]  }
 0x111   : > { %v2525_v18 = vsel %vm2409_vm2, %v2515_v60, %v2524_v10  ;;  %v4752_v60 = vrot.slane %v7936_v53, 3 }
 0x116   : > { %7167 = vmatmul.mubr.msk.bf16.gmra.mrb[20].mxu1 %vm355_vm1, %v1919_v15  ;;  %7331 = vmatmul.mubr.msk.bf16.gmra.mrb[32].mxu0 %vm355_vm1, %v4248_v21  ;;  %v2533_v15 = vor.u32 %v2532_v6, %v2529_v5  ;;  %v7935_v21 = vld [vmem:[%s8032_s27 + $0x88] sm:$0xff]   ;;  %v4755_v5 = vsel %vm4726_vm7, %v4752_v60, %v4754_v45  ;;  %v7941_v6 = vld [vmem:[%s8032_s27 + $0x90] sm:$0xff]  }
 0x117   : > { %7170 = vmatprep.mubr.msk.bf16.mxu1 %vm355_vm1, %v1921_v19  ;;  %7336 = vmatprep.mubr.msk.bf16.mxu0 %vm355_vm1, %v4729_v29  ;;  %v2538_v19 = vrot.slane %v2536_v11, 1  ;;  %v2547_v29 = vrot.slane %v2545_v38, 1  ;;  %v2554_v28 = vshrl.u32 %v7935_v21, 16  ;;  %v4758_v8 = vrot.slane %v7941_v6, 3 }
 0x118   : > { %v2534_v23 = vsel %vm2409_vm2, %v2524_v10, %v2533_v15  ;;  %v5322_v38 = vlaneseq }
 0x119   : > { %v2542_v27 = vor.u32 %v2541_v20, %v2538_v19  ;;  %v2556_v40 = vrot.slane %v2554_v28, 1 }
 0x11a   : > { %v8574_v16 = vshrl.u32 %v5322_v38, 7 }
 0x11b   : > { %v2543_v39 = vsel %vm2409_vm2, %v2533_v15, %v2542_v27 }
 0x11c   : > { %v5325_v17 = vadd.s32 16, %v8574_v16  ;;  %v5326_v20 = vadd.s32 24, %v8574_v16  ;;  %v5329_v24 = vadd.s32 48, %v8574_v16  ;;  %v5327_v28 = vadd.s32 32, %v8574_v16 }
 0x11d   : > { %v8599_v32 = vadd.s32 56, %v8574_v16  ;;  %v8606_v36 = vadd.s32 80, %v8574_v16  ;;  %v8613_v43 = vadd.s32 64, %v8574_v16  ;;  %v8661_v6 = vadd.s32 72, %v8574_v16 }
 0x11e   : > { %7171 = vmatmul.mubr.msk.bf16.gmra.mrb[24].mxu1 %vm355_vm1, %v1923_v26  ;;  %7337 = vmatmul.mubr.msk.bf16.vlgmr.msra.gmra.mrb[0].mxu0 %vm355_vm1, %v4731_v33  ;;  %v7930_v26 = vld [vmem:[%s8032_s27 + $0x60] sm:$0xff]   ;;  %v2551_v33 = vor.u32 %v2550_v35, %v2547_v29  ;;  %v8586_v29 = vmul.u32.u64.low 3817748708, %v5326_v20  ;;  %v8587_v35 = vmul.u32.u64.high 3817748708, %v5326_v20, %v8586_v29 }
 0x11f   : > { %7174 = vmatprep.mubr.msk.bf16.mxu1 %vm355_vm1, %v1925_v30  ;;  %7340 = vmatprep.mubr.msk.bf16.mxu0 %vm355_vm1, %v4733_v37  ;;  %v2557_v30 = vshll.u32 %v7935_v21, 16  ;;  %v4746_v37 = vrot.slane %v7930_v26, 3 }
 0x121   : > { %v2559_v41 = vrot.slane %v2557_v30, 2  ;;  %v4747_v57 = vsel %vm4726_vm7, %v4744_v22, %v4746_v37  ;;  %v8582_v21 = vmul.u32.u64.low 3817748708, %v8574_v16  ;;  %v8583_v22 = vmul.u32.u64.high 3817748708, %v8574_v16, %v8582_v21 }
 0x123   : > { %v2560_v49 = vor.u32 %v2559_v41, %v2556_v40  ;;  %v5365_v34 = vshrl.u32 %v8583_v22, 4  ;;  %v5398_v41 = vshrl.u32 %v8587_v35, 4 }
 0x125   : > { %v2561_v56 = vsel %vm2409_vm2, %v2551_v33, %v2560_v49  ;;  %v2570_v61 = vsel %vm2409_vm2, %v2560_v49, %v2569_v54 }
 0x126   : > { %7175 = vmatmul.mubr.msk.bf16.gmra.mrb[28].mxu1 %vm355_vm1, %v1927_v44  ;;  %7341 = vmatmul.mubr.msk.bf16.gmra.mrb[4].mxu0 %vm355_vm1, %v4735_v52  ;;  %v2552_v44 = vsel %vm2409_vm2, %v2542_v27, %v2551_v33  ;;  %v4749_v52 = vsel %vm4726_vm7, %v4746_v37, %v4748_v9  ;;  %v8602_v33 = vadd.s32 40, %v8574_v16 }
 0x127   : > { %7178 = vmatprep.mubr.msk.bf16.mxu1 %vm355_vm1, %v1929_v48  ;;  %7344 = vmatprep.mubr.msk.bf16.mxu0 %vm355_vm1, %v4737_v58  ;;  %v7934_v48 = vld [vmem:[%s8032_s27 + $0x70] sm:$0xff]   ;;  %v2574_v58 = vrot.slane %v2572_v50, 1  ;;  %v8625_v49 = vmul.u32.u64.low 3817748708, %v8606_v36  ;;  %v8626_v50 = vmul.u32.u64.high 3817748708, %v8606_v36, %v8625_v49 }
 0x128   : > { %v4750_v55 = vrot.slane %v7934_v48, 3  ;;  %v8620_v46 = vmul.u32.u64.low 3817748708, %v8602_v33  ;;  %v8621_v47 = vmul.u32.u64.high 3817748708, %v8602_v33, %v8620_v46 }
 0x129   : > { %v10202_v46 = vmov 0 }
 0x12a   : > { %v4751_v62 = vsel %vm4726_vm7, %v4748_v9, %v4750_v55  ;;  %v4753_v0 = vsel %vm4726_vm7, %v4750_v55, %v4752_v60  ;;  %v8640_v60 = vadd.s32 88, %v8574_v16 }
 0x12e   : > { %7179 = vmatmul.mubr.msk.bf16.gmra.mrb[32].mxu1 %vm355_vm1, %v1931_v63  ;;  %7345 = vmatmul.mubr.msk.bf16.gmra.mrb[8].mxu0 %vm355_vm1, %v4739_v7  ;;  %v2578_v63 = vor.u32 %v2577_v59, %v2574_v58  ;;  %v7942_v7 = vld [vmem:[%s8032_s27 + $0x98] sm:$0xff]  }
 0x12f   : > { %7204 = vmatprep.mubr.msk.bf16.mxu1 %vm355_vm1, %v2516_v4  ;;  %7348 = vmatprep.mubr.msk.bf16.mxu0 %vm355_vm1, %v4741_v13  ;;  %v4756_v4 = vrot.slane %v7940_v1, 3  ;;  %v4760_v10 = vrot.slane %v7942_v7, 3 }
 0x130   : > { %v2579_v2 = vsel %vm2409_vm2, %v2569_v54, %v2578_v63  ;;  %v8632_v54 = vmul.u32.u64.low 3817748708, %v8613_v43  ;;  %v8633_v55 = vmul.u32.u64.high 3817748708, %v8613_v43, %v8632_v54 }
 0x131   : > { %v4757_v3 = vsel %vm4726_vm7, %v4754_v45, %v4756_v4  ;;  %v4759_v11 = vsel %vm4726_vm7, %v4756_v4, %v4758_v8  ;;  %v4761_v13 = vsel %vm4726_vm7, %v4758_v8, %v4760_v10  ;;  %v4763_v15 = vsel %vm4726_vm7, %v4760_v10, %v4762_v14 }
 0x132   : > { %v5475_v45 = vshrl.u32 %v8626_v50, 4  ;;  %v5453_v8 = vshrl.u32 %v8633_v55, 4 }
 0x134   : > { %v5476_v38 = vmul.u32 18, %v5475_v45  ;;  %v5454_v29 = vmul.u32 18, %v5453_v8  ;;  %v10115_v45 = vmov 0  ;;  %v8922_v8 = vadd.s32 136, %v8574_v16 }
 0x136   : > { %7205 = vmatmul.mubr.msk.bf16.vlgmr.msra.gmra.mrb[20].mxu1 %vm355_vm1, %v2525_v18  ;;  %7349 = vmatmul.mubr.msk.bf16.gmra.mrb[12].mxu0 %vm355_vm1, %v4743_v25  ;;  %v8577_v18 = vmul.u32.u64.low 3817748708, %v5325_v17  ;;  %v8578_v19 = vmul.u32.u64.high 3817748708, %v5325_v17, %v8577_v18 }
 0x137   : > { %7208 = vmatprep.mubr.msk.bf16.mxu1 %vm355_vm1, %v2534_v23  ;;  %7352 = vmatprep.mubr.msk.bf16.mxu0 %vm355_vm1, %v4745_v31  ;;  %v5324_v23 = vadd.s32 8, %v8574_v16  ;;  %v8595_v30 = vmul.u32.u64.low 3817748708, %v5329_v24  ;;  %v8596_v31 = vmul.u32.u64.high 3817748708, %v5329_v24, %v8595_v30 }
 0x138   : > { %v5387_v27 = vshrl.u32 %v8578_v19, 4 }
 0x139   : > { %v8590_v25 = vmul.u32.u64.low 3817748708, %v5324_v23  ;;  %v8591_v26 = vmul.u32.u64.high 3817748708, %v5324_v23, %v8590_v25  ;;  %v5431_v53 = vshrl.u32 %v8596_v31, 4 }
 0x13a   : > { %v5388_v37 = vmul.u32 18, %v5387_v27 }
 0x13b   : > { %v5376_v48 = vshrl.u32 %v8591_v26, 4 }
 0x13c   : > { %v8628_v51 = vsub.s32 %v5325_v17, %v5388_v37  ;;  %v8683_v17 = vadd.s32 96, %v8574_v16  ;;  %v8743_v37 = vadd.s32 104, %v8574_v16 }
 0x13d   : > { %v5377_v58 = vmul.u32 18, %v5376_v48 }
 0x13e   : > { %7209 = vmatmul.mubr.msk.bf16.gmra.mrb[24].mxu1 %vm355_vm1, %v2543_v39  ;;  %7353 = vmatmul.mubr.msk.bf16.gmra.mrb[16].mxu0 %vm355_vm1, %v4747_v57  ;;  %v8608_v39 = vmul.u32.u64.low 3817748708, %v5327_v28  ;;  %v8609_v40 = vmul.u32.u64.high 3817748708, %v5327_v28, %v8608_v39  ;;  %v5366_v57 = vmul.u32 18, %v5365_v34  ;;  %vm5757_vm8 = vcmp.ne.s32.totalorder %v8628_v51, 0 }
 0x13f   : > { %7212 = vmatprep.mubr.msk.bf16.mxu1 %vm355_vm1, %v2552_v44  ;;  %7356 = vmatprep.mubr.msk.bf16.mxu0 %vm355_vm1, %v4749_v52  ;;  %v8616_v9 = vmul.u32.u64.low 3817748708, %v8599_v32  ;;  %v8617_v44 = vmul.u32.u64.high 3817748708, %v8599_v32, %v8616_v9  ;;  %v5399_v52 = vmul.u32 18, %v5398_v41  ;;  %vm5793_vm9 = vcmp.lt.s32.totalorder %v8628_v51, 0 }
 0x140   : > { %v5409_v59 = vshrl.u32 %v8609_v40, 4  ;;  %v8647_v42 = vadd.s32 18, %v8628_v51  ;;  %v8653_v1 = vsub.s32 %v5324_v23, %v5377_v58  ;;  %vm8715_vm2 = vmand %vm5793_vm9, %vm5757_vm8  ;;  %v8758_v41 = vsub.s32 %v8613_v43, %v5454_v29 }
 0x141   : > { %v5442_v63 = vshrl.u32 %v8617_v44, 4  ;;  %v8723_v30 = vmul.u32.u64.low 3817748708, %v8683_v17  ;;  %v8724_v31 = vmul.u32.u64.high 3817748708, %v8683_v17, %v8723_v30  ;;  %v8761_v9 = vadd.s32 144, %v8574_v16 }
 0x142   : > { %vm5756_vm14 = vcmp.ne.s32.totalorder %v8653_v1, 0  ;;  %vm5792_vm15 = vcmp.lt.s32.totalorder %v8653_v1, 0  ;;  %v8697_v23 = vadd.s32 18, %v8653_v1  ;;  %10100 = vst [vmem:[#allocation7_spill] sm:$0xff] %v8758_v41  ;;  %v10123_v29 = vmov 0 }
 0x143   : > { %vm8769_vm7 = vmand %vm5792_vm15, %vm5756_vm14  ;;  %v8805_v54 = vmul.u32.u64.low 3817748708, %v8743_v37  ;;  %v8806_v55 = vmul.u32.u64.high 3817748708, %v8743_v37, %v8805_v54  ;;  %v8912_v30 = vadd.s32 152, %v8574_v16 }
 0x146   : > { %7213 = vmatmul.mubr.msk.bf16.gmra.mrb[28].mxu1 %vm355_vm1, %v2561_v56  ;;  %7357 = vmatmul.mubr.msk.bf16.gmra.mrb[20].mxu0 %vm355_vm1, %v4751_v62  ;;  %v8636_v56 = vsub.s32 %v8574_v16, %v5366_v57  ;;  %v5432_v62 = vmul.u32 18, %v5431_v53 }
 0x147   : > { %7216 = vmatprep.mubr.msk.bf16.mxu1 %vm355_vm1, %v2570_v61  ;;  %7360 = vmatprep.mubr.msk.bf16.mxu0 %vm355_vm1, %v4753_v0  ;;  %v8643_v61 = vsub.s32 %v5326_v20, %v5399_v52  ;;  %v5420_v0 = vshrl.u32 %v8621_v47, 4  ;;  %v8691_v20 = vmul.u32.u64.low 3817748708, %v8661_v6  ;;  %v8692_v21 = vmul.u32.u64.high 3817748708, %v8661_v6, %v8691_v20 }
 0x148   : > { %vm5755_vm10 = vcmp.ne.s32.totalorder %v8636_v56, 0  ;;  %vm5791_vm11 = vcmp.lt.s32.totalorder %v8636_v56, 0  ;;  %v8667_v7 = vsub.s32 %v5329_v24, %v5432_v62  ;;  %v10105_v47 = vmov 0 }
 0x149   : > { %vm5758_vm12 = vcmp.ne.s32.totalorder %v8643_v61, 0  ;;  %vm5794_vm13 = vcmp.lt.s32.totalorder %v8643_v61, 0  ;;  %v5421_v12 = vmul.u32 18, %v5420_v0  ;;  %vm8733_vm3 = vmand %vm5791_vm11, %vm5755_vm10  ;;  %v5464_v53 = vshrl.u32 %v8692_v21, 4  ;;  %v10249_v27 = vld [vmem:[#allocation7_spill] sm:$0xff] }
 0x14a   : > { %vm5761_vm0 = vcmp.ne.s32.totalorder %v8667_v7, 0  ;;  %v8738_v34 = vadd.s32 18, %v8667_v7  ;;  %vm8749_vm5 = vmand %vm5794_vm13, %vm5758_vm12 }
 0x14b   : > { %v8705_v24 = vsub.s32 %v8602_v33, %v5421_v12  ;;  %v8855_v12 = vadd.s32 18, %v8758_v41 }
 0x14d   : > { %10092 = vst [vmem:[#allocation5_spill] sm:$0xff] %v8705_v24  ;;  %vm5760_vm10 = vcmp.ne.s32.totalorder %v8705_v24, 0  ;;  %vm5796_vm11 = vcmp.lt.s32.totalorder %v8705_v24, 0  ;;  %10122 = vst [vmem:[#allocation17_spill] sm:$0xff] %v8855_v12 }
 0x14e   : > { %7217 = vmatmul.mubr.msk.bf16.gmra.mrb[32].mxu1 %vm355_vm1, %v2579_v2  ;;  %7361 = vmatmul.mubr.msk.bf16.gmra.mrb[24].mxu0 %vm355_vm1, %v4755_v5  ;;  %v5410_v2 = vmul.u32 18, %v5409_v59  ;;  %v8657_v4 = vmul.u32.u64.low 3817748708, %v8640_v60  ;;  %v8658_v5 = vmul.u32.u64.high 3817748708, %v8640_v60, %v8657_v4  ;;  %v10111_v59 = vmov 0 }
 0x14f   : > { %7364 = vmatprep.mubr.msk.bf16.mxu0 %vm355_vm1, %v4757_v3  ;;  %v8664_v3 = vadd.s32 18, %v8636_v56 }
 0x150   : > { %v8688_v19 = vsub.s32 %v5327_v28, %v5410_v2  ;;  %v8720_v28 = vsub.s32 %v8606_v36, %v5476_v38  ;;  %v5486_v36 = vshrl.u32 %v8658_v5, 4  ;;  %v8836_v2 = vadd.s32 18, %v8705_v24 }
 0x151   : > { %v5497_v38 = vshrl.u32 %v8724_v31, 4  ;;  %v10165_v24 = vmov 0 }
 0x152   : > { %10095 = vst [vmem:[#allocation6_spill] sm:$0xff] %v8720_v28  ;;  %vm5759_vm4 = vcmp.ne.s32.totalorder %v8688_v19, 0  ;;  %vm5795_vm6 = vcmp.lt.s32.totalorder %v8688_v19, 0  ;;  %v8755_v40 = vadd.s32 18, %v8688_v19  ;;  %vm5765_vm13 = vcmp.ne.s32.totalorder %v8720_v28, 0  ;;  %10117 = vst [vmem:[#allocation14_spill] sm:$0xff] %v8836_v2 }
 0x153   : > { %vm5801_vm14 = vcmp.lt.s32.totalorder %v8720_v28, 0  ;;  %vm8799_vm15 = vmand %vm5795_vm6, %vm5759_vm4  ;;  %v5487_v52 = vmul.u32 18, %v5486_v36  ;;  %vm5799_vm4 = vcmp.lt.s32.totalorder %v8758_v41, 0  ;;  %v8839_v4 = vadd.s32 18, %v8720_v28 }
 0x154   : > { %vm8831_vm6 = vmand %vm5796_vm11, %vm5760_vm10  ;;  %v5498_v21 = vmul.u32 18, %v5497_v38 }
 0x155   : > { %v10116_v45 = vsel %vm8831_vm6, 4294967295, %v10115_v45  ;;  %10118 = vst [vmem:[#allocation15_spill] sm:$0xff] %v8839_v4 }
 0x156   : > { %7365 = vmatmul.mubr.msk.bf16.gmra.mrb[28].mxu0 %vm355_vm1, %v4759_v11  ;;  %v5443_v11 = vmul.u32 18, %v5442_v63  ;;  %v8821_v62 = vmul.u32.u64.low 3817748708, %v8761_v9  ;;  %v8822_v63 = vmul.u32.u64.high 3817748708, %v8761_v9, %v8821_v62 }
 0x157   : > { %7368 = vmatprep.mubr.msk.bf16.mxu0 %vm355_vm1, %v4761_v13  ;;  %v8674_v13 = vadd.s32 112, %v8574_v16 }
 0x158   : > { %v8702_v35 = vsub.s32 %v8599_v32, %v5443_v11  ;;  %v8727_v32 = vadd.s32 120, %v8574_v16  ;;  %v10119_v11 = vmov 0  ;;  %v5563_v38 = vshrl.u32 %v8822_v63, 4 }
 0x159   : > { %v8708_v25 = vmul.u32.u64.low 3817748708, %v8674_v13  ;;  %v8709_v26 = vmul.u32.u64.high 3817748708, %v8674_v13, %v8708_v25  ;;  %v8945_v63 = vsub.s32 %v8683_v17, %v5498_v21  ;;  %v8963_v17 = vadd.s32 208, %v8574_v16 }
 0x15a   : > { %10091 = vst [vmem:[#allocation4_spill] sm:$0xff] %v8702_v35  ;;  %vm5762_vm8 = vcmp.ne.s32.totalorder %v8702_v35, 0  ;;  %vm5798_vm9 = vcmp.lt.s32.totalorder %v8702_v35, 0  ;;  %v8790_v57 = vmul.u32.u64.low 3817748708, %v8727_v32  ;;  %v8791_v48 = vmul.u32.u64.high 3817748708, %v8727_v32, %v8790_v57 }
 0x15b   : > { %v8825_v0 = vadd.s32 18, %v8702_v35  ;;  %v5519_v5 = vshrl.u32 %v8709_v26, 4  ;;  %v8873_v25 = vsub.s32 %v8640_v60, %v5487_v52  ;;  %v5465_v26 = vmul.u32 18, %v5464_v53 }
 0x15c   : > { %v8888_v57 = vadd.s32 128, %v8574_v16  ;;  %v5530_v52 = vshrl.u32 %v8791_v48, 4 }
 0x15d   : > { %10114 = vst [vmem:[#allocation13_spill] sm:$0xff] %v8825_v0  ;;  %10126 = vst [vmem:[#allocation19_spill] sm:$0xff] %v8873_v25  ;;  %v5520_v62 = vmul.u32 18, %v5519_v5  ;;  %vm5766_vm10 = vcmp.ne.s32.totalorder %v8873_v25, 0  ;;  %v8918_v54 = vsub.s32 %v8661_v6, %v5465_v26  ;;  %v5508_v5 = vshrl.u32 %v8806_v55, 4 }
 0x15e   : > { %7369 = vmatmul.mubr.msk.bf16.gmra.mrb[32].mxu0 %vm355_vm1, %v4763_v15  ;;  %v8679_v15 = vadd.s32 18, %v8643_v61  ;;  %vm5797_vm1 = vcmp.lt.s32.totalorder %v8667_v7, 0  ;;  %v8928_v48 = vmul.u32.u64.low 3817748708, %v8888_v57  ;;  %v8929_v36 = vmul.u32.u64.high 3817748708, %v8888_v57, %v8928_v48 }
 0x15f   : > { %vm8783_vm12 = vmand %vm5797_vm1, %vm5761_vm0  ;;  %vm5763_vm1 = vcmp.ne.s32.totalorder %v8758_v41, 0  ;;  %10130 = vst [vmem:[#allocation23_spill] sm:$0xff] %v8918_v54  ;;  %vm5802_vm11 = vcmp.lt.s32.totalorder %v8873_v25, 0  ;;  %v8936_v6 = vsub.s32 %v8674_v13, %v5520_v62  ;;  %v8939_v55 = vadd.s32 160, %v8574_v16 }
 0x160   : > { %v10106_v47 = vsel %vm8783_vm12, 4294967295, %v10105_v47  ;;  %vm8814_vm0 = vmand %vm5798_vm9, %vm5762_vm8  ;;  %v8942_v26 = vadd.s32 184, %v8574_v16  ;;  %v8956_v13 = vadd.s32 168, %v8574_v16  ;;  %v5564_v62 = vmul.u32 18, %v5563_v38 }
 0x161   : > { %v10112_v59 = vsel %vm8814_vm0, 4294967295, %v10111_v59  ;;  %vm8850_vm8 = vmand %vm5801_vm14, %vm5765_vm13  ;;  %v8978_v38 = vadd.s32 18, %v8873_v25  ;;  %vm5764_vm13 = vcmp.ne.s32.totalorder %v8918_v54, 0  ;;  %vm10141_vm14 = vcmp.lt.s32.totalorder %v8918_v54, 0 }
 0x162   : > { %10113 = vst [vmem:[#allocation12_spill] sm:$0xff] %v10112_v59  ;;  %v10120_v11 = vsel %vm8850_vm8, 4294967295, %v10119_v11  ;;  %vm8868_vm9 = vmand %vm5799_vm4, %vm5763_vm1  ;;  %vm10145_vm4 = vcmp.ne.s32.totalorder %v8936_v6, 0  ;;  %v10157_v59 = vmov 0 }
 0x163   : > { %10121 = vst [vmem:[#allocation16_spill] sm:$0xff] %v10120_v11  ;;  %v10124_v29 = vsel %vm8868_vm9, 4294967295, %v10123_v29  ;;  %10134 = vst [vmem:[#allocation27_spill] sm:$0xff] %v8978_v38  ;;  %vm10146_vm9 = vcmp.lt.s32.totalorder %v8936_v6, 0 }
 0x164   : > { %10125 = vst [vmem:[#allocation18_spill] sm:$0xff] %v10124_v29  ;;  %vm9017_vm1 = vmand %vm5802_vm11, %vm5766_vm10  ;;  %vm10150_vm11 = vcmp.ne.s32.totalorder %v8945_v63, 0  ;;  %vm10151_vm10 = vcmp.lt.s32.totalorder %v8945_v63, 0 }
 0x165   : > { %vm9031_vm8 = vmand %vm10141_vm14, %vm5764_vm13 }
 0x166   : > { %vm9045_vm0 = vmand %vm10146_vm9, %vm10145_vm4 }
 0x167   : > { %vm9058_vm6 = vmand %vm10151_vm10, %vm10150_vm11 }
 0x1c1   : > { %v8670_v10 = vpop.f32.mrb[0].mxu1 }
 0x1c2   : > { %v8676_v14 = vpop.f32.mrb[1].mxu1 }
 0x1c3   : > { %v8685_v18 = vpop.f32.mrb[2].mxu1 }
 0x1c4   : > { %v8694_v22 = vpop.f32.mrb[3].mxu1 }
 0x1c5   : > { %10090 = vst [vmem:[#allocation3_spill] sm:$0xff] %v8694_v22 }
 0x1c9   : > { %v8763_v44 = vpop.f32.mrb[4].mxu1 }
 0x1ca   : > { %10101 = vst [vmem:[#allocation8_spill] sm:$0xff] %v8763_v44  ;;  %v8777_v43 = vpop.f32.mrb[5].mxu1 }
 0x1cb   : > { %10104 = vst [vmem:[#allocation9_spill] sm:$0xff] %v8777_v43  ;;  %v8793_v49 = vpop.f32.mrb[6].mxu1 }
 0x1cc   : > { %10107 = vst [vmem:[#allocation10_spill] sm:$0xff] %v8793_v49  ;;  %v8808_v58 = vpop.f32.mrb[7].mxu1 }
 0x1cd   : > { %10110 = vst [vmem:[#allocation11_spill] sm:$0xff] %v8808_v58  ;;  %v8952_v58 = vmul.u32.u64.low 3817748708, %v8922_v8  ;;  %v8953_v28 = vmul.u32.u64.high 3817748708, %v8922_v8, %v8952_v58 }
 0x1d1   : > { %v8890_v60 = vpop.f32.mrb[8].mxu1 }
 0x1d2   : > { %10127 = vst [vmem:[#allocation20_spill] sm:$0xff] %v8890_v60  ;;  %v8904_v31 = vpop.f32.mrb[9].mxu1  ;;  %v5509_v60 = vmul.u32 18, %v5508_v5 }
 0x1d3   : > { %10128 = vst [vmem:[#allocation21_spill] sm:$0xff] %v8904_v31  ;;  %v8914_v53 = vpop.f32.mrb[10].mxu1  ;;  %v8948_v48 = vmul.u32.u64.low 3817748708, %v8912_v30  ;;  %v8949_v31 = vmul.u32.u64.high 3817748708, %v8912_v30, %v8948_v48 }
 0x1d4   : > { %10129 = vst [vmem:[#allocation22_spill] sm:$0xff] %v8914_v53  ;;  %v8924_v20 = vpop.f32.mrb[11].mxu1  ;;  %v8932_v53 = vadd.s32 176, %v8574_v16  ;;  %v8972_v48 = vmul.u32.u64.low 3817748708, %v8942_v26  ;;  %v8973_v58 = vmul.u32.u64.high 3817748708, %v8942_v26, %v8972_v48  ;;  %v9002_v12 = vsub.s32 %v8743_v37, %v5509_v60 }
 0x1d5   : > { %10131 = vst [vmem:[#allocation24_spill] sm:$0xff] %v8924_v20  ;;  %v5531_v20 = vmul.u32 18, %v5530_v52  ;;  %v8968_v52 = vmul.u32.u64.low 3817748708, %v8939_v55  ;;  %v8969_v5 = vmul.u32.u64.high 3817748708, %v8939_v55, %v8968_v52  ;;  %v5574_v37 = vshrl.u32 %v8949_v31, 4 }
 0x1d6   : > { %v8959_v4 = vmul.u32.u64.low 3817748708, %v8932_v53  ;;  %v8960_v11 = vmul.u32.u64.high 3817748708, %v8932_v53, %v8959_v4  ;;  %v8988_v52 = vadd.s32 18, %v8918_v54  ;;  %v10142_v60 = vmov 0 }
 0x1d7   : > { %v8983_v4 = vadd.s32 192, %v8574_v16  ;;  %v8991_v43 = vsub.s32 %v8727_v32, %v5531_v20  ;;  %v9007_v32 = vsub.s32 %v8761_v9, %v5564_v62  ;;  %v10143_v60 = vsel %vm9031_vm8, 4294967295, %v10142_v60 }
 0x1d8   : > { %10136 = vst [vmem:[#allocation29_spill] sm:$0xff] %v8988_v52  ;;  %v9010_v20 = vmul.u32.u64.low 3817748708, %v8963_v17  ;;  %v9011_v29 = vmul.u32.u64.high 3817748708, %v8963_v17, %v9010_v20  ;;  %10144 = vst [vmem:[#allocation32_spill] sm:$0xff] %v10143_v60  ;;  %v9036_v62 = vadd.s32 18, %v8936_v6  ;;  %v5552_v31 = vshrl.u32 %v8953_v28, 4 }
 0x1d9   : > { %v8965_v21 = vpop.f32.mrb[12].mxu1  ;;  %v10147_v20 = vmov 0  ;;  %vm5768_vm13 = vcmp.ne.s32.totalorder %v9002_v12, 0  ;;  %vm5804_vm14 = vcmp.lt.s32.totalorder %v9002_v12, 0  ;;  %v10152_v28 = vmov 0 }
 0x1da   : > { %10132 = vst [vmem:[#allocation25_spill] sm:$0xff] %v8965_v21  ;;  %v8975_v49 = vpop.f32.mrb[13].mxu1  ;;  %v10148_v20 = vsel %vm9045_vm0, 4294967295, %v10147_v20  ;;  %v10153_v28 = vsel %vm9058_vm6, 4294967295, %v10152_v28  ;;  %v5585_v35 = vshrl.u32 %v8969_v5, 4  ;;  %vm10155_vm10 = vcmp.ne.s32.totalorder %v8991_v43, 0  ;;  %vm9092_vm4 = vmand %vm5804_vm14, %vm5768_vm13 }
 0x1db   : > { %10133 = vst [vmem:[#allocation26_spill] sm:$0xff] %v8975_v49  ;;  %v8985_v21 = vpop.f32.mrb[14].mxu1  ;;  %v8994_v48 = vmul.u32.u64.low 3817748708, %v8956_v13  ;;  %v8995_v49 = vmul.u32.u64.high 3817748708, %v8956_v13, %v8994_v48  ;;  %vm10156_vm11 = vcmp.lt.s32.totalorder %v8991_v43, 0  ;;  %v9084_v5 = vadd.s32 18, %v8991_v43 }
 0x1dc   : > { %10135 = vst [vmem:[#allocation28_spill] sm:$0xff] %v8985_v21  ;;  %v8997_v41 = vpop.f32.mrb[15].mxu1  ;;  %v5541_v21 = vshrl.u32 %v8929_v36, 4  ;;  %v10138_v48 = vmov 0  ;;  %v9024_v36 = vmul.u32.u64.low 3817748708, %v8983_v4  ;;  %v9025_v9 = vmul.u32.u64.high 3817748708, %v8983_v4, %v9024_v36  ;;  %vm9079_vm9 = vmand %vm10156_vm11, %vm10155_vm10 }
 0x1dd   : > { %10137 = vst [vmem:[#allocation30_spill] sm:$0xff] %v8997_v41  ;;  %v10139_v48 = vsel %vm9017_vm1, 4294967295, %v10138_v48  ;;  %v5607_v41 = vshrl.u32 %v8960_v11, 4  ;;  %v10158_v59 = vsel %vm9079_vm9, 4294967295, %v10157_v59  ;;  %v10160_v11 = vmov 0 }
 0x1de   : > { %10140 = vst [vmem:[#allocation31_spill] sm:$0xff] %v10139_v48  ;;  %v5542_v36 = vmul.u32 18, %v5541_v21  ;;  %v5618_v21 = vshrl.u32 %v8973_v58, 4  ;;  %v5575_v58 = vmul.u32 18, %v5574_v37  ;;  %v10161_v11 = vsel %vm9092_vm4, 4294967295, %v10160_v11 }
 0x1df   : > { %v9097_v25 = vadd.s32 18, %v9002_v12  ;;  %v9100_v38 = vadd.s32 18, %v9007_v32  ;;  %v5553_v48 = vmul.u32 18, %v5552_v31  ;;  %v5596_v22 = vshrl.u32 %v8995_v49, 4 }
 0x1e0   : > { %vm10163_vm13 = vcmp.ne.s32.totalorder %v9007_v32, 0  ;;  %vm10164_vm14 = vcmp.lt.s32.totalorder %v9007_v32, 0  ;;  %v9118_v2 = vsub.s32 %v8888_v57, %v5542_v36  ;;  %v5608_v31 = vmul.u32 18, %v5607_v41 }
 0x1e1   : > { %v9052_v44 = vpop.f32.mrb[16].mxu1  ;;  %vm9113_vm10 = vmand %vm10164_vm14, %vm10163_vm13  ;;  %v9121_v49 = vadd.s32 216, %v8574_v16  ;;  %v5619_v54 = vmul.u32 18, %v5618_v21  ;;  %v5651_v52 = vshrl.u32 %v9011_v29, 4  ;;  %v9137_v57 = vsub.s32 %v8912_v30, %v5575_v58 }
 0x1e2   : > { %10149 = vst [vmem:[#allocation33_spill] sm:$0xff] %v9052_v44  ;;  %v9066_v0 = vpop.f32.mrb[17].mxu1  ;;  %v9073_v44 = vadd.s32 18, %v8945_v63  ;;  %v10166_v24 = vsel %vm9113_vm10, 4294967295, %v10165_v24  ;;  %v5629_v36 = vshrl.u32 %v9025_v9, 4  ;;  %v9149_v21 = vsub.s32 %v8922_v8, %v5553_v48 }
 0x1e3   : > { %10154 = vst [vmem:[#allocation34_spill] sm:$0xff] %v9066_v0  ;;  %v9086_v0 = vpop.f32.mrb[18].mxu1  ;;  %10167 = vst [vmem:[#allocation37_spill] sm:$0xff] %v9137_v57  ;;  %v9153_v30 = vsub.s32 %v8932_v53, %v5608_v31  ;;  %v9156_v9 = vmul.u32.u64.low 3817748708, %v9121_v49  ;;  %v9157_v58 = vmul.u32.u64.high 3817748708, %v9121_v49, %v9156_v9  ;;  %vm5807_vm13 = vcmp.lt.s32.totalorder %v9118_v2, 0 }
 0x1e4   : > { %10159 = vst [vmem:[#allocation35_spill] sm:$0xff] %v9086_v0  ;;  %v9103_v37 = vpop.f32.mrb[19].mxu1  ;;  %10168 = vst [vmem:[#allocation38_spill] sm:$0xff] %v9149_v21  ;;  %v5597_v0 = vmul.u32 18, %v5596_v22  ;;  %v9164_v29 = vsub.s32 %v8942_v26, %v5619_v54  ;;  %v5652_v8 = vmul.u32 18, %v5651_v52  ;;  %vm5774_vm14 = vcmp.ne.s32.totalorder %v9137_v57, 0 }
 0x1e5   : > { %10162 = vst [vmem:[#allocation36_spill] sm:$0xff] %v9103_v37  ;;  %v5586_v37 = vmul.u32 18, %v5585_v35  ;;  %10169 = vst [vmem:[#allocation39_spill] sm:$0xff] %v9153_v30  ;;  %vm5810_vm11 = vcmp.lt.s32.totalorder %v9137_v57, 0  ;;  %v5630_v22 = vmul.u32 18, %v5629_v36  ;;  %v9169_v53 = vadd.s32 200, %v8574_v16 }
 0x1e6   : > { %10171 = vst [vmem:[#allocation41_spill] sm:$0xff] %v9164_v29  ;;  %v9172_v48 = vadd.s32 18, %v9118_v2  ;;  %vm5808_vm9 = vcmp.lt.s32.totalorder %v9149_v21, 0  ;;  %vm10173_vm4 = vcmp.ne.s32.totalorder %v9118_v2, 0  ;;  %v10174_v54 = vmov 0  ;;  %vm9193_vm1 = vmand %vm5810_vm11, %vm5774_vm14 }
 0x1e7   : > { %v9161_v41 = vsub.s32 %v8939_v55, %v5586_v37  ;;  %v9177_v55 = vsub.s32 %v8956_v13, %v5597_v0  ;;  %vm9181_vm0 = vmand %vm5807_vm13, %vm10173_vm4  ;;  %v9186_v26 = vadd.s32 18, %v9137_v57  ;;  %v9189_v52 = vadd.s32 18, %v9149_v21 }
 0x1e8   : > { %v10175_v54 = vsel %vm9181_vm0, 4294967295, %v10174_v54  ;;  %vm5777_vm6 = vcmp.ne.s32.totalorder %v9153_v30, 0  ;;  %vm5813_vm10 = vcmp.lt.s32.totalorder %v9153_v30, 0  ;;  %v10177_v37 = vmov 0 }
 0x1e9   : > { %10170 = vst [vmem:[#allocation40_spill] sm:$0xff] %v9161_v41  ;;  %10172 = vst [vmem:[#allocation42_spill] sm:$0xff] %v9177_v55  ;;  %v10178_v37 = vsel %vm9193_vm1, 4294967295, %v10177_v37  ;;  %vm5775_vm8 = vcmp.ne.s32.totalorder %v9161_v41, 0  ;;  %vm5811_vm4 = vcmp.lt.s32.totalorder %v9161_v41, 0  ;;  %v9201_v0 = vsub.s32 %v8963_v17, %v5652_v8 }
 0x1ea   : > { %10176 = vst [vmem:[#allocation43_spill] sm:$0xff] %v9186_v26  ;;  %10179 = vst [vmem:[#allocation44_spill] sm:$0xff] %v10178_v37  ;;  %v10181_v13 = vsel %vm8733_vm3, %v8664_v3, %v8636_v56  ;;  %vm10184_vm11 = vcmp.ne.s32.totalorder %v9149_v21, 0  ;;  %v9220_v17 = vsub.s32 %v8983_v4, %v5630_v22  ;;  %v10188_v3 = vmov 0 }
 0x1eb   : > { %10180 = vst [vmem:[#allocation45_spill] sm:$0xff] %v9201_v0  ;;  %vm9208_vm12 = vcmp.lt.s32.totalorder %v10181_v13, 16  ;;  %vm9214_vm14 = vmand %vm5808_vm9, %vm10184_vm11  ;;  %v9223_v33 = vmul.u32.u64.low 3817748708, %v9169_v53  ;;  %v9224_v9 = vmul.u32.u64.high 3817748708, %v9169_v53, %v9223_v33  ;;  %vm5776_vm9 = vcmp.ne.s32.totalorder %v9177_v55, 0 }
 0x1ec   : > { %10187 = vst [vmem:[#allocation46_spill] sm:$0xff] %v9220_v17  ;;  %vm9230_vm3 = vmand %vm5813_vm10, %vm5777_vm6  ;;  %v9237_v4 = vadd.s32 240, %v8574_v16  ;;  %v10191_v8 = vsel %vm8715_vm2, %v8647_v42, %v8628_v51  ;;  %v10194_v13 = vsel %vm8769_vm7, %v8697_v23, %v8653_v1  ;;  %v9262_v51 = vadd.s32 18, %v9153_v30  ;;  %v10341_v42 = vld [vmem:[#allocation35_spill] sm:$0xff] }
 0x1ed   : > { %v10189_v3 = vsel %vm9230_vm3, 4294967295, %v10188_v3  ;;  %vm9244_vm13 = vcmp.lt.s32.totalorder %v10191_v8, 16  ;;  %vm9253_vm6 = vcmp.lt.s32.totalorder %v10194_v13, 16  ;;  %vm9268_vm2 = vmand %vm5811_vm4, %vm5775_vm8  ;;  %v9273_v1 = vadd.s32 18, %v9161_v41 }
 0x1ee   : > { %10190 = vst [vmem:[#allocation47_spill] sm:$0xff] %v10189_v3  ;;  %10197 = vst [vmem:[#allocation48_spill] sm:$0xff] %v9262_v51  ;;  %v5662_v23 = vshrl.u32 %v9157_v58, 4  ;;  %vm10200_vm7 = vcmp.ne.s32.totalorder %v9164_v29, 0  ;;  %vm10201_vm10 = vcmp.lt.s32.totalorder %v9164_v29, 0  ;;  %v9285_v8 = vadd.s32 18, %v9164_v29 }
 0x1ef   : > { %vm9280_vm11 = vmand %vm10201_vm10, %vm10200_vm7  ;;  %v9288_v13 = vadd.s32 18, %v9177_v55  ;;  %vm5781_vm8 = vcmp.ne.s32.totalorder %v9201_v0, 0  ;;  %vm5817_vm4 = vcmp.lt.s32.totalorder %v9201_v0, 0  ;;  %v10207_v58 = vsel %vm8749_vm5, %v8679_v15, %v8643_v61 }
 0x1f0   : > { %v10203_v46 = vsel %vm9280_vm11, 4294967295, %v10202_v46  ;;  %10205 = vst [vmem:[#allocation50_spill] sm:$0xff] %v9285_v8  ;;  %vm9297_vm7 = vcmp.lt.s32.totalorder %v10207_v58, 16  ;;  %vm10210_vm10 = vcmp.lt.s32.totalorder %v9177_v55, 0  ;;  %v10211_v35 = vmov 0 }
 0x1f1   : > { %10204 = vst [vmem:[#allocation49_spill] sm:$0xff] %v10203_v46  ;;  %10206 = vst [vmem:[#allocation51_spill] sm:$0xff] %v9288_v13  ;;  %vm5779_vm5 = vcmp.ne.s32.totalorder %v9220_v17, 0  ;;  %vm5815_vm0 = vcmp.lt.s32.totalorder %v9220_v17, 0  ;;  %v9316_v61 = vadd.s32 224, %v8574_v16  ;;  %v9319_v15 = vadd.s32 18, %v9201_v0 }
 0x1f2   : > { %vm9309_vm1 = vmand %vm10210_vm10, %vm5776_vm9  ;;  %v9322_v39 = vmul.u32.u64.low 3817748708, %v9237_v4  ;;  %v9323_v58 = vmul.u32.u64.high 3817748708, %v9237_v4, %v9322_v39  ;;  %v9326_v56 = vadd.s32 248, %v8574_v16  ;;  %v10215_v26 = vmov 0  ;;  %v7338_v21 = vpop.f32.mrb[0].mxu0 }
 0x1f3   : > { %v10212_v35 = vsel %vm9309_vm1, 4294967295, %v10211_v35  ;;  %10214 = vst [vmem:[#allocation53_spill] sm:$0xff] %v9319_v15  ;;  %vm9336_vm9 = vmand %vm5817_vm4, %vm5781_vm8  ;;  %v9341_v37 = vadd.s32 18, %v9220_v17  ;;  %v5663_v39 = vmul.u32 18, %v5662_v23  ;;  %v10219_v30 = vmov 0  ;;  %v4855_v29 = vpop.f32.mrb[1].mxu0 }
 0x1f4   : > { %10213 = vst [vmem:[#allocation52_spill] sm:$0xff] %v10212_v35  ;;  %v10216_v26 = vsel %vm9336_vm9, 4294967295, %v10215_v26  ;;  %vm9356_vm8 = vmand %vm5815_vm0, %vm5779_vm5  ;;  %v9361_v23 = vadd.s32 232, %v8574_v16  ;;  %v9364_v51 = vadd.s32 272, %v8574_v16  ;;  %v7374_v60 = vadd.f32 %v7338_v21, %v8670_v10  ;;  %v7339_v3 = vpop.f32.mrb[2].mxu0 }
 0x1f5   : > { %10217 = vst [vmem:[#allocation54_spill] sm:$0xff] %v10216_v26  ;;  %10218 = vst [vmem:[#allocation55_spill] sm:$0xff] %v9341_v37  ;;  %v10220_v30 = vsel %vm9356_vm8, 4294967295, %v10219_v30  ;;  %v10223_v57 = vsel %vm8799_vm15, %v8755_v40, %v8688_v19  ;;  %v5640_v46 = vshrl.u32 %v9224_v9, 4  ;;  %v7375_v35 = vadd.f32 %v4855_v29, %v8676_v14  ;;  %v10231_v29 = vld [vmem:[#allocation14_spill] sm:$0xff] }
 0x1f6   : > { %10221 = vst [vmem:[#allocation56_spill] sm:$0xff] %v10220_v30  ;;  %10222 = vst [vmem:[#allocation57_spill] sm:$0xff] %v9364_v51  ;;  %vm9372_vm4 = vcmp.lt.s32.totalorder %v10223_v57, 16  ;;  %v9378_v55 = vmul.u32.u64.low 3817748708, %v9316_v61  ;;  %v9379_v13 = vmul.u32.u64.high 3817748708, %v9316_v61, %v9378_v55  ;;  %v7376_v50 = vadd.f32 %v7339_v3, %v8685_v18  ;;  %v4858_v57 = vpop.f32.mrb[3].mxu0 }
 0x1f7   : > { %v9387_v19 = vmul.u32.u64.low 3817748708, %v9326_v56  ;;  %v9388_v40 = vmul.u32.u64.high 3817748708, %v9326_v56, %v9387_v19  ;;  %vm10226_vm15 = vnez %v10106_v47  ;;  %vm10230_vm10 = vnez %v10116_v45  ;;  %v10232_v55 = vld [vmem:[#allocation5_spill] sm:$0xff]  ;;  %v10236_v45 = vld [vmem:[#allocation3_spill] sm:$0xff] }
 0x1f8   : > { %v10227_v21 = vsel %vm10226_vm15, %v8738_v34, %v8667_v7  ;;  %v10233_v9 = vsel %vm10230_vm10, %v10231_v29, %v10232_v55  ;;  %v9414_v7 = vsub.s32 %v9121_v49, %v5663_v39  ;;  %v9417_v34 = vadd.s32 256, %v8574_v16  ;;  %v10237_v39 = vld [vmem:[#allocation12_spill] sm:$0xff]  ;;  %v10239_v29 = vld [vmem:[#allocation13_spill] sm:$0xff] }
 0x1f9   : > { %vm9396_vm0 = vcmp.lt.s32.totalorder %v10227_v21, 16  ;;  %vm9405_vm5 = vcmp.lt.s32.totalorder %v10233_v9, 16  ;;  %v6043_v47 = vsel %vm9208_vm12, %v7375_v35, 0.0  ;;  %v7377_v3 = vadd.f32 %v4858_v57, %v10236_v45  ;;  %v10240_v55 = vld [vmem:[#allocation4_spill] sm:$0xff] }
 0x1fa   : > { %v9428_v19 = vmul.u32.u64.low 3817748708, %v9361_v23  ;;  %v9429_v21 = vmul.u32.u64.high 3817748708, %v9361_v23, %v9428_v19  ;;  %v6760_v49 = vpack.c.bf16 %v7376_v50, %v7374_v60  ;;  %vm10238_vm15 = vnez %v10237_v39 }
 0x1fb   : > { %v10241_v31 = vsel %vm10238_vm15, %v10239_v29, %v10240_v55  ;;  %v5641_v18 = vmul.u32 18, %v5640_v46  ;;  %v9441_v0 = vmul.u32.u64.low 3817748708, %v9364_v51  ;;  %v9442_v15 = vmul.u32.u64.high 3817748708, %v9364_v51, %v9441_v0  ;;  %v10253_v51 = vld [vmem:[#allocation9_spill] sm:$0xff] }
 0x1fc   : > { %vm9436_vm12 = vcmp.lt.s32.totalorder %v10241_v31, 16  ;;  %v6045_v57 = vsel %vm9244_vm13, %v7374_v60, 0.0  ;;  %v6755_v45 = vpack.c.bf16 %v7377_v3, %v7375_v35  ;;  %v6044_v19 = vsel %vm9253_vm6, %v7377_v3, 0.0  ;;  %6842 = vst [vmem:[%s9424_s20 + $0x8] sm:$0xff] %v6760_v49   ;;  %v7342_v0 = vpop.f32.mrb[4].mxu0  ;;  %v10246_v49 = vld [vmem:[#allocation18_spill] sm:$0xff] }
 0x1fd   : > { %v5695_v39 = vshrl.u32 %v9323_v58, 4  ;;  %v6121_v29 = vmul.f32 %v6043_v47, %v6043_v47  ;;  %v6079_v55 = vadd.f32 %v6044_v19, %v6043_v47  ;;  %v6122_v31 = vmul.f32 %v6044_v19, %v6044_v19  ;;  %v10245_v58 = vld [vmem:[#allocation8_spill] sm:$0xff]  ;;  %v4871_v3 = vpop.f32.mrb[5].mxu0  ;;  %v10248_v19 = vld [vmem:[#allocation17_spill] sm:$0xff] }
 0x1fe   : > { %v9452_v46 = vadd.s32 280, %v8574_v16  ;;  %v6046_v26 = vsel %vm9297_vm7, %v7376_v50, 0.0  ;;  %6756 = vst [vmem:[%s9424_s20] sm:$0xff] %v6755_v45   ;;  %v9460_v60 = vadd.s32 18, %v9414_v7  ;;  %v6123_v35 = vmul.f32 %v6045_v57, %v6045_v57  ;;  %v7343_v37 = vpop.f32.mrb[6].mxu0 }
 0x1ff   : > { %v6080_v22 = vadd.f32 %v6079_v55, %v6045_v57  ;;  %v6157_v33 = vadd.f32 %v6122_v31, %v6121_v29  ;;  %v7378_v47 = vadd.f32 %v7342_v0, %v10245_v58  ;;  %vm10247_vm6 = vnez %v10246_v49  ;;  %v10254_v58 = vld [vmem:[#allocation10_spill] sm:$0xff] }
 0x200   : > { %10244 = vst [vmem:[#allocation14_spill] sm:$0xff] %v9452_v46  ;;  %v10250_v50 = vsel %vm10247_vm6, %v10248_v19, %v10249_v27  ;;  %v7379_v17 = vadd.f32 %v4871_v3, %v10253_v51  ;;  %v9474_v30 = vsub.s32 %v9169_v53, %v5641_v18  ;;  %v5696_v57 = vmul.u32 18, %v5695_v39  ;;  %v4874_v46 = vpop.f32.mrb[7].mxu0  ;;  %v10255_v19 = vld [vmem:[#allocation16_spill] sm:$0xff]  ;;  %v10257_v27 = vld [vmem:[#allocation15_spill] sm:$0xff]  ;;  %v10264_v18 = vld [vmem:[#allocation29_spill] sm:$0xff] }
 0x201   : > { %vm9468_vm7 = vcmp.lt.s32.totalorder %v10250_v50, 16  ;;  %v5673_v29 = vshrl.u32 %v9379_v13, 4  ;;  %v6124_v55 = vmul.f32 %v6046_v26, %v6046_v26  ;;  %v6158_v31 = vadd.f32 %v6157_v33, %v6123_v35  ;;  %v10258_v50 = vld [vmem:[#allocation6_spill] sm:$0xff]  ;;  %v10262_v53 = vld [vmem:[#allocation32_spill] sm:$0xff]  ;;  %v10265_v39 = vld [vmem:[#allocation23_spill] sm:$0xff]  ;;  %v7346_v14 = vpop.f32.mrb[8].mxu0 }
 0x202   : > { %v6081_v0 = vadd.f32 %v6080_v22, %v6046_v26  ;;  %v7380_v49 = vadd.f32 %v7343_v37, %v10254_v58  ;;  %vm10256_vm15 = vnez %v10255_v19  ;;  %vm10263_vm10 = vnez %v10262_v53  ;;  %v10269_v37 = vld [vmem:[#allocation11_spill] sm:$0xff] }
 0x203   : > { %v10259_v41 = vsel %vm10256_vm15, %v10257_v27, %v10258_v50  ;;  %v10266_v13 = vsel %vm10263_vm10, %v10264_v18, %v10265_v39  ;;  %v6047_v26 = vsel %vm9372_vm4, %v7379_v17, 0.0  ;;  %v7381_v22 = vadd.f32 %v4874_v46, %v10269_v37  ;;  %v10274_v50 = vld [vmem:[#allocation31_spill] sm:$0xff] }
 0x204   : > { %vm9483_vm6 = vcmp.lt.s32.totalorder %v10259_v41, 16  ;;  %vm9492_vm13 = vcmp.lt.s32.totalorder %v10266_v13, 16  ;;  %vm10270_vm15 = vcmp.ne.s32.totalorder %v9414_v7, 0  ;;  %vm10271_vm9 = vcmp.lt.s32.totalorder %v9414_v7, 0  ;;  %v10276_v46 = vld [vmem:[#allocation27_spill] sm:$0xff] }
 0x205   : > { %vm9503_vm8 = vmand %vm10271_vm9, %vm10270_vm15  ;;  %v5706_v33 = vshrl.u32 %v9388_v40, 4  ;;  %v9509_v3 = vadd.s32 264, %v8574_v16  ;;  %v6082_v58 = vadd.f32 %v6081_v0, %v6047_v26  ;;  %v6125_v8 = vmul.f32 %v6047_v26, %v6047_v26  ;;  %v10277_v53 = vld [vmem:[#allocation19_spill] sm:$0xff] }
 0x206   : > { %v6159_v19 = vadd.f32 %v6158_v31, %v6124_v55  ;;  %v6770_v27 = vpack.c.bf16 %v7380_v49, %v7378_v47  ;;  %vm10275_vm4 = vnez %v10274_v50  ;;  %v6049_v40 = vsel %vm9396_vm0, %v7378_v47, 0.0 }
 0x207   : > { %v10278_v18 = vsel %vm10275_vm4, %v10276_v46, %v10277_v53  ;;  %v6765_v13 = vpack.c.bf16 %v7381_v22, %v7379_v17  ;;  %v6048_v16 = vsel %vm9405_vm5, %v7381_v22, 0.0  ;;  %v5674_v0 = vmul.u32 18, %v5673_v29  ;;  %v10281_v22 = vld [vmem:[#allocation20_spill] sm:$0xff] }
 0x208   : > { %vm9516_vm10 = vcmp.lt.s32.totalorder %v10278_v18, 16  ;;  %v6160_v26 = vadd.f32 %v6159_v19, %v6125_v8  ;;  %6844 = vst [vmem:[%s9424_s20 + $0x18] sm:$0xff] %v6770_v27   ;;  %v6083_v55 = vadd.f32 %v6082_v58, %v6048_v16  ;;  %v6126_v31 = vmul.f32 %v6048_v16, %v6048_v16  ;;  %v4887_v8 = vpop.f32.mrb[9].mxu0  ;;  %v10286_v19 = vld [vmem:[#allocation21_spill] sm:$0xff] }
 0x209   : > { %v5926_v37 = vsel %vm9503_vm8, %v9460_v60, %v9414_v7  ;;  %v6050_v50 = vsel %vm9436_vm12, %v7380_v49, 0.0  ;;  %6843 = vst [vmem:[%s9424_s20 + $0x10] sm:$0xff] %v6765_v13   ;;  %vm5780_vm9 = vcmp.ne.s32.totalorder %v9474_v30, 0  ;;  %v5684_v17 = vshrl.u32 %v9429_v21, 4  ;;  %v7347_v46 = vpop.f32.mrb[10].mxu0 }
 0x20a   : > { %v6127_v10 = vmul.f32 %v6049_v40, %v6049_v40  ;;  %v6084_v47 = vadd.f32 %v6083_v55, %v6049_v40  ;;  %v6161_v29 = vadd.f32 %v6160_v26, %v6126_v31  ;;  %v7382_v58 = vadd.f32 %v7346_v14, %v10281_v22  ;;  %v4890_v16 = vpop.f32.mrb[11].mxu0 }
 0x20b   : > { %vm10282_vm5 = vnez %v10153_v28  ;;  %v7383_v27 = vadd.f32 %v4887_v8, %v10286_v19  ;;  %v9547_v21 = vadd.s32 18, %v9474_v30  ;;  %v9550_v53 = vsub.s32 %v9237_v4, %v5696_v57  ;;  %v7350_v51 = vpop.f32.mrb[12].mxu0 }
 0x20c   : > { %v10283_v9 = vsel %vm10282_vm5, %v9073_v44, %v8945_v63  ;;  %v9553_v18 = vsub.s32 %v9316_v61, %v5674_v0  ;;  %v6128_v28 = vmul.f32 %v6050_v50, %v6050_v50  ;;  %v6162_v40 = vadd.f32 %v6161_v29, %v6127_v10  ;;  %v10287_v44 = vld [vmem:[#allocation22_spill] sm:$0xff]  ;;  %v10335_v10 = vld [vmem:[#allocation40_spill] sm:$0xff] }
 0x20d   : > { %vm9541_vm12 = vcmp.lt.s32.totalorder %v10283_v9, 16  ;;  %v6085_v13 = vadd.f32 %v6084_v47, %v6050_v50  ;;  %v7384_v63 = vadd.f32 %v7347_v46, %v10287_v44  ;;  %vm10288_vm15 = vnez %v10148_v20  ;;  %v10296_v20 = vld [vmem:[#allocation24_spill] sm:$0xff] }
 0x20e   : > { %v10289_v26 = vsel %vm10288_vm15, %v9036_v62, %v8936_v6  ;;  %vm10292_vm5 = vnez %v10161_v11  ;;  %v6051_v57 = vsel %vm9468_vm7, %v7383_v27, 0.0  ;;  %v7385_v0 = vadd.f32 %v4890_v16, %v10296_v20  ;;  %v9577_v6 = vpop.f32.mrb[20].mxu1  ;;  %v10309_v16 = vld [vmem:[#allocation26_spill] sm:$0xff] }
 0x20f   : > { %vm9561_vm4 = vcmp.lt.s32.totalorder %v10289_v26, 16  ;;  %v10293_v4 = vsel %vm10292_vm5, %v9097_v25, %v9002_v12  ;;  %v9580_v62 = vmul.u32.u64.low 3817748708, %v9417_v34  ;;  %v9581_v31 = vmul.u32.u64.high 3817748708, %v9417_v34, %v9580_v62  ;;  %v9584_v14 = vpop.f32.mrb[21].mxu1 }
 0x210   : > { %vm9570_vm0 = vcmp.lt.s32.totalorder %v10293_v4, 16  ;;  %v6086_v11 = vadd.f32 %v6085_v13, %v6051_v57  ;;  %v6129_v50 = vmul.f32 %v6051_v57, %v6051_v57  ;;  %v6163_v12 = vadd.f32 %v6162_v40, %v6128_v28  ;;  %v10304_v13 = vld [vmem:[#allocation25_spill] sm:$0xff]  ;;  %v10310_v62 = vld [vmem:[#allocation28_spill] sm:$0xff] }
 0x211   : > { %v6780_v25 = vpack.c.bf16 %v7384_v63, %v7382_v58  ;;  %vm10297_vm15 = vnez %v10158_v59  ;;  %vm10301_vm5 = vcmp.lt.s32.totalorder %v9474_v30, 0  ;;  %v6053_v29 = vsel %vm9483_vm6, %v7382_v58, 0.0 }
 0x212   : > { %v10298_v45 = vsel %vm10297_vm15, %v9084_v5, %v8991_v43  ;;  %vm9599_vm8 = vmand %vm10301_vm5, %vm5780_vm9  ;;  %v6775_v22 = vpack.c.bf16 %v7385_v0, %v7383_v27  ;;  %v6052_v59 = vsel %vm9492_vm13, %v7385_v0, 0.0  ;;  %v9607_v43 = vpop.f32.mrb[22].mxu1  ;;  %v5707_v5 = vmul.u32 18, %v5706_v33 }
 0x213   : > { %vm9591_vm7 = vcmp.lt.s32.totalorder %v10298_v45, 16  ;;  %v6164_v8 = vadd.f32 %v6163_v12, %v6129_v50  ;;  %6846 = vst [vmem:[%s9424_s20 + $0x28] sm:$0xff] %v6780_v25   ;;  %v6087_v9 = vadd.f32 %v6086_v11, %v6052_v59  ;;  %v6130_v19 = vmul.f32 %v6052_v59, %v6052_v59  ;;  %v9610_v46 = vpop.f32.mrb[23].mxu1  ;;  %v10315_v12 = vld [vmem:[#allocation38_spill] sm:$0xff] }
 0x214   : > { %v5685_v28 = vmul.u32 18, %v5684_v17  ;;  %v6054_v40 = vsel %vm9516_vm10, %v7384_v63, 0.0  ;;  %6845 = vst [vmem:[%s9424_s20 + $0x20] sm:$0xff] %v6775_v22   ;;  %v5924_v35 = vsel %vm9599_vm8, %v9547_v21, %v9474_v30  ;;  %vm5785_vm13 = vcmp.ne.s32.totalorder %v9550_v53, 0  ;;  %v4903_v17 = vpop.f32.mrb[13].mxu0  ;;  %v9659_v59 = vpop.f32.mrb[24].mxu1 }
 0x215   : > { %v6131_v33 = vmul.f32 %v6053_v29, %v6053_v29  ;;  %v6088_v58 = vadd.f32 %v6087_v9, %v6053_v29  ;;  %v6165_v27 = vadd.f32 %v6164_v8, %v6130_v19  ;;  %v7386_v44 = vadd.f32 %v7350_v51, %v10304_v13  ;;  %v7351_v4 = vpop.f32.mrb[14].mxu0  ;;  %v9673_v19 = vpop.f32.mrb[25].mxu1  ;;  %v10325_v51 = vld [vmem:[#allocation43_spill] sm:$0xff]  ;;  %v10356_v63 = vld [vmem:[#allocation50_spill] sm:$0xff] }
 0x216   : > { %vm10305_vm9 = vnez %v10175_v54  ;;  %v7387_v26 = vadd.f32 %v4903_v17, %v10309_v16  ;;  %v9633_v57 = vadd.s32 18, %v9550_v53  ;;  %v6132_v20 = vmul.f32 %v6054_v40, %v6054_v40  ;;  %v9696_v16 = vpop.f32.mrb[26].mxu1 }
 0x217   : > { %v10306_v39 = vsel %vm10305_vm9, %v9172_v48, %v9118_v2  ;;  %v6166_v0 = vadd.f32 %v6165_v27, %v6131_v33  ;;  %v6089_v54 = vadd.f32 %v6088_v58, %v6054_v40  ;;  %v7388_v11 = vadd.f32 %v7351_v4, %v10310_v62  ;;  %v4906_v2 = vpop.f32.mrb[15].mxu0  ;;  %v10323_v40 = vld [vmem:[#allocation44_spill] sm:$0xff]  ;;  %v10326_v33 = vld [vmem:[#allocation37_spill] sm:$0xff]  ;;  %v9702_v62 = vpop.f32.mrb[27].mxu1 }
 0x218   : > { %vm9627_vm10 = vcmp.lt.s32.totalorder %v10306_v39, 16  ;;  %vm10311_vm9 = vnez %v10166_v24  ;;  %v10316_v25 = vsel %vm9214_vm14, %v9189_v52, %v10315_v12  ;;  %v6055_v29 = vsel %vm9541_vm12, %v7387_v26, 0.0  ;;  %v10319_v24 = vld [vmem:[#allocation30_spill] sm:$0xff] }
 0x219   : > { %v10312_v48 = vsel %vm10311_vm9, %v9100_v38, %v9007_v32  ;;  %vm9652_vm5 = vcmp.lt.s32.totalorder %v10316_v25, 16  ;;  %v7389_v22 = vadd.f32 %v4906_v2, %v10319_v24  ;;  %vm10320_vm9 = vcmp.lt.s32.totalorder %v9550_v53, 0  ;;  %v10334_v25 = vld [vmem:[#allocation33_spill] sm:$0xff] }
 0x21a   : > { %vm9643_vm6 = vcmp.lt.s32.totalorder %v10312_v48, 16  ;;  %vm9665_vm15 = vmand %vm10320_vm9, %vm5785_vm13  ;;  %v9670_v32 = vadd.s32 18, %v9553_v18  ;;  %v5739_v52 = vshrl.u32 %v9442_v15, 4  ;;  %v6090_v36 = vadd.f32 %v6089_v54, %v6055_v29 }
 0x21b   : > { %v6133_v49 = vmul.f32 %v6055_v29, %v6055_v29  ;;  %v6167_v8 = vadd.f32 %v6166_v0, %v6132_v20  ;;  %v6790_v9 = vpack.c.bf16 %v7388_v11, %v7386_v44  ;;  %vm10324_vm14 = vnez %v10323_v40 }
 0x21c   : > { %v10327_v58 = vsel %vm10324_vm14, %v10325_v51, %v10326_v33  ;;  %vm10330_vm13 = vcmp.ne.s32.totalorder %v9553_v18, 0  ;;  %vm10331_vm9 = vcmp.lt.s32.totalorder %v9553_v18, 0  ;;  %v6057_v13 = vsel %vm9561_vm4, %v7386_v44, 0.0  ;;  %v7354_v44 = vpop.f32.mrb[16].mxu0 }
 0x21d   : > { %vm9680_vm12 = vcmp.lt.s32.totalorder %v10327_v58, 16  ;;  %vm9688_vm8 = vmand %vm10331_vm9, %vm10330_vm13  ;;  %v6785_v17 = vpack.c.bf16 %v7389_v22, %v7387_v26  ;;  %v6056_v39 = vsel %vm9570_vm0, %v7389_v22, 0.0  ;;  %v9699_v4 = vsub.s32 %v9326_v56, %v5707_v5  ;;  %6848 = vst [vmem:[%s9424_s20 + $0x38] sm:$0xff] %v6790_v9   ;;  %v4919_v24 = vpop.f32.mrb[17].mxu0 }
 0x21e   : > { %v6168_v20 = vadd.f32 %v6167_v8, %v6133_v49  ;;  %v6091_v0 = vadd.f32 %v6090_v36, %v6056_v39  ;;  %v6134_v54 = vmul.f32 %v6056_v39, %v6056_v39  ;;  %v5929_v55 = vsel %vm9665_vm15, %v9633_v57, %v9550_v53  ;;  %v10339_v36 = vld [vmem:[#allocation34_spill] sm:$0xff]  ;;  %v10344_v39 = vld [vmem:[#allocation39_spill] sm:$0xff] }
 0x21f   : > { %v6058_v61 = vsel %vm9591_vm7, %v7388_v11, 0.0  ;;  %6847 = vst [vmem:[%s9424_s20 + $0x30] sm:$0xff] %v6785_v17   ;;  %v5927_v56 = vsel %vm9688_vm8, %v9670_v32, %v9553_v18  ;;  %v9716_v5 = vsub.s32 %v9361_v23, %v5685_v28  ;;  %v5740_v26 = vmul.u32 18, %v5739_v52  ;;  %v7355_v23 = vpop.f32.mrb[18].mxu0  ;;  %v10340_v52 = vld [vmem:[#allocation14_spill] sm:$0xff]  ;;  %v10343_v17 = vld [vmem:[#allocation48_spill] sm:$0xff] }
 0x220   : > { %v6135_v2 = vmul.f32 %v6057_v13, %v6057_v13  ;;  %v6092_v48 = vadd.f32 %v6091_v0, %v6057_v13  ;;  %v6169_v12 = vadd.f32 %v6168_v20, %v6134_v54  ;;  %v7390_v29 = vadd.f32 %v7354_v44, %v10334_v25  ;;  %v4922_v13 = vpop.f32.mrb[19].mxu0  ;;  %v10349_v54 = vld [vmem:[#allocation51_spill] sm:$0xff]  ;;  %v10350_v44 = vld [vmem:[#allocation42_spill] sm:$0xff] }
 0x221   : > { %v10336_v11 = vsel %vm9268_vm2, %v9273_v1, %v10335_v10  ;;  %v7391_v49 = vadd.f32 %v4919_v24, %v10339_v36  ;;  %v5717_v28 = vshrl.u32 %v9581_v31, 4  ;;  %v6136_v40 = vmul.f32 %v6058_v61, %v6058_v61  ;;  %v9756_v24 = vpop.f32.mrb[28].mxu1 }
 0x222   : > { %vm9724_vm0 = vcmp.lt.s32.totalorder %v10336_v11, 16  ;;  %v9731_v8 = vmul.u32.u64.low 3817748708, %v10340_v52  ;;  %v9732_v9 = vmul.u32.u64.high 3817748708, %v10340_v52, %v9731_v8  ;;  %v6170_v51 = vadd.f32 %v6169_v12, %v6135_v2  ;;  %v9762_v1 = vpop.f32.mrb[29].mxu1 }
 0x223   : > { %v6093_v33 = vadd.f32 %v6092_v48, %v6058_v61  ;;  %v7392_v58 = vadd.f32 %v7355_v23, %v10341_v42  ;;  %v10345_v20 = vsel %vm9230_vm3, %v10343_v17, %v10344_v39  ;;  %v10351_v25 = vsel %vm9309_vm1, %v10349_v54, %v10350_v44  ;;  %v10354_v48 = vld [vmem:[#allocation36_spill] sm:$0xff]  ;;  %v10357_v39 = vld [vmem:[#allocation41_spill] sm:$0xff]  ;;  %v10364_v17 = vld [vmem:[#allocation46_spill] sm:$0xff] }
 0x224   : > { %vm9740_vm2 = vcmp.lt.s32.totalorder %v10345_v20, 16  ;;  %vm9749_vm4 = vcmp.lt.s32.totalorder %v10351_v25, 16  ;;  %v6059_v61 = vsel %vm9627_vm10, %v7391_v49, 0.0  ;;  %v7393_v12 = vadd.f32 %v4922_v13, %v10354_v48 }
 0x225   : > { %v9759_v10 = vmul.u32.u64.low 3817748708, %v9509_v3  ;;  %v9760_v11 = vmul.u32.u64.high 3817748708, %v9509_v3, %v9759_v10  ;;  %v6094_v36 = vadd.f32 %v6093_v33, %v6059_v61  ;;  %v6137_v23 = vmul.f32 %v6059_v61, %v6059_v61 }
 0x226   : > { %v6171_v8 = vadd.f32 %v6170_v51, %v6136_v40  ;;  %v6800_v42 = vpack.c.bf16 %v7392_v58, %v7390_v29  ;;  %v10358_v20 = vsel %vm9280_vm11, %v10356_v63, %v10357_v39  ;;  %v6061_v31 = vsel %vm9643_vm6, %v7390_v29, 0.0  ;;  %v9777_v51 = vpop.f32.mrb[30].mxu1  ;;  %v7358_v29 = vpop.f32.mrb[20].mxu0 }
 0x227   : > { %vm9769_vm1 = vcmp.lt.s32.totalorder %v10358_v20, 16  ;;  %v6795_v54 = vpack.c.bf16 %v7393_v12, %v7391_v49  ;;  %v6060_v40 = vsel %vm9652_vm5, %v7393_v12, 0.0  ;;  %vm5786_vm3 = vcmp.ne.s32.totalorder %v9699_v4, 0  ;;  %v9781_v61 = vpop.f32.mrb[31].mxu1  ;;  %v10368_v20 = vld [vmem:[#allocation57_spill] sm:$0xff] }
 0x228   : > { %v6172_v33 = vadd.f32 %v6171_v8, %v6137_v23  ;;  %6850 = vst [vmem:[%s9424_s20 + $0x48] sm:$0xff] %v6800_v42   ;;  %v6095_v44 = vadd.f32 %v6094_v36, %v6060_v40  ;;  %v6138_v25 = vmul.f32 %v6060_v40, %v6060_v40  ;;  %vm5822_vm11 = vcmp.lt.s32.totalorder %v9699_v4, 0  ;;  %v4935_v23 = vpop.f32.mrb[21].mxu0  ;;  %v10361_v8 = vld [vmem:[#allocation56_spill] sm:$0xff]  ;;  %v10363_v42 = vld [vmem:[#allocation55_spill] sm:$0xff] }
 0x229   : > { %v6062_v50 = vsel %vm9680_vm12, %v7392_v58, 0.0  ;;  %6849 = vst [vmem:[%s9424_s20 + $0x40] sm:$0xff] %v6795_v54   ;;  %v9788_v45 = vadd.s32 18, %v9699_v4  ;;  %vm5784_vm7 = vcmp.ne.s32.totalorder %v9716_v5, 0  ;;  %v5718_v49 = vmul.u32 18, %v5717_v28  ;;  %v7359_v39 = vpop.f32.mrb[22].mxu0 }
 0x22a   : > { %v6139_v48 = vmul.f32 %v6061_v31, %v6061_v31  ;;  %v6096_v12 = vadd.f32 %v6095_v44, %v6061_v31  ;;  %v6173_v10 = vadd.f32 %v6172_v33, %v6138_v25  ;;  %v7394_v36 = vadd.f32 %v7358_v29, %v9577_v6  ;;  %v4938_v44 = vpop.f32.mrb[23].mxu0  ;;  %v10369_v25 = vld [vmem:[#allocation54_spill] sm:$0xff]  ;;  %v10371_v29 = vld [vmem:[#allocation53_spill] sm:$0xff] }
 0x22b   : > { %vm10362_vm6 = vnez %v10361_v8  ;;  %v7395_v63 = vadd.f32 %v4935_v23, %v9584_v14  ;;  %vm5820_vm5 = vcmp.lt.s32.totalorder %v9716_v5, 0  ;;  %v5892_v28 = vadd.s32 18, %v9716_v5  ;;  %v10372_v8 = vld [vmem:[#allocation45_spill] sm:$0xff]  ;;  %v7362_v2 = vpop.f32.mrb[24].mxu0 }
 0x22c   : > { %v10365_v27 = vsel %vm10362_vm6, %v10363_v42, %v10364_v17  ;;  %v9805_v31 = vsub.s32 %v10368_v20, %v5740_v26  ;;  %v6140_v6 = vmul.f32 %v6062_v50, %v6062_v50  ;;  %v6174_v54 = vadd.f32 %v6173_v10, %v6139_v48  ;;  %v9829_v48 = vpop.f32.mrb[32].mxu1  ;;  %vm9835_vm6 = vmand %vm5822_vm11, %vm5786_vm3 }
 0x22d   : > { %vm9797_vm10 = vcmp.lt.s32.totalorder %v10365_v27, 16  ;;  %v6097_v40 = vadd.f32 %v6096_v12, %v6062_v50  ;;  %v7396_v33 = vadd.f32 %v7359_v39, %v9607_v43  ;;  %vm10370_vm14 = vnez %v10369_v25  ;;  %v9843_v10 = vpop.f32.mrb[33].mxu1  ;;  %vm9858_vm11 = vmand %vm5820_vm5, %vm5784_vm7 }
 0x22e   : > { %v10373_v42 = vsel %vm10370_vm14, %v10371_v29, %v10372_v8  ;;  %vm9822_vm9 = vcmp.lt.s32.totalorder %v5924_v35, 16  ;;  %v6063_v43 = vsel %vm9724_vm0, %v7395_v63, 0.0  ;;  %v7397_v50 = vadd.f32 %v4938_v44, %v9610_v46  ;;  %v9866_v7 = vpop.f32.mrb[34].mxu1  ;;  %v4951_v44 = vpop.f32.mrb[25].mxu0 }
 0x22f   : > { %vm9813_vm12 = vcmp.lt.s32.totalorder %v10373_v42, 16  ;;  %v9840_v30 = vsub.s32 %v9417_v34, %v5718_v49  ;;  %v5728_v21 = vshrl.u32 %v9760_v11, 4  ;;  %v6098_v35 = vadd.f32 %v6097_v40, %v6063_v43  ;;  %v9870_v39 = vpop.f32.mrb[35].mxu1  ;;  %v7363_v13 = vpop.f32.mrb[26].mxu0 }
 0x230   : > { %v6141_v22 = vmul.f32 %v6063_v43, %v6063_v43  ;;  %v6175_v12 = vadd.f32 %v6174_v54, %v6140_v6  ;;  %v6810_v46 = vpack.c.bf16 %v7396_v33, %v7394_v36  ;;  %vm9850_vm3 = vcmp.lt.s32.totalorder %v5926_v37, 16  ;;  %v4954_v25 = vpop.f32.mrb[27].mxu0 }
 0x231   : > { %v6065_v11 = vsel %vm9740_vm2, %v7394_v36, 0.0  ;;  %v6805_v49 = vpack.c.bf16 %v7397_v50, %v7395_v63  ;;  %v6064_v41 = vsel %vm9749_vm4, %v7397_v50, 0.0  ;;  %v5750_v60 = vshrl.u32 %v9732_v9, 4 }
 0x232   : > { %v6176_v37 = vadd.f32 %v6175_v12, %v6141_v22  ;;  %6852 = vst [vmem:[%s9424_s20 + $0x58] sm:$0xff] %v6810_v46   ;;  %v6099_v17 = vadd.f32 %v6098_v35, %v6064_v41  ;;  %v6142_v27 = vmul.f32 %v6064_v41, %v6064_v41  ;;  %v5930_v0 = vsel %vm9835_vm6, %v9788_v45, %v9699_v4  ;;  %v7366_v35 = vpop.f32.mrb[28].mxu0 }
 0x233   : > { %v6066_v36 = vsel %vm9769_vm1, %v7396_v33, 0.0  ;;  %6851 = vst [vmem:[%s9424_s20 + $0x50] sm:$0xff] %v6805_v49   ;;  %v5928_v9 = vsel %vm9858_vm11, %v5892_v28, %v9716_v5  ;;  %vm5789_vm2 = vcmp.ne.s32.totalorder %v9805_v31, 0  ;;  %v5729_v63 = vmul.u32 18, %v5728_v21  ;;  %v4967_v46 = vpop.f32.mrb[29].mxu0 }
 0x234   : > { %v6143_v20 = vmul.f32 %v6065_v11, %v6065_v11  ;;  %v6100_v6 = vadd.f32 %v6099_v17, %v6065_v11  ;;  %v6177_v54 = vadd.f32 %v6176_v37, %v6142_v27  ;;  %v7398_v40 = vadd.f32 %v7362_v2, %v9659_v59  ;;  %v7367_v11 = vpop.f32.mrb[30].mxu0 }
 0x235   : > { %vm9889_vm4 = vcmp.lt.s32.totalorder %v5927_v56, 16  ;;  %v7399_v5 = vadd.f32 %v4951_v44, %v9673_v19  ;;  %vm5825_vm1 = vcmp.lt.s32.totalorder %v9805_v31, 0  ;;  %vm5787_vm7 = vcmp.ne.s32.totalorder %v9840_v30, 0  ;;  %v4970_v17 = vpop.f32.mrb[31].mxu0 }
 0x236   : > { %v5751_v45 = vmul.u32 18, %v5750_v60  ;;  %v6144_v28 = vmul.f32 %v6066_v36, %v6066_v36  ;;  %v6178_v59 = vadd.f32 %v6177_v54, %v6143_v20  ;;  %v6101_v33 = vadd.f32 %v6100_v6, %v6066_v36  ;;  %vm9954_vm0 = vmand %vm5825_vm1, %vm5789_vm2 }
 0x237   : > { %v7400_v15 = vadd.f32 %v7363_v13, %v9696_v16  ;;  %vm9902_vm8 = vcmp.lt.s32.totalorder %v5929_v55, 16  ;;  %vm9906_vm5 = vcmp.lt.s32.totalorder %v5928_v9, 16  ;;  %v6067_v19 = vsel %vm9797_vm10, %v7399_v5, 0.0 }
 0x238   : > { %v7401_v16 = vadd.f32 %v4954_v25, %v9702_v62  ;;  %vm5823_vm14 = vcmp.lt.s32.totalorder %v9840_v30, 0  ;;  %v9915_v38 = vsub.s32 %v9509_v3, %v5729_v63  ;;  %v6102_v53 = vadd.f32 %v6101_v33, %v6067_v19 }
 0x239   : > { %v6145_v57 = vmul.f32 %v6067_v19, %v6067_v19  ;;  %v6179_v55 = vadd.f32 %v6178_v59, %v6144_v28  ;;  %v6820_v56 = vpack.c.bf16 %v7400_v15, %v7398_v40  ;;  %vm9917_vm15 = vcmp.lt.s32.totalorder %v5930_v0, 16  ;;  %vm9941_vm13 = vmand %vm5823_vm14, %vm5787_vm7  ;;  %v7370_v59 = vpop.f32.mrb[32].mxu0 }
 0x23a   : > { %v6069_v58 = vsel %vm9813_vm12, %v7398_v40, 0.0  ;;  %v6815_v8 = vpack.c.bf16 %v7401_v16, %v7399_v5  ;;  %v6068_v62 = vsel %vm9822_vm9, %v7401_v16, 0.0  ;;  %v9926_v42 = vsub.s32 %v10340_v52, %v5751_v45  ;;  %v4983_v19 = vpop.f32.mrb[33].mxu0 }
 0x23b   : > { %v6180_v3 = vadd.f32 %v6179_v55, %v6145_v57  ;;  %6854 = vst [vmem:[%s9424_s20 + $0x68] sm:$0xff] %v6820_v56   ;;  %v6103_v43 = vadd.f32 %v6102_v53, %v6068_v62  ;;  %v6146_v50 = vmul.f32 %v6068_v62, %v6068_v62  ;;  %v5897_v47 = vadd.s32 18, %v9805_v31  ;;  %v7371_v53 = vpop.f32.mrb[34].mxu0 }
 0x23c   : > { %v6070_v21 = vsel %vm9850_vm3, %v7400_v15, 0.0  ;;  %6853 = vst [vmem:[%s9424_s20 + $0x60] sm:$0xff] %v6815_v8   ;;  %v5895_v14 = vadd.s32 18, %v9840_v30  ;;  %vm5788_vm10 = vcmp.ne.s32.totalorder %v9915_v38, 0  ;;  %vm5824_vm12 = vcmp.lt.s32.totalorder %v9915_v38, 0 }
 0x23d   : > { %v6147_v26 = vmul.f32 %v6069_v58, %v6069_v58  ;;  %v6104_v52 = vadd.f32 %v6103_v43, %v6069_v58  ;;  %v6181_v22 = vadd.f32 %v6180_v3, %v6146_v50  ;;  %v7402_v12 = vadd.f32 %v7366_v35, %v9756_v24  ;;  %vm9969_vm3 = vmand %vm5824_vm12, %vm5788_vm10  ;;  %v4986_v58 = vpop.f32.mrb[35].mxu0 }
 0x23e   : > { %v7403_v34 = vadd.f32 %v4967_v46, %v9762_v1  ;;  %vm5790_vm9 = vcmp.ne.s32.totalorder %v9926_v42, 0  ;;  %vm5826_vm6 = vcmp.lt.s32.totalorder %v9926_v42, 0  ;;  %v5896_v49 = vadd.s32 18, %v9915_v38 }
 0x23f   : > { %v6148_v41 = vmul.f32 %v6070_v21, %v6070_v21  ;;  %v6182_v24 = vadd.f32 %v6181_v22, %v6147_v26  ;;  %v6105_v60 = vadd.f32 %v6104_v52, %v6070_v21  ;;  %v7404_v37 = vadd.f32 %v7367_v11, %v9777_v51  ;;  %vm9977_vm11 = vmand %vm5826_vm6, %vm5790_vm9 }
 0x240   : > { %v6071_v1 = vsel %vm9889_vm4, %v7403_v34, 0.0  ;;  %v7405_v0 = vadd.f32 %v4970_v17, %v9781_v61  ;;  %v5931_v36 = vsel %vm9941_vm13, %v5895_v14, %v9840_v30  ;;  %v5898_v51 = vadd.s32 18, %v9926_v42 }
 0x241   : > { %v6106_v9 = vadd.f32 %v6105_v60, %v6071_v1  ;;  %v6149_v63 = vmul.f32 %v6071_v1, %v6071_v1  ;;  %v6183_v20 = vadd.f32 %v6182_v24, %v6148_v41  ;;  %v6830_v6 = vpack.c.bf16 %v7404_v37, %v7402_v12 }
 0x242   : > { %v6073_v30 = vsel %vm9902_vm8, %v7402_v12, 0.0  ;;  %v6825_v54 = vpack.c.bf16 %v7405_v0, %v7403_v34  ;;  %v6072_v40 = vsel %vm9906_vm5, %v7405_v0, 0.0  ;;  %v5933_v44 = vsel %vm9954_vm0, %v5897_v47, %v9805_v31 }
 0x243   : > { %v6184_v4 = vadd.f32 %v6183_v20, %v6149_v63  ;;  %6856 = vst [vmem:[%s9424_s20 + $0x78] sm:$0xff] %v6830_v6   ;;  %v6107_v5 = vadd.f32 %v6106_v9, %v6072_v40  ;;  %v6150_v13 = vmul.f32 %v6072_v40, %v6072_v40  ;;  %v5932_v45 = vsel %vm9969_vm3, %v5896_v49, %v9915_v38 }
 0x244   : > { %v6074_v28 = vsel %vm9917_vm15, %v7404_v37, 0.0  ;;  %6855 = vst [vmem:[%s9424_s20 + $0x70] sm:$0xff] %v6825_v54   ;;  %vm9995_vm2 = vcmp.lt.s32.totalorder %v5931_v36, 16  ;;  %v5934_v31 = vsel %vm9977_vm11, %v5898_v51, %v9926_v42  ;;  %v6151_v15 = vmul.f32 %v6073_v30, %v6073_v30 }
 0x245   : > { %v6108_v25 = vadd.f32 %v6107_v5, %v6073_v30  ;;  %v6185_v18 = vadd.f32 %v6184_v4, %v6150_v13  ;;  %v7406_v32 = vadd.f32 %v7370_v59, %v9829_v48  ;;  %vm10003_vm4 = vcmp.lt.s32.totalorder %v5933_v44, 16 }
 0x246   : > { %v7407_v38 = vadd.f32 %v4983_v19, %v9843_v10  ;;  %vm5968_vm1 = vcmp.lt.s32.totalorder %v5932_v45, 16  ;;  %v6152_v57 = vmul.f32 %v6074_v28, %v6074_v28  ;;  %v7408_v29 = vadd.f32 %v7371_v53, %v9866_v7 }
 0x247   : > { %v6186_v55 = vadd.f32 %v6185_v18, %v6151_v15  ;;  %v6109_v56 = vadd.f32 %v6108_v25, %v6074_v28  ;;  %vm5970_vm7 = vcmp.lt.s32.totalorder %v5934_v31, 16  ;;  %v7409_v8 = vadd.f32 %v4986_v58, %v9870_v39 }
 0x248   : > { %v6075_v48 = vsel %vm9995_vm2, %v7407_v38, 0.0  ;;  %v6840_v10 = vpack.c.bf16 %v7408_v29, %v7406_v32  ;;  %v6077_v43 = vsel %vm10003_vm4, %v7406_v32, 0.0  ;;  %v6078_v14 = vsel %vm5970_vm7, %v7408_v29, 0.0 }
 0x249   : > { %v6110_v62 = vadd.f32 %v6109_v56, %v6075_v48  ;;  %v6153_v42 = vmul.f32 %v6075_v48, %v6075_v48  ;;  %v6187_v3 = vadd.f32 %v6186_v55, %v6152_v57  ;;  %v6835_v50 = vpack.c.bf16 %v7409_v8, %v7407_v38 }
 0x24a   : > { %v6076_v47 = vsel %vm5968_vm1, %v7409_v8, 0.0  ;;  %6858 = vst [vmem:[%s9424_s20 + $0x88] sm:$0xff] %v6840_v10   ;;  %v6155_v26 = vmul.f32 %v6077_v43, %v6077_v43  ;;  %v6156_v39 = vmul.f32 %v6078_v14, %v6078_v14 }
 0x24b   : > { %v6188_v21 = vadd.f32 %v6187_v3, %v6153_v42  ;;  %v6111_v7 = vadd.f32 %v6110_v62, %v6076_v47  ;;  %v6154_v35 = vmul.f32 %v6076_v47, %v6076_v47  ;;  %6857 = vst [vmem:[%s9424_s20 + $0x80] sm:$0xff] %v6835_v50  }
 0x24d   : > { %v6112_v52 = vadd.f32 %v6111_v7, %v6077_v43  ;;  %v6189_v22 = vadd.f32 %v6188_v21, %v6154_v35 }
 0x24f   : > { %v6113_v12 = vadd.f32 %v6112_v52, %v6078_v14  ;;  %v6190_v46 = vadd.f32 %v6189_v22, %v6155_v26 }
 0x251   : > { %v6114_v23 = vrot.slane %v6113_v12, 4  ;;  %v6191_v34 = vadd.f32 %v6190_v46, %v6156_v39 }
 0x253   : > { %v6115_v11 = vadd.f32 %v6114_v23, %v6113_v12  ;;  %v6192_v49 = vrot.slane %v6191_v34, 4 }
 0x255   : > { %v6116_v41 = vrot.slane %v6115_v11, 2  ;;  %v6193_v24 = vadd.f32 %v6192_v49, %v6191_v34 }
 0x257   : > { %v6117_v60 = vadd.f32 %v6116_v41, %v6115_v11  ;;  %v6194_v37 = vrot.slane %v6193_v24, 2 }
 0x259   : > { %v6118_v17 = vrot.slane %v6117_v60, 1  ;;  %v6195_v27 = vadd.f32 %v6194_v37, %v6193_v24 }
 0x25b   : > { %v6119_v1 = vadd.f32 %v6118_v17, %v6117_v60  ;;  %v6196_v0 = vrot.slane %v6195_v27, 1 }
 0x25d   : > { %6120 = vst [vmem:[%s226_s24] sm:$0x1] %v6119_v1  ;;  %v6197_v36 = vadd.f32 %v6196_v0, %v6195_v27 }
 0x25f   : > { %6198 = vst [vmem:[%s226_s24 + $0x1] sm:$0x1] %v6197_v36 }
 0x260 PF: > { %s14_s14 = sadd.s32 1, %s7967_s14   ;;  %s10406_s12 = smov %s7963_s13 }
 0x261   : > { %p11_p5 = scmp.ge.s32.totalorder %s14_s14, 4   ;;  %s10407_s13 = smov %s10409_s15 }
 0x263   :  { %13 = sbr.rel (!%p11_p5) target bundleno = 2 (0x2), region = 73 }

// kernel: _lambda_.14
= control target key start
LH: loop header
LB: loop body
LE: loop exit
PB: predicated region body
PF: predicated region fallthrough
CT: control target
= control target key end

     0   :  { %s3768_s12 = smov 0   ;;  %s3770_s13 = smov 0   ;;  %s4579_s0 = inlined_call_operand.vmem [shape: bf16[2,110,128], index: 0, kind: input, shape index: {}]   ;;  %s4580_s1 = inlined_call_operand.vmem [shape: bf16[1152,128], index: 1, kind: input, shape index: {}]   ;;  %s4581_s2 = inlined_call_operand.vmem [shape: bf16[2,80,128], index: 2, kind: output, shape index: {0}]   ;;  %s4582_s3 = inlined_call_operand.vmem [shape: f32[2,2,128], index: 3, kind: output, shape index: {1}]  }
   0x1   :  { %s3772_s14 = smov 0  }
   0x2 LB: > { %s23_s15 = sadd.s32 1, %s3740_s13  ;;  %p2766_p0 = scmp.ge.s32.totalorder %s3744_s14, 1  ;;  %s3744_s14 = sphi %s3772_s14, %s14_s14   ;;  %s3740_s13 = sphi %s3770_s13, %s4612_s13   ;;  %s3736_s12 = sphi %s3768_s12, %s4611_s12  }
   0x3   : > { %p24_p1 = scmp.ge.s32.totalorder %s23_s15, 2  ;;  %p165_p2 = scmp.lt.s32.totalorder %s3744_s14, 3 }
   0x5   : > { %s4614_s15 = smov (%p24_p1, %s23_s15), 0  ;;  %p166_p3 = pnand %p2766_p0, %p165_p2 }
   0x6   : > { %v3597_v0 = vld [vmem:[%s4580_s1] sm:$0xff] (!%p166_p3)   ;;  %v3746_v1 = vmov (!%p166_p3), 0.0   ;;  %v3599_v3 = vld [vmem:[%s4580_s1 + $0x8] sm:$0xff] (!%p166_p3)   ;;  %vm3747_vm0 = vmmov (!%p166_p3), 0   ;;  %p203_p4 = scmp.lt.s32.totalorder (!%p166_p3), %s3736_s12, 1  ;;  %v3601_v5 = vld [vmem:[%s4580_s1 + $0x10] sm:$0xff] (!%p166_p3)  }
   0x7   : > { %169 = sbr.rel (%p166_p3) target bundleno = 458 (0x1ca), region = 28  ;;  %3063 = vmatprep.subr.bf16.mxu1 (!%p166_p3), %v3746_v1  ;;  %3207 = vmatprep.subr.bf16.mxu0 (!%p166_p3), %v3746_v1  ;;  %v3598_v2 = vld [vmem:[%s4580_s1 + $0x100] sm:$0xff] (!%p166_p3)   ;;  %v3600_v4 = vld [vmem:[%s4580_s1 + $0x108] sm:$0xff] (!%p166_p3)   ;;  %v3602_v6 = vld [vmem:[%s4580_s1 + $0x110] sm:$0xff] (!%p166_p3)   ;;  %vm1171_vm1 = vsmask.f32 (!%p166_p3), 6400 }
   0x8   : > { %3064 = vmatpush3.bf16.msra.mxu1 (!%p166_p3), %v3597_v0  ;;  %3079 = vmatprep.mubr.msk.bf16.mxu1 (!%p166_p3), %vm3747_vm0, %v3746_v1  ;;  %v3603_v7 = vld [vmem:[%s4580_s1 + $0x18] sm:$0xff] (!%p166_p3)   ;;  %v3605_v9 = vld [vmem:[%s4580_s1 + $0x20] sm:$0xff] (!%p166_p3)   ;;  %v3607_v11 = vld [vmem:[%s4580_s1 + $0x28] sm:$0xff] (!%p166_p3)   ;;  %vm470_vm2 = vsmask.f32 (!%p166_p3), 7424  ;;  %vm1436_vm3 = vcmask (!%p166_p3), 1045504  }
   0x9   : > { %3208 = vmatpush3.bf16.msra.mxu0 (!%p166_p3), %v3598_v2  ;;  %3065 = vmatprep.subr.bf16.mxu1 (!%p166_p3), %v3746_v1  ;;  %v3604_v8 = vld [vmem:[%s4580_s1 + $0x118] sm:$0xff] (!%p166_p3)   ;;  %v3606_v10 = vld [vmem:[%s4580_s1 + $0x120] sm:$0xff] (!%p166_p3)   ;;  %v3608_v14 = vld [vmem:[%s4580_s1 + $0x128] sm:$0xff] (!%p166_p3)   ;;  %vm726_vm4 = vcmask (!%p166_p3), 1046528   ;;  %vm1881_vm5 = vsmask.f32 (!%p166_p3), 5376 }
   0xa   : > { %3209 = vmatprep.subr.bf16.mxu0 (!%p166_p3), %v3746_v1  ;;  %3223 = vmatprep.mubr.msk.bf16.mxu0 (!%p166_p3), %vm3747_vm0, %v3746_v1  ;;  %v3609_v19 = vld [vmem:[%s4580_s1 + $0x30] sm:$0xff] (!%p166_p3)   ;;  %v3611_v26 = vld [vmem:[%s4580_s1 + $0x38] sm:$0xff] (!%p166_p3)   ;;  %v3616_v33 = vld [vmem:[%s4580_s1 + $0x140] sm:$0xff] (!%p166_p3)   ;;  %vm2146_vm6 = vcmask (!%p166_p3), 1044480  }
   0xb   : > { %v3610_v20 = vld [vmem:[%s4580_s1 + $0x130] sm:$0xff] (!%p166_p3)   ;;  %v3612_v27 = vld [vmem:[%s4580_s1 + $0x138] sm:$0xff] (!%p166_p3)   ;;  %v3620_v38 = vld [vmem:[%s4580_s1 + $0x40] sm:$0xff] (!%p166_p3)  }
   0xc   : > { %3066 = vmatpush3.bf16.msra.mxu1 (!%p166_p3), %v3599_v3  ;;  %v3617_v39 = vld [vmem:[%s4580_s1 + $0x148] sm:$0xff] (!%p166_p3)   ;;  %v3621_v47 = vld [vmem:[%s4580_s1 + $0x150] sm:$0xff] (!%p166_p3)   ;;  %v3625_v55 = vld [vmem:[%s4580_s1 + $0x158] sm:$0xff] (!%p166_p3)  }
   0xd   : > { %3210 = vmatpush3.bf16.msra.mxu0 (!%p166_p3), %v3600_v4  ;;  %3067 = vmatprep.subr.bf16.mxu1 (!%p166_p3), %v3746_v1  ;;  %v3622_v43 = vld [vmem:[%s4580_s1 + $0x48] sm:$0xff] (!%p166_p3)   ;;  %v3626_v50 = vld [vmem:[%s4580_s1 + $0x50] sm:$0xff] (!%p166_p3)   ;;  %v3627_v56 = vld [vmem:[%s4580_s1 + $0x58] sm:$0xff] (!%p166_p3)  }
   0xe   : > { %s4616_s12 = smov (!%p203_p4, %s3736_s12), 1  ;;  %3211 = vmatprep.subr.bf16.mxu0 %v3746_v1  ;;  %v3628_v57 = vld [vmem:[%s4580_s1 + $0x160] sm:$0xff]   ;;  %v3632_v63 = vld [vmem:[%s4580_s1 + $0x168] sm:$0xff]  }
   0xf   : > { %s3549_s5 = smul.u32 56, %s4616_s12  ;;  %v3631_v62 = vld [vmem:[%s4580_s1 + $0x60] sm:$0xff]   ;;  %s2769_s7 = sshll.u32 %s4616_s12, 1 }
  0x10   : > { %3068 = vmatpush3.bf16.msra.mxu1 %v3601_v5  ;;  %v3633_v5 = vld [vmem:[%s4580_s1 + $0x68] sm:$0xff]   ;;  %s226_s10 = scalar_lea.vmem %s4582_s3, %s2769_s7 }
  0x11   : > { %3212 = vmatpush3.bf16.msra.mxu0 %v3602_v6  ;;  %3069 = vmatprep.subr.bf16.mxu1 %v3746_v1  ;;  %s3839_s16 = scalar_lea.vmem %s4579_s0, %s3549_s5  ;;  %v3634_v6 = vld [vmem:[%s4580_s1 + $0x170] sm:$0xff]  }
  0x12   : > { %3213 = vmatprep.subr.bf16.mxu0 %v3746_v1  ;;  %v3614_v12 = vld [vmem:[%s3839_s16 + $0x4] sm:$0xfe]   ;;  %v3615_v13 = vld [vmem:[%s3839_s16 + $0xc] sm:$0xff]   ;;  %v3619_v25 = vld [vmem:[%s3839_s16 + $0x14] sm:$0xff]  }
  0x13   : > { %v1173_v15 = vshrl.u32 %v3614_v12, 16  ;;  %v1176_v16 = vshll.u32 %v3614_v12, 16  ;;  %v1181_v17 = vshrl.u32 %v3615_v13, 16  ;;  %v1184_v18 = vshll.u32 %v3615_v13, 16  ;;  %v3613_v32 = vld [vmem:[%s3839_s16] sm:$0xff]   ;;  %v3618_v44 = vld [vmem:[%s3839_s16 + $0x8] sm:$0xff]  }
  0x14   : > { %3070 = vmatpush3.bf16.msra.mxu1 %v3603_v7  ;;  %v1190_v28 = vshrl.u32 %v3619_v25, 16  ;;  %v1193_v29 = vshll.u32 %v3619_v25, 16  ;;  %v3624_v36 = vld [vmem:[%s3839_s16 + $0x1c] sm:$0xff]   ;;  %v3630_v45 = vld [vmem:[%s3839_s16 + $0x24] sm:$0xff]   ;;  %v3623_v53 = vld [vmem:[%s3839_s16 + $0x10] sm:$0xff]  }
  0x15   : > { %3214 = vmatpush3.bf16.msra.mxu0 %v3604_v8  ;;  %3071 = vmatprep.subr.bf16.mxu1 %v3746_v1  ;;  %v1175_v21 = vrot.slane %v1173_v15, 1  ;;  %v1178_v22 = vrot.slane %v1176_v16, 2  ;;  %v1183_v23 = vrot.slane %v1181_v17, 1  ;;  %v1186_v24 = vrot.slane %v1184_v18, 2  ;;  %v3629_v0 = vld [vmem:[%s3839_s16 + $0x18] sm:$0xff]   ;;  %v3640_v7 = vld [vmem:[%s3839_s16] sm:$0xff]  }
  0x16   : > { %3215 = vmatprep.subr.bf16.mxu0 %v3746_v1  ;;  %v1192_v34 = vrot.slane %v1190_v28, 1  ;;  %v1195_v35 = vrot.slane %v1193_v29, 2  ;;  %v1199_v41 = vshrl.u32 %v3624_v36, 16  ;;  %v1202_v42 = vshll.u32 %v3624_v36, 16  ;;  %v3641_v12 = vld [vmem:[%s3839_s16 + $0x8] sm:$0xff]   ;;  %v3638_v16 = vld [vmem:[%s4580_s1 + $0x178] sm:$0xff]  }
  0x17   : > { %v1179_v30 = vor.u32 %v1178_v22, %v1175_v21  ;;  %v1187_v31 = vor.u32 %v1186_v24, %v1183_v23  ;;  %v1208_v51 = vshrl.u32 %v3630_v45, 16  ;;  %v1211_v52 = vshll.u32 %v3630_v45, 16  ;;  %v3636_v60 = vld [vmem:[%s3839_s16 + $0x2c] ss:$0 sps:$4 sm:$0x33]   ;;  %v3639_v17 = vld [vmem:[%s4580_s1 + $0x78] sm:$0xff]  }
  0x18   : > { %3072 = vmatpush3.bf16.msra.mxu1 %v3605_v9  ;;  %v1196_v40 = vor.u32 %v1195_v35, %v1192_v34  ;;  %v1201_v48 = vrot.slane %v1199_v41, 1  ;;  %v1204_v49 = vrot.slane %v1202_v42, 2  ;;  %v1217_v3 = vshrl.u32 %v3636_v60, 16  ;;  %v3643_v23 = vld [vmem:[%s3839_s16 + $0xc] sm:$0xff]   ;;  %v3647_v34 = vld [vmem:[%s3839_s16 + $0x14] sm:$0xff]   ;;  %v3648_v35 = vld [vmem:[%s4580_s1 + $0x80] sm:$0xff]  }
  0x19   : > { %3216 = vmatpush3.bf16.msra.mxu0 %v3606_v10  ;;  %3073 = vmatprep.subr.bf16.mxu1 %v3746_v1  ;;  %v1188_v37 = vsel %vm1171_vm1, %v1179_v30, %v1187_v31  ;;  %v1210_v58 = vrot.slane %v1208_v51, 1  ;;  %v1213_v59 = vrot.slane %v1211_v52, 2  ;;  %v1220_v4 = vshll.u32 %v3636_v60, 16  ;;  %v3646_v24 = vld [vmem:[%s3839_s16 + $0x10] sm:$0xff]   ;;  %v3650_v41 = vld [vmem:[%s4580_s1 + $0x88] sm:$0xff]   ;;  %v3657_v51 = vld [vmem:[%s3839_s16 + $0x20] sm:$0xff]  }
  0x1a   : > { %3217 = vmatprep.subr.bf16.mxu0 %v3746_v1  ;;  %v1197_v46 = vsel %vm1171_vm1, %v1187_v31, %v1196_v40  ;;  %v1205_v54 = vor.u32 %v1204_v49, %v1201_v48  ;;  %v1219_v9 = vrot.slane %v1217_v3, 1  ;;  %v474_v13 = vshll.u32 %v3640_v7, 16  ;;  %v3644_v31 = vld [vmem:[%s4580_s1 + $0x180] sm:$0xff]   ;;  %v3649_v42 = vld [vmem:[%s4580_s1 + $0x190] sm:$0xff]   ;;  %v3660_v3 = vld [vmem:[%s4580_s1 + $0x1a8] sm:$0xff]  }
  0x1b   : > { %v1214_v2 = vor.u32 %v1213_v59, %v1210_v58  ;;  %v1222_v10 = vrot.slane %v1220_v4, 2  ;;  %v472_v18 = vshrl.u32 %v3640_v7, 16  ;;  %v479_v21 = vshll.u32 %v3641_v12, 16  ;;  %v3654_v48 = vld [vmem:[%s4580_s1 + $0x90] sm:$0xff]   ;;  %v3658_v60 = vld [vmem:[%s3839_s16 + $0x24] sm:$0xff]  }
  0x1c   : > { %3074 = vmatpush3.bf16.msra.mxu1 %v3607_v11  ;;  %v1206_v61 = vsel %vm1171_vm1, %v1196_v40, %v1205_v54  ;;  %v3637_v11 = vld [vmem:[%s4580_s1 + $0x70] sm:$0xff]   ;;  %v1438_v28 = vrot.slane %v3643_v23, 2  ;;  %v487_v29 = vshll.u32 %v3646_v24, 16  ;;  %v1440_v40 = vrot.slane %v3647_v34, 2  ;;  %v3661_v4 = vld [vmem:[%s4580_s1 + $0xa8] sm:$0xff]  }
  0x1d   : > { %3218 = vmatpush3.bf16.msra.mxu0 %v3608_v14  ;;  %3075 = vmatprep.subr.bf16.mxu1 %v3746_v1  ;;  %v1215_v8 = vsel %vm1171_vm1, %v1205_v54, %v1214_v2  ;;  %v3635_v14 = vld [vmem:[%s3839_s16 + $0x20] sm:$0xff]   ;;  %v1223_v15 = vor.u32 %v1222_v10, %v1219_v9  ;;  %v3655_v54 = vld [vmem:[%s4580_s1 + $0x98] sm:$0xff]   ;;  %v503_v58 = vshll.u32 %v3657_v51, 16  ;;  %v507_v7 = vshrl.u32 %v3657_v51, 16  ;;  %v3662_v10 = vld [vmem:[%s4580_s1 + $0x1b0] sm:$0xff]  }
  0x1e   : > { %3219 = vmatprep.subr.bf16.mxu0 %v3746_v1  ;;  %v489_v36 = vrot.slane %v487_v29, 1  ;;  %v3674_v29 = vld [vmem:[%s3839_s16 + $0x10] sm:$0xff]   ;;  %v3673_v34 = vld [vmem:[%s4580_s1 + $0x1c8] sm:$0xff]  }
  0x1f   : > { %v1224_v22 = vsel %vm1171_vm1, %v1214_v2, %v1223_v15  ;;  %v1444_v2 = vrot.slane %v3658_v60, 2  ;;  %v3686_v51 = vld [vmem:[%s3839_s16 + $0x28] sm:$0xff]  }
  0x20   : > { %3076 = vmatpush3.bf16.msra.mxu1 %v3609_v19  ;;  %v3642_v19 = vld [vmem:[%s3839_s16 + $0x4] sm:$0xfc]  }
  0x21   : > { %3220 = vmatpush3.bf16.msra.mxu0 %v3610_v20  ;;  %3077 = vmatprep.subr.bf16.mxu1 %v3746_v1  ;;  %v476_v20 = vrot.slane %v474_v13, 1 }
  0x22   : > { %3221 = vmatprep.subr.bf16.mxu0 %v3746_v1 }
  0x23   : > { %v477_v25 = vor.u32 %v476_v20, %v472_v18  ;;  %v3671_v18 = vld [vmem:[%s3839_s16 + $0x10] sm:$0xff]   ;;  %v3668_v20 = vld [vmem:[%s3839_s16] sm:$0xfe]  }
  0x24   : > { %3078 = vmatpush3.bf16.msra.mxu1 %v3611_v26  ;;  %v481_v26 = vrot.slane %v479_v21, 1  ;;  %v3670_v21 = vld [vmem:[%s3839_s16 + $0x8] sm:$0xfc]   ;;  %v727_v23 = vrot.slane %v3668_v20, 1 }
  0x25   : > { %3222 = vmatpush3.bf16.msra.mxu0 %v3612_v27  ;;  %3099 = vmatprep.subr.bf16.mxu1 %v3746_v1  ;;  %v1437_v27 = vrot.slane %v3642_v19, 2 }
  0x26   : > { %3243 = vmatprep.subr.bf16.mxu0 %v3746_v1  ;;  %v482_v30 = vsel %vm470_vm2, %v477_v25, %v481_v26  ;;  %v1659_v25 = vrot.slane %v3670_v21, 2 }
  0x27   : > { %3080 = vmatmul.mubr.bf16.vlgmr.msra.gmra.mrb[0].mxu1 %v3613_v32  ;;  %v483_v32 = vshrl.u32 %v3641_v12, 16 }
  0x28   : > { %3224 = vmatmul.mubr.bf16.vlgmr.msra.gmra.mrb[0].mxu0 %v1188_v37  ;;  %3083 = vmatprep.mubr.msk.bf16.mxu1 %vm3747_vm0, %v3746_v1  ;;  %v3651_v37 = vld [vmem:[%s3839_s16 + $0x18] sm:$0xff]  }
  0x29   : > { %3244 = vmatpush3.bf16.msra.mxu0 %v3616_v33  ;;  %3227 = vmatprep.mubr.msk.bf16.mxu0 %vm3747_vm0, %v3746_v1  ;;  %v1439_v33 = vsel %vm1436_vm3, %v1437_v27, %v1438_v28  ;;  %v3672_v27 = vld [vmem:[%s4580_s1 + $0x1c0] sm:$0xff]  }
  0x2a   : > { %3245 = vmatprep.subr.bf16.mxu0 %v3746_v1  ;;  %3100 = vmatpush3.bf16.msra.mxu1 %v3620_v38  ;;  %v485_v38 = vor.u32 %v483_v32, %v481_v26  ;;  %v1660_v26 = vrot.slane %v3671_v18, 2  ;;  %v3676_v32 = vld [vmem:[%s4580_s1 + $0xc0] sm:$0xff]   ;;  %v3703_v18 = vld [vmem:[%s3839_s16 + $0x18] sm:$0xff]  }
  0x2b   : > { %3101 = vmatprep.subr.bf16.mxu1 %v3746_v1 }
  0x2c   : > { %v490_v45 = vsel %vm470_vm2, %v485_v38, %v489_v36  ;;  %v3677_v38 = vld [vmem:[%s4580_s1 + $0x1d0] sm:$0xff]  }
  0x2d   : > { %3246 = vmatpush3.bf16.msra.mxu0 %v3617_v39  ;;  %v3645_v39 = vld [vmem:[%s4580_s1 + $0x188] sm:$0xff]  }
  0x2e   : > { %3247 = vmatprep.subr.bf16.mxu0 %v3746_v1  ;;  %3102 = vmatpush3.bf16.msra.mxu1 %v3622_v43  ;;  %v491_v43 = vshrl.u32 %v3646_v24, 16 }
  0x2f   : > { %3084 = vmatmul.mubr.bf16.gmra.mrb[4].mxu1 %v3618_v44  ;;  %3103 = vmatprep.subr.bf16.mxu1 %v3746_v1  ;;  %v495_v44 = vshll.u32 %v3651_v37, 16 }
  0x30   : > { %3228 = vmatmul.mubr.bf16.gmra.mrb[4].mxu0 %v1197_v46  ;;  %3087 = vmatprep.mubr.msk.bf16.mxu1 %vm3747_vm0, %v3746_v1  ;;  %v1441_v46 = vsel %vm1436_vm3, %v1438_v28, %v1440_v40  ;;  %v493_v49 = vor.u32 %v491_v43, %v489_v36  ;;  %v3678_v36 = vld [vmem:[%s4580_s1 + $0xc8] sm:$0xff]  }
  0x31   : > { %3248 = vmatpush3.bf16.msra.mxu0 %v3621_v47  ;;  %3231 = vmatprep.mubr.msk.bf16.mxu0 %vm3747_vm0, %v3746_v1  ;;  %v3652_v47 = vld [vmem:[%s3839_s16 + $0x1c] sm:$0xff]  }
  0x32   : > { %3249 = vmatprep.subr.bf16.mxu0 %v3746_v1  ;;  %3104 = vmatpush3.bf16.msra.mxu1 %v3626_v50  ;;  %v497_v50 = vrot.slane %v495_v44, 1  ;;  %v1442_v52 = vrot.slane %v3652_v47, 2  ;;  %v3684_v47 = vld [vmem:[%s4580_s1 + $0x1e0] sm:$0xff]  }
  0x33   : > { %3105 = vmatprep.subr.bf16.mxu1 %v3746_v1 }
  0x34   : > { %v1443_v59 = vsel %vm1436_vm3, %v1440_v40, %v1442_v52  ;;  %v1445_v9 = vsel %vm1436_vm3, %v1442_v52, %v1444_v2  ;;  %v3687_v52 = vld [vmem:[%s4580_s1 + $0xe0] sm:$0xff]  }
  0x35   : > { %3250 = vmatpush3.bf16.msra.mxu0 %v3625_v55  ;;  %v3656_v55 = vld [vmem:[%s4580_s1 + $0x1a0] sm:$0xff]  }
  0x36   : > { %3251 = vmatprep.subr.bf16.mxu0 %v3746_v1  ;;  %3106 = vmatpush3.bf16.msra.mxu1 %v3627_v56  ;;  %v498_v56 = vsel %vm470_vm2, %v493_v49, %v497_v50 }
  0x37   : > { %3088 = vmatmul.mubr.bf16.gmra.mrb[8].mxu1 %v3623_v53  ;;  %3107 = vmatprep.subr.bf16.mxu1 %v3746_v1  ;;  %v3653_v53 = vld [vmem:[%s4580_s1 + $0x198] sm:$0xff]  }
  0x38   : > { %3232 = vmatmul.mubr.bf16.gmra.mrb[8].mxu0 %v1206_v61  ;;  %3091 = vmatprep.mubr.msk.bf16.mxu1 %vm3747_vm0, %v3746_v1  ;;  %v3659_v61 = vld [vmem:[%s4580_s1 + $0xa0] sm:$0xff]  }
  0x39   : > { %3252 = vmatpush3.bf16.msra.mxu0 %v3628_v57  ;;  %3235 = vmatprep.mubr.msk.bf16.mxu0 %vm3747_vm0, %v3746_v1  ;;  %v499_v57 = vshrl.u32 %v3651_v37, 16 }
  0x3a   : > { %3108 = vmatpush3.bf16.msra.mxu1 %v3631_v62  ;;  %3253 = vmatprep.subr.bf16.mxu0 %v3746_v1  ;;  %v3663_v62 = vld [vmem:[%s3839_s16 + $0x28] ss:$0 sps:$4 sm:$0x11]  }
  0x3b   : > { %3109 = vmatprep.subr.bf16.mxu1 %v3746_v1 }
  0x3d   : > { %3254 = vmatpush3.bf16.msra.mxu0 %v3632_v63  ;;  %v501_v63 = vor.u32 %v499_v57, %v497_v50 }
  0x3e   : > { %3110 = vmatpush3.bf16.msra.mxu1 %v3633_v5  ;;  %3255 = vmatprep.subr.bf16.mxu0 %v3746_v1  ;;  %v3664_v5 = vld [vmem:[%s3839_s16 + $0x2c] ss:$0 sps:$4 sm:$0x33]  }
  0x3f   : > { %3092 = vmatmul.mubr.bf16.gmra.mrb[12].mxu1 %v3629_v0  ;;  %3111 = vmatprep.subr.bf16.mxu1 %v3746_v1  ;;  %v505_v0 = vrot.slane %v503_v58, 1  ;;  %v1446_v15 = vrot.slane %v3664_v5, 2  ;;  %v3691_v58 = vld [vmem:[%s3839_s16 + $0x28] ss:$0 sps:$4 sm:$0x11]  }
  0x40   : > { %3236 = vmatmul.mubr.bf16.gmra.mrb[12].mxu0 %v1215_v8  ;;  %3095 = vmatprep.mubr.msk.bf16.mxu1 %vm3747_vm0, %v3746_v1  ;;  %v511_v8 = vshll.u32 %v3663_v62, 16  ;;  %v3698_v62 = vld [vmem:[%s3839_s16 + $0x8] sm:$0xfc]  }
  0x41   : > { %3239 = vmatprep.mubr.msk.bf16.mxu0 %vm3747_vm0, %v3746_v1  ;;  %3256 = vmatpush3.bf16.msra.mxu0 %v3634_v6  ;;  %v506_v6 = vsel %vm470_vm2, %v501_v63, %v505_v0  ;;  %v509_v12 = vor.u32 %v507_v7, %v505_v0  ;;  %v3699_v63 = vld [vmem:[%s3839_s16 + $0x10] sm:$0xff]   ;;  %v1883_v5 = vshrl.u32 %v3698_v62, 16 }
  0x42   : > { %3112 = vmatpush3.bf16.msra.mxu1 %v3637_v11  ;;  %3257 = vmatprep.subr.bf16.mxu0 %v3746_v1  ;;  %v3665_v11 = vld [vmem:[%s4580_s1 + $0xb0] sm:$0xff]   ;;  %v513_v13 = vrot.slane %v511_v8, 1  ;;  %v1891_v7 = vshrl.u32 %v3699_v63, 16  ;;  %v1894_v8 = vshll.u32 %v3699_v63, 16 }
  0x43   : > { %3113 = vmatprep.subr.bf16.mxu1 %v3746_v1  ;;  %v3693_v0 = vld [vmem:[%s4580_s1 + $0xf0] sm:$0xff]  }
  0x44   : > { %v514_v19 = vsel %vm470_vm2, %v509_v12, %v513_v13  ;;  %v3696_v12 = vld [vmem:[%s3839_s16 + $0x4] sm:$0xfe]   ;;  %v3697_v13 = vld [vmem:[%s3839_s16 + $0xc] sm:$0xff]  }
  0x45   : > { %3258 = vmatpush3.bf16.msra.mxu0 %v3638_v16  ;;  %v3667_v16 = vld [vmem:[%s4580_s1 + $0xb8] sm:$0xff]   ;;  %v950_v20 = vrot.slane %v3697_v13, 1 }
  0x46   : > { %3114 = vmatpush3.bf16.msra.mxu1 %v3639_v17  ;;  %3279 = vmatprep.subr.bf16.mxu0 %v3746_v1  ;;  %v3669_v17 = vld [vmem:[%s3839_s16 + $0x8] sm:$0xff]  }
  0x47   : > { %3096 = vmatmul.mubr.bf16.gmra.mrb[16].mxu1 %v3635_v14  ;;  %3135 = vmatprep.subr.bf16.mxu1 %v3746_v1  ;;  %v3666_v14 = vld [vmem:[%s4580_s1 + $0x1b8] sm:$0xff]   ;;  %v728_v24 = vrot.slane %v3669_v17, 1  ;;  %v1896_v17 = vrot.slane %v1894_v8, 3  ;;  %v3718_v8 = vld [vmem:[%s3839_s16 + $0x20] sm:$0xff]  }
  0x48   : > { %3240 = vmatmul.mubr.bf16.gmra.mrb[16].mxu0 %v1224_v22  ;;  %3115 = vmatprep.mubr.msk.bf16.mxu1 %vm3747_vm0, %v3746_v1  ;;  %v1447_v22 = vsel %vm1436_vm3, %v1444_v2, %v1446_v15  ;;  %v736_v2 = vrot.slane %v3691_v58, 1  ;;  %v3711_v58 = vld [vmem:[%s4580_s1 + $0x228] sm:$0xff]   ;;  %v2152_v13 = vrot.slane %v3718_v8, 3 }
  0x49   : > { %3259 = vmatprep.mubr.msk.bf16.mxu0 %vm3747_vm0, %v3746_v1  ;;  %v729_v28 = vsel %vm726_vm4, %v727_v23, %v728_v24  ;;  %v1900_v23 = vshrl.u32 %v3703_v18, 16 }
  0x4f   : > { %3116 = vmatmul.mubr.bf16.vlgmr.msra.gmra.mrb[0].mxu1 %v482_v30  ;;  %v1661_v30 = vsel %vm1436_vm3, %v1659_v25, %v1660_v26 }
  0x50   : > { %3260 = vmatmul.mubr.bf16.vlgmr.msra.gmra.mrb[0].mxu0 %v1439_v33  ;;  %3119 = vmatprep.mubr.msk.bf16.mxu1 %vm3747_vm0, %v3746_v1  ;;  %v730_v33 = vrot.slane %v3674_v29, 1  ;;  %v1902_v29 = vrot.slane %v1900_v23, 2 }
  0x51   : > { %3280 = vmatpush3.bf16.msra.mxu0 %v3644_v31  ;;  %3263 = vmatprep.mubr.msk.bf16.mxu0 %vm3747_vm0, %v3746_v1  ;;  %v3675_v31 = vld [vmem:[%s3839_s16 + $0x18] sm:$0xff]  }
  0x52   : > { %3281 = vmatprep.subr.bf16.mxu0 %v3746_v1  ;;  %3136 = vmatpush3.bf16.msra.mxu1 %v3648_v35  ;;  %v1662_v35 = vrot.slane %v3675_v31, 2  ;;  %v731_v37 = vsel %vm726_vm4, %v728_v24, %v730_v33  ;;  %v1903_v24 = vshll.u32 %v3703_v18, 16  ;;  %v3706_v31 = vld [vmem:[%s3839_s16 + $0x20] sm:$0xff]   ;;  %v3721_v18 = vld [vmem:[%s3839_s16 + $0x30] ss:$0 sps:$4 sm:$0x77]  }
  0x53   : > { %3137 = vmatprep.subr.bf16.mxu1 %v3746_v1 }
  0x54   : > { %v1663_v40 = vsel %vm1436_vm3, %v1660_v26, %v1662_v35  ;;  %v3702_v26 = vld [vmem:[%s3839_s16 + $0x14] sm:$0xff]  }
  0x55   : > { %3282 = vmatpush3.bf16.msra.mxu0 %v3645_v39  ;;  %v3679_v39 = vld [vmem:[%s3839_s16 + $0x18] sm:$0xff]  }
  0x56   : > { %3283 = vmatprep.subr.bf16.mxu0 %v3746_v1  ;;  %3138 = vmatpush3.bf16.msra.mxu1 %v3650_v41  ;;  %v3680_v41 = vld [vmem:[%s3839_s16 + $0x20] sm:$0xff]   ;;  %v732_v43 = vrot.slane %v3679_v39, 1 }
  0x57   : > { %3120 = vmatmul.mubr.bf16.gmra.mrb[4].mxu1 %v490_v45  ;;  %3139 = vmatprep.subr.bf16.mxu1 %v3746_v1  ;;  %v1664_v44 = vrot.slane %v3680_v41, 2  ;;  %v3681_v45 = vld [vmem:[%s4580_s1 + $0x1d8] sm:$0xff]  }
  0x58   : > { %3264 = vmatmul.mubr.bf16.gmra.mrb[4].mxu0 %v1441_v46  ;;  %3123 = vmatprep.mubr.msk.bf16.mxu1 %vm3747_vm0, %v3746_v1  ;;  %v3683_v46 = vld [vmem:[%s4580_s1 + $0xd8] sm:$0xff]   ;;  %v733_v49 = vsel %vm726_vm4, %v730_v33, %v732_v43  ;;  %v3701_v33 = vld [vmem:[%s4580_s1 + $0x208] sm:$0xff]  }
  0x59   : > { %3284 = vmatpush3.bf16.msra.mxu0 %v3649_v42  ;;  %3267 = vmatprep.mubr.msk.bf16.mxu0 %vm3747_vm0, %v3746_v1  ;;  %v3682_v42 = vld [vmem:[%s4580_s1 + $0xd0] sm:$0xff]   ;;  %v1665_v50 = vsel %vm1436_vm3, %v1662_v35, %v1664_v44  ;;  %v1909_v35 = vshrl.u32 %v3706_v31, 16 }
  0x5a   : > { %3285 = vmatprep.subr.bf16.mxu0 %v3746_v1  ;;  %3140 = vmatpush3.bf16.msra.mxu1 %v3654_v48  ;;  %v3685_v48 = vld [vmem:[%s3839_s16 + $0x20] sm:$0xff]  }
  0x5b   : > { %3141 = vmatprep.subr.bf16.mxu1 %v3746_v1  ;;  %v1911_v41 = vrot.slane %v1909_v35, 2 }
  0x5d   : > { %3286 = vmatpush3.bf16.msra.mxu0 %v3653_v53  ;;  %v734_v53 = vrot.slane %v3685_v48, 1 }
  0x5e   : > { %3287 = vmatprep.subr.bf16.mxu0 %v3746_v1  ;;  %3142 = vmatpush3.bf16.msra.mxu1 %v3655_v54  ;;  %v1666_v54 = vrot.slane %v3686_v51, 2 }
  0x5f   : > { %3124 = vmatmul.mubr.bf16.gmra.mrb[8].mxu1 %v498_v56  ;;  %3143 = vmatprep.subr.bf16.mxu1 %v3746_v1  ;;  %v3689_v56 = vld [vmem:[%s4580_s1 + $0xe8] sm:$0xff]   ;;  %v735_v57 = vsel %vm726_vm4, %v732_v43, %v734_v53 }
  0x60   : > { %3268 = vmatmul.mubr.bf16.gmra.mrb[8].mxu0 %v1443_v59  ;;  %3127 = vmatprep.mubr.msk.bf16.mxu1 %vm3747_vm0, %v3746_v1  ;;  %v3692_v59 = vld [vmem:[%s3839_s16 + $0x30] ss:$0 sps:$4 sm:$0x33]   ;;  %v1667_v60 = vsel %vm1436_vm3, %v1664_v44, %v1666_v54  ;;  %v3710_v43 = vld [vmem:[%s3839_s16 + $0x28] sm:$0xff]  }
  0x61   : > { %3288 = vmatpush3.bf16.msra.mxu0 %v3656_v55  ;;  %3271 = vmatprep.mubr.msk.bf16.mxu0 %vm3747_vm0, %v3746_v1  ;;  %v3688_v55 = vld [vmem:[%s4580_s1 + $0x1e8] sm:$0xff]   ;;  %v1921_v48 = vshll.u32 %v3710_v43, 16 }
  0x62   : > { %3144 = vmatpush3.bf16.msra.mxu1 %v3659_v61  ;;  %3289 = vmatprep.subr.bf16.mxu0 %v3746_v1  ;;  %v3690_v61 = vld [vmem:[%s4580_s1 + $0x1f0] sm:$0xff]  }
  0x63   : > { %3145 = vmatprep.subr.bf16.mxu1 %v3746_v1 }
  0x65   : > { %3290 = vmatpush3.bf16.msra.mxu0 %v3660_v3  ;;  %v1668_v3 = vrot.slane %v3692_v59, 2 }
  0x66   : > { %3146 = vmatpush3.bf16.msra.mxu1 %v3661_v4  ;;  %3291 = vmatprep.subr.bf16.mxu0 %v3746_v1  ;;  %v3694_v4 = vld [vmem:[%s4580_s1 + $0x1f8] sm:$0xff]  }
  0x67   : > { %3128 = vmatmul.mubr.bf16.gmra.mrb[12].mxu1 %v506_v6  ;;  %3147 = vmatprep.subr.bf16.mxu1 %v3746_v1  ;;  %v1886_v6 = vshll.u32 %v3698_v62, 16  ;;  %v3713_v62 = vld [vmem:[%s3839_s16 + $0x2c] ss:$0 sps:$4 sm:$0x11]  }
  0x68   : > { %3272 = vmatmul.mubr.bf16.gmra.mrb[12].mxu0 %v1445_v9  ;;  %3131 = vmatprep.mubr.msk.bf16.mxu1 %vm3747_vm0, %v3746_v1  ;;  %v3695_v9 = vld [vmem:[%s4580_s1 + $0xf8] sm:$0xff]  }
  0x69   : > { %3275 = vmatprep.mubr.msk.bf16.mxu0 %vm3747_vm0, %v3746_v1  ;;  %3292 = vmatpush3.bf16.msra.mxu0 %v3662_v10  ;;  %v737_v10 = vsel %vm726_vm4, %v734_v53, %v736_v2  ;;  %v1888_v15 = vrot.slane %v1886_v6, 3  ;;  %v3715_v6 = vld [vmem:[%s4580_s1 + $0x238] sm:$0xff]  }
  0x6a   : > { %3148 = vmatpush3.bf16.msra.mxu1 %v3665_v11  ;;  %3293 = vmatprep.subr.bf16.mxu0 %v3746_v1  ;;  %v1669_v11 = vsel %vm1436_vm3, %v1666_v54, %v1668_v3  ;;  %v1923_v54 = vrot.slane %v1921_v48, 3 }
  0x6b   : > { %3149 = vmatprep.subr.bf16.mxu1 %v3746_v1 }
  0x6d   : > { %3294 = vmatpush3.bf16.msra.mxu0 %v3666_v14  ;;  %v1885_v14 = vrot.slane %v1883_v5, 2 }
  0x6e   : > { %3150 = vmatpush3.bf16.msra.mxu1 %v3667_v16  ;;  %3315 = vmatprep.subr.bf16.mxu0 %v3746_v1  ;;  %v1893_v16 = vrot.slane %v1891_v7, 2 }
  0x6f   : > { %3132 = vmatmul.mubr.bf16.gmra.mrb[16].mxu1 %v514_v19  ;;  %3171 = vmatprep.subr.bf16.mxu1 %v3746_v1  ;;  %v949_v19 = vrot.slane %v3696_v12, 1  ;;  %v1889_v21 = vor.u32 %v1888_v15, %v1885_v14  ;;  %v3717_v12 = vld [vmem:[%s3839_s16 + $0x10] sm:$0xff]  }
  0x70   : > { %3276 = vmatmul.mubr.bf16.gmra.mrb[16].mxu0 %v1447_v22  ;;  %3151 = vmatprep.mubr.msk.bf16.mxu1 %vm3747_vm0, %v3746_v1  ;;  %v1897_v22 = vor.u32 %v1896_v17, %v1893_v16  ;;  %v2148_v16 = vrot.slane %v3717_v12, 3 }
  0x71   : > { %3295 = vmatprep.mubr.msk.bf16.mxu0 %vm3747_vm0, %v3746_v1  ;;  %v951_v25 = vsel %vm726_vm4, %v949_v19, %v950_v20 }
  0x77   : > { %3152 = vmatmul.mubr.bf16.vlgmr.msra.gmra.mrb[0].mxu1 %v729_v28  ;;  %v3700_v28 = vld [vmem:[%s4580_s1 + $0x200] sm:$0xff]  }
  0x78   : > { %3296 = vmatmul.mubr.bf16.vlgmr.msra.gmra.mrb[0].mxu0 %v1661_v30  ;;  %3155 = vmatprep.mubr.msk.bf16.mxu1 %vm3747_vm0, %v3746_v1  ;;  %v1905_v30 = vrot.slane %v1903_v24, 3 }
  0x79   : > { %3316 = vmatpush3.bf16.msra.mxu0 %v3672_v27  ;;  %3299 = vmatprep.mubr.msk.bf16.mxu0 %vm3747_vm0, %v3746_v1  ;;  %v1898_v27 = vsel %vm1881_vm5, %v1889_v21, %v1897_v22  ;;  %v2156_v21 = vrot.slane %v3721_v18, 3 }
  0x7a   : > { %3317 = vmatprep.subr.bf16.mxu0 %v3746_v1  ;;  %3172 = vmatpush3.bf16.msra.mxu1 %v3676_v32  ;;  %v952_v32 = vrot.slane %v3702_v26, 1 }
  0x7b   : > { %3173 = vmatprep.subr.bf16.mxu1 %v3746_v1 }
  0x7d   : > { %3318 = vmatpush3.bf16.msra.mxu0 %v3673_v34  ;;  %v1906_v34 = vor.u32 %v1905_v30, %v1902_v29  ;;  %v2374_v30 = vlaneseq }
  0x7e   : > { %3319 = vmatprep.subr.bf16.mxu0 %v3746_v1  ;;  %3174 = vmatpush3.bf16.msra.mxu1 %v3678_v36  ;;  %v1912_v36 = vshll.u32 %v3706_v31, 16 }
  0x7f   : > { %3156 = vmatmul.mubr.bf16.gmra.mrb[4].mxu1 %v731_v37  ;;  %3175 = vmatprep.subr.bf16.mxu1 %v3746_v1  ;;  %v953_v37 = vsel %vm726_vm4, %v950_v20, %v952_v32  ;;  %v1907_v39 = vsel %vm1881_vm5, %v1897_v22, %v1906_v34  ;;  %v3720_v20 = vld [vmem:[%s3839_s16 + $0x18] sm:$0xff]  }
  0x80   : > { %3300 = vmatmul.mubr.bf16.gmra.mrb[4].mxu0 %v1663_v40  ;;  %3159 = vmatprep.mubr.msk.bf16.mxu1 %vm3747_vm0, %v3746_v1  ;;  %v3704_v40 = vld [vmem:[%s4580_s1 + $0x210] sm:$0xff]   ;;  %v2150_v22 = vrot.slane %v3720_v20, 3 }
  0x81   : > { %3320 = vmatpush3.bf16.msra.mxu0 %v3677_v38  ;;  %3303 = vmatprep.mubr.msk.bf16.mxu0 %vm3747_vm0, %v3746_v1  ;;  %v3705_v38 = vld [vmem:[%s3839_s16 + $0x1c] sm:$0xff]  }
  0x82   : > { %3321 = vmatprep.subr.bf16.mxu0 %v3746_v1  ;;  %3176 = vmatpush3.bf16.msra.mxu1 %v3682_v42  ;;  %v1914_v42 = vrot.slane %v1912_v36, 3  ;;  %v954_v44 = vrot.slane %v3705_v38, 1  ;;  %v2151_v24 = vsel %vm2146_vm6, %v2148_v16, %v2150_v22 }
  0x83   : > { %3177 = vmatprep.subr.bf16.mxu1 %v3746_v1 }
  0x85   : > { %3322 = vmatpush3.bf16.msra.mxu0 %v3681_v45  ;;  %v1915_v45 = vor.u32 %v1914_v42, %v1911_v41 }
  0x86   : > { %3323 = vmatprep.subr.bf16.mxu0 %v3746_v1  ;;  %3178 = vmatpush3.bf16.msra.mxu1 %v3683_v46  ;;  %v3707_v46 = vld [vmem:[%s4580_s1 + $0x218] sm:$0xff]  }
  0x87   : > { %3160 = vmatmul.mubr.bf16.gmra.mrb[8].mxu1 %v733_v49  ;;  %3179 = vmatprep.subr.bf16.mxu1 %v3746_v1  ;;  %v955_v49 = vsel %vm726_vm4, %v952_v32, %v954_v44  ;;  %v1916_v51 = vsel %vm1881_vm5, %v1906_v34, %v1915_v45  ;;  %v2375_v32 = vshrl.u32 %v2374_v30, 7 }
  0x88   : > { %3304 = vmatmul.mubr.bf16.gmra.mrb[8].mxu0 %v1665_v50  ;;  %3163 = vmatprep.mubr.msk.bf16.mxu1 %vm3747_vm0, %v3746_v1  ;;  %v3709_v50 = vld [vmem:[%s3839_s16 + $0x24] sm:$0xff]  }
  0x89   : > { %3324 = vmatpush3.bf16.msra.mxu0 %v3684_v47  ;;  %3307 = vmatprep.mubr.msk.bf16.mxu0 %vm3747_vm0, %v3746_v1  ;;  %v1918_v47 = vshrl.u32 %v3710_v43, 16  ;;  %v2376_v35 = vadd.s32 8, %v2375_v32  ;;  %v4293_v41 = vadd.s32 16, %v2375_v32  ;;  %v4295_v43 = vadd.s32 48, %v2375_v32 }
  0x8a   : > { %3180 = vmatpush3.bf16.msra.mxu1 %v3687_v52  ;;  %3325 = vmatprep.subr.bf16.mxu0 %v3746_v1  ;;  %v3708_v52 = vld [vmem:[%s4580_s1 + $0x220] sm:$0xff]  }
  0x8b   : > { %3181 = vmatprep.subr.bf16.mxu1 %v3746_v1  ;;  %v1920_v53 = vrot.slane %v1918_v47, 2 }
  0x8d   : > { %3326 = vmatpush3.bf16.msra.mxu0 %v3688_v55  ;;  %v3714_v55 = vld [vmem:[%s3839_s16 + $0x30] ss:$0 sps:$4 sm:$0x77]  }
  0x8e   : > { %3182 = vmatpush3.bf16.msra.mxu1 %v3689_v56  ;;  %3327 = vmatprep.subr.bf16.mxu0 %v3746_v1  ;;  %v956_v56 = vrot.slane %v3709_v50, 1  ;;  %v1927_v59 = vshrl.u32 %v3714_v55, 16 }
  0x8f   : > { %3164 = vmatmul.mubr.bf16.gmra.mrb[12].mxu1 %v735_v57  ;;  %3183 = vmatprep.subr.bf16.mxu1 %v3746_v1  ;;  %v1924_v57 = vor.u32 %v1923_v54, %v1920_v53 }
  0x90   : > { %3308 = vmatmul.mubr.bf16.gmra.mrb[12].mxu0 %v1667_v60  ;;  %3167 = vmatprep.mubr.msk.bf16.mxu1 %vm3747_vm0, %v3746_v1  ;;  %v1930_v60 = vshll.u32 %v3714_v55, 16  ;;  %v1929_v2 = vrot.slane %v1927_v59, 2 }
  0x91   : > { %3311 = vmatprep.mubr.msk.bf16.mxu0 %vm3747_vm0, %v3746_v1  ;;  %3328 = vmatpush3.bf16.msra.mxu0 %v3690_v61  ;;  %v957_v61 = vsel %vm726_vm4, %v954_v44, %v956_v56  ;;  %v1925_v63 = vsel %vm1881_vm5, %v1915_v45, %v1924_v57  ;;  %v4299_v45 = vadd.s32 24, %v2375_v32 }
  0x92   : > { %3184 = vmatpush3.bf16.msra.mxu1 %v3693_v0  ;;  %3329 = vmatprep.subr.bf16.mxu0 %v3746_v1  ;;  %v3712_v0 = vld [vmem:[%s4580_s1 + $0x230] sm:$0xff]   ;;  %v1932_v3 = vrot.slane %v1930_v60, 3 }
  0x93   : > { %3185 = vmatprep.subr.bf16.mxu1 %v3746_v1  ;;  %v4312_v53 = vmul.u32.u64.low 3435973837, %v4299_v45  ;;  %v4313_v54 = vmul.u32.u64.high 3435973837, %v4299_v45, %v4312_v53 }
  0x94   : > { %v1933_v5 = vor.u32 %v1932_v3, %v1929_v2  ;;  %v4321_v2 = vadd.s32 40, %v2375_v32 }
  0x95   : > { %3330 = vmatpush3.bf16.msra.mxu0 %v3694_v4  ;;  %v958_v4 = vrot.slane %v3713_v62, 1 }
  0x96   : > { %3186 = vmatpush3.bf16.msra.mxu1 %v3695_v9  ;;  %3351 = vmatprep.subr.bf16.mxu0 %v3746_v1  ;;  %v3719_v9 = vld [vmem:[%s3839_s16 + $0x28] sm:$0xff]  }
  0x97   : > { %3168 = vmatmul.mubr.bf16.gmra.mrb[16].mxu1 %v737_v10  ;;  %3387 = vmatprep.subr.bf16.mxu1 %v3746_v1  ;;  %v959_v7 = vsel %vm726_vm4, %v956_v56, %v958_v4  ;;  %v1934_v10 = vsel %vm1881_vm5, %v1924_v57, %v1933_v5  ;;  %v2154_v14 = vrot.slane %v3719_v9, 3  ;;  %v4315_v56 = vadd.s32 56, %v2375_v32 }
  0x98   : > { %3312 = vmatmul.mubr.bf16.gmra.mrb[16].mxu0 %v1669_v11  ;;  %3187 = vmatprep.mubr.msk.bf16.mxu1 %vm3747_vm0, %v3746_v1  ;;  %v3716_v11 = vld [vmem:[%s3839_s16 + $0x8] sm:$0xf8]   ;;  %s3550_s16 = smul.u32 40, %s4616_s12 }
  0x99   : > { %3331 = vmatprep.mubr.msk.bf16.mxu0 %vm3747_vm0, %v3746_v1  ;;  %v2147_v15 = vrot.slane %v3716_v11, 3  ;;  %v2155_v17 = vsel %vm2146_vm6, %v2152_v13, %v2154_v14  ;;  %v2157_v23 = vsel %vm2146_vm6, %v2154_v14, %v2156_v21  ;;  %v4335_v14 = vadd.s32 64, %v2375_v32 }
  0x9a   : > { %s4423_s6 = scalar_lea.vmem %s4581_s2, %s3550_s16 }
  0x9b   : > { %v2149_v19 = vsel %vm2146_vm6, %v2147_v15, %v2148_v16  ;;  %v2424_v16 = vshrl.u32 %v4313_v54, 3 }
  0x9f   : > { %3188 = vmatmul.mubr.bf16.vlgmr.msra.gmra.mrb[0].mxu1 %v951_v25  ;;  %v2153_v25 = vsel %vm2146_vm6, %v2150_v22, %v2152_v13 }
  0xa0   : > { %3332 = vmatmul.mubr.bf16.vlgmr.msra.gmra.mrb[0].mxu0 %v1898_v27  ;;  %3191 = vmatprep.mubr.msk.bf16.mxu1 %vm3747_vm0, %v3746_v1 }
  0xa1   : > { %3352 = vmatpush3.bf16.msra.mxu0 %v3700_v28  ;;  %3335 = vmatprep.mubr.msk.bf16.mxu0 %vm3747_vm0, %v3746_v1 }
  0xa2   : > { %3353 = vmatprep.subr.bf16.mxu0 %v3746_v1  ;;  %3395 = vmatpush3.bf16.msra.mxu1 %v3700_v28 }
  0xa3   : > { %3388 = vmatprep.subr.bf16.mxu1 %v3746_v1 }
  0xa5   : > { %3354 = vmatpush3.bf16.msra.mxu0 %v3701_v33 }
  0xa6   : > { %3355 = vmatprep.subr.bf16.mxu0 %v3746_v1  ;;  %3396 = vmatpush3.bf16.msra.mxu1 %v3701_v33 }
  0xa7   : > { %3192 = vmatmul.mubr.bf16.gmra.mrb[4].mxu1 %v953_v37  ;;  %3389 = vmatprep.subr.bf16.mxu1 %v3746_v1 }
  0xa8   : > { %3336 = vmatmul.mubr.bf16.gmra.mrb[4].mxu0 %v1907_v39  ;;  %3195 = vmatprep.mubr.msk.bf16.mxu1 %vm3747_vm0, %v3746_v1  ;;  %v4288_v38 = vmul.u32.u64.low 3435973837, %v2376_v35  ;;  %v4289_v39 = vmul.u32.u64.high 3435973837, %v2376_v35, %v4288_v38 }
  0xa9   : > { %3356 = vmatpush3.bf16.msra.mxu0 %v3704_v40  ;;  %3339 = vmatprep.mubr.msk.bf16.mxu0 %vm3747_vm0, %v3746_v1 }
  0xaa   : > { %3357 = vmatprep.subr.bf16.mxu0 %v3746_v1  ;;  %3397 = vmatpush3.bf16.msra.mxu1 %v3704_v40 }
  0xab   : > { %3390 = vmatprep.subr.bf16.mxu1 %v3746_v1 }
  0xad   : > { %3358 = vmatpush3.bf16.msra.mxu0 %v3707_v46 }
  0xae   : > { %3359 = vmatprep.subr.bf16.mxu0 %v3746_v1  ;;  %3398 = vmatpush3.bf16.msra.mxu1 %v3707_v46 }
  0xaf   : > { %3196 = vmatmul.mubr.bf16.gmra.mrb[8].mxu1 %v955_v49  ;;  %3391 = vmatprep.subr.bf16.mxu1 %v3746_v1  ;;  %v4303_v48 = vmul.u32.u64.low 3435973837, %v4293_v41  ;;  %v4304_v49 = vmul.u32.u64.high 3435973837, %v4293_v41, %v4303_v48 }
  0xb0   : > { %3340 = vmatmul.mubr.bf16.gmra.mrb[8].mxu0 %v1916_v51  ;;  %3199 = vmatprep.mubr.msk.bf16.mxu1 %vm3747_vm0, %v3746_v1  ;;  %v4307_v50 = vmul.u32.u64.low 3435973837, %v4295_v43  ;;  %v4308_v51 = vmul.u32.u64.high 3435973837, %v4295_v43, %v4307_v50 }
  0xb1   : > { %3360 = vmatpush3.bf16.msra.mxu0 %v3708_v52  ;;  %3343 = vmatprep.mubr.msk.bf16.mxu0 %vm3747_vm0, %v3746_v1 }
  0xb2   : > { %3399 = vmatpush3.bf16.msra.mxu1 %v3708_v52  ;;  %3361 = vmatprep.subr.bf16.mxu0 %v3746_v1  ;;  %v2402_v52 = vshrl.u32 %v4289_v39, 3  ;;  %v2457_v13 = vshrl.u32 %v4308_v51, 3 }
  0xb3   : > { %3392 = vmatprep.subr.bf16.mxu1 %v3746_v1 }
  0xb5   : > { %3362 = vmatpush3.bf16.msra.mxu0 %v3711_v58 }
  0xb6   : > { %3400 = vmatpush3.bf16.msra.mxu1 %v3711_v58  ;;  %3363 = vmatprep.subr.bf16.mxu0 %v3746_v1  ;;  %v4317_v58 = vadd.s32 32, %v2375_v32 }
  0xb7   : > { %3200 = vmatmul.mubr.bf16.gmra.mrb[12].mxu1 %v957_v61  ;;  %3393 = vmatprep.subr.bf16.mxu1 %v3746_v1 }
  0xb8   : > { %3344 = vmatmul.mubr.bf16.gmra.mrb[12].mxu0 %v1925_v63  ;;  %3203 = vmatprep.mubr.msk.bf16.mxu1 %vm3747_vm0, %v3746_v1  ;;  %v4331_v11 = vmul.u32.u64.low 3435973837, %v4317_v58  ;;  %v4332_v12 = vmul.u32.u64.high 3435973837, %v4317_v58, %v4331_v11 }
  0xb9   : > { %3347 = vmatprep.mubr.msk.bf16.mxu0 %vm3747_vm0, %v3746_v1  ;;  %3364 = vmatpush3.bf16.msra.mxu0 %v3712_v0 }
  0xba   : > { %3401 = vmatpush3.bf16.msra.mxu1 %v3712_v0  ;;  %3365 = vmatprep.subr.bf16.mxu0 %v3746_v1  ;;  %v2403_v0 = vmul.u32 10, %v2402_v52  ;;  %v2435_v50 = vshrl.u32 %v4332_v12, 3 }
  0xbb   : > { %3394 = vmatprep.subr.bf16.mxu1 %v3746_v1 }
  0xbc   : > { %v2404_v15 = vsub.s32 %v2376_v35, %v2403_v0 }
  0xbd   : > { %3366 = vmatpush3.bf16.msra.mxu0 %v3715_v6 }
  0xbe   : > { %3402 = vmatpush3.bf16.msra.mxu1 %v3715_v6  ;;  %vm2496_vm9 = vcmp.ne.s32.totalorder %v2404_v15, 0  ;;  %vm2506_vm10 = vcmp.lt.s32.totalorder %v2404_v15, 0  ;;  %v2526_v48 = vadd.s32 10, %v2404_v15 }
  0xbf   : > { %3204 = vmatmul.mubr.bf16.gmra.mrb[16].mxu1 %v959_v7  ;;  %v4324_v6 = vmul.u32.u64.low 3435973837, %v4315_v56  ;;  %v4325_v7 = vmul.u32.u64.high 3435973837, %v4315_v56, %v4324_v6  ;;  %vm4371_vm12 = vmand %vm2506_vm10, %vm2496_vm9 }
  0xc0   : > { %3348 = vmatmul.mubr.bf16.gmra.mrb[16].mxu0 %v1934_v10  ;;  %3379 = vmatprep.mubr.msk.bf16.mxu1 %vm3747_vm0, %v3746_v1  ;;  %v2413_v10 = vshrl.u32 %v4304_v49, 3 }
  0xc1   : > { %3367 = vmatprep.mubr.msk.bf16.mxu0 %vm3747_vm0, %v3746_v1  ;;  %v2468_v38 = vshrl.u32 %v4325_v7, 3 }
  0xc2   : > { %v2414_v21 = vmul.u32 10, %v2413_v10 }
  0xc4   : > { %v4364_v49 = vsub.s32 %v4293_v41, %v2414_v21  ;;  %v2469_v41 = vmul.u32 10, %v2468_v38 }
  0xc6   : > { %vm2497_vm13 = vcmp.ne.s32.totalorder %v4364_v49, 0  ;;  %vm2507_vm14 = vcmp.lt.s32.totalorder %v4364_v49, 0  ;;  %v2527_v0 = vadd.s32 10, %v4364_v49  ;;  %v4407_v11 = vsub.s32 %v4315_v56, %v2469_v41 }
  0xc7   : > { %3380 = vmatmul.mubr.bf16.vlgmr.msra.gmra.mrb[20].mxu1 %v2155_v17  ;;  %v4339_v17 = vmul.u32.u64.low 3435973837, %v4321_v2  ;;  %v4340_v18 = vmul.u32.u64.high 3435973837, %v4321_v2, %v4339_v17  ;;  %vm4413_vm4 = vmand %vm2507_vm14, %vm2497_vm13 }
  0xc8   : > { %3368 = vmatmul.mubr.bf16.vlgmr.msra.gmra.mrb[0].mxu0 %v2149_v19  ;;  %3383 = vmatprep.mubr.msk.bf16.mxu1 %vm3747_vm0, %v3746_v1  ;;  %v4342_v19 = vadd.s32 72, %v2375_v32  ;;  %vm2512_vm13 = vcmp.lt.s32.totalorder %v4407_v11, 0 }
  0xc9   : > { %3371 = vmatprep.mubr.msk.bf16.mxu0 %vm3747_vm0, %v3746_v1 }
  0xcf   : > { %3384 = vmatmul.mubr.bf16.gmra.mrb[24].mxu1 %v2157_v23 }
  0xd0   : > { %3372 = vmatmul.mubr.bf16.gmra.mrb[4].mxu0 %v2151_v24 }
  0xd1   : > { %3375 = vmatprep.mubr.msk.bf16.mxu0 %vm3747_vm0, %v3746_v1  ;;  %v4285_v37 = vmul.u32.u64.low 3435973837, %v2375_v32  ;;  %v4286_v1 = vmul.u32.u64.high 3435973837, %v2375_v32, %v4285_v37 }
  0xd3   : > { %v2391_v47 = vshrl.u32 %v4286_v1, 3 }
  0xd5   : > { %v2392_v55 = vmul.u32 10, %v2391_v47 }
  0xd7   : > { %v2393_v5 = vsub.s32 %v2375_v32, %v2392_v55  ;;  %v2425_v32 = vmul.u32 10, %v2424_v16  ;;  %v2446_v55 = vshrl.u32 %v4340_v18, 3 }
  0xd8   : > { %3376 = vmatmul.mubr.bf16.gmra.mrb[8].mxu0 %v2153_v25  ;;  %v2458_v25 = vmul.u32 10, %v2457_v13 }
  0xd9   : > { %vm2495_vm7 = vcmp.ne.s32.totalorder %v2393_v5, 0  ;;  %vm2505_vm8 = vcmp.lt.s32.totalorder %v2393_v5, 0  ;;  %v2525_v24 = vadd.s32 10, %v2393_v5  ;;  %v4378_v54 = vsub.s32 %v4299_v45, %v2425_v32 }
  0xda   : > { %vm4352_vm11 = vmand %vm2505_vm8, %vm2495_vm7  ;;  %v4368_v51 = vsub.s32 %v4295_v43, %v2458_v25  ;;  %v2536_v43 = vsel %vm4371_vm12, %v2526_v48, %v2404_v15  ;;  %v2447_v7 = vmul.u32 10, %v2446_v55  ;;  %vm2502_vm7 = vcmp.ne.s32.totalorder %v4407_v11, 0 }
  0xdb   : > { %v2535_v53 = vsel %vm4352_vm11, %v2525_v24, %v2393_v5  ;;  %vm2498_vm1 = vcmp.ne.s32.totalorder %v4378_v54, 0  ;;  %vm2508_vm2 = vcmp.lt.s32.totalorder %v4378_v54, 0  ;;  %vm4399_vm3 = vcmp.lt.s32.totalorder %v2536_v43, 8 }
  0xdc   : > { %vm4386_vm15 = vcmp.lt.s32.totalorder %v2535_v53, 8  ;;  %vm2501_vm0 = vcmp.ne.s32.totalorder %v4368_v51, 0  ;;  %v2528_v16 = vadd.s32 10, %v4378_v54  ;;  %vm2511_vm5 = vcmp.lt.s32.totalorder %v4368_v51, 0  ;;  %vm4440_vm6 = vmand %vm2508_vm2, %vm2498_vm1 }
  0xdd   : > { %v4432_v18 = vadd.s32 10, %v4368_v51  ;;  %v4450_v24 = vsub.s32 %v4321_v2, %v2447_v7  ;;  %vm4495_vm1 = vmand %vm2511_vm5, %vm2501_vm0 }
  0xdf   : > { %vm2500_vm11 = vcmp.ne.s32.totalorder %v4450_v24, 0  ;;  %vm2510_vm12 = vcmp.lt.s32.totalorder %v4450_v24, 0  ;;  %v2530_v43 = vadd.s32 10, %v4450_v24 }
  0xe0   : > { %vm4511_vm0 = vmand %vm2510_vm12, %vm2500_vm11 }
 0x172   : > { %v4277_v26 = vpop.f32.mrb[0].mxu1 }
 0x173   : > { %v3189_v27 = vpop.f32.mrb[1].mxu1 }
 0x174   : > { %v4279_v28 = vpop.f32.mrb[2].mxu1 }
 0x175   : > { %v3190_v29 = vpop.f32.mrb[3].mxu1 }
 0x176   : > { %v4345_v27 = vmul.u32.u64.low 3435973837, %v4335_v14  ;;  %v4346_v29 = vmul.u32.u64.high 3435973837, %v4335_v14, %v4345_v27 }
 0x17a   : > { %v4281_v31 = vpop.f32.mrb[4].mxu1 }
 0x17b   : > { %v3193_v33 = vpop.f32.mrb[5].mxu1 }
 0x17c   : > { %v4283_v34 = vpop.f32.mrb[6].mxu1 }
 0x17d   : > { %v3194_v36 = vpop.f32.mrb[7].mxu1 }
 0x182   : > { %v4291_v40 = vpop.f32.mrb[8].mxu1 }
 0x183   : > { %v3197_v42 = vpop.f32.mrb[9].mxu1 }
 0x184   : > { %v4297_v44 = vpop.f32.mrb[10].mxu1  ;;  %v4358_v39 = vmul.u32.u64.low 3435973837, %v4342_v19  ;;  %v4359_v42 = vmul.u32.u64.high 3435973837, %v4342_v19, %v4358_v39 }
 0x185   : > { %v3198_v46 = vpop.f32.mrb[11].mxu1 }
 0x186   : > { %v2490_v13 = vshrl.u32 %v4359_v42, 3 }
 0x188   : > { %v2491_v32 = vmul.u32 10, %v2490_v13 }
 0x18a   : > { %v1071_v57 = vpop.f32.mrb[12].mxu1  ;;  %v2492_v41 = vsub.s32 %v4342_v19, %v2491_v32 }
 0x18b   : > { %v2046_v59 = vpop.f32.mrb[12].mxu0  ;;  %v3201_v60 = vpop.f32.mrb[13].mxu1 }
 0x18c   : > { %v4319_v61 = vadd.f32 %v2046_v59, %v1071_v57  ;;  %v3345_v62 = vpop.f32.mrb[13].mxu0  ;;  %v1074_v63 = vpop.f32.mrb[14].mxu1  ;;  %v2436_v59 = vmul.u32 10, %v2435_v50  ;;  %v2532_v50 = vadd.s32 10, %v4407_v11  ;;  %vm2504_vm5 = vcmp.ne.s32.totalorder %v2492_v41, 0 }
 0x18d   : > { %v2049_v3 = vpop.f32.mrb[14].mxu0  ;;  %v3202_v4 = vpop.f32.mrb[15].mxu1 }
 0x18e   : > { %v4327_v8 = vadd.f32 %v2049_v3, %v1074_v63  ;;  %v3346_v9 = vpop.f32.mrb[15].mxu0  ;;  %v2479_v3 = vshrl.u32 %v4346_v29, 3  ;;  %v4428_v17 = vsub.s32 %v4317_v58, %v2436_v59 }
 0x190   : > { %v2480_v21 = vmul.u32 10, %v2479_v3  ;;  %vm2499_vm8 = vcmp.ne.s32.totalorder %v4428_v17, 0  ;;  %vm2509_vm9 = vcmp.lt.s32.totalorder %v4428_v17, 0  ;;  %v2541_v3 = vsel %vm4495_vm1, %v4432_v18, %v4368_v51 }
 0x191   : > { %v2540_v51 = vsel %vm4511_vm0, %v2530_v43, %v4450_v24 }
 0x192   : > { %v1079_v20 = vpop.f32.mrb[16].mxu1  ;;  %v4468_v38 = vsub.s32 %v4335_v14, %v2480_v21  ;;  %vm2550_vm11 = vcmp.lt.s32.totalorder %v2540_v51, 8 }
 0x193   : > { %v2054_v22 = vpop.f32.mrb[16].mxu0  ;;  %v3205_v23 = vpop.f32.mrb[17].mxu1 }
 0x194   : > { %v4348_v30 = vadd.f32 %v2054_v22, %v1079_v20  ;;  %v3349_v33 = vpop.f32.mrb[17].mxu0  ;;  %v1082_v35 = vpop.f32.mrb[18].mxu1  ;;  %v2537_v23 = vsel %vm4413_vm4, %v2527_v0, %v4364_v49  ;;  %v2529_v49 = vadd.s32 10, %v4428_v17  ;;  %vm2503_vm2 = vcmp.ne.s32.totalorder %v4468_v38, 0  ;;  %vm4529_vm4 = vmand %vm2512_vm13, %vm2502_vm7 }
 0x195   : > { %v2057_v36 = vpop.f32.mrb[18].mxu0  ;;  %v3206_v37 = vpop.f32.mrb[19].mxu1  ;;  %vm4460_vm10 = vcmp.lt.s32.totalorder %v2537_v23, 8  ;;  %v2542_v13 = vsel %vm4529_vm4, %v2532_v50, %v4407_v11 }
 0x196   : > { %v4361_v46 = vadd.f32 %v2057_v36, %v1082_v35  ;;  %v3350_v47 = vpop.f32.mrb[19].mxu0  ;;  %v2538_v35 = vsel %vm4440_vm6, %v2528_v16, %v4378_v54  ;;  %vm2514_vm6 = vcmp.lt.s32.totalorder %v2492_v41, 0  ;;  %vm2552_vm12 = vcmp.lt.s32.totalorder %v2542_v13, 8 }
 0x197   : > { %vm4476_vm14 = vcmp.lt.s32.totalorder %v2538_v35, 8 }
 0x19a   : > { %v2269_v57 = vpop.f32.mrb[20].mxu1 }
 0x19b   : > { %v2245_v60 = vpop.f32.mrb[0].mxu0  ;;  %v4391_v45 = vadd.f32 %v4319_v61, %v2269_v57  ;;  %v3381_v63 = vpop.f32.mrb[21].mxu1 }
 0x19c   : > { %v3403_v4 = vadd.f32 %v2245_v60, %v4277_v26  ;;  %v3369_v5 = vpop.f32.mrb[1].mxu0  ;;  %v2272_v6 = vpop.f32.mrb[22].mxu1 }
 0x19d   : > { %v2248_v9 = vpop.f32.mrb[2].mxu0  ;;  %v4404_v10 = vadd.f32 %v4327_v8, %v2272_v6  ;;  %v3382_v12 = vpop.f32.mrb[23].mxu1 }
 0x19e   : > { %v2575_v15 = vsel %vm4386_vm15, %v3403_v4, 0.0  ;;  %v3404_v56 = vadd.f32 %v2248_v9, %v4279_v28  ;;  %v3370_v8 = vpop.f32.mrb[3].mxu0  ;;  %vm4487_vm15 = vmand %vm2509_vm9, %vm2499_vm8  ;;  %v2533_v9 = vadd.s32 10, %v4468_v38  ;;  %vm2551_vm9 = vcmp.lt.s32.totalorder %v2541_v3, 8 }
 0x19f   : > { %v2935_v20 = vpack.c.bf16 %v4404_v10, %v4391_v45  ;;  %v2601_v25 = vmul.f32 %v2575_v15, %v2575_v15  ;;  %v2539_v0 = vsel %vm4487_vm15, %v2529_v49, %v4428_v17 }
 0x1a0   : > { %v2920_v22 = vpack.c.bf16 %v3404_v56, %v3403_v4  ;;  %v2576_v58 = vsel %vm4399_vm3, %v3404_v56, 0.0  ;;  %vm2513_vm3 = vcmp.lt.s32.totalorder %v4468_v38, 0  ;;  %vm2549_vm8 = vcmp.lt.s32.totalorder %v2539_v0, 8 }
 0x1a1   : > { %v2585_v27 = vadd.f32 %v2576_v58, %v2575_v15  ;;  %v2602_v29 = vmul.f32 %v2576_v58, %v2576_v58  ;;  %2944 = vst [vmem:[%s4423_s6 + $0x18] sm:$0xff] %v2935_v20   ;;  %vm4543_vm7 = vmand %vm2513_vm3, %vm2503_vm2  ;;  %v2534_v15 = vadd.s32 10, %v2492_v41 }
 0x1a2   : > { %2921 = vst [vmem:[%s4423_s6] sm:$0xff] %v2920_v22   ;;  %v2277_v33 = vpop.f32.mrb[24].mxu1  ;;  %v2543_v18 = vsel %vm4543_vm7, %v2533_v9, %v4468_v38  ;;  %v2581_v22 = vsel %vm2551_vm9, %v4391_v45, 0.0 }
 0x1a3   : > { %v2611_v36 = vadd.f32 %v2602_v29, %v2601_v25  ;;  %v2253_v2 = vpop.f32.mrb[4].mxu0  ;;  %v4465_v1 = vadd.f32 %v4348_v30, %v2277_v33  ;;  %v3385_v39 = vpop.f32.mrb[25].mxu1  ;;  %vm2553_vm13 = vcmp.lt.s32.totalorder %v2543_v18, 8  ;;  %v2582_v33 = vsel %vm2552_vm12, %v4404_v10, 0.0 }
 0x1a4   : > { %v3405_v42 = vadd.f32 %v2253_v2, %v4281_v31  ;;  %v3373_v47 = vpop.f32.mrb[5].mxu0  ;;  %v2280_v48 = vpop.f32.mrb[26].mxu1  ;;  %v2607_v35 = vmul.f32 %v2581_v22, %v2581_v22  ;;  %v2608_v2 = vmul.f32 %v2582_v33, %v2582_v33 }
 0x1a5   : > { %v2256_v30 = vpop.f32.mrb[6].mxu0  ;;  %v4481_v14 = vadd.f32 %v4361_v46, %v2280_v48  ;;  %v3386_v53 = vpop.f32.mrb[27].mxu1 }
 0x1a6   : > { %v2577_v46 = vsel %vm4460_vm10, %v3405_v42, 0.0  ;;  %v3406_v55 = vadd.f32 %v2256_v30, %v4283_v34  ;;  %v3374_v57 = vpop.f32.mrb[7].mxu0  ;;  %vm4551_vm10 = vmand %vm2514_vm6, %vm2504_vm5 }
 0x1a7   : > { %v2586_v59 = vadd.f32 %v2585_v27, %v2577_v46  ;;  %v2603_v60 = vmul.f32 %v2577_v46, %v2577_v46  ;;  %v2940_v62 = vpack.c.bf16 %v4481_v14, %v4465_v1  ;;  %v2544_v58 = vsel %vm4551_vm10, %v2534_v15, %v2492_v41 }
 0x1a8   : > { %v2925_v19 = vpack.c.bf16 %v3406_v55, %v3405_v42  ;;  %v2578_v63 = vsel %vm4476_vm14, %v3406_v55, 0.0  ;;  %vm2554_vm14 = vcmp.lt.s32.totalorder %v2544_v58, 8 }
 0x1a9   : > { %v2612_v5 = vadd.f32 %v2611_v36, %v2603_v60  ;;  %v2587_v6 = vadd.f32 %v2586_v59, %v2578_v63  ;;  %v2604_v7 = vmul.f32 %v2578_v63, %v2578_v63  ;;  %2945 = vst [vmem:[%s4423_s6 + $0x20] sm:$0xff] %v2940_v62   ;;  %v2583_v36 = vsel %vm2553_vm13, %v4465_v1, 0.0 }
 0x1aa   : > { %2942 = vst [vmem:[%s4423_s6 + $0x8] sm:$0xff] %v2925_v19   ;;  %v2584_v38 = vsel %vm2554_vm14, %v4481_v14, 0.0  ;;  %v2609_v39 = vmul.f32 %v2583_v36, %v2583_v36 }
 0x1ab   : > { %v2613_v12 = vadd.f32 %v2612_v5, %v2604_v7  ;;  %v2261_v26 = vpop.f32.mrb[8].mxu0  ;;  %v2610_v48 = vmul.f32 %v2584_v38, %v2584_v38 }
 0x1ac   : > { %v3407_v56 = vadd.f32 %v2261_v26, %v4291_v40  ;;  %v3377_v8 = vpop.f32.mrb[9].mxu0 }
 0x1ad   : > { %v2264_v17 = vpop.f32.mrb[10].mxu0 }
 0x1ae   : > { %v2579_v20 = vsel %vm2549_vm8, %v3407_v56, 0.0  ;;  %v3408_v21 = vadd.f32 %v2264_v17, %v4297_v44  ;;  %v3378_v11 = vpop.f32.mrb[11].mxu0 }
 0x1af   : > { %v2588_v28 = vadd.f32 %v2587_v6, %v2579_v20  ;;  %v2605_v40 = vmul.f32 %v2579_v20, %v2579_v20 }
 0x1b0   : > { %v2930_v23 = vpack.c.bf16 %v3408_v21, %v3407_v56  ;;  %v2580_v24 = vsel %vm2550_vm11, %v3408_v21, 0.0 }
 0x1b1   : > { %v2614_v25 = vadd.f32 %v2613_v12, %v2605_v40  ;;  %v2589_v27 = vadd.f32 %v2588_v28, %v2580_v24  ;;  %v2606_v29 = vmul.f32 %v2580_v24, %v2580_v24 }
 0x1b2   : > { %2943 = vst [vmem:[%s4423_s6 + $0x10] sm:$0xff] %v2930_v23  }
 0x1b3   : > { %v2590_v44 = vadd.f32 %v2589_v27, %v2581_v22  ;;  %v2615_v32 = vadd.f32 %v2614_v25, %v2606_v29 }
 0x1b5   : > { %v2591_v45 = vadd.f32 %v2590_v44, %v2582_v33  ;;  %v2616_v37 = vadd.f32 %v2615_v32, %v2607_v35 }
 0x1b7   : > { %v2592_v42 = vadd.f32 %v2591_v45, %v2583_v36  ;;  %v2617_v47 = vadd.f32 %v2616_v37, %v2608_v2 }
 0x1b9   : > { %v2593_v49 = vadd.f32 %v2592_v42, %v2584_v38  ;;  %v2618_v50 = vadd.f32 %v2617_v47, %v2609_v39 }
 0x1bb   : > { %v2594_v10 = vrot.slane %v2593_v49, 4  ;;  %v2619_v30 = vadd.f32 %v2618_v50, %v2610_v48 }
 0x1bd   : > { %v2595_v52 = vadd.f32 %v2594_v10, %v2593_v49  ;;  %v2620_v31 = vrot.slane %v2619_v30, 4 }
 0x1bf   : > { %v2596_v53 = vrot.slane %v2595_v52, 2  ;;  %v2621_v54 = vadd.f32 %v2620_v31, %v2619_v30 }
 0x1c1   : > { %v2597_v1 = vadd.f32 %v2596_v53, %v2595_v52  ;;  %v2622_v46 = vrot.slane %v2621_v54, 2 }
 0x1c3   : > { %v2598_v55 = vrot.slane %v2597_v1, 1  ;;  %v2623_v41 = vadd.f32 %v2622_v46, %v2621_v54 }
 0x1c5   : > { %v2599_v14 = vadd.f32 %v2598_v55, %v2597_v1  ;;  %v2624_v57 = vrot.slane %v2623_v41, 1 }
 0x1c7   : > { %2600 = vst [vmem:[%s226_s10] sm:$0x1] %v2599_v14  ;;  %v2625_v43 = vadd.f32 %v2624_v57, %v2623_v41 }
 0x1c9   : > { %2626 = vst [vmem:[%s226_s10 + $0x1] sm:$0x1] %v2625_v43 }
 0x1ca PF: > { %s14_s14 = sadd.s32 1, %s3744_s14   ;;  %s4611_s12 = smov %s3740_s13 }
 0x1cb   : > { %p11_p5 = scmp.ge.s32.totalorder %s14_s14, 4   ;;  %s4612_s13 = smov %s4614_s15 }
 0x1cd   :  { %13 = sbr.rel (!%p11_p5) target bundleno = 2 (0x2), region = 73 }

// kernel: _lambda_.17
= control target key start
LH: loop header
LB: loop body
LE: loop exit
PB: predicated region body
PF: predicated region fallthrough
CT: control target
= control target key end

     0   :  { %v293_v28 = vlaneseq  ;;  %v1968_v36 = vmov 1966171168   ;;  %s2419_s0 = inlined_call_operand.vmem [shape: bf16[2,2048], index: 0, kind: input, shape index: {}]   ;;  %s2420_s1 = inlined_call_operand.vmem [shape: bf16[2048,128], index: 1, kind: input, shape index: {}]   ;;  %s2421_s2 = inlined_call_operand.vmem [shape: f32[1,128], index: 2, kind: input, shape index: {}]   ;;  %s2422_s3 = inlined_call_operand.hbm [shape: f32[2,128], index: 3, kind: output, shape index: {}]  }
   0x1   :  { %v1814_v0 = vld [vmem:[%s2420_s1 + $0x40] sm:$0xff]   ;;  %v1818_v4 = vld [vmem:[%s2420_s1 + $0x48] sm:$0xff]   ;;  %v1822_v8 = vld [vmem:[%s2420_s1 + $0x50] sm:$0xff]   ;;  %v291_v37 = vunpack.c.l.s4 %v1968_v36 }
   0x2   :  { %v1815_v1 = vld [vmem:[%s2420_s1 + $0xc0] sm:$0xff]   ;;  %1636 = vmatprep.subr.bf16.mxu0 %v1814_v0  ;;  %v1819_v5 = vld [vmem:[%s2420_s1 + $0xc8] sm:$0xff]   ;;  %v1823_v9 = vld [vmem:[%s2420_s1 + $0xd0] sm:$0xff]   ;;  %v294_v33 = vshrl.u32 %v293_v28, 7 }
   0x3   :  { %v1816_v2 = vld [vmem:[%s2420_s1] sm:$0xff]   ;;  %1658 = vmatprep.subr.bf16.mxu1 %v1815_v1  ;;  %v1820_v6 = vld [vmem:[%s2420_s1 + $0x8] sm:$0xff]   ;;  %v1824_v10 = vld [vmem:[%s2420_s1 + $0x10] sm:$0xff]   ;;  %v292_v40 = vunpack.c.0.s8 %v291_v37 }
   0x4   :  { %v1817_v3 = vld [vmem:[%s2420_s1 + $0x80] sm:$0xff]   ;;  %1637 = vmatpush3.bf16.msra.mxu0 %v1816_v2  ;;  %v1821_v7 = vld [vmem:[%s2420_s1 + $0x88] sm:$0xff]   ;;  %v1825_v11 = vld [vmem:[%s2420_s1 + $0x90] sm:$0xff]  }
   0x5   :  { %1659 = vmatpush3.bf16.msra.mxu1 %v1817_v3  ;;  %1638 = vmatprep.subr.bf16.mxu0 %v1818_v4  ;;  %v1826_v12 = vld [vmem:[%s2420_s1 + $0x58] sm:$0xff]   ;;  %v1830_v16 = vld [vmem:[%s2420_s1 + $0x60] sm:$0xff]   ;;  %v1834_v20 = vld [vmem:[%s2420_s1 + $0x68] sm:$0xff]   ;;  %v2095_v41 = vsub.s32 %v292_v40, %v294_v33 }
   0x6   :  { %1660 = vmatprep.subr.bf16.mxu1 %v1819_v5  ;;  %v1827_v13 = vld [vmem:[%s2420_s1 + $0xd8] sm:$0xff]   ;;  %v1831_v17 = vld [vmem:[%s2420_s1 + $0xe0] sm:$0xff]   ;;  %v1835_v21 = vld [vmem:[%s2420_s1 + $0xe8] sm:$0xff]  }
   0x7   :  { %v1828_v14 = vld [vmem:[%s2420_s1 + $0x18] sm:$0xff]   ;;  %v1832_v18 = vld [vmem:[%s2420_s1 + $0x20] sm:$0xff]   ;;  %v1836_v22 = vld [vmem:[%s2420_s1 + $0x28] sm:$0xff]  }
   0x8   :  { %1639 = vmatpush3.bf16.msra.mxu0 %v1820_v6  ;;  %v1829_v15 = vld [vmem:[%s2420_s1 + $0x98] sm:$0xff]   ;;  %v1833_v19 = vld [vmem:[%s2420_s1 + $0xa0] sm:$0xff]   ;;  %v1837_v23 = vld [vmem:[%s2420_s1 + $0xa8] sm:$0xff]  }
   0x9   :  { %1661 = vmatpush3.bf16.msra.mxu1 %v1821_v7  ;;  %1640 = vmatprep.subr.bf16.mxu0 %v1822_v8  ;;  %v1838_v24 = vld [vmem:[%s2420_s1 + $0x70] sm:$0xff]   ;;  %v1842_v29 = vld [vmem:[%s2420_s1 + $0x78] sm:$0xff]   ;;  %v29_v34 = vld [vmem:[%s2419_s0] sm:$0xff] }
   0xa   :  { %1662 = vmatprep.subr.bf16.mxu1 %v1823_v9  ;;  %v1839_v25 = vld [vmem:[%s2420_s1 + $0xf0] sm:$0xff]   ;;  %v1843_v30 = vld [vmem:[%s2420_s1 + $0xf8] sm:$0xff]   ;;  %v1847_v35 = vld [vmem:[%s2420_s1 + $0x140] sm:$0xff]   ;;  %v289_v39 = vcombine.high %v29_v34, %v29_v34  ;;  %v296_v42 = vrot.slane %v29_v34, %v2095_v41 }
   0xb   :  { %v1840_v26 = vld [vmem:[%s2420_s1 + $0x30] sm:$0xff]   ;;  %v1844_v31 = vld [vmem:[%s2420_s1 + $0x38] sm:$0xff]   ;;  %v1848_v38 = vld [vmem:[%s2420_s1 + $0x1c0] sm:$0xff]  }
   0xc   :  { %1641 = vmatpush3.bf16.msra.mxu0 %v1824_v10  ;;  %v1841_v27 = vld [vmem:[%s2420_s1 + $0xb0] sm:$0xff]   ;;  %v1845_v32 = vld [vmem:[%s2420_s1 + $0xb8] sm:$0xff]   ;;  %v2099_v43 = vrot.slane %v289_v39, %v2095_v41  ;;  %v304_v44 = vcombine.high %v296_v42, %v296_v42  ;;  %v312_v45 = vrot.slane %v296_v42, %v2095_v41  ;;  %v1849_v48 = vld [vmem:[%s2420_s1 + $0x100] sm:$0xff]  }
   0xd   :  { %1663 = vmatpush3.bf16.msra.mxu1 %v1825_v11  ;;  %1642 = vmatprep.subr.bf16.mxu0 %v1826_v12  ;;  %v1851_v51 = vld [vmem:[%s2420_s1 + $0x148] sm:$0xff]   ;;  %v1850_v53 = vld [vmem:[%s2420_s1 + $0x180] sm:$0xff]   ;;  %v1855_v57 = vld [vmem:[%s2420_s1 + $0x150] sm:$0xff]  }
   0xe   :  { %1664 = vmatprep.subr.bf16.mxu1 %v1827_v13  ;;  %v305_v46 = vcombine.high %v2099_v43, %v2099_v43  ;;  %v326_v47 = vrot.slane %v304_v44, %v2095_v41  ;;  %v334_v50 = vcombine.high %v312_v45, %v312_v45  ;;  %v1852_v54 = vld [vmem:[%s2420_s1 + $0x1c8] sm:$0xff]   ;;  %v1856_v59 = vld [vmem:[%s2420_s1 + $0x1d0] sm:$0xff]   ;;  %v1859_v61 = vld [vmem:[%s2420_s1 + $0x158] sm:$0xff]  }
   0xf   :  { %v1853_v56 = vld [vmem:[%s2420_s1 + $0x108] sm:$0xff]   ;;  %v1857_v60 = vld [vmem:[%s2420_s1 + $0x110] sm:$0xff]   ;;  %v1860_v63 = vld [vmem:[%s2420_s1 + $0x1d8] sm:$0xff]  }
  0x10   :  { %1643 = vmatpush3.bf16.msra.mxu0 %v1828_v14  ;;  %v333_v49 = vrot.slane %v305_v46, %v2095_v41  ;;  %1203 = vmatprep.mubr.bf16.mxu0 %v326_v47  ;;  %v336_v52 = vcombine.high %v326_v47, %v326_v47  ;;  %v1854_v58 = vld [vmem:[%s2420_s1 + $0x188] sm:$0xff]   ;;  %v1858_v62 = vld [vmem:[%s2420_s1 + $0x190] sm:$0xff]   ;;  %v1861_v0 = vld [vmem:[%s2420_s1 + $0x118] sm:$0xff]  }
  0x11   :  { %1665 = vmatpush3.bf16.msra.mxu1 %v1829_v15  ;;  %1644 = vmatprep.subr.bf16.mxu0 %v1830_v16  ;;  %v1863_v1 = vld [vmem:[%s2420_s1 + $0x160] sm:$0xff]   ;;  %v1862_v2 = vld [vmem:[%s2420_s1 + $0x198] sm:$0xff]   ;;  %v1867_v5 = vld [vmem:[%s2420_s1 + $0x168] sm:$0xff]  }
  0x12   :  { %1666 = vmatprep.subr.bf16.mxu1 %v1831_v17  ;;  %v337_v55 = vcombine.high %v333_v49, %v333_v49  ;;  %1243 = vmatprep.mubr.bf16.mxu1 %v336_v52  ;;  %v1864_v3 = vld [vmem:[%s2420_s1 + $0x1e0] sm:$0xff]   ;;  %v1868_v7 = vld [vmem:[%s2420_s1 + $0x1e8] sm:$0xff]   ;;  %v1871_v9 = vld [vmem:[%s2420_s1 + $0x170] sm:$0xff]   ;;  %v319_v17 = vrot.slane %v2099_v43, %v2095_v41 }
  0x13   :  { %v1865_v4 = vld [vmem:[%s2420_s1 + $0x120] sm:$0xff]   ;;  %v1869_v8 = vld [vmem:[%s2420_s1 + $0x128] sm:$0xff]   ;;  %v1872_v11 = vld [vmem:[%s2420_s1 + $0x1f0] sm:$0xff]  }
  0x14   :  { %1645 = vmatpush3.bf16.msra.mxu0 %v1832_v18  ;;  %v1866_v6 = vld [vmem:[%s2420_s1 + $0x1a0] sm:$0xff]   ;;  %v1870_v10 = vld [vmem:[%s2420_s1 + $0x1a8] sm:$0xff]   ;;  %v1873_v12 = vld [vmem:[%s2420_s1 + $0x130] sm:$0xff]  }
  0x15   :  { %1667 = vmatpush3.bf16.msra.mxu1 %v1833_v19  ;;  %1646 = vmatprep.subr.bf16.mxu0 %v1834_v20  ;;  %v1875_v13 = vld [vmem:[%s2420_s1 + $0x178] sm:$0xff]   ;;  %v1874_v14 = vld [vmem:[%s2420_s1 + $0x1b0] sm:$0xff]   ;;  %v1879_v18 = vld [vmem:[%s2420_s1 + $0x240] sm:$0xff]  }
  0x16   :  { %1668 = vmatprep.subr.bf16.mxu1 %v1835_v21  ;;  %v1876_v15 = vld [vmem:[%s2420_s1 + $0x1f8] sm:$0xff]   ;;  %v1880_v20 = vld [vmem:[%s2420_s1 + $0x2c0] sm:$0xff]   ;;  %v1886_v28 = vld [vmem:[%s2420_s1 + $0x288] sm:$0xff]  }
  0x17   :  { %v1877_v16 = vld [vmem:[%s2420_s1 + $0x138] sm:$0xff]   ;;  %v1881_v21 = vld [vmem:[%s2420_s1 + $0x200] sm:$0xff]   ;;  %v1899_v39 = vld [vmem:[%s2420_s1 + $0x268] sm:$0xff]  }
  0x18   :  { %1647 = vmatpush3.bf16.msra.mxu0 %v1836_v22  ;;  %v1878_v19 = vld [vmem:[%s2420_s1 + $0x1b8] sm:$0xff]   ;;  %v335_v22 = vcombine.high %v319_v17, %v319_v17  ;;  %v1896_v37 = vld [vmem:[%s2420_s1 + $0x2e0] sm:$0xff]   ;;  %v1900_v42 = vld [vmem:[%s2420_s1 + $0x2e8] sm:$0xff]  }
  0x19   :  { %1669 = vmatpush3.bf16.msra.mxu1 %v1837_v23  ;;  %1648 = vmatprep.subr.bf16.mxu0 %v1838_v24  ;;  %v1883_v23 = vld [vmem:[%s2420_s1 + $0x248] sm:$0xff]   ;;  %v1882_v24 = vld [vmem:[%s2420_s1 + $0x280] sm:$0xff]   ;;  %v1892_v33 = vld [vmem:[%s2420_s1 + $0x2d8] sm:$0xff]  }
  0x1a   :  { %1670 = vmatprep.subr.bf16.mxu1 %v1839_v25  ;;  %v1884_v25 = vld [vmem:[%s2420_s1 + $0x2c8] sm:$0xff]   ;;  %v1893_v34 = vld [vmem:[%s2420_s1 + $0x218] sm:$0xff]   ;;  %v1898_v40 = vld [vmem:[%s2420_s1 + $0x2a0] sm:$0xff]  }
  0x1b   :  { %v1894_v36 = vld [vmem:[%s2420_s1 + $0x298] sm:$0xff]   ;;  %v1901_v43 = vld [vmem:[%s2420_s1 + $0x228] sm:$0xff]   ;;  %v1903_v44 = vld [vmem:[%s2420_s1 + $0x270] sm:$0xff]  }
  0x1c   :  { %1649 = vmatpush3.bf16.msra.mxu0 %v1840_v26  ;;  %v1885_v26 = vld [vmem:[%s2420_s1 + $0x208] sm:$0xff]  }
  0x1d   :  { %1671 = vmatpush3.bf16.msra.mxu1 %v1841_v27  ;;  %1650 = vmatprep.subr.bf16.mxu0 %v1842_v29  ;;  %v1887_v27 = vld [vmem:[%s2420_s1 + $0x250] sm:$0xff]   ;;  %v1902_v46 = vld [vmem:[%s2420_s1 + $0x2a8] sm:$0xff]  }
  0x1e   :  { %1672 = vmatprep.subr.bf16.mxu1 %v1843_v30  ;;  %v1888_v29 = vld [vmem:[%s2420_s1 + $0x2d0] sm:$0xff]  }
  0x1f   :  { %v1889_v30 = vld [vmem:[%s2420_s1 + $0x210] sm:$0xff]  }
  0x20   :  { %1651 = vmatpush3.bf16.msra.mxu0 %v1844_v31  ;;  %v1891_v31 = vld [vmem:[%s2420_s1 + $0x258] sm:$0xff]  }
  0x21   :  { %1673 = vmatpush3.bf16.msra.mxu1 %v1845_v32  ;;  %1680 = vmatprep.subr.bf16.mxu0 %v1847_v35  ;;  %v1890_v32 = vld [vmem:[%s2420_s1 + $0x290] sm:$0xff]   ;;  %v1895_v35 = vld [vmem:[%s2420_s1 + $0x260] sm:$0xff]  }
  0x22   :  { %1702 = vmatprep.subr.bf16.mxu1 %v1848_v38  ;;  %v1897_v38 = vld [vmem:[%s2420_s1 + $0x220] sm:$0xff]  }
  0x23   :  { %1204 = vmatmul.mubr.bf16.vlgmr.msra.gmra.mrb[0].mxu0 %v312_v45  ;;  %v30_v45 = vld [vmem:[%s2419_s0 + $0x8] sm:$0xff] }
  0x24   :  { %1681 = vmatpush3.bf16.msra.mxu0 %v1849_v48  ;;  %1244 = vmatmul.mubr.bf16.vlgmr.msra.gmra.mrb[0].mxu1 %v334_v50  ;;  %v345_v47 = vrot.slane %v30_v45, %v2095_v41  ;;  %v338_v48 = vcombine.high %v30_v45, %v30_v45  ;;  %v1905_v50 = vld [vmem:[%s2420_s1 + $0x230] sm:$0xff]  }
  0x25   :  { %1682 = vmatprep.subr.bf16.mxu0 %v1851_v51  ;;  %1703 = vmatpush3.bf16.msra.mxu1 %v1850_v53  ;;  %v1907_v53 = vld [vmem:[%s2420_s1 + $0x278] sm:$0xff]  }
  0x26   :  { %1283 = vmatprep.mubr.bf16.mxu0 %v333_v49  ;;  %1704 = vmatprep.subr.bf16.mxu1 %v1852_v54  ;;  %v1904_v49 = vld [vmem:[%s2420_s1 + $0x2f0] sm:$0xff]   ;;  %v353_v51 = vcombine.high %v345_v47, %v345_v47  ;;  %v2284_v52 = vrot.slane %v338_v48, %v2095_v41 }
  0x27   :  { %1323 = vmatprep.mubr.bf16.mxu1 %v337_v55  ;;  %v1906_v54 = vld [vmem:[%s2420_s1 + $0x2b0] sm:$0xff]  }
  0x28   :  { %1683 = vmatpush3.bf16.msra.mxu0 %v1853_v56  ;;  %v375_v55 = vrot.slane %v353_v51, %v2095_v41  ;;  %v354_v56 = vcombine.high %v2284_v52, %v2284_v52 }
  0x29   :  { %1684 = vmatprep.subr.bf16.mxu0 %v1855_v57  ;;  %1705 = vmatpush3.bf16.msra.mxu1 %v1854_v58  ;;  %v1908_v57 = vld [vmem:[%s2420_s1 + $0x2f8] sm:$0xff]  }
  0x2a   :  { %1706 = vmatprep.subr.bf16.mxu1 %v1856_v59  ;;  %v1909_v58 = vld [vmem:[%s2420_s1 + $0x238] sm:$0xff]   ;;  %v385_v59 = vcombine.high %v375_v55, %v375_v55 }
  0x2c   :  { %1685 = vmatpush3.bf16.msra.mxu0 %v1857_v60  ;;  %v361_v60 = vrot.slane %v345_v47, %v2095_v41 }
  0x2d   :  { %1686 = vmatprep.subr.bf16.mxu0 %v1859_v61  ;;  %1707 = vmatpush3.bf16.msra.mxu1 %v1858_v62  ;;  %v1911_v61 = vld [vmem:[%s2420_s1 + $0x340] sm:$0xff]   ;;  %v1910_v62 = vld [vmem:[%s2420_s1 + $0x2b8] sm:$0xff]  }
  0x2e   :  { %1708 = vmatprep.subr.bf16.mxu1 %v1860_v63  ;;  %v382_v63 = vrot.slane %v354_v56, %v2095_v41 }
  0x30   :  { %1687 = vmatpush3.bf16.msra.mxu0 %v1861_v0  ;;  %v1912_v0 = vld [vmem:[%s2420_s1 + $0x3c0] sm:$0xff]  }
  0x31   :  { %1688 = vmatprep.subr.bf16.mxu0 %v1863_v1  ;;  %1709 = vmatpush3.bf16.msra.mxu1 %v1862_v2  ;;  %v1913_v1 = vld [vmem:[%s2420_s1 + $0x300] sm:$0xff]   ;;  %v383_v2 = vcombine.high %v361_v60, %v361_v60 }
  0x32   :  { %1710 = vmatprep.subr.bf16.mxu1 %v1864_v3  ;;  %v1915_v3 = vld [vmem:[%s2420_s1 + $0x348] sm:$0xff]  }
  0x34   :  { %1689 = vmatpush3.bf16.msra.mxu0 %v1865_v4  ;;  %v1914_v4 = vld [vmem:[%s2420_s1 + $0x380] sm:$0xff]  }
  0x35   :  { %1690 = vmatprep.subr.bf16.mxu0 %v1867_v5  ;;  %1711 = vmatpush3.bf16.msra.mxu1 %v1866_v6  ;;  %v386_v5 = vcombine.high %v382_v63, %v382_v63  ;;  %v1916_v6 = vld [vmem:[%s2420_s1 + $0x3c8] sm:$0xff]  }
  0x36   :  { %1712 = vmatprep.subr.bf16.mxu1 %v1868_v7  ;;  %v1917_v7 = vld [vmem:[%s2420_s1 + $0x308] sm:$0xff]  }
  0x38   :  { %1691 = vmatpush3.bf16.msra.mxu0 %v1869_v8  ;;  %v1919_v8 = vld [vmem:[%s2420_s1 + $0x350] sm:$0xff]  }
  0x39   :  { %1692 = vmatprep.subr.bf16.mxu0 %v1871_v9  ;;  %1713 = vmatpush3.bf16.msra.mxu1 %v1870_v10  ;;  %v1918_v9 = vld [vmem:[%s2420_s1 + $0x388] sm:$0xff]   ;;  %v1920_v10 = vld [vmem:[%s2420_s1 + $0x3d0] sm:$0xff]  }
  0x3a   :  { %1714 = vmatprep.subr.bf16.mxu1 %v1872_v11  ;;  %v1921_v11 = vld [vmem:[%s2420_s1 + $0x310] sm:$0xff]  }
  0x3c   :  { %1693 = vmatpush3.bf16.msra.mxu0 %v1873_v12  ;;  %v1923_v12 = vld [vmem:[%s2420_s1 + $0x358] sm:$0xff]  }
  0x3d   :  { %1694 = vmatprep.subr.bf16.mxu0 %v1875_v13  ;;  %1715 = vmatpush3.bf16.msra.mxu1 %v1874_v14  ;;  %v1922_v13 = vld [vmem:[%s2420_s1 + $0x390] sm:$0xff]   ;;  %v1924_v14 = vld [vmem:[%s2420_s1 + $0x3d8] sm:$0xff]  }
  0x3e   :  { %1716 = vmatprep.subr.bf16.mxu1 %v1876_v15  ;;  %v1925_v15 = vld [vmem:[%s2420_s1 + $0x318] sm:$0xff]  }
  0x40   :  { %1695 = vmatpush3.bf16.msra.mxu0 %v1877_v16  ;;  %v1927_v16 = vld [vmem:[%s2420_s1 + $0x360] sm:$0xff]  }
  0x41   :  { %1724 = vmatprep.subr.bf16.mxu0 %v1879_v18  ;;  %1717 = vmatpush3.bf16.msra.mxu1 %v1878_v19  ;;  %v1928_v18 = vld [vmem:[%s2420_s1 + $0x3e0] sm:$0xff]  }
  0x42   :  { %1746 = vmatprep.subr.bf16.mxu1 %v1880_v20  ;;  %v1929_v19 = vld [vmem:[%s2420_s1 + $0x320] sm:$0xff]   ;;  %v1931_v20 = vld [vmem:[%s2420_s1 + $0x368] sm:$0xff]  }
  0x43   :  { %1284 = vmatmul.mubr.bf16.vlgmr.msra.gmra.mrb[4].mxu0 %v319_v17  ;;  %v1926_v17 = vld [vmem:[%s2420_s1 + $0x398] sm:$0xff]  }
  0x44   :  { %1725 = vmatpush3.bf16.msra.mxu0 %v1881_v21  ;;  %1324 = vmatmul.mubr.bf16.vlgmr.msra.gmra.mrb[4].mxu1 %v335_v22  ;;  %v1930_v21 = vld [vmem:[%s2420_s1 + $0x3a0] sm:$0xff]   ;;  %v1932_v22 = vld [vmem:[%s2420_s1 + $0x3e8] sm:$0xff]  }
  0x45   :  { %1726 = vmatprep.subr.bf16.mxu0 %v1883_v23  ;;  %1747 = vmatpush3.bf16.msra.mxu1 %v1882_v24  ;;  %v1933_v23 = vld [vmem:[%s2420_s1 + $0x328] sm:$0xff]   ;;  %v1935_v24 = vld [vmem:[%s2420_s1 + $0x370] sm:$0xff]  }
  0x46   :  { %1748 = vmatprep.subr.bf16.mxu1 %v1884_v25  ;;  %1363 = vmatprep.mubr.bf16.mxu0 %v375_v55 }
  0x47   :  { %1403 = vmatprep.mubr.bf16.mxu1 %v385_v59 }
  0x48   :  { %1727 = vmatpush3.bf16.msra.mxu0 %v1885_v26 }
  0x49   :  { %1728 = vmatprep.subr.bf16.mxu0 %v1887_v27  ;;  %1749 = vmatpush3.bf16.msra.mxu1 %v1886_v28 }
  0x4a   :  { %1750 = vmatprep.subr.bf16.mxu1 %v1888_v29 }
  0x4c   :  { %1729 = vmatpush3.bf16.msra.mxu0 %v1889_v30 }
  0x4d   :  { %1730 = vmatprep.subr.bf16.mxu0 %v1891_v31  ;;  %1751 = vmatpush3.bf16.msra.mxu1 %v1890_v32 }
  0x4e   :  { %1752 = vmatprep.subr.bf16.mxu1 %v1892_v33 }
  0x50   :  { %1731 = vmatpush3.bf16.msra.mxu0 %v1893_v34 }
  0x51   :  { %1732 = vmatprep.subr.bf16.mxu0 %v1895_v35  ;;  %1753 = vmatpush3.bf16.msra.mxu1 %v1894_v36 }
  0x52   :  { %1754 = vmatprep.subr.bf16.mxu1 %v1896_v37 }
  0x54   :  { %1733 = vmatpush3.bf16.msra.mxu0 %v1897_v38 }
  0x55   :  { %1734 = vmatprep.subr.bf16.mxu0 %v1899_v39  ;;  %1755 = vmatpush3.bf16.msra.mxu1 %v1898_v40 }
  0x56   :  { %1756 = vmatprep.subr.bf16.mxu1 %v1900_v42 }
  0x58   :  { %1735 = vmatpush3.bf16.msra.mxu0 %v1901_v43 }
  0x59   :  { %1736 = vmatprep.subr.bf16.mxu0 %v1903_v44  ;;  %1757 = vmatpush3.bf16.msra.mxu1 %v1902_v46 }
  0x5a   :  { %1758 = vmatprep.subr.bf16.mxu1 %v1904_v49 }
  0x5c   :  { %1737 = vmatpush3.bf16.msra.mxu0 %v1905_v50 }
  0x5d   :  { %1738 = vmatprep.subr.bf16.mxu0 %v1907_v53  ;;  %1759 = vmatpush3.bf16.msra.mxu1 %v1906_v54 }
  0x5e   :  { %1760 = vmatprep.subr.bf16.mxu1 %v1908_v57 }
  0x60   :  { %1739 = vmatpush3.bf16.msra.mxu0 %v1909_v58 }
  0x61   :  { %1768 = vmatprep.subr.bf16.mxu0 %v1911_v61  ;;  %1761 = vmatpush3.bf16.msra.mxu1 %v1910_v62 }
  0x62   :  { %1790 = vmatprep.subr.bf16.mxu1 %v1912_v0 }
  0x63   :  { %1364 = vmatmul.mubr.bf16.vlgmr.msra.gmra.mrb[8].mxu0 %v361_v60 }
  0x64   :  { %1769 = vmatpush3.bf16.msra.mxu0 %v1913_v1  ;;  %1443 = vmatprep.mubr.bf16.mxu0 %v382_v63 }
  0x65   :  { %1404 = vmatmul.mubr.bf16.vlgmr.msra.gmra.mrb[8].mxu1 %v383_v2  ;;  %1770 = vmatprep.subr.bf16.mxu0 %v1915_v3 }
  0x66   :  { %1791 = vmatpush3.bf16.msra.mxu1 %v1914_v4  ;;  %1483 = vmatprep.mubr.bf16.mxu1 %v386_v5 }
  0x67   :  { %1792 = vmatprep.subr.bf16.mxu1 %v1916_v6 }
  0x68   :  { %1771 = vmatpush3.bf16.msra.mxu0 %v1917_v7 }
  0x69   :  { %1772 = vmatprep.subr.bf16.mxu0 %v1919_v8 }
  0x6a   :  { %1793 = vmatpush3.bf16.msra.mxu1 %v1918_v9 }
  0x6b   :  { %1794 = vmatprep.subr.bf16.mxu1 %v1920_v10 }
  0x6c   :  { %1773 = vmatpush3.bf16.msra.mxu0 %v1921_v11 }
  0x6d   :  { %1774 = vmatprep.subr.bf16.mxu0 %v1923_v12 }
  0x6e   :  { %1795 = vmatpush3.bf16.msra.mxu1 %v1922_v13 }
  0x6f   :  { %1796 = vmatprep.subr.bf16.mxu1 %v1924_v14 }
  0x70   :  { %1775 = vmatpush3.bf16.msra.mxu0 %v1925_v15 }
  0x71   :  { %1776 = vmatprep.subr.bf16.mxu0 %v1927_v16 }
  0x72   :  { %1797 = vmatpush3.bf16.msra.mxu1 %v1926_v17 }
  0x73   :  { %1798 = vmatprep.subr.bf16.mxu1 %v1928_v18 }
  0x74   :  { %1777 = vmatpush3.bf16.msra.mxu0 %v1929_v19 }
  0x75   :  { %1778 = vmatprep.subr.bf16.mxu0 %v1931_v20 }
  0x76   :  { %8 = vsyncpa [#allocation3], 0  ;;  %1799 = vmatpush3.bf16.msra.mxu1 %v1930_v21  ;;  %v1934_v25 = vld [vmem:[%s2420_s1 + $0x3a8] sm:$0xff]   ;;  %v1936_v26 = vld [vmem:[%s2420_s1 + $0x3f0] sm:$0xff]   ;;  %v368_v32 = vrot.slane %v2284_v52, %v2095_v41 }
  0x77   :  { %1800 = vmatprep.subr.bf16.mxu1 %v1932_v22  ;;  %v1937_v27 = vld [vmem:[%s2420_s1 + $0x330] sm:$0xff]   ;;  %v1939_v28 = vld [vmem:[%s2420_s1 + $0x378] sm:$0xff]   ;;  %v1507_v35 = vld [vmem:[%s2421_s2] ss:$0 sm:$0xff] }
  0x78   :  { %1779 = vmatpush3.bf16.msra.mxu0 %v1933_v23  ;;  %v1938_v29 = vld [vmem:[%s2420_s1 + $0x3b0] sm:$0xff]   ;;  %v1940_v30 = vld [vmem:[%s2420_s1 + $0x3f8] sm:$0xff]   ;;  %v384_v34 = vcombine.high %v368_v32, %v368_v32  ;;  %27 = vst [vmem:[#allocation2] sm:$0x3] %v1507_v35 }
  0x79   :  { %1780 = vmatprep.subr.bf16.mxu0 %v1935_v24  ;;  %v1941_v31 = vld [vmem:[%s2420_s1 + $0x338] sm:$0xff]  }
  0x7a   :  { %1801 = vmatpush3.bf16.msra.mxu1 %v1934_v25  ;;  %v1942_v33 = vld [vmem:[%s2420_s1 + $0x3b8] sm:$0xff]   ;;  %s1969_s1 = smov [#allocation2]  }
  0x7b   :  { %1802 = vmatprep.subr.bf16.mxu1 %v1936_v26  ;;  %s1499_s2 = sshll.u32 %s1969_s1, 4  ;;  %s1500_s2 = int_to_ptr.vmem [resolvable:$true] %s1499_s2 }
  0x7c   :  { %1781 = vmatpush3.bf16.msra.mxu0 %v1937_v27  ;;  %s1944_s28 = scalar_lea.vmem %s1500_s2, 32  ;;  %p1949_p1 = scmp.lt.s32.totalorder %s1500_s2, %s1500_s2 }
  0x7d   :  { %1782 = vmatprep.subr.bf16.mxu0 %v1939_v28  ;;  %p1945_p0 = scmp.ne.s32.totalorder %s1500_s2, %s1944_s28  ;;  %p1950_p2 = scmp.lt.s32.totalorder %s1944_s28, %s1944_s28 }
  0x7e   :  { %1803 = vmatpush3.bf16.msra.mxu1 %v1938_v29 }
  0x7f   :  { %1804 = vmatprep.subr.bf16.mxu1 %v1940_v30  ;;  %v28_v18 = vld [vmem:[#allocation2] sm:$0x3]  ;;  %p1951_p3 = por %p1950_p2, %p1949_p1 }
  0x80   :  { %1783 = vmatpush3.bf16.msra.mxu0 %v1941_v31 }
  0x81   :  { %p1952_p4 = pnand %p1951_p3, %p1945_p0 }
  0x82   :  { %1805 = vmatpush3.bf16.msra.mxu1 %v1942_v33 }
  0x83   :  { %1444 = vmatmul.mubr.bf16.vlgmr.msra.gmra.mrb[12].mxu0 %v368_v32 }
  0x85   :  { %1484 = vmatmul.mubr.bf16.vlgmr.msra.gmra.mrb[12].mxu1 %v384_v34 }
  0xf6   :  { %v1652_v36 = vpop.f32.mrb[0].mxu0 }
  0xf7   :  { %v1653_v37 = vpop.f32.mrb[1].mxu0  ;;  %v1674_v38 = vpop.f32.mrb[0].mxu1 }
  0xf8   :  { %v1654_v41 = vadd.f32 %v1653_v37, %v1652_v36  ;;  %v1655_v39 = vpop.f32.mrb[2].mxu0  ;;  %v1675_v40 = vpop.f32.mrb[1].mxu1 }
  0xf9   :  { %v1656_v42 = vpop.f32.mrb[3].mxu0  ;;  %v1676_v43 = vadd.f32 %v1675_v40, %v1674_v38  ;;  %v1677_v44 = vpop.f32.mrb[2].mxu1 }
  0xfa   :  { %v1678_v45 = vpop.f32.mrb[3].mxu1 }
  0xfb   :  { %v1246_v46 = vadd.f32 %v1676_v43, %v1654_v41 }
 0x116   :  { %v1696_v47 = vpop.f32.mrb[4].mxu0 }
 0x117   :  { %v1697_v48 = vpop.f32.mrb[5].mxu0  ;;  %v1718_v49 = vpop.f32.mrb[4].mxu1 }
 0x118   :  { %v1698_v50 = vadd.f32 %v1697_v48, %v1696_v47  ;;  %v1699_v51 = vpop.f32.mrb[6].mxu0  ;;  %v1719_v52 = vpop.f32.mrb[5].mxu1 }
 0x119   :  { %v1700_v53 = vpop.f32.mrb[7].mxu0  ;;  %v1720_v55 = vadd.f32 %v1719_v52, %v1718_v49  ;;  %v1721_v56 = vpop.f32.mrb[6].mxu1 }
 0x11a   :  { %v1286_v54 = vadd.f32 %v1698_v50, %v1246_v46  ;;  %v1722_v57 = vpop.f32.mrb[7].mxu1 }
 0x11c   :  { %v1326_v58 = vadd.f32 %v1720_v55, %v1286_v54 }
 0x136   :  { %v1740_v59 = vpop.f32.mrb[8].mxu0 }
 0x137   :  { %v1741_v60 = vpop.f32.mrb[9].mxu0 }
 0x138   :  { %v1762_v61 = vpop.f32.mrb[8].mxu1  ;;  %v1742_v62 = vadd.f32 %v1741_v60, %v1740_v59  ;;  %v1743_v63 = vpop.f32.mrb[10].mxu0 }
 0x139   :  { %v1763_v0 = vpop.f32.mrb[9].mxu1  ;;  %v1744_v1 = vpop.f32.mrb[11].mxu0 }
 0x13a   :  { %v1366_v2 = vadd.f32 %v1742_v62, %v1326_v58  ;;  %v1764_v3 = vadd.f32 %v1763_v0, %v1762_v61  ;;  %v1765_v4 = vpop.f32.mrb[10].mxu1 }
 0x13b   :  { %v1766_v5 = vpop.f32.mrb[11].mxu1 }
 0x13c   :  { %v1406_v6 = vadd.f32 %v1764_v3, %v1366_v2 }
 0x156   :  { %v1784_v7 = vpop.f32.mrb[12].mxu0 }
 0x157   :  { %v1785_v8 = vpop.f32.mrb[13].mxu0 }
 0x158   :  { %v1806_v9 = vpop.f32.mrb[12].mxu1  ;;  %v1786_v10 = vadd.f32 %v1785_v8, %v1784_v7  ;;  %v1787_v11 = vpop.f32.mrb[14].mxu0 }
 0x159   :  { %v1807_v12 = vpop.f32.mrb[13].mxu1  ;;  %v1788_v13 = vpop.f32.mrb[15].mxu0 }
 0x15a   :  { %v1446_v14 = vadd.f32 %v1786_v10, %v1406_v6  ;;  %v1808_v15 = vadd.f32 %v1807_v12, %v1806_v9  ;;  %v1809_v16 = vpop.f32.mrb[14].mxu1 }
 0x15b   :  { %v1810_v17 = vpop.f32.mrb[15].mxu1 }
 0x15c   :  { %v1486_v19 = vadd.f32 %v1808_v15, %v1446_v14 }
 0x15e   :  { %v1491_v20 = vadd.f32 %v1486_v19, %v28_v18 }
 0x160   :  { %1492 = vst [vmem:[#allocation2] sm:$0x3] %v1491_v20 }
 0x161   :  { %1955 = shalt.err (!%p1952_p4)
}
 0x162   :  { %s1956_s4 = scalar_lea.hbm %s2422_s3, 32 }
 0x163   :  { %p1957_p5 = scmp.ne.s32.totalorder %s2422_s3, %s1956_s4  ;;  %p1960_p6 = scmp.lt.u32.totalorder %s1956_s4, %s2422_s3 }
 0x165   :  { %p1962_p7 = pnand %p1960_p6, %p1957_p5 }
 0x167   :  { %1965 = shalt.err (!%p1962_p7)
}
 0x168   :  { %1502 = dma.vmem_to_hbm [thread:$0]  %s1500_s2, 32, %s2422_s3, [#allocation3]  }
 0x169   :  { %1966 = dma.done.wait [#allocation3], 32  }
 0x16a   :  { %1967 = vsyncadd [#allocation3], 4294967264 }
 0x16b   :  { %1506 = vsyncpa [#allocation3], 1 }

</bundles_post_ra>
